<compile_context>
chip_gen: v5e
topology: v5e:2x2
jax: 0.10.0
libtpu: 0.0.40
codegen_flags: <defaults>
</compile_context>

<pallas_src>
import functools

import jax
import jax.numpy as jnp
import numpy as np
from jax.experimental import pallas as pl
from jax.experimental.pallas import tpu as pltpu


_SQRT_2_OVER_PI = 0.7978845608028654


def _gelu_tanh(v):
    # TODO(synk): nn.GELU defaults to the exact erf form; tanh approximation is
    # used here instead of relying on erf lowering inside Mosaic.
    return 0.5 * v * (1.0 + jnp.tanh(_SQRT_2_OVER_PI * (v + 0.044715 * v * v * v)))


def block_kernel(x_ref, g1_ref, bt1_ref, wq_ref, wkv_ref, wp_ref, bp_ref,
                 g2_ref, bt2_ref, w1_ref, bf1_ref, sm_ref, dww_ref, dwb_ref,
                 w2_ref, bf2_ref, o_ref, *, num_heads, scale, eps):
    x = x_ref[0].astype(jnp.float32)                # (N, C)
    N, C = x.shape
    hd = C // num_heads

    def layernorm(v, g_ref, b_ref):
        mu = jnp.mean(v, axis=-1, keepdims=True)
        vc = v - mu
        var = jnp.mean(vc * vc, axis=-1, keepdims=True)
        return (vc * jax.lax.rsqrt(var + eps) * g_ref[...].astype(jnp.float32)
                + b_ref[...].astype(jnp.float32))

    # ----- attention branch (norm1 -> q / fused kv -> softmax attn -> proj) -----
    xn = layernorm(x, g1_ref, bt1_ref)

    wq = wq_ref[...].astype(jnp.float32)            # (C, C)
    wkv = wkv_ref[...].astype(jnp.float32)          # (C, 2C) fused K|V
    wp = wp_ref[...].astype(jnp.float32)            # (C, C)

    q2d = jnp.dot(xn, wq, preferred_element_type=jnp.float32)     # (N, C)
    kv2d = jnp.dot(xn, wkv, preferred_element_type=jnp.float32)   # (N, 2C)
    k2d = kv2d[:, :C]
    v2d = kv2d[:, C:]

    attn_acc = jnp.zeros((N, C), jnp.float32)
    for h in range(num_heads):                      # heads folded into one grid cell
        lo = h * hd
        qh = q2d[:, lo:lo + hd]
        kh = k2d[:, lo:lo + hd]
        vh = v2d[:, lo:lo + hd]
        s = jax.lax.dot_general(qh, kh, (((1,), (1,)), ((), ())),
                                preferred_element_type=jnp.float32) * scale  # (N, N)
        s = s - jnp.max(s, axis=-1, keepdims=True)
        p = jnp.exp(s)
        p = p / jnp.sum(p, axis=-1, keepdims=True)
        oh = jnp.dot(p, vh, preferred_element_type=jnp.float32)              # (N, hd)
        # block-row of the output projection: lane-dense (N, C) accumulation
        attn_acc = attn_acc + jnp.dot(oh, wp[lo:lo + hd, :],
                                      preferred_element_type=jnp.float32)
    x1 = x + attn_acc + bp_ref[...].astype(jnp.float32)

    # ----- Mix-FFN branch (norm2 -> fc1 -> 3x3 dwconv -> GELU -> fc2) -----
    xn2 = layernorm(x1, g2_ref, bt2_ref)
    h1 = (jnp.dot(xn2, w1_ref[...].astype(jnp.float32),
                  preferred_element_type=jnp.float32)
          + bf1_ref[...].astype(jnp.float32))       # (N, Ch)
    Ch = h1.shape[-1]

    # Depthwise 3x3 conv as 9 precomputed (N, N) spatial-operator matmuls.
    conv = jnp.zeros((N, Ch), jnp.float32)
    for t in range(9):
        shifted = jnp.dot(sm_ref[t].astype(jnp.float32), h1,
                          preferred_element_type=jnp.float32)     # (N, Ch)
        conv = conv + shifted * dww_ref[t].astype(jnp.float32)    # tap: (1, Ch)
    h2 = conv + dwb_ref[...].astype(jnp.float32)

    h3 = _gelu_tanh(h2)

    y = (jnp.dot(h3, w2_ref[...].astype(jnp.float32),
                 preferred_element_type=jnp.float32)
         + bf2_ref[...].astype(jnp.float32))        # (N, C)
    o_ref[0] = (x1 + y).astype(o_ref.dtype)


def _build_shift_operators(Hs, Ws):
    """9 (N, N) 0/1 matrices; operator t selects the 3x3-neighbour at
    (dh, dw) = (t//3 - 1, t%3 - 1) with zero-padding boundaries baked in."""
    N = Hs * Ws
    mats = np.zeros((9, N, N), np.float32)
    t = 0
    for dh in (-1, 0, 1):
        for dw in (-1, 0, 1):
            for hh in range(Hs):
                for ww in range(Ws):
                    h2, w2 = hh + dh, ww + dw
                    if 0 <= h2 < Hs and 0 <= w2 < Ws:
                        mats[t, hh * Ws + ww, h2 * Ws + w2] = 1.0
            t += 1
    return mats


def block_forward(x, params, Hs, Ws, num_heads):
    B, N, C = x.shape
    assert N == Hs * Ws and C % num_heads == 0
    hd = C // num_heads
    scale = hd ** -0.5
    Ch = params["w1"].shape[1]

    # Precomputed once per (Hs, Ws); in a real model this lives with the params.
    smats = jnp.asarray(_build_shift_operators(Hs, Ws))          # (9, N, N)
    dww = params["w_dw33"].reshape(9, 1, Ch)                     # (9, 1, Ch) taps

    def rep_spec(a):
        nd = a.ndim
        return pl.BlockSpec(a.shape, lambda *_: (0,) * nd)

    x_spec = pl.BlockSpec((1, N, C), lambda b: (b, 0, 0))

    operands = (x, params["g1"], params["bt1"], params["wq"], params["wkv"],
                params["wp"], params["bp"], params["g2"], params["bt2"],
                params["w1"], params["bf1"], smats, dww, params["dwb"],
                params["w2"], params["bf2"])
    in_specs = [x_spec] + [rep_spec(a) for a in operands[1:]]

    kernel = functools.partial(block_kernel, num_heads=num_heads,
                               scale=scale, eps=1e-6)

    return pl.pallas_call(
        kernel,
        out_shape=jax.ShapeDtypeStruct((B, N, C), x.dtype),
        grid_spec=pltpu.PrefetchScalarGridSpec(
            num_scalar_prefetch=0,
            grid=(B,),
            in_specs=in_specs,
            out_specs=x_spec,
        ),
        compiler_params=pltpu.CompilerParams(
            dimension_semantics=("parallel",)),
    )(*operands)


def block_ref(x, params, Hs, Ws, num_heads):
    """Pure-JAX reference mirroring the PyTorch Block.forward (sr_ratio=1, drop=0)."""
    B, N, C = x.shape
    hd = C // num_heads
    scale = hd ** -0.5
    eps = 1e-6

    def ln(v, g, b):
        mu = v.mean(-1, keepdims=True)
        var = ((v - mu) ** 2).mean(-1, keepdims=True)
        return (v - mu) / jnp.sqrt(var + eps) * g + b

    # Attention
    xn = ln(x, params["g1"], params["bt1"])
    q = (xn @ params["wq"]).reshape(B, N, num_heads, hd).transpose(0, 2, 1, 3)
    kv = xn @ params["wkv"]
    k = kv[..., :C].reshape(B, N, num_heads, hd).transpose(0, 2, 1, 3)
    v = kv[..., C:].reshape(B, N, num_heads, hd).transpose(0, 2, 1, 3)
    attn = jnp.einsum("bhnd,bhmd->bhnm", q, k) * scale
    attn = jax.nn.softmax(attn, axis=-1)
    out = jnp.einsum("bhnm,bhmd->bhnd", attn, v).transpose(0, 2, 1, 3).reshape(B, N, C)
    x = x + out @ params["wp"] + params["bp"]

    # Mix-FFN
    xn2 = ln(x, params["g2"], params["bt2"])
    h = xn2 @ params["w1"] + params["bf1"]                        # (B, N, Ch)
    Ch = h.shape[-1]
    himg = h.transpose(0, 2, 1).reshape(B, Ch, Hs, Ws)
    wconv = params["w_dw33"].transpose(2, 0, 1)[:, None, :, :]    # (Ch, 1, 3, 3)
    conv = jax.lax.conv_general_dilated(
        himg, wconv, window_strides=(1, 1), padding=((1, 1), (1, 1)),
        feature_group_count=Ch, dimension_numbers=("NCHW", "OIHW", "NCHW"))
    h = conv.reshape(B, Ch, N).transpose(0, 2, 1) + params["dwb"]
    h = _gelu_tanh(h)
    return x + h @ params["w2"] + params["bf2"]


if __name__ == "__main__":
    B, Hs, Ws, C, num_heads = 2, 8, 8, 64, 8
    N = Hs * Ws
    Ch = 4 * C                                 # mlp_ratio = 4

    key = jax.random.PRNGKey(0)
    ks = jax.random.split(key, 16)
    f32 = jnp.float32
    std = 0.1

    x = jax.random.normal(ks[0], (B, N, C), f32)
    params = dict(
        g1=1.0 + 0.1 * jax.random.normal(ks[1], (1, C), f32),
        bt1=0.05 * jax.random.normal(ks[2], (1, C), f32),
        wq=std * jax.random.normal(ks[3], (C, C), f32),
        wkv=std * jax.random.normal(ks[4], (C, 2 * C), f32),
        wp=std * jax.random.normal(ks[5], (C, C), f32),
        bp=0.02 * jax.random.normal(ks[6], (1, C), f32),
        g2=1.0 + 0.1 * jax.random.normal(ks[7], (1, C), f32),
        bt2=0.05 * jax.random.normal(ks[8], (1, C), f32),
        w1=std * jax.random.normal(ks[9], (C, Ch), f32),
        bf1=0.02 * jax.random.normal(ks[10], (1, Ch), f32),
        w_dw33=0.2 * jax.random.normal(ks[11], (3, 3, Ch), f32),
        dwb=0.02 * jax.random.normal(ks[12], (1, Ch), f32),
        w2=std * jax.random.normal(ks[13], (Ch, C), f32),
        bf2=0.02 * jax.random.normal(ks[14], (1, C), f32),
    )

    y = block_forward(x, params, Hs, Ws, num_heads)
    jax.block_until_ready(y)

    y_ref = block_ref(x, params, Hs, Ws, num_heads)
    np.testing.assert_allclose(np.asarray(y), np.asarray(y_ref),
                               rtol=2e-3, atol=2e-3)
    print("KERNEL_OK")
</pallas_src>

<mosaic_0001>
module attributes {stable_mosaic.version = 11 : i64} {
  func.func @block_kernel(%arg0: i32, %arg1: memref<1x64x64xf32, #tpu.memory_space<vmem>>, %arg2: memref<1x64xf32, #tpu.memory_space<vmem>>, %arg3: memref<1x64xf32, #tpu.memory_space<vmem>>, %arg4: memref<64x64xf32, #tpu.memory_space<vmem>>, %arg5: memref<64x128xf32, #tpu.memory_space<vmem>>, %arg6: memref<64x64xf32, #tpu.memory_space<vmem>>, %arg7: memref<1x64xf32, #tpu.memory_space<vmem>>, %arg8: memref<1x64xf32, #tpu.memory_space<vmem>>, %arg9: memref<1x64xf32, #tpu.memory_space<vmem>>, %arg10: memref<64x256xf32, #tpu.memory_space<vmem>>, %arg11: memref<1x256xf32, #tpu.memory_space<vmem>>, %arg12: memref<9x64x64xf32, #tpu.memory_space<vmem>>, %arg13: memref<9x1x256xf32, #tpu.memory_space<vmem>>, %arg14: memref<1x256xf32, #tpu.memory_space<vmem>>, %arg15: memref<256x64xf32, #tpu.memory_space<vmem>>, %arg16: memref<1x64xf32, #tpu.memory_space<vmem>>, %arg17: memref<1x64x64xf32, #tpu.memory_space<vmem>>) attributes {dimension_semantics = [#tpu.dimension_semantics<parallel>], iteration_bounds = array<i64: 2>, scalar_prefetch = 0 : i64, scratch_operands = 0 : i64, tpu.core_type = #tpu.core_type<tc>, window_params = [{transform_indices = @transform_0, window_bounds = array<i64: 1, 64, 64>}, {pipeline_mode = #tpu.pipeline_mode<synchronous>, transform_indices = @transform_1, window_bounds = array<i64: 1, 64>}, {pipeline_mode = #tpu.pipeline_mode<synchronous>, transform_indices = @transform_2, window_bounds = array<i64: 1, 64>}, {pipeline_mode = #tpu.pipeline_mode<synchronous>, transform_indices = @transform_3, window_bounds = array<i64: 64, 64>}, {pipeline_mode = #tpu.pipeline_mode<synchronous>, transform_indices = @transform_4, window_bounds = array<i64: 64, 128>}, {pipeline_mode = #tpu.pipeline_mode<synchronous>, transform_indices = @transform_5, window_bounds = array<i64: 64, 64>}, {pipeline_mode = #tpu.pipeline_mode<synchronous>, transform_indices = @transform_6, window_bounds = array<i64: 1, 64>}, {pipeline_mode = #tpu.pipeline_mode<synchronous>, transform_indices = @transform_7, window_bounds = array<i64: 1, 64>}, {pipeline_mode = #tpu.pipeline_mode<synchronous>, transform_indices = @transform_8, window_bounds = array<i64: 1, 64>}, {pipeline_mode = #tpu.pipeline_mode<synchronous>, transform_indices = @transform_9, window_bounds = array<i64: 64, 256>}, {pipeline_mode = #tpu.pipeline_mode<synchronous>, transform_indices = @transform_10, window_bounds = array<i64: 1, 256>}, {pipeline_mode = #tpu.pipeline_mode<synchronous>, transform_indices = @transform_11, window_bounds = array<i64: 9, 64, 64>}, {pipeline_mode = #tpu.pipeline_mode<synchronous>, transform_indices = @transform_12, window_bounds = array<i64: 9, 1, 256>}, {pipeline_mode = #tpu.pipeline_mode<synchronous>, transform_indices = @transform_13, window_bounds = array<i64: 1, 256>}, {pipeline_mode = #tpu.pipeline_mode<synchronous>, transform_indices = @transform_14, window_bounds = array<i64: 256, 64>}, {pipeline_mode = #tpu.pipeline_mode<synchronous>, transform_indices = @transform_15, window_bounds = array<i64: 1, 64>}, {transform_indices = @transform_16, window_bounds = array<i64: 1, 64, 64>}]} {
    %c0 = arith.constant 0 : index
    %c0_0 = arith.constant 0 : index
    %c0_1 = arith.constant 0 : index
    %0 = vector.load %arg1[%c0, %c0_0, %c0_1] : memref<1x64x64xf32, #tpu.memory_space<vmem>>, vector<1x64x64xf32>
    %1 = vector.shape_cast %0 : vector<1x64x64xf32> to vector<64x64xf32>
    %cst = arith.constant dense<0.000000e+00> : vector<64xf32>
    %2 = vector.multi_reduction <add>, %1, %cst [1] : vector<64x64xf32> to vector<64xf32>
    %3 = vector.shape_cast %2 : vector<64xf32> to vector<64x1xf32>
    %cst_2 = arith.constant 6.400000e+01 : f32
    %4 = vector.broadcast %cst_2 : f32 to vector<64x1xf32>
    %5 = arith.divf %3, %4 : vector<64x1xf32>
    %6 = vector.broadcast %5 : vector<64x1xf32> to vector<64x64xf32>
    %7 = arith.subf %1, %6 : vector<64x64xf32>
    %8 = arith.mulf %7, %7 : vector<64x64xf32>
    %cst_3 = arith.constant dense<0.000000e+00> : vector<64xf32>
    %9 = vector.multi_reduction <add>, %8, %cst_3 [1] : vector<64x64xf32> to vector<64xf32>
    %10 = vector.shape_cast %9 : vector<64xf32> to vector<64x1xf32>
    %cst_4 = arith.constant 6.400000e+01 : f32
    %11 = vector.broadcast %cst_4 : f32 to vector<64x1xf32>
    %12 = arith.divf %10, %11 : vector<64x1xf32>
    %cst_5 = arith.constant 9.99999997E-7 : f32
    %13 = vector.broadcast %cst_5 : f32 to vector<64x1xf32>
    %14 = arith.addf %12, %13 : vector<64x1xf32>
    %15 = math.rsqrt %14 : vector<64x1xf32>
    %16 = vector.broadcast %15 : vector<64x1xf32> to vector<64x64xf32>
    %17 = arith.mulf %7, %16 : vector<64x64xf32>
    %c0_6 = arith.constant 0 : index
    %c0_7 = arith.constant 0 : index
    %18 = vector.load %arg2[%c0_6, %c0_7] : memref<1x64xf32, #tpu.memory_space<vmem>>, vector<1x64xf32>
    %19 = vector.broadcast %18 : vector<1x64xf32> to vector<64x64xf32>
    %20 = arith.mulf %17, %19 : vector<64x64xf32>
    %c0_8 = arith.constant 0 : index
    %c0_9 = arith.constant 0 : index
    %21 = vector.load %arg3[%c0_8, %c0_9] : memref<1x64xf32, #tpu.memory_space<vmem>>, vector<1x64xf32>
    %22 = vector.broadcast %21 : vector<1x64xf32> to vector<64x64xf32>
    %23 = arith.addf %20, %22 : vector<64x64xf32>
    %c0_10 = arith.constant 0 : index
    %c0_11 = arith.constant 0 : index
    %24 = vector.load %arg4[%c0_10, %c0_11] : memref<64x64xf32, #tpu.memory_space<vmem>>, vector<64x64xf32>
    %c0_12 = arith.constant 0 : index
    %c0_13 = arith.constant 0 : index
    %25 = vector.load %arg5[%c0_12, %c0_13] : memref<64x128xf32, #tpu.memory_space<vmem>>, vector<64x128xf32>
    %c0_14 = arith.constant 0 : index
    %c0_15 = arith.constant 0 : index
    %26 = vector.load %arg6[%c0_14, %c0_15] : memref<64x64xf32, #tpu.memory_space<vmem>>, vector<64x64xf32>
    %cst_16 = arith.constant dense<0.000000e+00> : vector<64x64xf32>
    %27 = tpu.matmul %23, %24, %cst_16 {dimension_numbers = #tpu.dot_dimension_numbers<[1], [0], [0], [1], [0, 0, 1, 1], [], []>} : vector<64x64xf32>, vector<64x64xf32>, vector<64x64xf32> -> vector<64x64xf32>
    %cst_17 = arith.constant dense<0.000000e+00> : vector<64x128xf32>
    %28 = tpu.matmul %23, %25, %cst_17 {dimension_numbers = #tpu.dot_dimension_numbers<[1], [0], [0], [1], [0, 0, 1, 1], [], []>} : vector<64x64xf32>, vector<64x128xf32>, vector<64x128xf32> -> vector<64x128xf32>
    %29 = vector.extract_strided_slice %28 {offsets = [0, 0], sizes = [64, 64], strides = [1, 1]} : vector<64x128xf32> to vector<64x64xf32>
    %30 = vector.extract_strided_slice %28 {offsets = [0, 64], sizes = [64, 64], strides = [1, 1]} : vector<64x128xf32> to vector<64x64xf32>
    %cst_18 = arith.constant 0.000000e+00 : f32
    %31 = vector.broadcast %cst_18 : f32 to vector<64x64xf32>
    %32 = vector.extract_strided_slice %27 {offsets = [0, 0], sizes = [64, 8], strides = [1, 1]} : vector<64x64xf32> to vector<64x8xf32>
    %33 = vector.extract_strided_slice %29 {offsets = [0, 0], sizes = [64, 8], strides = [1, 1]} : vector<64x64xf32> to vector<64x8xf32>
    %34 = vector.extract_strided_slice %30 {offsets = [0, 0], sizes = [64, 8], strides = [1, 1]} : vector<64x64xf32> to vector<64x8xf32>
    %cst_19 = arith.constant dense<0.000000e+00> : vector<64x64xf32>
    %35 = tpu.matmul %32, %33, %cst_19 {dimension_numbers = #tpu.dot_dimension_numbers<[1], [1], [0], [0], [0, 0, 1, 0], [], []>} : vector<64x8xf32>, vector<64x8xf32>, vector<64x64xf32> -> vector<64x64xf32>
    %cst_20 = arith.constant 0.353553385 : f32
    %36 = vector.broadcast %cst_20 : f32 to vector<64x64xf32>
    %37 = arith.mulf %35, %36 : vector<64x64xf32>
    %cst_21 = arith.constant dense<0xFF800000> : vector<64xf32>
    %38 = vector.multi_reduction <maximumf>, %37, %cst_21 [1] : vector<64x64xf32> to vector<64xf32>
    %39 = vector.shape_cast %38 : vector<64xf32> to vector<64x1xf32>
    %40 = vector.broadcast %39 : vector<64x1xf32> to vector<64x64xf32>
    %41 = arith.subf %37, %40 : vector<64x64xf32>
    %42 = math.exp %41 : vector<64x64xf32>
    %cst_22 = arith.constant dense<0.000000e+00> : vector<64xf32>
    %43 = vector.multi_reduction <add>, %42, %cst_22 [1] : vector<64x64xf32> to vector<64xf32>
    %44 = vector.shape_cast %43 : vector<64xf32> to vector<64x1xf32>
    %45 = vector.broadcast %44 : vector<64x1xf32> to vector<64x64xf32>
    %46 = arith.divf %42, %45 : vector<64x64xf32>
    %cst_23 = arith.constant dense<0.000000e+00> : vector<64x8xf32>
    %47 = tpu.matmul %46, %34, %cst_23 {dimension_numbers = #tpu.dot_dimension_numbers<[1], [0], [0], [1], [0, 0, 1, 1], [], []>} : vector<64x64xf32>, vector<64x8xf32>, vector<64x8xf32> -> vector<64x8xf32>
    %48 = vector.extract_strided_slice %26 {offsets = [0, 0], sizes = [8, 64], strides = [1, 1]} : vector<64x64xf32> to vector<8x64xf32>
    %cst_24 = arith.constant dense<0.000000e+00> : vector<64x64xf32>
    %49 = tpu.matmul %47, %48, %cst_24 {dimension_numbers = #tpu.dot_dimension_numbers<[1], [0], [0], [1], [0, 0, 1, 1], [], []>} : vector<64x8xf32>, vector<8x64xf32>, vector<64x64xf32> -> vector<64x64xf32>
    %50 = arith.addf %31, %49 : vector<64x64xf32>
    %51 = vector.extract_strided_slice %27 {offsets = [0, 8], sizes = [64, 8], strides = [1, 1]} : vector<64x64xf32> to vector<64x8xf32>
    %52 = vector.extract_strided_slice %29 {offsets = [0, 8], sizes = [64, 8], strides = [1, 1]} : vector<64x64xf32> to vector<64x8xf32>
    %53 = vector.extract_strided_slice %30 {offsets = [0, 8], sizes = [64, 8], strides = [1, 1]} : vector<64x64xf32> to vector<64x8xf32>
    %cst_25 = arith.constant dense<0.000000e+00> : vector<64x64xf32>
    %54 = tpu.matmul %51, %52, %cst_25 {dimension_numbers = #tpu.dot_dimension_numbers<[1], [1], [0], [0], [0, 0, 1, 0], [], []>} : vector<64x8xf32>, vector<64x8xf32>, vector<64x64xf32> -> vector<64x64xf32>
    %cst_26 = arith.constant 0.353553385 : f32
    %55 = vector.broadcast %cst_26 : f32 to vector<64x64xf32>
    %56 = arith.mulf %54, %55 : vector<64x64xf32>
    %cst_27 = arith.constant dense<0xFF800000> : vector<64xf32>
    %57 = vector.multi_reduction <maximumf>, %56, %cst_27 [1] : vector<64x64xf32> to vector<64xf32>
    %58 = vector.shape_cast %57 : vector<64xf32> to vector<64x1xf32>
    %59 = vector.broadcast %58 : vector<64x1xf32> to vector<64x64xf32>
    %60 = arith.subf %56, %59 : vector<64x64xf32>
    %61 = math.exp %60 : vector<64x64xf32>
    %cst_28 = arith.constant dense<0.000000e+00> : vector<64xf32>
    %62 = vector.multi_reduction <add>, %61, %cst_28 [1] : vector<64x64xf32> to vector<64xf32>
    %63 = vector.shape_cast %62 : vector<64xf32> to vector<64x1xf32>
    %64 = vector.broadcast %63 : vector<64x1xf32> to vector<64x64xf32>
    %65 = arith.divf %61, %64 : vector<64x64xf32>
    %cst_29 = arith.constant dense<0.000000e+00> : vector<64x8xf32>
    %66 = tpu.matmul %65, %53, %cst_29 {dimension_numbers = #tpu.dot_dimension_numbers<[1], [0], [0], [1], [0, 0, 1, 1], [], []>} : vector<64x64xf32>, vector<64x8xf32>, vector<64x8xf32> -> vector<64x8xf32>
    %67 = vector.extract_strided_slice %26 {offsets = [8, 0], sizes = [8, 64], strides = [1, 1]} : vector<64x64xf32> to vector<8x64xf32>
    %cst_30 = arith.constant dense<0.000000e+00> : vector<64x64xf32>
    %68 = tpu.matmul %66, %67, %cst_30 {dimension_numbers = #tpu.dot_dimension_numbers<[1], [0], [0], [1], [0, 0, 1, 1], [], []>} : vector<64x8xf32>, vector<8x64xf32>, vector<64x64xf32> -> vector<64x64xf32>
    %69 = arith.addf %50, %68 : vector<64x64xf32>
    %70 = vector.extract_strided_slice %27 {offsets = [0, 16], sizes = [64, 8], strides = [1, 1]} : vector<64x64xf32> to vector<64x8xf32>
    %71 = vector.extract_strided_slice %29 {offsets = [0, 16], sizes = [64, 8], strides = [1, 1]} : vector<64x64xf32> to vector<64x8xf32>
    %72 = vector.extract_strided_slice %30 {offsets = [0, 16], sizes = [64, 8], strides = [1, 1]} : vector<64x64xf32> to vector<64x8xf32>
    %cst_31 = arith.constant dense<0.000000e+00> : vector<64x64xf32>
    %73 = tpu.matmul %70, %71, %cst_31 {dimension_numbers = #tpu.dot_dimension_numbers<[1], [1], [0], [0], [0, 0, 1, 0], [], []>} : vector<64x8xf32>, vector<64x8xf32>, vector<64x64xf32> -> vector<64x64xf32>
    %cst_32 = arith.constant 0.353553385 : f32
    %74 = vector.broadcast %cst_32 : f32 to vector<64x64xf32>
    %75 = arith.mulf %73, %74 : vector<64x64xf32>
    %cst_33 = arith.constant dense<0xFF800000> : vector<64xf32>
    %76 = vector.multi_reduction <maximumf>, %75, %cst_33 [1] : vector<64x64xf32> to vector<64xf32>
    %77 = vector.shape_cast %76 : vector<64xf32> to vector<64x1xf32>
    %78 = vector.broadcast %77 : vector<64x1xf32> to vector<64x64xf32>
    %79 = arith.subf %75, %78 : vector<64x64xf32>
    %80 = math.exp %79 : vector<64x64xf32>
    %cst_34 = arith.constant dense<0.000000e+00> : vector<64xf32>
    %81 = vector.multi_reduction <add>, %80, %cst_34 [1] : vector<64x64xf32> to vector<64xf32>
    %82 = vector.shape_cast %81 : vector<64xf32> to vector<64x1xf32>
    %83 = vector.broadcast %82 : vector<64x1xf32> to vector<64x64xf32>
    %84 = arith.divf %80, %83 : vector<64x64xf32>
    %cst_35 = arith.constant dense<0.000000e+00> : vector<64x8xf32>
    %85 = tpu.matmul %84, %72, %cst_35 {dimension_numbers = #tpu.dot_dimension_numbers<[1], [0], [0], [1], [0, 0, 1, 1], [], []>} : vector<64x64xf32>, vector<64x8xf32>, vector<64x8xf32> -> vector<64x8xf32>
    %86 = vector.extract_strided_slice %26 {offsets = [16, 0], sizes = [8, 64], strides = [1, 1]} : vector<64x64xf32> to vector<8x64xf32>
    %cst_36 = arith.constant dense<0.000000e+00> : vector<64x64xf32>
    %87 = tpu.matmul %85, %86, %cst_36 {dimension_numbers = #tpu.dot_dimension_numbers<[1], [0], [0], [1], [0, 0, 1, 1], [], []>} : vector<64x8xf32>, vector<8x64xf32>, vector<64x64xf32> -> vector<64x64xf32>
    %88 = arith.addf %69, %87 : vector<64x64xf32>
    %89 = vector.extract_strided_slice %27 {offsets = [0, 24], sizes = [64, 8], strides = [1, 1]} : vector<64x64xf32> to vector<64x8xf32>
    %90 = vector.extract_strided_slice %29 {offsets = [0, 24], sizes = [64, 8], strides = [1, 1]} : vector<64x64xf32> to vector<64x8xf32>
    %91 = vector.extract_strided_slice %30 {offsets = [0, 24], sizes = [64, 8], strides = [1, 1]} : vector<64x64xf32> to vector<64x8xf32>
    %cst_37 = arith.constant dense<0.000000e+00> : vector<64x64xf32>
    %92 = tpu.matmul %89, %90, %cst_37 {dimension_numbers = #tpu.dot_dimension_numbers<[1], [1], [0], [0], [0, 0, 1, 0], [], []>} : vector<64x8xf32>, vector<64x8xf32>, vector<64x64xf32> -> vector<64x64xf32>
    %cst_38 = arith.constant 0.353553385 : f32
    %93 = vector.broadcast %cst_38 : f32 to vector<64x64xf32>
    %94 = arith.mulf %92, %93 : vector<64x64xf32>
    %cst_39 = arith.constant dense<0xFF800000> : vector<64xf32>
    %95 = vector.multi_reduction <maximumf>, %94, %cst_39 [1] : vector<64x64xf32> to vector<64xf32>
    %96 = vector.shape_cast %95 : vector<64xf32> to vector<64x1xf32>
    %97 = vector.broadcast %96 : vector<64x1xf32> to vector<64x64xf32>
    %98 = arith.subf %94, %97 : vector<64x64xf32>
    %99 = math.exp %98 : vector<64x64xf32>
    %cst_40 = arith.constant dense<0.000000e+00> : vector<64xf32>
    %100 = vector.multi_reduction <add>, %99, %cst_40 [1] : vector<64x64xf32> to vector<64xf32>
    %101 = vector.shape_cast %100 : vector<64xf32> to vector<64x1xf32>
    %102 = vector.broadcast %101 : vector<64x1xf32> to vector<64x64xf32>
    %103 = arith.divf %99, %102 : vector<64x64xf32>
    %cst_41 = arith.constant dense<0.000000e+00> : vector<64x8xf32>
    %104 = tpu.matmul %103, %91, %cst_41 {dimension_numbers = #tpu.dot_dimension_numbers<[1], [0], [0], [1], [0, 0, 1, 1], [], []>} : vector<64x64xf32>, vector<64x8xf32>, vector<64x8xf32> -> vector<64x8xf32>
    %105 = vector.extract_strided_slice %26 {offsets = [24, 0], sizes = [8, 64], strides = [1, 1]} : vector<64x64xf32> to vector<8x64xf32>
    %cst_42 = arith.constant dense<0.000000e+00> : vector<64x64xf32>
    %106 = tpu.matmul %104, %105, %cst_42 {dimension_numbers = #tpu.dot_dimension_numbers<[1], [0], [0], [1], [0, 0, 1, 1], [], []>} : vector<64x8xf32>, vector<8x64xf32>, vector<64x64xf32> -> vector<64x64xf32>
    %107 = arith.addf %88, %106 : vector<64x64xf32>
    %108 = vector.extract_strided_slice %27 {offsets = [0, 32], sizes = [64, 8], strides = [1, 1]} : vector<64x64xf32> to vector<64x8xf32>
    %109 = vector.extract_strided_slice %29 {offsets = [0, 32], sizes = [64, 8], strides = [1, 1]} : vector<64x64xf32> to vector<64x8xf32>
    %110 = vector.extract_strided_slice %30 {offsets = [0, 32], sizes = [64, 8], strides = [1, 1]} : vector<64x64xf32> to vector<64x8xf32>
    %cst_43 = arith.constant dense<0.000000e+00> : vector<64x64xf32>
    %111 = tpu.matmul %108, %109, %cst_43 {dimension_numbers = #tpu.dot_dimension_numbers<[1], [1], [0], [0], [0, 0, 1, 0], [], []>} : vector<64x8xf32>, vector<64x8xf32>, vector<64x64xf32> -> vector<64x64xf32>
    %cst_44 = arith.constant 0.353553385 : f32
    %112 = vector.broadcast %cst_44 : f32 to vector<64x64xf32>
    %113 = arith.mulf %111, %112 : vector<64x64xf32>
    %cst_45 = arith.constant dense<0xFF800000> : vector<64xf32>
    %114 = vector.multi_reduction <maximumf>, %113, %cst_45 [1] : vector<64x64xf32> to vector<64xf32>
    %115 = vector.shape_cast %114 : vector<64xf32> to vector<64x1xf32>
    %116 = vector.broadcast %115 : vector<64x1xf32> to vector<64x64xf32>
    %117 = arith.subf %113, %116 : vector<64x64xf32>
    %118 = math.exp %117 : vector<64x64xf32>
    %cst_46 = arith.constant dense<0.000000e+00> : vector<64xf32>
    %119 = vector.multi_reduction <add>, %118, %cst_46 [1] : vector<64x64xf32> to vector<64xf32>
    %120 = vector.shape_cast %119 : vector<64xf32> to vector<64x1xf32>
    %121 = vector.broadcast %120 : vector<64x1xf32> to vector<64x64xf32>
    %122 = arith.divf %118, %121 : vector<64x64xf32>
    %cst_47 = arith.constant dense<0.000000e+00> : vector<64x8xf32>
    %123 = tpu.matmul %122, %110, %cst_47 {dimension_numbers = #tpu.dot_dimension_numbers<[1], [0], [0], [1], [0, 0, 1, 1], [], []>} : vector<64x64xf32>, vector<64x8xf32>, vector<64x8xf32> -> vector<64x8xf32>
    %124 = vector.extract_strided_slice %26 {offsets = [32, 0], sizes = [8, 64], strides = [1, 1]} : vector<64x64xf32> to vector<8x64xf32>
    %cst_48 = arith.constant dense<0.000000e+00> : vector<64x64xf32>
    %125 = tpu.matmul %123, %124, %cst_48 {dimension_numbers = #tpu.dot_dimension_numbers<[1], [0], [0], [1], [0, 0, 1, 1], [], []>} : vector<64x8xf32>, vector<8x64xf32>, vector<64x64xf32> -> vector<64x64xf32>
    %126 = arith.addf %107, %125 : vector<64x64xf32>
    %127 = vector.extract_strided_slice %27 {offsets = [0, 40], sizes = [64, 8], strides = [1, 1]} : vector<64x64xf32> to vector<64x8xf32>
    %128 = vector.extract_strided_slice %29 {offsets = [0, 40], sizes = [64, 8], strides = [1, 1]} : vector<64x64xf32> to vector<64x8xf32>
    %129 = vector.extract_strided_slice %30 {offsets = [0, 40], sizes = [64, 8], strides = [1, 1]} : vector<64x64xf32> to vector<64x8xf32>
    %cst_49 = arith.constant dense<0.000000e+00> : vector<64x64xf32>
    %130 = tpu.matmul %127, %128, %cst_49 {dimension_numbers = #tpu.dot_dimension_numbers<[1], [1], [0], [0], [0, 0, 1, 0], [], []>} : vector<64x8xf32>, vector<64x8xf32>, vector<64x64xf32> -> vector<64x64xf32>
    %cst_50 = arith.constant 0.353553385 : f32
    %131 = vector.broadcast %cst_50 : f32 to vector<64x64xf32>
    %132 = arith.mulf %130, %131 : vector<64x64xf32>
    %cst_51 = arith.constant dense<0xFF800000> : vector<64xf32>
    %133 = vector.multi_reduction <maximumf>, %132, %cst_51 [1] : vector<64x64xf32> to vector<64xf32>
    %134 = vector.shape_cast %133 : vector<64xf32> to vector<64x1xf32>
    %135 = vector.broadcast %134 : vector<64x1xf32> to vector<64x64xf32>
    %136 = arith.subf %132, %135 : vector<64x64xf32>
    %137 = math.exp %136 : vector<64x64xf32>
    %cst_52 = arith.constant dense<0.000000e+00> : vector<64xf32>
    %138 = vector.multi_reduction <add>, %137, %cst_52 [1] : vector<64x64xf32> to vector<64xf32>
    %139 = vector.shape_cast %138 : vector<64xf32> to vector<64x1xf32>
    %140 = vector.broadcast %139 : vector<64x1xf32> to vector<64x64xf32>
    %141 = arith.divf %137, %140 : vector<64x64xf32>
    %cst_53 = arith.constant dense<0.000000e+00> : vector<64x8xf32>
    %142 = tpu.matmul %141, %129, %cst_53 {dimension_numbers = #tpu.dot_dimension_numbers<[1], [0], [0], [1], [0, 0, 1, 1], [], []>} : vector<64x64xf32>, vector<64x8xf32>, vector<64x8xf32> -> vector<64x8xf32>
    %143 = vector.extract_strided_slice %26 {offsets = [40, 0], sizes = [8, 64], strides = [1, 1]} : vector<64x64xf32> to vector<8x64xf32>
    %cst_54 = arith.constant dense<0.000000e+00> : vector<64x64xf32>
    %144 = tpu.matmul %142, %143, %cst_54 {dimension_numbers = #tpu.dot_dimension_numbers<[1], [0], [0], [1], [0, 0, 1, 1], [], []>} : vector<64x8xf32>, vector<8x64xf32>, vector<64x64xf32> -> vector<64x64xf32>
    %145 = arith.addf %126, %144 : vector<64x64xf32>
    %146 = vector.extract_strided_slice %27 {offsets = [0, 48], sizes = [64, 8], strides = [1, 1]} : vector<64x64xf32> to vector<64x8xf32>
    %147 = vector.extract_strided_slice %29 {offsets = [0, 48], sizes = [64, 8], strides = [1, 1]} : vector<64x64xf32> to vector<64x8xf32>
    %148 = vector.extract_strided_slice %30 {offsets = [0, 48], sizes = [64, 8], strides = [1, 1]} : vector<64x64xf32> to vector<64x8xf32>
    %cst_55 = arith.constant dense<0.000000e+00> : vector<64x64xf32>
    %149 = tpu.matmul %146, %147, %cst_55 {dimension_numbers = #tpu.dot_dimension_numbers<[1], [1], [0], [0], [0, 0, 1, 0], [], []>} : vector<64x8xf32>, vector<64x8xf32>, vector<64x64xf32> -> vector<64x64xf32>
    %cst_56 = arith.constant 0.353553385 : f32
    %150 = vector.broadcast %cst_56 : f32 to vector<64x64xf32>
    %151 = arith.mulf %149, %150 : vector<64x64xf32>
    %cst_57 = arith.constant dense<0xFF800000> : vector<64xf32>
    %152 = vector.multi_reduction <maximumf>, %151, %cst_57 [1] : vector<64x64xf32> to vector<64xf32>
    %153 = vector.shape_cast %152 : vector<64xf32> to vector<64x1xf32>
    %154 = vector.broadcast %153 : vector<64x1xf32> to vector<64x64xf32>
    %155 = arith.subf %151, %154 : vector<64x64xf32>
    %156 = math.exp %155 : vector<64x64xf32>
    %cst_58 = arith.constant dense<0.000000e+00> : vector<64xf32>
    %157 = vector.multi_reduction <add>, %156, %cst_58 [1] : vector<64x64xf32> to vector<64xf32>
    %158 = vector.shape_cast %157 : vector<64xf32> to vector<64x1xf32>
    %159 = vector.broadcast %158 : vector<64x1xf32> to vector<64x64xf32>
    %160 = arith.divf %156, %159 : vector<64x64xf32>
    %cst_59 = arith.constant dense<0.000000e+00> : vector<64x8xf32>
    %161 = tpu.matmul %160, %148, %cst_59 {dimension_numbers = #tpu.dot_dimension_numbers<[1], [0], [0], [1], [0, 0, 1, 1], [], []>} : vector<64x64xf32>, vector<64x8xf32>, vector<64x8xf32> -> vector<64x8xf32>
    %162 = vector.extract_strided_slice %26 {offsets = [48, 0], sizes = [8, 64], strides = [1, 1]} : vector<64x64xf32> to vector<8x64xf32>
    %cst_60 = arith.constant dense<0.000000e+00> : vector<64x64xf32>
    %163 = tpu.matmul %161, %162, %cst_60 {dimension_numbers = #tpu.dot_dimension_numbers<[1], [0], [0], [1], [0, 0, 1, 1], [], []>} : vector<64x8xf32>, vector<8x64xf32>, vector<64x64xf32> -> vector<64x64xf32>
    %164 = arith.addf %145, %163 : vector<64x64xf32>
    %165 = vector.extract_strided_slice %27 {offsets = [0, 56], sizes = [64, 8], strides = [1, 1]} : vector<64x64xf32> to vector<64x8xf32>
    %166 = vector.extract_strided_slice %29 {offsets = [0, 56], sizes = [64, 8], strides = [1, 1]} : vector<64x64xf32> to vector<64x8xf32>
    %167 = vector.extract_strided_slice %30 {offsets = [0, 56], sizes = [64, 8], strides = [1, 1]} : vector<64x64xf32> to vector<64x8xf32>
    %cst_61 = arith.constant dense<0.000000e+00> : vector<64x64xf32>
    %168 = tpu.matmul %165, %166, %cst_61 {dimension_numbers = #tpu.dot_dimension_numbers<[1], [1], [0], [0], [0, 0, 1, 0], [], []>} : vector<64x8xf32>, vector<64x8xf32>, vector<64x64xf32> -> vector<64x64xf32>
    %cst_62 = arith.constant 0.353553385 : f32
    %169 = vector.broadcast %cst_62 : f32 to vector<64x64xf32>
    %170 = arith.mulf %168, %169 : vector<64x64xf32>
    %cst_63 = arith.constant dense<0xFF800000> : vector<64xf32>
    %171 = vector.multi_reduction <maximumf>, %170, %cst_63 [1] : vector<64x64xf32> to vector<64xf32>
    %172 = vector.shape_cast %171 : vector<64xf32> to vector<64x1xf32>
    %173 = vector.broadcast %172 : vector<64x1xf32> to vector<64x64xf32>
    %174 = arith.subf %170, %173 : vector<64x64xf32>
    %175 = math.exp %174 : vector<64x64xf32>
    %cst_64 = arith.constant dense<0.000000e+00> : vector<64xf32>
    %176 = vector.multi_reduction <add>, %175, %cst_64 [1] : vector<64x64xf32> to vector<64xf32>
    %177 = vector.shape_cast %176 : vector<64xf32> to vector<64x1xf32>
    %178 = vector.broadcast %177 : vector<64x1xf32> to vector<64x64xf32>
    %179 = arith.divf %175, %178 : vector<64x64xf32>
    %cst_65 = arith.constant dense<0.000000e+00> : vector<64x8xf32>
    %180 = tpu.matmul %179, %167, %cst_65 {dimension_numbers = #tpu.dot_dimension_numbers<[1], [0], [0], [1], [0, 0, 1, 1], [], []>} : vector<64x64xf32>, vector<64x8xf32>, vector<64x8xf32> -> vector<64x8xf32>
    %181 = vector.extract_strided_slice %26 {offsets = [56, 0], sizes = [8, 64], strides = [1, 1]} : vector<64x64xf32> to vector<8x64xf32>
    %cst_66 = arith.constant dense<0.000000e+00> : vector<64x64xf32>
    %182 = tpu.matmul %180, %181, %cst_66 {dimension_numbers = #tpu.dot_dimension_numbers<[1], [0], [0], [1], [0, 0, 1, 1], [], []>} : vector<64x8xf32>, vector<8x64xf32>, vector<64x64xf32> -> vector<64x64xf32>
    %183 = arith.addf %164, %182 : vector<64x64xf32>
    %184 = arith.addf %1, %183 : vector<64x64xf32>
    %c0_67 = arith.constant 0 : index
    %c0_68 = arith.constant 0 : index
    %185 = vector.load %arg7[%c0_67, %c0_68] : memref<1x64xf32, #tpu.memory_space<vmem>>, vector<1x64xf32>
    %186 = vector.broadcast %185 : vector<1x64xf32> to vector<64x64xf32>
    %187 = arith.addf %184, %186 : vector<64x64xf32>
    %cst_69 = arith.constant dense<0.000000e+00> : vector<64xf32>
    %188 = vector.multi_reduction <add>, %187, %cst_69 [1] : vector<64x64xf32> to vector<64xf32>
    %189 = vector.shape_cast %188 : vector<64xf32> to vector<64x1xf32>
    %cst_70 = arith.constant 6.400000e+01 : f32
    %190 = vector.broadcast %cst_70 : f32 to vector<64x1xf32>
    %191 = arith.divf %189, %190 : vector<64x1xf32>
    %192 = vector.broadcast %191 : vector<64x1xf32> to vector<64x64xf32>
    %193 = arith.subf %187, %192 : vector<64x64xf32>
    %194 = arith.mulf %193, %193 : vector<64x64xf32>
    %cst_71 = arith.constant dense<0.000000e+00> : vector<64xf32>
    %195 = vector.multi_reduction <add>, %194, %cst_71 [1] : vector<64x64xf32> to vector<64xf32>
    %196 = vector.shape_cast %195 : vector<64xf32> to vector<64x1xf32>
    %cst_72 = arith.constant 6.400000e+01 : f32
    %197 = vector.broadcast %cst_72 : f32 to vector<64x1xf32>
    %198 = arith.divf %196, %197 : vector<64x1xf32>
    %cst_73 = arith.constant 9.99999997E-7 : f32
    %199 = vector.broadcast %cst_73 : f32 to vector<64x1xf32>
    %200 = arith.addf %198, %199 : vector<64x1xf32>
    %201 = math.rsqrt %200 : vector<64x1xf32>
    %202 = vector.broadcast %201 : vector<64x1xf32> to vector<64x64xf32>
    %203 = arith.mulf %193, %202 : vector<64x64xf32>
    %c0_74 = arith.constant 0 : index
    %c0_75 = arith.constant 0 : index
    %204 = vector.load %arg8[%c0_74, %c0_75] : memref<1x64xf32, #tpu.memory_space<vmem>>, vector<1x64xf32>
    %205 = vector.broadcast %204 : vector<1x64xf32> to vector<64x64xf32>
    %206 = arith.mulf %203, %205 : vector<64x64xf32>
    %c0_76 = arith.constant 0 : index
    %c0_77 = arith.constant 0 : index
    %207 = vector.load %arg9[%c0_76, %c0_77] : memref<1x64xf32, #tpu.memory_space<vmem>>, vector<1x64xf32>
    %208 = vector.broadcast %207 : vector<1x64xf32> to vector<64x64xf32>
    %209 = arith.addf %206, %208 : vector<64x64xf32>
    %c0_78 = arith.constant 0 : index
    %c0_79 = arith.constant 0 : index
    %210 = vector.load %arg10[%c0_78, %c0_79] : memref<64x256xf32, #tpu.memory_space<vmem>>, vector<64x256xf32>
    %cst_80 = arith.constant dense<0.000000e+00> : vector<64x256xf32>
    %211 = tpu.matmul %209, %210, %cst_80 {dimension_numbers = #tpu.dot_dimension_numbers<[1], [0], [0], [1], [0, 0, 1, 1], [], []>} : vector<64x64xf32>, vector<64x256xf32>, vector<64x256xf32> -> vector<64x256xf32>
    %c0_81 = arith.constant 0 : index
    %c0_82 = arith.constant 0 : index
    %212 = vector.load %arg11[%c0_81, %c0_82] : memref<1x256xf32, #tpu.memory_space<vmem>>, vector<1x256xf32>
    %213 = vector.broadcast %212 : vector<1x256xf32> to vector<64x256xf32>
    %214 = arith.addf %211, %213 : vector<64x256xf32>
    %cst_83 = arith.constant 0.000000e+00 : f32
    %215 = vector.broadcast %cst_83 : f32 to vector<64x256xf32>
    %c0_84 = arith.constant 0 : index
    %c0_85 = arith.constant 0 : index
    %c0_86 = arith.constant 0 : index
    %216 = vector.load %arg12[%c0_84, %c0_85, %c0_86] : memref<9x64x64xf32, #tpu.memory_space<vmem>>, vector<1x64x64xf32>
    %217 = vector.shape_cast %216 : vector<1x64x64xf32> to vector<64x64xf32>
    %cst_87 = arith.constant dense<0.000000e+00> : vector<64x256xf32>
    %218 = tpu.matmul %217, %214, %cst_87 {dimension_numbers = #tpu.dot_dimension_numbers<[1], [0], [0], [1], [0, 0, 1, 1], [], []>} : vector<64x64xf32>, vector<64x256xf32>, vector<64x256xf32> -> vector<64x256xf32>
    %c0_88 = arith.constant 0 : index
    %c0_89 = arith.constant 0 : index
    %c0_90 = arith.constant 0 : index
    %219 = vector.load %arg13[%c0_88, %c0_89, %c0_90] : memref<9x1x256xf32, #tpu.memory_space<vmem>>, vector<1x1x256xf32>
    %220 = vector.shape_cast %219 : vector<1x1x256xf32> to vector<1x256xf32>
    %221 = vector.broadcast %220 : vector<1x256xf32> to vector<64x256xf32>
    %222 = arith.mulf %218, %221 : vector<64x256xf32>
    %223 = arith.addf %215, %222 : vector<64x256xf32>
    %c1 = arith.constant 1 : index
    %c0_91 = arith.constant 0 : index
    %c0_92 = arith.constant 0 : index
    %224 = vector.load %arg12[%c1, %c0_91, %c0_92] : memref<9x64x64xf32, #tpu.memory_space<vmem>>, vector<1x64x64xf32>
    %225 = vector.shape_cast %224 : vector<1x64x64xf32> to vector<64x64xf32>
    %cst_93 = arith.constant dense<0.000000e+00> : vector<64x256xf32>
    %226 = tpu.matmul %225, %214, %cst_93 {dimension_numbers = #tpu.dot_dimension_numbers<[1], [0], [0], [1], [0, 0, 1, 1], [], []>} : vector<64x64xf32>, vector<64x256xf32>, vector<64x256xf32> -> vector<64x256xf32>
    %c1_94 = arith.constant 1 : index
    %c0_95 = arith.constant 0 : index
    %c0_96 = arith.constant 0 : index
    %227 = vector.load %arg13[%c1_94, %c0_95, %c0_96] : memref<9x1x256xf32, #tpu.memory_space<vmem>>, vector<1x1x256xf32>
    %228 = vector.shape_cast %227 : vector<1x1x256xf32> to vector<1x256xf32>
    %229 = vector.broadcast %228 : vector<1x256xf32> to vector<64x256xf32>
    %230 = arith.mulf %226, %229 : vector<64x256xf32>
    %231 = arith.addf %223, %230 : vector<64x256xf32>
    %c2 = arith.constant 2 : index
    %c0_97 = arith.constant 0 : index
    %c0_98 = arith.constant 0 : index
    %232 = vector.load %arg12[%c2, %c0_97, %c0_98] : memref<9x64x64xf32, #tpu.memory_space<vmem>>, vector<1x64x64xf32>
    %233 = vector.shape_cast %232 : vector<1x64x64xf32> to vector<64x64xf32>
    %cst_99 = arith.constant dense<0.000000e+00> : vector<64x256xf32>
    %234 = tpu.matmul %233, %214, %cst_99 {dimension_numbers = #tpu.dot_dimension_numbers<[1], [0], [0], [1], [0, 0, 1, 1], [], []>} : vector<64x64xf32>, vector<64x256xf32>, vector<64x256xf32> -> vector<64x256xf32>
    %c2_100 = arith.constant 2 : index
    %c0_101 = arith.constant 0 : index
    %c0_102 = arith.constant 0 : index
    %235 = vector.load %arg13[%c2_100, %c0_101, %c0_102] : memref<9x1x256xf32, #tpu.memory_space<vmem>>, vector<1x1x256xf32>
    %236 = vector.shape_cast %235 : vector<1x1x256xf32> to vector<1x256xf32>
    %237 = vector.broadcast %236 : vector<1x256xf32> to vector<64x256xf32>
    %238 = arith.mulf %234, %237 : vector<64x256xf32>
    %239 = arith.addf %231, %238 : vector<64x256xf32>
    %c3 = arith.constant 3 : index
    %c0_103 = arith.constant 0 : index
    %c0_104 = arith.constant 0 : index
    %240 = vector.load %arg12[%c3, %c0_103, %c0_104] : memref<9x64x64xf32, #tpu.memory_space<vmem>>, vector<1x64x64xf32>
    %241 = vector.shape_cast %240 : vector<1x64x64xf32> to vector<64x64xf32>
    %cst_105 = arith.constant dense<0.000000e+00> : vector<64x256xf32>
    %242 = tpu.matmul %241, %214, %cst_105 {dimension_numbers = #tpu.dot_dimension_numbers<[1], [0], [0], [1], [0, 0, 1, 1], [], []>} : vector<64x64xf32>, vector<64x256xf32>, vector<64x256xf32> -> vector<64x256xf32>
    %c3_106 = arith.constant 3 : index
    %c0_107 = arith.constant 0 : index
    %c0_108 = arith.constant 0 : index
    %243 = vector.load %arg13[%c3_106, %c0_107, %c0_108] : memref<9x1x256xf32, #tpu.memory_space<vmem>>, vector<1x1x256xf32>
    %244 = vector.shape_cast %243 : vector<1x1x256xf32> to vector<1x256xf32>
    %245 = vector.broadcast %244 : vector<1x256xf32> to vector<64x256xf32>
    %246 = arith.mulf %242, %245 : vector<64x256xf32>
    %247 = arith.addf %239, %246 : vector<64x256xf32>
    %c4 = arith.constant 4 : index
    %c0_109 = arith.constant 0 : index
    %c0_110 = arith.constant 0 : index
    %248 = vector.load %arg12[%c4, %c0_109, %c0_110] : memref<9x64x64xf32, #tpu.memory_space<vmem>>, vector<1x64x64xf32>
    %249 = vector.shape_cast %248 : vector<1x64x64xf32> to vector<64x64xf32>
    %cst_111 = arith.constant dense<0.000000e+00> : vector<64x256xf32>
    %250 = tpu.matmul %249, %214, %cst_111 {dimension_numbers = #tpu.dot_dimension_numbers<[1], [0], [0], [1], [0, 0, 1, 1], [], []>} : vector<64x64xf32>, vector<64x256xf32>, vector<64x256xf32> -> vector<64x256xf32>
    %c4_112 = arith.constant 4 : index
    %c0_113 = arith.constant 0 : index
    %c0_114 = arith.constant 0 : index
    %251 = vector.load %arg13[%c4_112, %c0_113, %c0_114] : memref<9x1x256xf32, #tpu.memory_space<vmem>>, vector<1x1x256xf32>
    %252 = vector.shape_cast %251 : vector<1x1x256xf32> to vector<1x256xf32>
    %253 = vector.broadcast %252 : vector<1x256xf32> to vector<64x256xf32>
    %254 = arith.mulf %250, %253 : vector<64x256xf32>
    %255 = arith.addf %247, %254 : vector<64x256xf32>
    %c5 = arith.constant 5 : index
    %c0_115 = arith.constant 0 : index
    %c0_116 = arith.constant 0 : index
    %256 = vector.load %arg12[%c5, %c0_115, %c0_116] : memref<9x64x64xf32, #tpu.memory_space<vmem>>, vector<1x64x64xf32>
    %257 = vector.shape_cast %256 : vector<1x64x64xf32> to vector<64x64xf32>
    %cst_117 = arith.constant dense<0.000000e+00> : vector<64x256xf32>
    %258 = tpu.matmul %257, %214, %cst_117 {dimension_numbers = #tpu.dot_dimension_numbers<[1], [0], [0], [1], [0, 0, 1, 1], [], []>} : vector<64x64xf32>, vector<64x256xf32>, vector<64x256xf32> -> vector<64x256xf32>
    %c5_118 = arith.constant 5 : index
    %c0_119 = arith.constant 0 : index
    %c0_120 = arith.constant 0 : index
    %259 = vector.load %arg13[%c5_118, %c0_119, %c0_120] : memref<9x1x256xf32, #tpu.memory_space<vmem>>, vector<1x1x256xf32>
    %260 = vector.shape_cast %259 : vector<1x1x256xf32> to vector<1x256xf32>
    %261 = vector.broadcast %260 : vector<1x256xf32> to vector<64x256xf32>
    %262 = arith.mulf %258, %261 : vector<64x256xf32>
    %263 = arith.addf %255, %262 : vector<64x256xf32>
    %c6 = arith.constant 6 : index
    %c0_121 = arith.constant 0 : index
    %c0_122 = arith.constant 0 : index
    %264 = vector.load %arg12[%c6, %c0_121, %c0_122] : memref<9x64x64xf32, #tpu.memory_space<vmem>>, vector<1x64x64xf32>
    %265 = vector.shape_cast %264 : vector<1x64x64xf32> to vector<64x64xf32>
    %cst_123 = arith.constant dense<0.000000e+00> : vector<64x256xf32>
    %266 = tpu.matmul %265, %214, %cst_123 {dimension_numbers = #tpu.dot_dimension_numbers<[1], [0], [0], [1], [0, 0, 1, 1], [], []>} : vector<64x64xf32>, vector<64x256xf32>, vector<64x256xf32> -> vector<64x256xf32>
    %c6_124 = arith.constant 6 : index
    %c0_125 = arith.constant 0 : index
    %c0_126 = arith.constant 0 : index
    %267 = vector.load %arg13[%c6_124, %c0_125, %c0_126] : memref<9x1x256xf32, #tpu.memory_space<vmem>>, vector<1x1x256xf32>
    %268 = vector.shape_cast %267 : vector<1x1x256xf32> to vector<1x256xf32>
    %269 = vector.broadcast %268 : vector<1x256xf32> to vector<64x256xf32>
    %270 = arith.mulf %266, %269 : vector<64x256xf32>
    %271 = arith.addf %263, %270 : vector<64x256xf32>
    %c7 = arith.constant 7 : index
    %c0_127 = arith.constant 0 : index
    %c0_128 = arith.constant 0 : index
    %272 = vector.load %arg12[%c7, %c0_127, %c0_128] : memref<9x64x64xf32, #tpu.memory_space<vmem>>, vector<1x64x64xf32>
    %273 = vector.shape_cast %272 : vector<1x64x64xf32> to vector<64x64xf32>
    %cst_129 = arith.constant dense<0.000000e+00> : vector<64x256xf32>
    %274 = tpu.matmul %273, %214, %cst_129 {dimension_numbers = #tpu.dot_dimension_numbers<[1], [0], [0], [1], [0, 0, 1, 1], [], []>} : vector<64x64xf32>, vector<64x256xf32>, vector<64x256xf32> -> vector<64x256xf32>
    %c7_130 = arith.constant 7 : index
    %c0_131 = arith.constant 0 : index
    %c0_132 = arith.constant 0 : index
    %275 = vector.load %arg13[%c7_130, %c0_131, %c0_132] : memref<9x1x256xf32, #tpu.memory_space<vmem>>, vector<1x1x256xf32>
    %276 = vector.shape_cast %275 : vector<1x1x256xf32> to vector<1x256xf32>
    %277 = vector.broadcast %276 : vector<1x256xf32> to vector<64x256xf32>
    %278 = arith.mulf %274, %277 : vector<64x256xf32>
    %279 = arith.addf %271, %278 : vector<64x256xf32>
    %c8 = arith.constant 8 : index
    %c0_133 = arith.constant 0 : index
    %c0_134 = arith.constant 0 : index
    %280 = vector.load %arg12[%c8, %c0_133, %c0_134] : memref<9x64x64xf32, #tpu.memory_space<vmem>>, vector<1x64x64xf32>
    %281 = vector.shape_cast %280 : vector<1x64x64xf32> to vector<64x64xf32>
    %cst_135 = arith.constant dense<0.000000e+00> : vector<64x256xf32>
    %282 = tpu.matmul %281, %214, %cst_135 {dimension_numbers = #tpu.dot_dimension_numbers<[1], [0], [0], [1], [0, 0, 1, 1], [], []>} : vector<64x64xf32>, vector<64x256xf32>, vector<64x256xf32> -> vector<64x256xf32>
    %c8_136 = arith.constant 8 : index
    %c0_137 = arith.constant 0 : index
    %c0_138 = arith.constant 0 : index
    %283 = vector.load %arg13[%c8_136, %c0_137, %c0_138] : memref<9x1x256xf32, #tpu.memory_space<vmem>>, vector<1x1x256xf32>
    %284 = vector.shape_cast %283 : vector<1x1x256xf32> to vector<1x256xf32>
    %285 = vector.broadcast %284 : vector<1x256xf32> to vector<64x256xf32>
    %286 = arith.mulf %282, %285 : vector<64x256xf32>
    %287 = arith.addf %279, %286 : vector<64x256xf32>
    %c0_139 = arith.constant 0 : index
    %c0_140 = arith.constant 0 : index
    %288 = vector.load %arg14[%c0_139, %c0_140] : memref<1x256xf32, #tpu.memory_space<vmem>>, vector<1x256xf32>
    %289 = vector.broadcast %288 : vector<1x256xf32> to vector<64x256xf32>
    %290 = arith.addf %287, %289 : vector<64x256xf32>
    %cst_141 = arith.constant 5.000000e-01 : f32
    %291 = vector.broadcast %cst_141 : f32 to vector<64x256xf32>
    %292 = arith.mulf %291, %290 : vector<64x256xf32>
    %cst_142 = arith.constant 4.471500e-02 : f32
    %293 = vector.broadcast %cst_142 : f32 to vector<64x256xf32>
    %294 = arith.mulf %293, %290 : vector<64x256xf32>
    %295 = arith.mulf %294, %290 : vector<64x256xf32>
    %296 = arith.mulf %295, %290 : vector<64x256xf32>
    %297 = arith.addf %290, %296 : vector<64x256xf32>
    %cst_143 = arith.constant 0.797884583 : f32
    %298 = vector.broadcast %cst_143 : f32 to vector<64x256xf32>
    %299 = arith.mulf %298, %297 : vector<64x256xf32>
    %300 = math.tanh %299 : vector<64x256xf32>
    %cst_144 = arith.constant 1.000000e+00 : f32
    %301 = vector.broadcast %cst_144 : f32 to vector<64x256xf32>
    %302 = arith.addf %301, %300 : vector<64x256xf32>
    %303 = arith.mulf %292, %302 : vector<64x256xf32>
    %c0_145 = arith.constant 0 : index
    %c0_146 = arith.constant 0 : index
    %304 = vector.load %arg15[%c0_145, %c0_146] : memref<256x64xf32, #tpu.memory_space<vmem>>, vector<256x64xf32>
    %cst_147 = arith.constant dense<0.000000e+00> : vector<64x64xf32>
    %305 = tpu.matmul %303, %304, %cst_147 {dimension_numbers = #tpu.dot_dimension_numbers<[1], [0], [0], [1], [0, 0, 1, 1], [], []>} : vector<64x256xf32>, vector<256x64xf32>, vector<64x64xf32> -> vector<64x64xf32>
    %c0_148 = arith.constant 0 : index
    %c0_149 = arith.constant 0 : index
    %306 = vector.load %arg16[%c0_148, %c0_149] : memref<1x64xf32, #tpu.memory_space<vmem>>, vector<1x64xf32>
    %307 = vector.broadcast %306 : vector<1x64xf32> to vector<64x64xf32>
    %308 = arith.addf %305, %307 : vector<64x64xf32>
    %309 = arith.addf %187, %308 : vector<64x64xf32>
    %c0_150 = arith.constant 0 : index
    %c0_151 = arith.constant 0 : index
    %c0_152 = arith.constant 0 : index
    %310 = vector.load %arg17[%c0_150, %c0_151, %c0_152] : memref<1x64x64xf32, #tpu.memory_space<vmem>>, vector<1x64x64xf32>
    %311 = vector.shape_cast %310 : vector<1x64x64xf32> to vector<64x64xf32>
    %312 = vector.shape_cast %309 : vector<64x64xf32> to vector<1x64x64xf32>
    tpu.vector_store %arg17[%c0_150, %c0_151, %c0_152], %312 {strides = array<i32>} : memref<1x64x64xf32, #tpu.memory_space<vmem>>, vector<1x64x64xf32>,
    return
  }
  func.func @transform_0(%arg0: i32) -> (i32, i32, i32) {
    %c0_i32 = arith.constant 0 : i32
    %c0_i32_0 = arith.constant 0 : i32
    %c0_i32_1 = arith.constant 0 : i32
    return %arg0, %c0_i32, %c0_i32_0 : i32, i32, i32
  }
  func.func @transform_1(%arg0: i32) -> (i32, i32) {
    %c0_i32 = arith.constant 0 : i32
    %c0_i32_0 = arith.constant 0 : i32
    %c0_i32_1 = arith.constant 0 : i32
    return %c0_i32, %c0_i32_0 : i32, i32
  }
  func.func @transform_2(%arg0: i32) -> (i32, i32) {
    %c0_i32 = arith.constant 0 : i32
    %c0_i32_0 = arith.constant 0 : i32
    %c0_i32_1 = arith.constant 0 : i32
    return %c0_i32, %c0_i32_0 : i32, i32
  }
  func.func @transform_3(%arg0: i32) -> (i32, i32) {
    %c0_i32 = arith.constant 0 : i32
    %c0_i32_0 = arith.constant 0 : i32
    %c0_i32_1 = arith.constant 0 : i32
    return %c0_i32, %c0_i32_0 : i32, i32
  }
  func.func @transform_4(%arg0: i32) -> (i32, i32) {
    %c0_i32 = arith.constant 0 : i32
    %c0_i32_0 = arith.constant 0 : i32
    %c0_i32_1 = arith.constant 0 : i32
    return %c0_i32, %c0_i32_0 : i32, i32
  }
  func.func @transform_5(%arg0: i32) -> (i32, i32) {
    %c0_i32 = arith.constant 0 : i32
    %c0_i32_0 = arith.constant 0 : i32
    %c0_i32_1 = arith.constant 0 : i32
    return %c0_i32, %c0_i32_0 : i32, i32
  }
  func.func @transform_6(%arg0: i32) -> (i32, i32) {
    %c0_i32 = arith.constant 0 : i32
    %c0_i32_0 = arith.constant 0 : i32
    %c0_i32_1 = arith.constant 0 : i32
    return %c0_i32, %c0_i32_0 : i32, i32
  }
  func.func @transform_7(%arg0: i32) -> (i32, i32) {
    %c0_i32 = arith.constant 0 : i32
    %c0_i32_0 = arith.constant 0 : i32
    %c0_i32_1 = arith.constant 0 : i32
    return %c0_i32, %c0_i32_0 : i32, i32
  }
  func.func @transform_8(%arg0: i32) -> (i32, i32) {
    %c0_i32 = arith.constant 0 : i32
    %c0_i32_0 = arith.constant 0 : i32
    %c0_i32_1 = arith.constant 0 : i32
    return %c0_i32, %c0_i32_0 : i32, i32
  }
  func.func @transform_9(%arg0: i32) -> (i32, i32) {
    %c0_i32 = arith.constant 0 : i32
    %c0_i32_0 = arith.constant 0 : i32
    %c0_i32_1 = arith.constant 0 : i32
    return %c0_i32, %c0_i32_0 : i32, i32
  }
  func.func @transform_10(%arg0: i32) -> (i32, i32) {
    %c0_i32 = arith.constant 0 : i32
    %c0_i32_0 = arith.constant 0 : i32
    %c0_i32_1 = arith.constant 0 : i32
    return %c0_i32, %c0_i32_0 : i32, i32
  }
  func.func @transform_11(%arg0: i32) -> (i32, i32, i32) {
    %c0_i32 = arith.constant 0 : i32
    %c0_i32_0 = arith.constant 0 : i32
    %c0_i32_1 = arith.constant 0 : i32
    %c0_i32_2 = arith.constant 0 : i32
    return %c0_i32, %c0_i32_0, %c0_i32_1 : i32, i32, i32
  }
  func.func @transform_12(%arg0: i32) -> (i32, i32, i32) {
    %c0_i32 = arith.constant 0 : i32
    %c0_i32_0 = arith.constant 0 : i32
    %c0_i32_1 = arith.constant 0 : i32
    %c0_i32_2 = arith.constant 0 : i32
    return %c0_i32, %c0_i32_0, %c0_i32_1 : i32, i32, i32
  }
  func.func @transform_13(%arg0: i32) -> (i32, i32) {
    %c0_i32 = arith.constant 0 : i32
    %c0_i32_0 = arith.constant 0 : i32
    %c0_i32_1 = arith.constant 0 : i32
    return %c0_i32, %c0_i32_0 : i32, i32
  }
  func.func @transform_14(%arg0: i32) -> (i32, i32) {
    %c0_i32 = arith.constant 0 : i32
    %c0_i32_0 = arith.constant 0 : i32
    %c0_i32_1 = arith.constant 0 : i32
    return %c0_i32, %c0_i32_0 : i32, i32
  }
  func.func @transform_15(%arg0: i32) -> (i32, i32) {
    %c0_i32 = arith.constant 0 : i32
    %c0_i32_0 = arith.constant 0 : i32
    %c0_i32_1 = arith.constant 0 : i32
    return %c0_i32, %c0_i32_0 : i32, i32
  }
  func.func @transform_16(%arg0: i32) -> (i32, i32, i32) {
    %c0_i32 = arith.constant 0 : i32
    %c0_i32_0 = arith.constant 0 : i32
    %c0_i32_1 = arith.constant 0 : i32
    return %arg0, %c0_i32, %c0_i32_0 : i32, i32, i32
  }
}

</mosaic_0001>

<bundles_post_ra>
// kernel: tpu_custom_call.1
= control target key start
LH: loop header
LB: loop body
LE: loop exit
PB: predicated region body
PF: predicated region fallthrough
CT: control target
= control target key end

     0   :  { %s12089_s0 = inlined_call_operand.vmem [shape: f32[2,64,64], index: 0, kind: input, shape index: {}]   ;;  %s12090_s1 = inlined_call_operand.hbm [shape: f32[1,64], index: 1, kind: input, shape index: {}]   ;;  %s12091_s2 = inlined_call_operand.hbm [shape: f32[1,64], index: 2, kind: input, shape index: {}]   ;;  %s12092_s3 = inlined_call_operand.vmem [shape: f32[64,64], index: 3, kind: input, shape index: {}]   ;;  %s12093_s4 = inlined_call_operand.vmem [shape: f32[64,128], index: 4, kind: input, shape index: {}]   ;;  %s12094_s5 = inlined_call_operand.hbm [shape: f32[64,64], index: 5, kind: input, shape index: {}]   ;;  %s12095_s6 = inlined_call_operand.hbm [shape: f32[1,64], index: 6, kind: input, shape index: {}]   ;;  %s12096_s7 = inlined_call_operand.hbm [shape: f32[1,64], index: 7, kind: input, shape index: {}]   ;;  %s12097_s8 = inlined_call_operand.hbm [shape: f32[1,64], index: 8, kind: input, shape index: {}]   ;;  %s12098_s9 = inlined_call_operand.vmem [shape: f32[64,256], index: 9, kind: input, shape index: {}]   ;;  %s12099_s10 = inlined_call_operand.vmem [shape: f32[1,256], index: 10, kind: input, shape index: {}]   ;;  %s12100_s11 = inlined_call_operand.hbm [shape: f32[9,64,64], index: 11, kind: input, shape index: {}]   ;;  %s12101_s12 = inlined_call_operand.hbm [shape: f32[9,1,256], index: 12, kind: input, shape index: {}]   ;;  %s12102_s13 = inlined_call_operand.vmem [shape: f32[1,256], index: 13, kind: input, shape index: {}]   ;;  %s12103_s14 = inlined_call_operand.vmem [shape: f32[256,64], index: 14, kind: input, shape index: {}]   ;;  %s12104_s15 = inlined_call_operand.vmem [shape: f32[1,64], index: 15, kind: input, shape index: {}]   ;;  %s12105_s16 = inlined_call_operand.hbm [shape: f32[2,64,64], index: 16, kind: output, shape index: {}]  }
   0x1   :  { %12128 = sst [smem:[#allocation88_spill]] %s12089_s0 }
   0x2   :  { %12129 = sst [smem:[#allocation89_spill]] %s12090_s1 }
   0x3   :  { %12130 = sst [smem:[#allocation90_spill]] %s12091_s2 }
   0x4   :  { %12131 = sst [smem:[#allocation91_spill]] %s12095_s6 }
   0x5   :  { %12132 = sst [smem:[#allocation92_spill]] %s12097_s8 }
   0x6   :  { %21 = vsyncpa [#allocation3], 0 }
   0x7   :  { %22 = vsyncpa [#allocation6], 0 }
   0x8   :  { %23 = vsyncpa [#allocation9], 0 }
   0x9   :  { %24 = vsyncpa [#allocation12], 0 }
   0xa   :  { %25 = vsyncpa [#allocation15], 0 }
   0xb   :  { %26 = vsyncpa [#allocation4], 0 }
   0xc   :  { %28 = vsyncpa [#allocation4 + $0x1], 0  ;;  %s8428_s21 = smov 0   ;;  %s8430_s22 = smov 0  }
   0xd   :  { %s8432_s23 = smov 0   ;;  %s8434_s24 = smov 0  }
   0xe LB: > { %12133 = sst [smem:[#allocation23_spill]] %s8300_s21  ;;  %s8449_s25 = sadd.s32 4294967295, %s8312_s24   ;;  %s8312_s24 = sphi %s8434_s24, %s12371_s24   ;;  %s8308_s23 = sphi %s8432_s23, %s12373_s23   ;;  %s8304_s22 = sphi %s8430_s22, %s12375_s22   ;;  %s8300_s21 = sphi %s8428_s21, %s12374_s21  }
   0xf   : > { %12134 = sst [smem:[#allocation24_spill]] %s8308_s23  ;;  %s6883_s26 = sadd.s32 4294967294, %s8312_s24  }
  0x10   : > { %12135 = sst [smem:[#allocation25_spill]] %s8312_s24  ;;  %s8453_s27 = sadd.s32 1, %s8312_s24  }
  0x11   : > { %12136 = sst [smem:[#allocation26_spill]] %s8453_s27  ;;  %s382_s28 = sadd.s32 1, %s8308_s23 }
  0x12   : > { %s379_s29 = ssub.s32 %s8312_s24, %s8453_s27  ;;  %p392_p0 = scmp.ne.s32.totalorder %s8308_s23, %s8304_s22 }
  0x13   : > { %p380_p1 = scmp.eq.s32.totalorder %s379_s29, 0  ;;  %p393_p2 = scmp.eq.s32.totalorder %s8449_s25, 1 }
  0x14   : > { %p398_p3 = scmp.ne.s32.totalorder %s8304_s22, %s8300_s21  ;;  %p399_p4 = scmp.eq.s32.totalorder %s6883_s26, 1 }
  0x15   : > { %s8464_s30 = scalar_select %p380_p1, %s8308_s23, %s382_s28  }
  0x16   : > { %p8466_p5 = por %p393_p2, %p392_p0  ;;  %p8470_p6 = por %p399_p4, %p398_p3 }
  0x17   : > { %12137 = sst [smem:[#allocation27_spill]] %s8464_s30  ;;  %p6884_p7 = scmp.ge.s32.totalorder %s8312_s24, 1 }
  0x18   : > { %s12138_s0 = scalar_select %p8466_p5, 1, 0 }
  0x19   : > { %s12140_s17 = scalar_select %p8470_p6, 1, 0 }
  0x1a   : > { %12139 = sst [smem:[#allocation28_spill]] %s12138_s0  ;;  %p406_p8 = scmp.lt.s32.totalorder %s8312_s24, 3 }
  0x1b   : > { %12141 = sst [smem:[#allocation29_spill]] %s12140_s17  ;;  %p7416_p9 = scmp.eq.s32.totalorder %s8449_s25, 0 }
  0x1c   : > { %p8477_p10 = pnand %p6884_p7, %p406_p8  ;;  %s12143_s2 = sld [smem:[#allocation90_spill]] }
  0x1d   : > { %s8314_s28 = smov [#allocation5]   ;;  %s12144_s6 = sld [smem:[#allocation91_spill]] }
  0x1e   : > { %p7387_p11 = pneg %p8477_p10  ;;  %s432_s29 = sshll.u32 %s8314_s28, 4  ;;  %s433_s29 = int_to_ptr.vmem [resolvable:$true] %s432_s29 }
  0x1f   : > { %s12146_s8 = sld [smem:[#allocation92_spill]]  ;;  %s8315_s21 = smov [#allocation8]  }
  0x20   : > { %p8491_p12 = pnand %p7416_p9, %p7387_p11  ;;  %s464_s28 = sshll.u32 %s8315_s21, 4  ;;  %s465_s28 = int_to_ptr.vmem [resolvable:$true] %s464_s28 }
  0x21   : > { %s12147_s1 = sld [smem:[#allocation89_spill]]  ;;  %s8316_s24 = smov [#allocation11]  }
  0x22   : > { %s430_s26 = sshll.u32 %s12143_s2, 4  ;;  %s488_s0 = sshll.u32 %s8316_s24, 4  ;;  %s431_s26 = int_to_ptr.hbm [resolvable:$true] %s430_s26  ;;  %s489_s0 = int_to_ptr.vmem [resolvable:$true] %s488_s0 }
  0x23   : > { %s462_s27 = sshll.u32 %s12144_s6, 4  ;;  %s8317_s19 = smov [#allocation2]   ;;  %s463_s27 = int_to_ptr.hbm [resolvable:$true] %s462_s27 }
  0x24   : > { %7393 = dma.hbm_to_vmem [thread:$0]  (!%p8491_p12), %s431_s26, 16, %s433_s29, [#allocation6]  }
  0x25   : > { %s486_s2 = sshll.u32 %s12146_s8, 4  ;;  %s420_s21 = sshll.u32 %s8317_s19, 4  ;;  %s487_s2 = int_to_ptr.hbm [resolvable:$true] %s486_s2  ;;  %s421_s21 = int_to_ptr.vmem [resolvable:$true] %s420_s21 }
  0x26   : > { %7399 = dma.hbm_to_vmem [thread:$0]  (!%p8491_p12), %s463_s27, 16, %s465_s28, [#allocation9]  }
  0x27   : > { %s418_s6 = sshll.u32 %s12147_s1, 4  ;;  %s447_s26 = sshll.u32 %s12094_s5, 4  ;;  %s419_s6 = int_to_ptr.hbm [resolvable:$true] %s418_s6  ;;  %s448_s26 = int_to_ptr.hbm [resolvable:$true] %s447_s26 }
  0x28   : > { %7405 = dma.hbm_to_vmem [thread:$0]  (!%p8491_p12), %s487_s2, 16, %s489_s0, [#allocation12]  }
  0x29   : > { %7390 = dma.hbm_to_vmem [thread:$0]  (!%p8491_p12), %s419_s6, 16, %s421_s21, [#allocation3]  }
  0x2a   : > { %s8318_s27 = smov [#allocation7]   ;;  %s474_s23 = sshll.u32 %s12096_s7, 4  ;;  %s475_s23 = int_to_ptr.hbm [resolvable:$true] %s474_s23 }
  0x2b   : > { %s449_s29 = sshll.u32 %s8318_s27, 4  ;;  %s8319_s2 = smov 128   ;;  %s450_s29 = int_to_ptr.vmem [resolvable:$true] %s449_s29 }
  0x2c   : > { %s8320_s0 = smov 8   ;;  %s8321_s8 = smov [#allocation10]  }
  0x2d   : > { %7396 = dma.hbm_to_vmem [thread:$0]  (!%p8491_p12), %s448_s26, 1024, %s450_s29, [#allocation6], %s8319_s2, %s8319_s2, %s8320_s0  }
  0x2e   : > { %s476_s30 = sshll.u32 %s8321_s8, 4  ;;  %s503_s6 = sshll.u32 %s12100_s11, 4  ;;  %s477_s30 = int_to_ptr.vmem [resolvable:$true] %s476_s30  ;;  %s504_s6 = int_to_ptr.hbm [resolvable:$true] %s503_s6 }
  0x2f   : > { %7402 = dma.hbm_to_vmem [thread:$0]  (!%p8491_p12), %s475_s23, 16, %s477_s30, [#allocation9]  }
  0x30   : > { %s517_s24 = sshll.u32 %s12101_s12, 4  ;;  %s8322_s28 = smov [#allocation13]   ;;  %s518_s24 = int_to_ptr.hbm [resolvable:$true] %s517_s24 }
  0x31   : > { %s505_s1 = sshll.u32 %s8322_s28, 4  ;;  %s8323_s26 = smov [#allocation14]   ;;  %s506_s1 = int_to_ptr.vmem [resolvable:$true] %s505_s1 }
  0x32   : > { %7408 = dma.hbm_to_vmem [thread:$0]  (!%p8491_p12), %s504_s6, 9216, %s506_s1, [#allocation12], %s8319_s2, %s8319_s2, %s8320_s0  }
  0x33   : > { %s519_s29 = sshll.u32 %s8323_s26, 4  ;;  %s8324_s8 = smov 32   ;;  %s520_s29 = int_to_ptr.vmem [resolvable:$true] %s519_s29 }
  0x34   : > { %s8325_s19 = smov 2   ;;  %552 = sbr.rel (%p8477_p10) target bundleno = 4627 (0x1213), region = 84 }
  0x35   : > { %7411 = dma.hbm_to_vmem [thread:$0]  (!%p8491_p12), %s518_s24, 288, %s520_s29, [#allocation15], %s8324_s8, %s8324_s8, %s8325_s19  }
  0x39   : > { %8275 = dma.done.wait (%p7416_p9), [#allocation3], 16  }
  0x3a   : > { %8277 = vsyncadd (%p7416_p9), [#allocation3], 4294967280 }
  0x3b   : > { %8279 = dma.done.wait (%p7416_p9), [#allocation6], 1040  }
  0x3c   : > { %8281 = vsyncadd (%p7416_p9), [#allocation6], 4294966256 }
  0x3d   : > { %8283 = dma.done.wait (%p7416_p9), [#allocation9], 32  }
  0x3e   : > { %8285 = vsyncadd (%p7416_p9), [#allocation9], 4294967264 }
  0x3f   : > { %8287 = dma.done.wait (%p7416_p9), [#allocation12], 9232  }
  0x40   : > { %8289 = vsyncadd (%p7416_p9), [#allocation12], 4294958064 }
  0x41   : > { %8291 = dma.done.wait (%p7416_p9), [#allocation15], 288  }
  0x42   : > { %8293 = vsyncadd (%p7416_p9), [#allocation15], 4294967008  ;;  %p638_p13 = scmp.lt.s32.totalorder %s8449_s25, 1  ;;  %s12148_s2 = sld [smem:[#allocation88_spill]]  ;;  %vm651_vm0 = vcmask 523264   ;;  %v8326_v14 = vmov 64.0  }
  0x43   : > { %7660 = vrcp.f32 %v8326_v14  ;;  %v866_v58 = vld [vmem:[%s12092_s3 + $0x38] sm:$0xff]  ;;  %v865_v60 = vld [vmem:[%s12092_s3 + $0x30] sm:$0xff]  ;;  %v864_v62 = vld [vmem:[%s12092_s3 + $0x28] sm:$0xff]  ;;  %s8327_s30 = smov 64   ;;  %s8328_s20 = smov 120  }
  0x44   : > { %s639_s1 = scalar_select %p638_p13, %s8449_s25, 1  ;;  %v874_v59 = vld [vmem:[%s12093_s4 + $0x38] sm:$0xff]  ;;  %915 = vmatpush.msra.mxu0 %v866_v58  ;;  %v873_v61 = vld [vmem:[%s12093_s4 + $0x30] sm:$0xff]  ;;  %v872_v63 = vld [vmem:[%s12093_s4 + $0x28] sm:$0xff] }
  0x45   : > { %956 = vmatpush.msra.mxu1 %v874_v59  ;;  %s8329_s6 = smov 112   ;;  %s8330_s21 = smov 104  }
  0x46   : > { %s7343_s17 = sshll.u32 %s639_s1, 6  ;;  %916 = vmatpush.msra.mxu0 %v865_v60  ;;  %s8331_s27 = smov 56  }
  0x47   : > { %957 = vmatpush.msra.mxu1 %v873_v61  ;;  %s8332_s24 = smov 48   ;;  %s8333_s28 = smov 40  }
  0x48   : > { %s8556_s0 = scalar_lea.vmem %s12148_s2, %s7343_s17  ;;  %917 = vmatpush.msra.mxu0 %v864_v62  ;;  %s8334_s26 = smov 96  }
  0x49   : > { %v647_v0 = vld [vmem:[%s8556_s0 + $0x20] sm:$0xff]  ;;  %v645_v1 = vld [vmem:[%s8556_s0 + $0x10] sm:$0xff]  ;;  %v648_v6 = vld [vmem:[%s8556_s0 + $0x28] sm:$0xff]  ;;  %v7661_v15 = vpop.eup %7660  ;;  %958 = vmatpush.msra.mxu1 %v872_v63  ;;  %s8335_s29 = smov 88   ;;  %s8336_s8 = smov 24  }
  0x4a   : > { %v643_v2 = vld [vmem:[%s8556_s0] sm:$0xff]  ;;  %v664_v3 = vsel %vm651_vm0, %v647_v0, 0.0  ;;  %v658_v4 = vsel %vm651_vm0, %v645_v1, 0.0  ;;  %v646_v7 = vld [vmem:[%s8556_s0 + $0x18] sm:$0xff]  ;;  %v644_v8 = vld [vmem:[%s8556_s0 + $0x8] sm:$0xff]  ;;  %v667_v9 = vsel %vm651_vm0, %v648_v6, 0.0  ;;  %vm681_vm1 = vweird.f32 %v7661_v15 }
  0x4b   : > { %v652_v5 = vsel %vm651_vm0, %v643_v2, 0.0  ;;  %665 = vadd.xlane.f32.xlu2 %v664_v3  ;;  %659 = vadd.xlane.f32.xlu1 %v658_v4  ;;  %v661_v10 = vsel %vm651_vm0, %v646_v7, 0.0  ;;  %v655_v11 = vsel %vm651_vm0, %v644_v8, 0.0  ;;  %v649_v12 = vld [vmem:[%s8556_s0 + $0x30] sm:$0xff]  ;;  %v677_v16 = vmul.f32 64.0, %v7661_v15  ;;  %v8593_v40 = vld [vmem:[%s8556_s0 + $0x38] sm:$0xff] }
  0x4c   : > { %653 = vadd.xlane.f32.xlu0 %v652_v5  ;;  %v670_v13 = vsel %vm651_vm0, %v649_v12, 0.0  ;;  %v673_v45 = vsel %vm651_vm0, %v8593_v40, 0.0  ;;  %v870_v3 = vld [vmem:[%s12093_s4 + $0x18] sm:$0xff]  ;;  %v861_v4 = vld [vmem:[%s12092_s3 + $0x10] sm:$0xff]  ;;  %s8337_s19 = smov 32   ;;  %s8338_s1 = smov 72  }
  0x4d   : > { %v678_v17 = vsub.f32 1.0, %v677_v16  ;;  %v869_v5 = vld [vmem:[%s12093_s4 + $0x10] sm:$0xff]  ;;  %s8339_s17 = smov 80   ;;  %s8340_s18 = smov 16  }
  0x4e   : > { %s8341_s23 = smov 8  }
  0x4f   : > { %v679_v18 = vmul.f32 %v7661_v15, %v678_v17 }
  0x51   : > { %v680_v19 = vadd.f32 %v7661_v15, %v679_v18 }
  0x53   : > { %668 = vadd.xlane.f32.xlu2 %v667_v9  ;;  %662 = vadd.xlane.f32.xlu1 %v661_v10  ;;  %v8572_v20 = vsel %vm681_vm1, %v7661_v15, %v680_v19  ;;  %v867_v9 = vld [vmem:[%s12093_s4] sm:$0xff] }
  0x54   : > { %656 = vadd.xlane.f32.xlu0 %v655_v11  ;;  %12149 = vst [vmem:[#allocation30_spill] sm:$0xff] %v8572_v20 }
  0x5b   : > { %671 = vadd.xlane.f32.xlu1 %v670_v13 }
  0xbe   : > { %v666_v21 = vpop.xlane.xlu2 %665  ;;  %v660_v22 = vpop.xlane.xlu1 %659 }
  0xbf   : > { %v685_v23 = vmul.f32 %v8572_v20, %v660_v22  ;;  %v654_v24 = vpop.xlane.xlu0 %653  ;;  %v687_v36 = vmul.f32 %v8572_v20, %v666_v21 }
  0xc0   : > { %v683_v25 = vmul.f32 %v8572_v20, %v654_v24 }
  0xc1   : > { %v8576_v26 = vsub.f32 %v645_v1, %v685_v23  ;;  %v8599_v43 = vsub.f32 %v647_v0, %v687_v36  ;;  %v863_v0 = vld [vmem:[%s12092_s3 + $0x20] sm:$0xff] }
  0xc2   : > { %v8578_v27 = vsub.f32 %v643_v2, %v683_v25  ;;  %v871_v1 = vld [vmem:[%s12093_s4 + $0x20] sm:$0xff]  ;;  %918 = vmatpush.msra.mxu0 %v863_v0  ;;  %v862_v2 = vld [vmem:[%s12092_s3 + $0x18] sm:$0xff] }
  0xc3   : > { %v701_v28 = vmul.f32 %v8576_v26, %v8576_v26  ;;  %v703_v51 = vmul.f32 %v8599_v43, %v8599_v43  ;;  %959 = vmatpush.msra.mxu1 %v871_v1 }
  0xc4   : > { %v699_v29 = vmul.f32 %v8578_v27, %v8578_v27  ;;  %919 = vmatpush.msra.mxu0 %v862_v2 }
  0xc5   : > { %v713_v30 = vsel %vm651_vm0, %v701_v28, 0.0  ;;  %v719_v54 = vsel %vm651_vm0, %v703_v51, 0.0  ;;  %960 = vmatpush.msra.mxu1 %v870_v3  ;;  %v8692_v51 = vld [vmem:[#allocation2] ss:$0 sm:$0xff] }
  0xc6   : > { %v669_v31 = vpop.xlane.xlu2 %668  ;;  %714 = vadd.xlane.f32.xlu1 %v713_v30  ;;  %v707_v32 = vsel %vm651_vm0, %v699_v29, 0.0  ;;  %v663_v33 = vpop.xlane.xlu1 %662  ;;  %920 = vmatpush.msra.mxu0 %v861_v4 }
  0xc7   : > { %v688_v34 = vmul.f32 %v8572_v20, %v669_v31  ;;  %708 = vadd.xlane.f32.xlu0 %v707_v32  ;;  %v657_v35 = vpop.xlane.xlu0 %656  ;;  %v686_v38 = vmul.f32 %v8572_v20, %v663_v33  ;;  %961 = vmatpush.msra.mxu1 %v869_v5 }
  0xc8   : > { %v684_v37 = vmul.f32 %v8572_v20, %v657_v35 }
  0xc9   : > { %v8590_v39 = vsub.f32 %v648_v6, %v688_v34  ;;  %v8601_v44 = vsub.f32 %v646_v7, %v686_v38  ;;  %v860_v6 = vld [vmem:[%s12092_s3 + $0x8] sm:$0xff] }
  0xca   : > { %v8595_v41 = vsub.f32 %v644_v8, %v684_v37  ;;  %v868_v7 = vld [vmem:[%s12093_s4 + $0x8] sm:$0xff]  ;;  %921 = vmatpush.msra.mxu0 %v860_v6  ;;  %v859_v8 = vld [vmem:[%s12092_s3] sm:$0xff] }
  0xcb   : > { %v704_v42 = vmul.f32 %v8590_v39, %v8590_v39  ;;  %v702_v52 = vmul.f32 %v8601_v44, %v8601_v44  ;;  %962 = vmatpush.msra.mxu1 %v868_v7 }
  0xcc   : > { %v700_v46 = vmul.f32 %v8595_v41, %v8595_v41  ;;  %922 = vmatpush.msra.mxu0 %v859_v8 }
  0xcd   : > { %v722_v47 = vsel %vm651_vm0, %v704_v42, 0.0  ;;  %v716_v55 = vsel %vm651_vm0, %v702_v52, 0.0  ;;  %963 = vmatpush.msra.mxu1 %v867_v9 }
  0xce   : > { %723 = vadd.xlane.f32.xlu1 %v722_v47  ;;  %v710_v48 = vsel %vm651_vm0, %v700_v46, 0.0  ;;  %v672_v49 = vpop.xlane.xlu1 %671 }
  0xcf   : > { %674 = vadd.xlane.f32.xlu0 %v673_v45  ;;  %711 = vadd.xlane.f32.xlu2 %v710_v48  ;;  %v689_v50 = vmul.f32 %v8572_v20, %v672_v49 }
  0xd1   : > { %v8614_v53 = vsub.f32 %v649_v12, %v689_v50 }
  0xd3   : > { %v705_v56 = vmul.f32 %v8614_v53, %v8614_v53 }
  0xd5   : > { %v725_v57 = vsel %vm651_vm0, %v705_v56, 0.0 }
  0xd7   : > { %720 = vadd.xlane.f32.xlu0 %v719_v54  ;;  %717 = vadd.xlane.f32.xlu2 %v716_v55 }
  0xdf   : > { %726 = vadd.xlane.f32.xlu2 %v725_v57  ;;  %v8698_v57 = vld [vmem:[#allocation5] ss:$0 sm:$0xff] }
 0x139   : > { %v715_v10 = vpop.xlane.xlu1 %714 }
 0x13a   : > { %v733_v11 = vmul.f32 %v715_v10, %v8572_v20  ;;  %v709_v12 = vpop.xlane.xlu0 %708 }
 0x13b   : > { %v731_v13 = vmul.f32 %v709_v12, %v8572_v20 }
 0x13c   : > { %v8671_v14 = vadd.f32 1e-06, %v733_v11 }
 0x13d   : > { %v739_v15 = vadd.f32 1e-06, %v731_v13 }
 0x13e   : > { %7662 = vrsqrt.f32 %v8671_v14  ;;  %vm773_vm7 = vweird.f32 %v8671_v14 }
 0x13f   : > { %7664 = vrsqrt.f32 %v739_v15  ;;  %vm753_vm3 = vweird.f32 %v739_v15 }
 0x141   : > { %v724_v31 = vpop.xlane.xlu1 %723 }
 0x142   : > { %v712_v16 = vpop.xlane.xlu2 %711  ;;  %v675_v17 = vpop.xlane.xlu0 %674  ;;  %v736_v45 = vmul.f32 %v724_v31, %v8572_v20 }
 0x143   : > { %v732_v18 = vmul.f32 %v712_v16, %v8572_v20  ;;  %v690_v19 = vmul.f32 %v8572_v20, %v675_v17 }
 0x144   : > { %v8676_v21 = vpop.eup %7662  ;;  %v8695_v55 = vadd.f32 1e-06, %v736_v45 }
 0x145   : > { %v7665_v22 = vpop.eup %7664  ;;  %v740_v23 = vadd.f32 1e-06, %v732_v18  ;;  %v8679_v24 = vsub.f32 %v8593_v40, %v690_v19  ;;  %v768_v25 = vmul.f32 %v8676_v21, %v8671_v14  ;;  %vm774_vm8 = vweird.f32 %v8676_v21 }
 0x146   : > { %v748_v28 = vmul.f32 %v7665_v22, %v739_v15  ;;  %vm754_vm2 = vweird.f32 %v7665_v22  ;;  %vm8707_vm10 = vmor %vm773_vm7, %vm774_vm8 }
 0x147   : > { %7666 = vrsqrt.f32 %v740_v23  ;;  %v706_v29 = vmul.f32 %v8679_v24, %v8679_v24  ;;  %v769_v33 = vmul.f32 %v8676_v21, %v768_v25  ;;  %vm755_vm4 = vmor %vm753_vm3, %vm754_vm2  ;;  %vm763_vm5 = vweird.f32 %v740_v23 }
 0x148   : > { %v749_v30 = vmul.f32 %v7665_v22, %v748_v28  ;;  %vm803_vm2 = vweird.f32 %v8695_v55 }
 0x149   : > { %v728_v32 = vsel %vm651_vm0, %v706_v29, 0.0  ;;  %v770_v47 = vmul.f32 0.5, %v769_v33 }
 0x14a   : > { %v750_v34 = vmul.f32 0.5, %v749_v30  ;;  %v718_v35 = vpop.xlane.xlu2 %717  ;;  %729 = vadd.xlane.f32.xlu0 %v728_v32  ;;  %v721_v36 = vpop.xlane.xlu0 %720 }
 0x14b   : > { %v734_v37 = vmul.f32 %v718_v35, %v8572_v20  ;;  %v735_v38 = vmul.f32 %v721_v36, %v8572_v20  ;;  %v771_v58 = vsub.f32 1.5, %v770_v47 }
 0x14c   : > { %v751_v40 = vsub.f32 1.5, %v750_v34 }
 0x14d   : > { %v7667_v42 = vpop.eup %7666  ;;  %v742_v46 = vadd.f32 1e-06, %v734_v37  ;;  %v8690_v50 = vadd.f32 1e-06, %v735_v38  ;;  %v772_v2 = vmul.f32 %v8676_v21, %v771_v58 }
 0x14e   : > { %v752_v48 = vmul.f32 %v7665_v22, %v751_v40  ;;  %v758_v49 = vmul.f32 %v7667_v42, %v740_v23  ;;  %vm764_vm6 = vweird.f32 %v7667_v42 }
 0x14f   : > { %7668 = vrsqrt.f32 %v742_v46  ;;  %vm765_vm9 = vmor %vm763_vm5, %vm764_vm6  ;;  %v776_v13 = vsel %vm8707_vm10, %v8676_v21, %v772_v2  ;;  %vm783_vm11 = vweird.f32 %v742_v46  ;;  %vm793_vm14 = vweird.f32 %v8690_v50 }
 0x150   : > { %v759_v52 = vmul.f32 %v7667_v42, %v758_v49  ;;  %7670 = vrsqrt.f32 %v8690_v50  ;;  %v756_v54 = vsel %vm755_vm4, %v7665_v22, %v752_v48  ;;  %v829_v18 = vmul.f32 %v776_v13, %v8576_v26 }
 0x151   : > { %v827_v56 = vmul.f32 %v756_v54, %v8578_v27  ;;  %7672 = vrsqrt.f32 %v8695_v55 }
 0x152   : > { %v760_v59 = vmul.f32 0.5, %v759_v52  ;;  %v727_v60 = vpop.xlane.xlu2 %726  ;;  %v841_v21 = vmul.f32 %v8692_v51, %v829_v18 }
 0x153   : > { %v839_v61 = vmul.f32 %v8692_v51, %v827_v56  ;;  %v737_v27 = vmul.f32 %v727_v60, %v8572_v20 }
 0x154   : > { %v761_v62 = vsub.f32 1.5, %v760_v59  ;;  %v853_v26 = vadd.f32 %v8698_v57, %v841_v21 }
 0x155   : > { %v7669_v63 = vpop.eup %7668  ;;  %v851_v0 = vadd.f32 %v8698_v57, %v839_v61  ;;  %v745_v9 = vadd.f32 1e-06, %v737_v27 }
 0x156   : > { %v7671_v1 = vpop.eup %7670  ;;  %v762_v3 = vmul.f32 %v7667_v42, %v761_v62  ;;  %v778_v4 = vmul.f32 %v7669_v63, %v742_v46  ;;  %vm784_vm12 = vweird.f32 %v7669_v63 }
 0x157   : > { %v788_v6 = vmul.f32 %v7671_v1, %v8690_v50  ;;  %6906 = vmatmul.msk.f32.vlgmr.msra.gmra.mxu0 %vm651_vm0, %v851_v0  ;;  %6914 = vmatmul.msk.f32.vlgmr.msra.gmra.mxu1 %vm651_vm0, %v851_v0  ;;  %v7673_v14 = vpop.eup %7672  ;;  %7674 = vrsqrt.f32 %v745_v9  ;;  %vm785_vm13 = vmor %vm783_vm11, %vm784_vm12  ;;  %vm794_vm15 = vweird.f32 %v7671_v1  ;;  %vm813_vm5 = vweird.f32 %v745_v9 }
 0x158   : > { %v779_v7 = vmul.f32 %v7669_v63, %v778_v4  ;;  %v766_v8 = vsel %vm765_vm9, %v7667_v42, %v762_v3  ;;  %v798_v19 = vmul.f32 %v7673_v14, %v8695_v55  ;;  %vm795_vm1 = vmor %vm793_vm14, %vm794_vm15  ;;  %vm804_vm3 = vweird.f32 %v7673_v14 }
 0x159   : > { %v828_v10 = vmul.f32 %v766_v8, %v8595_v41  ;;  %v789_v12 = vmul.f32 %v7671_v1, %v788_v6  ;;  %vm805_vm4 = vmor %vm803_vm2, %vm804_vm3  ;;  %vm989_vm11 = vcmask 64512  }
 0x15a   : > { %v780_v11 = vmul.f32 0.5, %v779_v7  ;;  %v799_v23 = vmul.f32 %v7673_v14, %v798_v19 }
 0x15b   : > { %v840_v15 = vmul.f32 %v8692_v51, %v828_v10  ;;  %v790_v22 = vmul.f32 0.5, %v789_v12 }
 0x15c   : > { %v781_v16 = vsub.f32 1.5, %v780_v11  ;;  %v800_v31 = vmul.f32 0.5, %v799_v23 }
 0x15d   : > { %v852_v17 = vadd.f32 %v8698_v57, %v840_v15  ;;  %v791_v25 = vsub.f32 1.5, %v790_v22  ;;  %v7675_v29 = vpop.eup %7674 }
 0x15e   : > { %v782_v41 = vmul.f32 %v7669_v63, %v781_v16  ;;  %v808_v33 = vmul.f32 %v7675_v29, %v745_v9  ;;  %v801_v35 = vsub.f32 1.5, %v800_v31  ;;  %vm814_vm6 = vweird.f32 %v7675_v29 }
 0x15f   : > { %6907 = vmatmul.msk.f32.gmra.mxu0 %vm651_vm0, %v852_v17  ;;  %6915 = vmatmul.msk.f32.gmra.mxu1 %vm651_vm0, %v852_v17  ;;  %v792_v32 = vmul.f32 %v7671_v1, %v791_v25  ;;  %vm815_vm7 = vmor %vm813_vm5, %vm814_vm6 }
 0x160   : > { %v786_v28 = vsel %vm785_vm13, %v7669_v63, %v782_v41  ;;  %v809_v36 = vmul.f32 %v7675_v29, %v808_v33  ;;  %v802_v40 = vmul.f32 %v7673_v14, %v801_v35 }
 0x161   : > { %v830_v30 = vmul.f32 %v786_v28, %v8601_v44  ;;  %v796_v37 = vsel %vm795_vm1, %v7671_v1, %v792_v32 }
 0x162   : > { %v831_v44 = vmul.f32 %v796_v37, %v8599_v43  ;;  %v810_v42 = vmul.f32 0.5, %v809_v36  ;;  %v806_v47 = vsel %vm805_vm4, %v7673_v14, %v802_v40 }
 0x163   : > { %v842_v34 = vmul.f32 %v8692_v51, %v830_v30  ;;  %v832_v49 = vmul.f32 %v806_v47, %v8590_v39 }
 0x164   : > { %v843_v45 = vmul.f32 %v8692_v51, %v831_v44  ;;  %v811_v46 = vsub.f32 1.5, %v810_v42 }
 0x165   : > { %v854_v38 = vadd.f32 %v8698_v57, %v842_v34  ;;  %v844_v43 = vmul.f32 %v8692_v51, %v832_v49 }
 0x166   : > { %v855_v48 = vadd.f32 %v8698_v57, %v843_v45  ;;  %v812_v50 = vmul.f32 %v7675_v29, %v811_v46 }
 0x167   : > { %6908 = vmatmul.msk.f32.gmra.mxu0 %vm651_vm0, %v853_v26  ;;  %6916 = vmatmul.msk.f32.gmra.mxu1 %vm651_vm0, %v853_v26  ;;  %v856_v54 = vadd.f32 %v8698_v57, %v844_v43 }
 0x168   : > { %v816_v52 = vsel %vm815_vm7, %v7675_v29, %v812_v50 }
 0x169   : > { %v833_v55 = vmul.f32 %v816_v52, %v8614_v53 }
 0x16b   : > { %v845_v56 = vmul.f32 %v8692_v51, %v833_v55 }
 0x16d   : > { %v857_v39 = vadd.f32 %v8698_v57, %v845_v56 }
 0x16f   : > { %6909 = vmatmul.msk.f32.gmra.mxu0 %vm651_vm0, %v854_v38  ;;  %6917 = vmatmul.msk.f32.gmra.mxu1 %vm651_vm0, %v854_v38 }
 0x177   : > { %6910 = vmatmul.msk.f32.gmra.mxu0 %vm651_vm0, %v855_v48  ;;  %6918 = vmatmul.msk.f32.gmra.mxu1 %vm651_vm0, %v855_v48 }
 0x17f   : > { %6911 = vmatmul.msk.f32.gmra.mxu0 %vm651_vm0, %v856_v54  ;;  %6919 = vmatmul.msk.f32.gmra.mxu1 %vm651_vm0, %v856_v54 }
 0x187   : > { %6912 = vmatmul.msk.f32.gmra.mxu0 %vm651_vm0, %v857_v39  ;;  %6920 = vmatmul.msk.f32.gmra.mxu1 %vm651_vm0, %v857_v39 }
 0x1bd   : > { %v730_v58 = vpop.xlane.xlu0 %729 }
 0x1be   : > { %v738_v59 = vmul.f32 %v730_v58, %v8572_v20 }
 0x1c0   : > { %v746_v60 = vadd.f32 1e-06, %v738_v59 }
 0x1c2   : > { %7676 = vrsqrt.f32 %v746_v60  ;;  %vm823_vm9 = vweird.f32 %v746_v60 }
 0x1c8   : > { %v7677_v61 = vpop.eup %7676 }
 0x1c9   : > { %v818_v62 = vmul.f32 %v7677_v61, %v746_v60  ;;  %vm824_vm8 = vweird.f32 %v7677_v61 }
 0x1ca   : > { %vm825_vm10 = vmor %vm823_vm9, %vm824_vm8 }
 0x1cb   : > { %v819_v53 = vmul.f32 %v7677_v61, %v818_v62 }
 0x1cd   : > { %v820_v63 = vmul.f32 0.5, %v819_v53 }
 0x1cf   : > { %v821_v27 = vsub.f32 1.5, %v820_v63 }
 0x1d1   : > { %v822_v0 = vmul.f32 %v7677_v61, %v821_v27 }
 0x1d3   : > { %v826_v1 = vsel %vm825_vm10, %v7677_v61, %v822_v0 }
 0x1d4   : > { %v8751_v2 = vpop.f32.mrf.mxu1  ;;  %v834_v3 = vmul.f32 %v826_v1, %v8679_v24  ;;  %v8800_v13 = vpop.f32.mrf.mxu0 }
 0x1d6   : > { %v846_v4 = vmul.f32 %v8692_v51, %v834_v3 }
 0x1d8   : > { %v858_v5 = vadd.f32 %v8698_v57, %v846_v4 }
 0x1da   : > { %6913 = vmatmul.msk.f32.gmra.mxu0 %vm651_vm0, %v858_v5  ;;  %6921 = vmatmul.msk.f32.gmra.mxu1 %vm651_vm0, %v858_v5 }
 0x1dc   : > { %v8758_v6 = vpop.f32.mrf.mxu1  ;;  %v8806_v14 = vpop.f32.mrf.mxu0 }
 0x1dd   : > { %v8857_v60 = vpack.i.bf16 %v8751_v2, %v8758_v6 }
 0x1e4   : > { %v8760_v7 = vpop.f32.mrf.mxu1  ;;  %v8812_v15 = vpop.f32.mrf.mxu0 }
 0x1ec   : > { %v8762_v8 = vpop.f32.mrf.mxu1  ;;  %v8818_v16 = vpop.f32.mrf.mxu0 }
 0x1ed   : > { %v8766_v9 = vpack.i.bf16 %v8760_v7, %v8762_v8 }
 0x1ef   : > { %7495 = vrot.lane.b32.xlu2 %v8766_v9, %s8327_s30 }
 0x1f4   : > { %v8770_v24 = vpop.f32.mrf.mxu1  ;;  %v8822_v17 = vpop.f32.mrf.mxu0 }
 0x1fc   : > { %v8772_v51 = vpop.f32.mrf.mxu1  ;;  %v8826_v18 = vpop.f32.mrf.mxu0 }
 0x1fd   : > { %v8776_v57 = vpack.i.bf16 %v8770_v24, %v8772_v51 }
 0x1ff   : > { %7500 = vrot.lane.b32.xlu0 %v8776_v57, %s8327_s30 }
 0x204   : > { %v8780_v10 = vpop.f32.mrf.mxu1  ;;  %v8830_v19 = vpop.f32.mrf.mxu0 }
 0x205   : > { %12153 = vst [vmem:[#allocation32_spill] sm:$0xff] %v8830_v19 }
 0x249   : > { %v7496_v29 = vpop.permute.xlu2 %7495 }
 0x24a   : > { %v7497_v30 = vunpack.i.l.bf16 %v7496_v29  ;;  %v7498_v31 = vunpack.i.h.bf16 %v7496_v29 }
 0x257   : > { %v8782_v11 = vpop.f32.mrf.mxu1  ;;  %v8834_v41 = vpop.f32.mrf.mxu0 }
 0x258   : > { %6922 = vmatpush.xpose.msk.msra.mxu2 %vm989_vm11, %v8782_v11  ;;  %v8788_v12 = vpack.i.bf16 %v8780_v10, %v8782_v11 }
 0x25a   : > { %12152 = vst [vmem:[#allocation31_spill] sm:$0xff] %v8788_v12  ;;  %7505 = vrot.lane.b32.xlu1 %v8788_v12, %s8327_s30 }
 0x25c   : > { %6923 = vmatpush.xpose.msk.msra.mxu2 %vm989_vm11, %v8780_v10 }
 0x260   : > { %6924 = vmatpush.xpose.msk.msra.mxu2 %vm989_vm11, %v8772_v51 }
 0x264   : > { %6925 = vmatpush.xpose.msk.msra.mxu2 %vm989_vm11, %v8770_v24 }
 0x268   : > { %6926 = vmatpush.xpose.msk.msra.mxu2 %vm989_vm11, %v8762_v8 }
 0x26c   : > { %6927 = vmatpush.xpose.msk.msra.mxu2 %vm989_vm11, %v8760_v7 }
 0x270   : > { %6928 = vmatpush.xpose.msk.msra.mxu2 %vm989_vm11, %v8758_v6 }
 0x271   : > { %v7501_v23 = vpop.permute.xlu0 %7500 }
 0x272   : > { %v7502_v28 = vunpack.i.l.bf16 %v7501_v23  ;;  %v7503_v26 = vunpack.i.h.bf16 %v7501_v23 }
 0x274   : > { %6929 = vmatpush.xpose.msk.msra.mxu2 %vm989_vm11, %v8751_v2 }
 0x277   : > { %6930 = vmatmul.msk.f32.vlgmr.msra.gmra.mxu2 %vm989_vm11, %v8800_v13 }
 0x27f   : > { %6931 = vmatmul.msk.f32.gmra.mxu2 %vm989_vm11, %v8806_v14 }
 0x287   : > { %6932 = vmatmul.msk.f32.gmra.mxu2 %vm989_vm11, %v8812_v15 }
 0x28f   : > { %6933 = vmatmul.msk.f32.gmra.mxu2 %vm989_vm11, %v8818_v16 }
 0x297   : > { %6934 = vmatmul.msk.f32.gmra.mxu2 %vm989_vm11, %v8822_v17 }
 0x29f   : > { %6935 = vmatmul.msk.f32.gmra.mxu2 %vm989_vm11, %v8826_v18 }
 0x2a7   : > { %6936 = vmatmul.msk.f32.gmra.mxu2 %vm989_vm11, %v8830_v19 }
 0x2af   : > { %6937 = vmatmul.msk.f32.gmra.mxu2 %vm989_vm11, %v8834_v41 }
 0x2cc   : > { %v7506_v22 = vpop.permute.xlu1 %7505 }
 0x2cd   : > { %v7507_v21 = vunpack.i.l.bf16 %v7506_v22  ;;  %v7508_v25 = vunpack.i.h.bf16 %v7506_v22 }
 0x2cf   : > { %1335 = vmatpush.msra.mxu3 %v7507_v21 }
 0x2d1   : > { %1336 = vmatpush.msra.mxu3 %v7508_v25 }
 0x2d3   : > { %1337 = vmatpush.msra.mxu3 %v7502_v28 }
 0x2d5   : > { %1338 = vmatpush.msra.mxu3 %v7503_v26 }
 0x2d7   : > { %1339 = vmatpush.msra.mxu3 %v7497_v30 }
 0x2d9   : > { %1340 = vmatpush.msra.mxu3 %v7498_v31 }
 0x2fa   : > { %v1055_v32 = vpop.f32.mrf.mxu2 }
 0x2fb   : > { %v1079_v33 = vmul.f32 0.35355338, %v1055_v32 }
 0x2fd   : > { %v1087_v34 = vsel %vm651_vm0, %v1079_v33, -inf }
 0x2fe   : > { %1088 = vmax.xlane.f32.xlu1 %v1087_v34 }
 0x302   : > { %v1058_v35 = vpop.f32.mrf.mxu2 }
 0x303   : > { %v1080_v36 = vmul.f32 0.35355338, %v1058_v35 }
 0x305   : > { %v1090_v37 = vsel %vm651_vm0, %v1080_v36, -inf }
 0x306   : > { %1091 = vmax.xlane.f32.xlu2 %v1090_v37 }
 0x30a   : > { %v1061_v38 = vpop.f32.mrf.mxu2 }
 0x30b   : > { %v1081_v44 = vmul.f32 0.35355338, %v1061_v38 }
 0x30d   : > { %v1093_v40 = vsel %vm651_vm0, %v1081_v44, -inf }
 0x30e   : > { %1094 = vmax.xlane.f32.xlu0 %v1093_v40 }
 0x312   : > { %v1064_v42 = vpop.f32.mrf.mxu2 }
 0x313   : > { %v1082_v45 = vmul.f32 0.35355338, %v1064_v42 }
 0x315   : > { %v1096_v46 = vsel %vm651_vm0, %v1082_v45, -inf }
 0x316   : > { %1097 = vmax.xlane.f32.xlu1 %v1096_v46 }
 0x31a   : > { %v1067_v47 = vpop.f32.mrf.mxu2 }
 0x31b   : > { %v1083_v48 = vmul.f32 0.35355338, %v1067_v47 }
 0x31d   : > { %v1099_v49 = vsel %vm651_vm0, %v1083_v48, -inf }
 0x31e   : > { %1100 = vmax.xlane.f32.xlu2 %v1099_v49 }
 0x322   : > { %v1070_v50 = vpop.f32.mrf.mxu2 }
 0x323   : > { %v8843_v43 = vmul.f32 0.35355338, %v1070_v50 }
 0x325   : > { %v1102_v52 = vsel %vm651_vm0, %v8843_v43, -inf }
 0x326   : > { %1103 = vmax.xlane.f32.xlu0 %v1102_v52 }
 0x32a   : > { %v1073_v54 = vpop.f32.mrf.mxu2 }
 0x32b   : > { %v8847_v55 = vmul.f32 0.35355338, %v1073_v54 }
 0x32d   : > { %v1105_v56 = vsel %vm651_vm0, %v8847_v55, -inf }
 0x32e   : > { %1106 = vmax.xlane.f32.xlu1 %v1105_v56 }
 0x332   : > { %v1076_v39 = vpop.f32.mrf.mxu2 }
 0x333   : > { %v8851_v58 = vmul.f32 0.35355338, %v1076_v39 }
 0x335   : > { %v1108_v59 = vsel %vm651_vm0, %v8851_v58, -inf }
 0x336   : > { %1109 = vmax.xlane.f32.xlu0 %v1108_v59 }
 0x34a   : > { %7510 = vrot.lane.b32.xlu0 %v8857_v60, %s8327_s30 }
 0x371   : > { %v1089_v61 = vpop.xlane.xlu1 %1088 }
 0x372   : > { %v1111_v62 = vsub.f32 %v1079_v33, %v1089_v61 }
 0x374   : > { %v1119_v53 = vmul.f32 1.442695, %v1111_v62 }
 0x376   : > { %7678 = vpow2.f32 %v1119_v53 }
 0x379   : > { %v1092_v63 = vpop.xlane.xlu2 %1091 }
 0x37a   : > { %v1112_v27 = vsub.f32 %v1080_v36, %v1092_v63 }
 0x37c   : > { %v8861_v0 = vpop.eup %7678  ;;  %v1121_v1 = vmul.f32 1.442695, %v1112_v27 }
 0x37d   : > { %v1135_v3 = vsel %vm651_vm0, %v8861_v0, 0.0 }
 0x37e   : > { %7680 = vpow2.f32 %v1121_v1  ;;  %1136 = vadd.xlane.f32.xlu2 %v1135_v3 }
 0x381   : > { %v1095_v4 = vpop.xlane.xlu0 %1094 }
 0x382   : > { %v1113_v5 = vsub.f32 %v1081_v44, %v1095_v4 }
 0x384   : > { %v8865_v22 = vpop.eup %7680  ;;  %v1123_v21 = vmul.f32 1.442695, %v1113_v5 }
 0x385   : > { %v1138_v23 = vsel %vm651_vm0, %v8865_v22, 0.0 }
 0x386   : > { %7682 = vpow2.f32 %v1123_v21  ;;  %1139 = vadd.xlane.f32.xlu2 %v1138_v23 }
 0x389   : > { %v1098_v25 = vpop.xlane.xlu1 %1097 }
 0x38a   : > { %v1114_v28 = vsub.f32 %v1082_v45, %v1098_v25 }
 0x38c   : > { %v8869_v29 = vpop.eup %7682  ;;  %v1125_v26 = vmul.f32 1.442695, %v1114_v28 }
 0x38d   : > { %v1141_v30 = vsel %vm651_vm0, %v8869_v29, 0.0 }
 0x38e   : > { %7684 = vpow2.f32 %v1125_v26  ;;  %1142 = vadd.xlane.f32.xlu1 %v1141_v30 }
 0x391   : > { %v1101_v31 = vpop.xlane.xlu2 %1100 }
 0x392   : > { %v1115_v32 = vsub.f32 %v1083_v48, %v1101_v31 }
 0x394   : > { %v8873_v33 = vpop.eup %7684  ;;  %v1127_v34 = vmul.f32 1.442695, %v1115_v32 }
 0x395   : > { %v1144_v35 = vsel %vm651_vm0, %v8873_v33, 0.0 }
 0x396   : > { %7686 = vpow2.f32 %v1127_v34  ;;  %1145 = vadd.xlane.f32.xlu2 %v1144_v35 }
 0x399   : > { %v1104_v38 = vpop.xlane.xlu0 %1103 }
 0x39a   : > { %v1116_v46 = vsub.f32 %v8843_v43, %v1104_v38 }
 0x39c   : > { %v8877_v36 = vpop.eup %7686  ;;  %v1129_v47 = vmul.f32 1.442695, %v1116_v46 }
 0x39d   : > { %v1147_v37 = vsel %vm651_vm0, %v8877_v36, 0.0 }
 0x39e   : > { %1148 = vadd.xlane.f32.xlu0 %v1147_v37  ;;  %7688 = vpow2.f32 %v1129_v47 }
 0x3a1   : > { %v1107_v50 = vpop.xlane.xlu1 %1106 }
 0x3a2   : > { %v1117_v43 = vsub.f32 %v8847_v55, %v1107_v50 }
 0x3a4   : > { %v8918_v48 = vpop.eup %7688  ;;  %v1131_v52 = vmul.f32 1.442695, %v1117_v43 }
 0x3a5   : > { %v1150_v49 = vsel %vm651_vm0, %v8918_v48, 0.0 }
 0x3a7   : > { %1394 = vrot.lane.b32.xlu1 %v8772_v51, %s8328_s20 }
 0x3a9   : > { %v8889_v44 = vpop.xlane.xlu0 %1109 }
 0x3ae   : > { %1396 = vrot.lane.b32.xlu2 %v8780_v10, %s8328_s20 }
 0x3af   : > { %1386 = vrot.lane.b32.xlu1 %v8758_v6, %s8328_s20 }
 0x3b2   : > { %1398 = vrot.lane.b32.xlu0 %v8782_v11, %s8328_s20 }
 0x3b6   : > { %1390 = vrot.lane.b32.xlu2 %v8762_v8, %s8328_s20 }
 0x3b7   : > { %1370 = vrot.lane.b32.xlu1 %v8806_v14, %s8328_s20 }
 0x3ba   : > { %1392 = vrot.lane.b32.xlu0 %v8770_v24, %s8328_s20 }
 0x3bc   : > { %v7511_v40 = vpop.permute.xlu0 %7510 }
 0x3bd   : > { %v7512_v42 = vunpack.i.l.bf16 %v7511_v40  ;;  %v7513_v45 = vunpack.i.h.bf16 %v7511_v40 }
 0x3be   : > { %1384 = vrot.lane.b32.xlu2 %v8751_v2, %s8328_s20 }
 0x3bf   : > { %1376 = vrot.lane.b32.xlu1 %v8822_v17, %s8328_s20  ;;  %1341 = vmatpush.msra.mxu3 %v7512_v42 }
 0x3c1   : > { %1342 = vmatpush.msra.mxu3 %v7513_v45 }
 0x3c2   : > { %1388 = vrot.lane.b32.xlu0 %v8760_v7, %s8328_s20 }
 0x3c6   : > { %1372 = vrot.lane.b32.xlu2 %v8812_v15, %s8328_s20 }
 0x3ca   : > { %1368 = vrot.lane.b32.xlu0 %v8800_v13, %s8328_s20 }
 0x3ce   : > { %1922 = vrot.lane.b32.xlu2 %v8782_v11, %s8329_s6 }
 0x3d2   : > { %1374 = vrot.lane.b32.xlu0 %v8818_v16, %s8328_s20 }
 0x3d6   : > { %2387 = vrot.lane.b32.xlu2 %v8780_v10, %s8330_s21 }
 0x3da   : > { %2389 = vrot.lane.b32.xlu0 %v8782_v11, %s8330_s21 }
 0x3e2   : > { %1378 = vrot.lane.b32.xlu0 %v8826_v18, %s8328_s20 }
 0x3e9   : > { %1151 = vadd.xlane.f32.xlu1 %v1150_v49 }
 0x3ea   : > { %1916 = vrot.lane.b32.xlu0 %v8770_v24, %s8329_s6 }
 0x3f1   : > { %v1137_v54 = vpop.xlane.xlu2 %1136 }
 0x3f2   : > { %7690 = vrcp.f32 %v1137_v54  ;;  %1914 = vrot.lane.b32.xlu0 %v8762_v8, %s8329_s6  ;;  %v1170_v53 = vand.u32 2147483648, %v1137_v54  ;;  %v1168_v55 = vand.u32 2147483647, %v1137_v54  ;;  %vm1164_vm13 = vweird.f32 %v1137_v54 }
 0x3f3   : > { %7692 = vpow2.f32 %v1131_v52 }
 0x3f4   : > { %v1171_v4 = vor.u32 1.1754944e-38, %v1170_v53  ;;  %vm1169_vm15 = vcmp.eq.f32.partialorder %v1168_v55, 8.507059e+37 }
 0x3f8   : > { %v7691_v56 = vpop.eup %7690 }
 0x3f9   : > { %v1160_v39 = vmul.f32 %v7691_v56, %v1137_v54  ;;  %v1140_v59 = vpop.xlane.xlu2 %1139  ;;  %v8929_v61 = vpop.eup %7692  ;;  %vm1165_vm12 = vweird.f32 %v7691_v56 }
 0x3fa   : > { %7694 = vrcp.f32 %v1140_v59  ;;  %2379 = vrot.lane.b32.xlu0 %v8760_v7, %s8330_s21  ;;  %v1153_v27 = vsel %vm651_vm0, %v8929_v61, 0.0  ;;  %vm1166_vm14 = vmor %vm1164_vm13, %vm1165_vm12  ;;  %v1185_v30 = vand.u32 2147483648, %v1140_v59  ;;  %v1183_v32 = vand.u32 2147483647, %v1140_v59 }
 0x3fb   : > { %v1161_v62 = vsub.f32 1.0, %v1160_v39  ;;  %vm1179_vm2 = vweird.f32 %v1140_v59 }
 0x3fc   : > { %v1186_v37 = vor.u32 1.1754944e-38, %v1185_v30  ;;  %vm1184_vm4 = vcmp.eq.f32.partialorder %v1183_v32, 8.507059e+37 }
 0x3fd   : > { %v1162_v63 = vmul.f32 %v7691_v56, %v1161_v62 }
 0x3ff   : > { %1154 = vadd.xlane.f32.xlu2 %v1153_v27  ;;  %v1163_v1 = vadd.f32 %v7691_v56, %v1162_v63 }
 0x400   : > { %v7695_v3 = vpop.eup %7694 }
 0x401   : > { %v1175_v5 = vmul.f32 %v7695_v3, %v1140_v59  ;;  %v1143_v21 = vpop.xlane.xlu1 %1142  ;;  %v1167_v23 = vsel %vm1166_vm14, %v7691_v56, %v1163_v1  ;;  %vm1180_vm1 = vweird.f32 %v7695_v3 }
 0x402   : > { %7696 = vrcp.f32 %v1143_v21  ;;  %2377 = vrot.lane.b32.xlu0 %v8758_v6, %s8330_s21  ;;  %1920 = vrot.lane.b32.xlu1 %v8780_v10, %s8329_s6  ;;  %v1172_v25 = vsel %vm1169_vm15, %v1171_v4, %v1167_v23  ;;  %vm1181_vm3 = vmor %vm1179_vm2, %vm1180_vm1  ;;  %v1200_v47 = vand.u32 2147483648, %v1143_v21  ;;  %v1198_v50 = vand.u32 2147483647, %v1143_v21 }
 0x403   : > { %v1176_v28 = vsub.f32 1.0, %v1175_v5  ;;  %v1173_v26 = vmul.f32 %v8861_v0, %v1172_v25  ;;  %vm1194_vm6 = vweird.f32 %v1143_v21 }
 0x404   : > { %v1201_v54 = vor.u32 1.1754944e-38, %v1200_v47  ;;  %vm1199_vm8 = vcmp.eq.f32.partialorder %v1198_v50, 8.507059e+37 }
 0x405   : > { %6938 = vmatmul.msk.f32.vlgmr.msra.gmra.mxu3 %vm651_vm0, %v1173_v26  ;;  %v1177_v31 = vmul.f32 %v7695_v3, %v1176_v28 }
 0x407   : > { %v1178_v34 = vadd.f32 %v7695_v3, %v1177_v31 }
 0x408   : > { %v7697_v35 = vpop.eup %7696 }
 0x409   : > { %v1190_v38 = vmul.f32 %v7697_v35, %v1143_v21  ;;  %v1146_v40 = vpop.xlane.xlu2 %1145  ;;  %v1182_v42 = vsel %vm1181_vm3, %v7695_v3, %v1178_v34  ;;  %vm1195_vm5 = vweird.f32 %v7697_v35 }
 0x40a   : > { %7698 = vrcp.f32 %v1146_v40  ;;  %1892 = vrot.lane.b32.xlu0 %v8800_v13, %s8329_s6  ;;  %v1187_v0 = vsel %vm1184_vm4, %v1186_v37, %v1182_v42  ;;  %vm1196_vm7 = vmor %vm1194_vm6, %vm1195_vm5  ;;  %v1215_v63 = vand.u32 2147483648, %v1146_v40  ;;  %v1213_v27 = vand.u32 2147483647, %v1146_v40 }
 0x40b   : > { %v1191_v45 = vsub.f32 1.0, %v1190_v38  ;;  %v1188_v46 = vmul.f32 %v8865_v22, %v1187_v0  ;;  %vm1209_vm10 = vweird.f32 %v1146_v40 }
 0x40c   : > { %v1216_v4 = vor.u32 1.1754944e-38, %v1215_v63  ;;  %vm1214_vm13 = vcmp.eq.f32.partialorder %v1213_v27, 8.507059e+37 }
 0x40d   : > { %6939 = vmatmul.msk.f32.gmra.mxu3 %vm651_vm0, %v1188_v46  ;;  %v1192_v49 = vmul.f32 %v7697_v35, %v1191_v45  ;;  %v875_v46 = vld [vmem:[#allocation7] sm:$0xff] }
 0x40e   : > { %1866 = vmatpush.msrb.mxu2 %v875_v46 }
 0x40f   : > { %v1193_v43 = vadd.f32 %v7697_v35, %v1192_v49 }
 0x410   : > { %v7699_v52 = vpop.eup %7698 }
 0x411   : > { %v1205_v56 = vmul.f32 %v7699_v52, %v1146_v40  ;;  %v1149_v39 = vpop.xlane.xlu0 %1148  ;;  %v1197_v59 = vsel %vm1196_vm7, %v7697_v35, %v1193_v43  ;;  %vm1210_vm9 = vweird.f32 %v7699_v52  ;;  %v1397_v5 = vpop.permute.xlu2 %1396 }
 0x412   : > { %7700 = vrcp.f32 %v1149_v39  ;;  %2361 = vrot.lane.b32.xlu0 %v8806_v14, %s8330_s21  ;;  %v1202_v22 = vsel %vm1199_vm8, %v1201_v54, %v1197_v59  ;;  %vm1211_vm12 = vmor %vm1209_vm10, %vm1210_vm9  ;;  %v1230_v30 = vand.u32 2147483648, %v1149_v39  ;;  %v1228_v32 = vand.u32 2147483647, %v1149_v39 }
 0x413   : > { %v1206_v62 = vsub.f32 1.0, %v1205_v56  ;;  %v1203_v53 = vmul.f32 %v8869_v29, %v1202_v22  ;;  %v1118_v29 = vsub.f32 %v8851_v58, %v8889_v44  ;;  %vm1224_vm15 = vweird.f32 %v1149_v39 }
 0x414   : > { %v1231_v58 = vor.u32 1.1754944e-38, %v1230_v30  ;;  %vm1229_vm2 = vcmp.eq.f32.partialorder %v1228_v32, 8.507059e+37 }
 0x415   : > { %6940 = vmatmul.msk.f32.gmra.mxu3 %vm651_vm0, %v1203_v53  ;;  %v1207_v55 = vmul.f32 %v7699_v52, %v1206_v62  ;;  %v1133_v34 = vmul.f32 1.442695, %v1118_v29 }
 0x417   : > { %2385 = vrot.lane.b32.xlu2 %v8772_v51, %s8330_s21  ;;  %v1208_v1 = vadd.f32 %v7699_v52, %v1207_v55  ;;  %7702 = vpow2.f32 %v1133_v34 }
 0x418   : > { %v7701_v3 = vpop.eup %7700 }
 0x419   : > { %v1220_v21 = vmul.f32 %v7701_v3, %v1149_v39  ;;  %v1212_v23 = vsel %vm1211_vm12, %v7699_v52, %v1208_v1  ;;  %vm1225_vm14 = vweird.f32 %v7701_v3  ;;  %v1391_v37 = vpop.permute.xlu2 %1390  ;;  %v1395_v45 = vpop.permute.xlu1 %1394 }
 0x41a   : > { %1898 = vrot.lane.b32.xlu0 %v8818_v16, %s8329_s6  ;;  %v1217_v25 = vsel %vm1214_vm13, %v1216_v4, %v1212_v23  ;;  %vm1226_vm1 = vmor %vm1224_vm15, %vm1225_vm14 }
 0x41b   : > { %v1221_v28 = vsub.f32 1.0, %v1220_v21  ;;  %v1218_v26 = vmul.f32 %v8873_v33, %v1217_v25 }
 0x41d   : > { %6941 = vmatmul.msk.f32.gmra.mxu3 %vm651_vm0, %v1218_v26  ;;  %v1222_v31 = vmul.f32 %v7701_v3, %v1221_v28  ;;  %v8964_v42 = vpop.eup %7702 }
 0x41e   : > { %v1156_v0 = vsel %vm651_vm0, %v8964_v42, 0.0 }
 0x41f   : > { %1380 = vrot.lane.b32.xlu2 %v8830_v19, %s8328_s20  ;;  %v1223_v35 = vadd.f32 %v7701_v3, %v1222_v31 }
 0x421   : > { %v1227_v44 = vsel %vm1226_vm1, %v7701_v3, %v1223_v35  ;;  %v1385_v47 = vpop.permute.xlu2 %1384  ;;  %v1387_v43 = vpop.permute.xlu1 %1386 }
 0x422   : > { %2367 = vrot.lane.b32.xlu0 %v8822_v17, %s8330_s21  ;;  %v1232_v33 = vsel %vm1229_vm2, %v1231_v58, %v1227_v44 }
 0x423   : > { %v1233_v38 = vmul.f32 %v8877_v36, %v1232_v33 }
 0x424   : > { %v1399_v40 = vpop.permute.xlu0 %1398 }
 0x425   : > { %6942 = vmatmul.msk.f32.gmra.mxu3 %vm651_vm0, %v1233_v38  ;;  %6946 = vmatpush.xpose.msk.msrb.mxu0 %vm989_vm11, %v1399_v40 }
 0x427   : > { %1912 = vrot.lane.b32.xlu2 %v8760_v7, %s8329_s6 }
 0x429   : > { %6947 = vmatpush.xpose.msk.msrb.mxu0 %vm989_vm11, %v1397_v5  ;;  %v1373_v50 = vpop.permute.xlu2 %1372  ;;  %v1371_v39 = vpop.permute.xlu1 %1370 }
 0x42a   : > { %1904 = vrot.lane.b32.xlu0 %v8830_v19, %s8329_s6 }
 0x42c   : > { %1157 = vadd.xlane.f32.xlu1 %v1156_v0  ;;  %v1393_v36 = vpop.permute.xlu0 %1392 }
 0x42d   : > { %6948 = vmatpush.xpose.msk.msrb.mxu0 %vm989_vm11, %v1395_v45 }
 0x42f   : > { %1910 = vrot.lane.b32.xlu2 %v8758_v6, %s8329_s6 }
 0x431   : > { %6949 = vmatpush.xpose.msk.msrb.mxu0 %vm989_vm11, %v1393_v36  ;;  %v1923_v54 = vpop.permute.xlu2 %1922  ;;  %v1377_v62 = vpop.permute.xlu1 %1376 }
 0x432   : > { %2373 = vrot.lane.b32.xlu0 %v8834_v41, %s8330_s21 }
 0x434   : > { %v1389_v49 = vpop.permute.xlu0 %1388 }
 0x435   : > { %6950 = vmatpush.xpose.msk.msrb.mxu0 %vm989_vm11, %v1391_v37 }
 0x437   : > { %2375 = vrot.lane.b32.xlu2 %v8751_v2, %s8330_s21 }
 0x439   : > { %6951 = vmatpush.xpose.msk.msrb.mxu0 %vm989_vm11, %v1389_v49  ;;  %v2388_v22 = vpop.permute.xlu2 %2387 }
 0x43c   : > { %v1369_v52 = vpop.permute.xlu0 %1368 }
 0x43d   : > { %6952 = vmatpush.xpose.msk.msrb.mxu0 %vm989_vm11, %v1387_v43 }
 0x43f   : > { %1894 = vrot.lane.b32.xlu2 %v8806_v14, %s8329_s6 }
 0x441   : > { %6953 = vmatpush.xpose.msk.msrb.mxu0 %vm989_vm11, %v1385_v47 }
 0x444   : > { %6954 = vmatmul.msk.f32.vlgmr.msrb.gmra.mxu0 %vm989_vm11, %v1369_v52  ;;  %v1375_v56 = vpop.permute.xlu0 %1374 }
 0x445   : > { %6986 = vmatpush.xpose.msk.msra.mxu0 %vm989_vm11, %v1923_v54  ;;  %1918 = vrot.lane.b32.xlu1 %v8772_v51, %s8329_s6 }
 0x447   : > { %2363 = vrot.lane.b32.xlu2 %v8812_v15, %s8330_s21 }
 0x44c   : > { %6955 = vmatmul.msk.f32.gmra.mxu0 %vm989_vm11, %v1371_v39  ;;  %v2390_v59 = vpop.permute.xlu0 %2389 }
 0x44d   : > { %2383 = vrot.lane.b32.xlu1 %v8770_v24, %s8330_s21  ;;  %7018 = vmatpush.xpose.msk.msra.mxu2 %vm989_vm11, %v2390_v59 }
 0x44f   : > { %1900 = vrot.lane.b32.xlu2 %v8822_v17, %s8329_s6 }
 0x451   : > { %7019 = vmatpush.xpose.msk.msra.mxu2 %vm989_vm11, %v2388_v22 }
 0x454   : > { %6956 = vmatmul.msk.f32.gmra.mxu0 %vm989_vm11, %v1373_v50  ;;  %v1379_v21 = vpop.permute.xlu0 %1378 }
 0x455   : > { %2381 = vrot.lane.b32.xlu1 %v8762_v8, %s8330_s21 }
 0x457   : > { %2369 = vrot.lane.b32.xlu2 %v8826_v18, %s8330_s21 }
 0x45c   : > { %v1152_v53 = vpop.xlane.xlu1 %1151  ;;  %6957 = vmatmul.msk.f32.gmra.mxu0 %vm989_vm11, %v1375_v56 }
 0x45d   : > { %7704 = vrcp.f32 %v1152_v53  ;;  %1382 = vrot.lane.b32.xlu1 %v8834_v41, %s8328_s20  ;;  %v1245_v1 = vand.u32 2147483648, %v1152_v53  ;;  %v1243_v4 = vand.u32 2147483647, %v1152_v53  ;;  %vm1239_vm4 = vweird.f32 %v1152_v53 }
 0x45f   : > { %1906 = vrot.lane.b32.xlu2 %v8834_v41, %s8329_s6  ;;  %v1246_v23 = vor.u32 1.1754944e-38, %v1245_v1  ;;  %vm1244_vm6 = vcmp.eq.f32.partialorder %v1243_v4, 8.507059e+37 }
 0x463   : > { %v7705_v63 = vpop.eup %7704 }
 0x464   : > { %v1235_v55 = vmul.f32 %v7705_v63, %v1152_v53  ;;  %6958 = vmatmul.msk.f32.gmra.mxu0 %vm989_vm11, %v1377_v62  ;;  %vm1240_vm3 = vweird.f32 %v7705_v63 }
 0x465   : > { %1908 = vrot.lane.b32.xlu1 %v8751_v2, %s8329_s6  ;;  %vm1241_vm5 = vmor %vm1239_vm4, %vm1240_vm3 }
 0x466   : > { %v1236_v27 = vsub.f32 1.0, %v1235_v55  ;;  %v1917_v55 = vpop.permute.xlu0 %1916 }
 0x468   : > { %v1237_v3 = vmul.f32 %v7705_v63, %v1236_v27 }
 0x46a   : > { %v1238_v5 = vadd.f32 %v7705_v63, %v1237_v3 }
 0x46c   : > { %6959 = vmatmul.msk.f32.gmra.mxu0 %vm989_vm11, %v1379_v21  ;;  %v1242_v29 = vsel %vm1241_vm5, %v7705_v63, %v1238_v5 }
 0x46d   : > { %2359 = vrot.lane.b32.xlu1 %v8800_v13, %s8330_s21  ;;  %v1247_v25 = vsel %vm1244_vm6, %v1246_v23, %v1242_v29 }
 0x46e   : > { %v1248_v28 = vmul.f32 %v8918_v48, %v1247_v25  ;;  %v1915_v3 = vpop.permute.xlu0 %1914 }
 0x470   : > { %6943 = vmatmul.msk.f32.gmra.mxu3 %vm651_vm0, %v1248_v28 }
 0x472   : > { %v1155_v26 = vpop.xlane.xlu2 %1154 }
 0x473   : > { %7706 = vrcp.f32 %v1155_v26  ;;  %v1260_v48 = vand.u32 2147483648, %v1155_v26  ;;  %v1258_v44 = vand.u32 2147483647, %v1155_v26  ;;  %vm1254_vm8 = vweird.f32 %v1155_v26 }
 0x474   : > { %v1921_v30 = vpop.permute.xlu1 %1920 }
 0x475   : > { %1896 = vrot.lane.b32.xlu1 %v8812_v15, %s8329_s6  ;;  %6987 = vmatpush.xpose.msk.msra.mxu0 %vm989_vm11, %v1921_v30  ;;  %v1261_v37 = vor.u32 1.1754944e-38, %v1260_v48  ;;  %vm1259_vm10 = vcmp.eq.f32.partialorder %v1258_v44, 8.507059e+37 }
 0x476   : > { %v2380_v29 = vpop.permute.xlu0 %2379 }
 0x479   : > { %v7707_v31 = vpop.eup %7706 }
 0x47a   : > { %v1250_v32 = vmul.f32 %v7707_v31, %v1155_v26  ;;  %v2386_v34 = vpop.permute.xlu2 %2385  ;;  %vm1255_vm7 = vweird.f32 %v7707_v31 }
 0x47b   : > { %7020 = vmatpush.xpose.msk.msra.mxu2 %vm989_vm11, %v2386_v34  ;;  %vm1256_vm9 = vmor %vm1254_vm8, %vm1255_vm7 }
 0x47c   : > { %v1251_v35 = vsub.f32 1.0, %v1250_v32 }
 0x47d   : > { %2365 = vrot.lane.b32.xlu1 %v8818_v16, %s8330_s21 }
 0x47e   : > { %v1252_v58 = vmul.f32 %v7707_v31, %v1251_v35  ;;  %v2378_v32 = vpop.permute.xlu0 %2377 }
 0x480   : > { %v1253_v33 = vadd.f32 %v7707_v31, %v1252_v58 }
 0x482   : > { %v1381_v38 = vpop.permute.xlu2 %1380  ;;  %v1257_v40 = vsel %vm1256_vm9, %v7707_v31, %v1253_v33 }
 0x483   : > { %6960 = vmatmul.msk.f32.gmra.mxu0 %vm989_vm11, %v1381_v38  ;;  %v1262_v0 = vsel %vm1259_vm10, %v1261_v37, %v1257_v40 }
 0x484   : > { %v1263_v45 = vmul.f32 %v8929_v61, %v1262_v0 }
 0x485   : > { %1902 = vrot.lane.b32.xlu1 %v8826_v18, %s8329_s6  ;;  %s8250_s6 = scalar_lea.hbm %s12105_s16, 128 }
 0x486   : > { %6944 = vmatmul.msk.f32.gmra.mxu3 %vm651_vm0, %v1263_v45  ;;  %v1893_v38 = vpop.permute.xlu0 %1892 }
 0x488   : > { %v1344_v36 = vpop.f32.mrf.mxu3 }
 0x489   : > { %6978 = vmatmul.msk.f32.vlgmr.msrb.gmra.mxu2 %vm989_vm11, %v1344_v36 }
 0x48a   : > { %v1913_v4 = vpop.permute.xlu2 %1912 }
 0x48d   : > { %2371 = vrot.lane.b32.xlu1 %v8830_v19, %s8330_s21 }
 0x490   : > { %v1347_v46 = vpop.f32.mrf.mxu3 }
 0x491   : > { %6979 = vmatmul.msk.f32.gmra.mxu2 %vm989_vm11, %v1347_v46 }
 0x492   : > { %v1911_v25 = vpop.permute.xlu2 %1910 }
 0x498   : > { %v1350_v47 = vpop.f32.mrf.mxu3 }
 0x499   : > { %6980 = vmatmul.msk.f32.gmra.mxu2 %vm989_vm11, %v1350_v47 }
 0x49a   : > { %v2376_v58 = vpop.permute.xlu2 %2375 }
 0x49f   : > { %v1158_v49 = vpop.xlane.xlu1 %1157 }
 0x4a0   : > { %7708 = vrcp.f32 %v1158_v49  ;;  %v1353_v61 = vpop.f32.mrf.mxu3  ;;  %v1275_v56 = vand.u32 2147483648, %v1158_v49  ;;  %v1273_v59 = vand.u32 2147483647, %v1158_v49  ;;  %vm1269_vm13 = vweird.f32 %v1158_v49 }
 0x4a1   : > { %6981 = vmatmul.msk.f32.gmra.mxu2 %vm989_vm11, %v1353_v61  ;;  %v2362_v61 = vpop.permute.xlu0 %2361 }
 0x4a2   : > { %v1276_v62 = vor.u32 1.1754944e-38, %v1275_v56  ;;  %vm1274_vm15 = vcmp.eq.f32.partialorder %v1273_v59, 8.507059e+37  ;;  %v1895_v46 = vpop.permute.xlu2 %1894 }
 0x4a6   : > { %v7709_v50 = vpop.eup %7708 }
 0x4a7   : > { %v1265_v43 = vmul.f32 %v7709_v50, %v1158_v49  ;;  %vm1270_vm12 = vweird.f32 %v7709_v50 }
 0x4a8   : > { %v1356_v52 = vpop.f32.mrf.mxu3  ;;  %vm1271_vm14 = vmor %vm1269_vm13, %vm1270_vm12 }
 0x4a9   : > { %v1266_v54 = vsub.f32 1.0, %v1265_v43  ;;  %6982 = vmatmul.msk.f32.gmra.mxu2 %vm989_vm11, %v1356_v52 }
 0x4aa   : > { %v2364_v56 = vpop.permute.xlu2 %2363 }
 0x4ab   : > { %v1267_v39 = vmul.f32 %v7709_v50, %v1266_v54 }
 0x4ad   : > { %v1268_v22 = vadd.f32 %v7709_v50, %v1267_v39  ;;  %v1899_v39 = vpop.permute.xlu0 %1898 }
 0x4af   : > { %v1272_v53 = vsel %vm1271_vm14, %v7709_v50, %v1268_v22 }
 0x4b0   : > { %v1277_v63 = vsel %vm1274_vm15, %v1276_v62, %v1272_v53 }
 0x4b1   : > { %v1278_v27 = vmul.f32 %v8964_v42, %v1277_v63 }
 0x4b2   : > { %v1901_v62 = vpop.permute.xlu2 %1900 }
 0x4b3   : > { %6945 = vmatmul.msk.f32.gmra.mxu3 %vm651_vm0, %v1278_v27 }
 0x4b5   : > { %v2368_v53 = vpop.permute.xlu0 %2367 }
 0x4b7   : > { %v1919_v1 = vpop.permute.xlu1 %1918 }
 0x4b8   : > { %6988 = vmatpush.xpose.msk.msra.mxu0 %vm989_vm11, %v1919_v1 }
 0x4bc   : > { %6989 = vmatpush.xpose.msk.msra.mxu0 %vm989_vm11, %v1917_v55 }
 0x4bf   : > { %v2384_v5 = vpop.permute.xlu1 %2383 }
 0x4c0   : > { %6990 = vmatpush.xpose.msk.msra.mxu0 %vm989_vm11, %v1915_v3  ;;  %7021 = vmatpush.xpose.msk.msra.mxu2 %vm989_vm11, %v2384_v5  ;;  %v2370_v3 = vpop.permute.xlu2 %2369  ;;  %v1905_v5 = vpop.permute.xlu0 %1904 }
 0x4c1   : > { %v1449_v21 = vpop.f32.mrf.mxu0 }
 0x4c2   : > { %v9040_v23 = vmul.f32 0.35355338, %v1449_v21 }
 0x4c4   : > { %6991 = vmatpush.xpose.msk.msra.mxu0 %vm989_vm11, %v1913_v4  ;;  %v1481_v42 = vsel %vm651_vm0, %v9040_v23, -inf }
 0x4c5   : > { %1482 = vmax.xlane.f32.xlu1 %v1481_v42 }
 0x4c7   : > { %v2382_v28 = vpop.permute.xlu1 %2381 }
 0x4c8   : > { %6992 = vmatpush.xpose.msk.msra.mxu0 %vm989_vm11, %v1911_v25  ;;  %7022 = vmatpush.xpose.msk.msra.mxu2 %vm989_vm11, %v2382_v28  ;;  %v1907_v21 = vpop.permute.xlu2 %1906 }
 0x4c9   : > { %v1452_v26 = vpop.f32.mrf.mxu0 }
 0x4ca   : > { %v9047_v30 = vmul.f32 0.35355338, %v1452_v26  ;;  %v2374_v26 = vpop.permute.xlu0 %2373 }
 0x4cc   : > { %7023 = vmatpush.xpose.msk.msra.mxu2 %vm989_vm11, %v2380_v29  ;;  %v1484_v31 = vsel %vm651_vm0, %v9047_v30, -inf }
 0x4cd   : > { %1485 = vmax.xlane.f32.xlu2 %v1484_v31 }
 0x4cf   : > { %v1383_v34 = vpop.permute.xlu1 %1382 }
 0x4d0   : > { %6961 = vmatmul.msk.f32.gmra.mxu0 %vm989_vm11, %v1383_v34  ;;  %7024 = vmatpush.xpose.msk.msra.mxu2 %vm989_vm11, %v2378_v32 }
 0x4d1   : > { %v1455_v35 = vpop.f32.mrf.mxu0 }
 0x4d2   : > { %v9054_v48 = vmul.f32 0.35355338, %v1455_v35 }
 0x4d4   : > { %7025 = vmatpush.xpose.msk.msra.mxu2 %vm989_vm11, %v2376_v58  ;;  %v1487_v44 = vsel %vm651_vm0, %v9054_v48, -inf }
 0x4d5   : > { %1488 = vmax.xlane.f32.xlu0 %v1487_v44 }
 0x4d7   : > { %v1909_v33 = vpop.permute.xlu1 %1908 }
 0x4d8   : > { %6993 = vmatpush.xpose.msk.msra.mxu0 %vm989_vm11, %v1909_v33 }
 0x4d9   : > { %v1458_v37 = vpop.f32.mrf.mxu0 }
 0x4da   : > { %v9060_v40 = vmul.f32 0.35355338, %v1458_v37 }
 0x4db   : > { %6994 = vmatmul.msk.f32.vlgmr.msra.gmra.mxu0 %vm989_vm11, %v1893_v38 }
 0x4dc   : > { %v1490_v0 = vsel %vm651_vm0, %v9060_v40, -inf }
 0x4dd   : > { %1491 = vmax.xlane.f32.xlu1 %v1490_v0 }
 0x4df   : > { %v2360_v45 = vpop.permute.xlu1 %2359 }
 0x4e1   : > { %v1461_v36 = vpop.f32.mrf.mxu0 }
 0x4e2   : > { %v9065_v47 = vmul.f32 0.35355338, %v1461_v36 }
 0x4e3   : > { %6995 = vmatmul.msk.f32.gmra.mxu0 %vm989_vm11, %v1895_v46 }
 0x4e4   : > { %v1493_v49 = vsel %vm651_vm0, %v9065_v47, -inf }
 0x4e5   : > { %1494 = vmax.xlane.f32.xlu2 %v1493_v49 }
 0x4e7   : > { %v1897_v43 = vpop.permute.xlu1 %1896 }
 0x4e9   : > { %v1464_v50 = vpop.f32.mrf.mxu0 }
 0x4ea   : > { %v9070_v52 = vmul.f32 0.35355338, %v1464_v50 }
 0x4eb   : > { %6996 = vmatmul.msk.f32.gmra.mxu0 %vm989_vm11, %v1897_v43 }
 0x4ec   : > { %v1496_v54 = vsel %vm651_vm0, %v9070_v52, -inf }
 0x4ed   : > { %1497 = vmax.xlane.f32.xlu0 %v1496_v54 }
 0x4ef   : > { %v2366_v22 = vpop.permute.xlu1 %2365 }
 0x4f3   : > { %v1359_v59 = vpop.f32.mrf.mxu3  ;;  %6997 = vmatmul.msk.f32.gmra.mxu0 %vm989_vm11, %v1899_v39 }
 0x4f4   : > { %6983 = vmatmul.msk.f32.gmra.mxu2 %vm989_vm11, %v1359_v59 }
 0x4f7   : > { %v1903_v27 = vpop.permute.xlu1 %1902 }
 0x4fb   : > { %6998 = vmatmul.msk.f32.gmra.mxu0 %vm989_vm11, %v1901_v62 }
 0x4ff   : > { %v2372_v31 = vpop.permute.xlu1 %2371 }
 0x500   : > { %v1467_v63 = vpop.f32.mrf.mxu0 }
 0x501   : > { %v9078_v55 = vmul.f32 0.35355338, %v1467_v63 }
 0x503   : > { %6999 = vmatmul.msk.f32.gmra.mxu0 %vm989_vm11, %v1903_v27  ;;  %v1499_v1 = vsel %vm651_vm0, %v9078_v55, -inf }
 0x504   : > { %1500 = vmax.xlane.f32.xlu1 %v1499_v1 }
 0x509   : > { %v1362_v4 = vpop.f32.mrf.mxu3 }
 0x50a   : > { %6984 = vmatmul.msk.f32.gmra.mxu2 %vm989_vm11, %v1362_v4 }
 0x50b   : > { %7000 = vmatmul.msk.f32.gmra.mxu0 %vm989_vm11, %v1905_v5 }
 0x513   : > { %7001 = vmatmul.msk.f32.gmra.mxu0 %vm989_vm11, %v1907_v21 }
 0x51d   : > { %7515 = vrot.lane.b32.xlu1 %v8788_v12, %s8331_s27 }
 0x525   : > { %7535 = vrot.lane.b32.xlu1 %v8788_v12, %s8332_s24 }
 0x536   : > { %v1365_v42 = vpop.f32.mrf.mxu3 }
 0x537   : > { %6985 = vmatmul.msk.f32.gmra.mxu2 %vm989_vm11, %v1365_v42 }
 0x538   : > { %v1483_v58 = vpop.xlane.xlu1 %1482 }
 0x53f   : > { %7026 = vmatmul.msk.f32.vlgmr.msra.gmra.mxu2 %vm989_vm11, %v2360_v45 }
 0x540   : > { %v1486_v0 = vpop.xlane.xlu2 %1485 }
 0x547   : > { %7027 = vmatmul.msk.f32.gmra.mxu2 %vm989_vm11, %v2362_v61 }
 0x548   : > { %v1489_v44 = vpop.xlane.xlu0 %1488 }
 0x549   : > { %v1507_v37 = vsub.f32 %v9054_v48, %v1489_v44 }
 0x54b   : > { %v1517_v38 = vmul.f32 1.442695, %v1507_v37  ;;  %v1506_v37 = vsub.f32 %v9047_v30, %v1486_v0 }
 0x54d   : > { %v1470_v29 = vpop.f32.mrf.mxu0  ;;  %7710 = vpow2.f32 %v1517_v38  ;;  %v1515_v38 = vmul.f32 1.442695, %v1506_v37 }
 0x54e   : > { %v9093_v25 = vmul.f32 0.35355338, %v1470_v29 }
 0x54f   : > { %7028 = vmatmul.msk.f32.gmra.mxu2 %vm989_vm11, %v2364_v56 }
 0x550   : > { %v1502_v28 = vsel %vm651_vm0, %v9093_v25, -inf  ;;  %v1492_v45 = vpop.xlane.xlu1 %1491 }
 0x551   : > { %1503 = vmax.xlane.f32.xlu0 %v1502_v28  ;;  %v1508_v49 = vsub.f32 %v9060_v40, %v1492_v45 }
 0x553   : > { %v1519_v48 = vmul.f32 1.442695, %v1508_v49  ;;  %v9116_v43 = vpop.eup %7710 }
 0x554   : > { %v1535_v56 = vsel %vm651_vm0, %v9116_v43, 0.0 }
 0x555   : > { %7712 = vpow2.f32 %v1519_v48 }
 0x557   : > { %7029 = vmatmul.msk.f32.gmra.mxu2 %vm989_vm11, %v2366_v22  ;;  %v9126_v22 = vpop.f32.mrf.mxu2 }
 0x558   : > { %v1973_v32 = vpop.f32.mrf.mxu0  ;;  %v1495_v50 = vpop.xlane.xlu2 %1494  ;;  %12154 = vst [vmem:[#allocation33_spill] sm:$0xff] %v9126_v22 }
 0x559   : > { %v9099_v34 = vmul.f32 0.35355338, %v1973_v32  ;;  %v1509_v54 = vsub.f32 %v9065_v47, %v1495_v50 }
 0x55b   : > { %v2005_v35 = vsel %vm651_vm0, %v9099_v34, -inf  ;;  %v1521_v40 = vmul.f32 1.442695, %v1509_v54  ;;  %v9124_v59 = vpop.eup %7712 }
 0x55c   : > { %2006 = vmax.xlane.f32.xlu2 %v2005_v35  ;;  %v1538_v47 = vsel %vm651_vm0, %v9124_v59, 0.0 }
 0x55d   : > { %7714 = vpow2.f32 %v1521_v40 }
 0x55f   : > { %7030 = vmatmul.msk.f32.gmra.mxu2 %vm989_vm11, %v2368_v53  ;;  %v9136_v4 = vpop.f32.mrf.mxu2 }
 0x560   : > { %v1976_v33 = vpop.f32.mrf.mxu0  ;;  %v1498_v39 = vpop.xlane.xlu0 %1497  ;;  %12155 = vst [vmem:[#allocation34_spill] sm:$0xff] %v9136_v4 }
 0x561   : > { %v1510_v62 = vsub.f32 %v9070_v52, %v1498_v39  ;;  %v1505_v52 = vsub.f32 %v9040_v23, %v1483_v58  ;;  %v9147_v35 = vmul.f32 0.35355338, %v1976_v33 }
 0x563   : > { %v1523_v53 = vmul.f32 1.442695, %v1510_v62  ;;  %v9131_v27 = vpop.eup %7714  ;;  %v1513_v28 = vmul.f32 1.442695, %v1505_v52  ;;  %v2008_v58 = vsel %vm651_vm0, %v9147_v35, -inf }
 0x565   : > { %7520 = vrot.lane.b32.xlu0 %v8776_v57, %s8331_s27  ;;  %7716 = vpow2.f32 %v1523_v53 }
 0x567   : > { %7031 = vmatmul.msk.f32.gmra.mxu2 %vm989_vm11, %v2370_v3  ;;  %v1541_v3 = vsel %vm651_vm0, %v9131_v27, 0.0  ;;  %v9143_v29 = vpop.f32.mrf.mxu2 }
 0x568   : > { %v1979_v36 = vpop.f32.mrf.mxu0  ;;  %12156 = vst [vmem:[#allocation35_spill] sm:$0xff] %v9143_v29 }
 0x569   : > { %v9108_v46 = vmul.f32 0.35355338, %v1979_v36 }
 0x56b   : > { %v2011_v61 = vsel %vm651_vm0, %v9108_v46, -inf  ;;  %v9138_v21 = vpop.eup %7716 }
 0x56c   : > { %2012 = vmax.xlane.f32.xlu1 %v2011_v61  ;;  %v1544_v42 = vsel %vm651_vm0, %v9138_v21, 0.0 }
 0x56d   : > { %7530 = vrot.lane.b32.xlu0 %v8857_v60, %s8331_s27 }
 0x56f   : > { %7032 = vmatmul.msk.f32.gmra.mxu2 %vm989_vm11, %v2372_v31  ;;  %v9154_v45 = vpop.f32.mrf.mxu2 }
 0x570   : > { %12157 = vst [vmem:[#allocation36_spill] sm:$0xff] %v9154_v45 }
 0x574   : > { %7525 = vrot.lane.b32.xlu2 %v8766_v9, %s8331_s27  ;;  %1536 = vadd.xlane.f32.xlu1 %v1535_v56  ;;  %s635_s27 = sand.u32 1, %s8304_s22  }
 0x577   : > { %7033 = vmatmul.msk.f32.gmra.mxu2 %vm989_vm11, %v2374_v26  ;;  %v1501_v63 = vpop.xlane.xlu1 %1500  ;;  %v9166_v48 = vpop.f32.mrf.mxu2 }
 0x578   : > { %v1511_v1 = vsub.f32 %v9078_v55, %v1501_v63  ;;  %v1982_v55 = vpop.f32.mrf.mxu0  ;;  %12158 = vst [vmem:[#allocation37_spill] sm:$0xff] %v9166_v48 }
 0x579   : > { %v9158_v49 = vmul.f32 0.35355338, %v1982_v55 }
 0x57a   : > { %v1525_v5 = vmul.f32 1.442695, %v1511_v1 }
 0x57b   : > { %v2014_v0 = vsel %vm651_vm0, %v9158_v49, -inf }
 0x57c   : > { %1539 = vadd.xlane.f32.xlu1 %v1538_v47  ;;  %7718 = vpow2.f32 %v1525_v5 }
 0x57d   : > { %7720 = vpow2.f32 %v1513_v28 }
 0x57e   : > { %7722 = vpow2.f32 %v1515_v38 }
 0x57f   : > { %v9174_v39 = vpop.f32.mrf.mxu2 }
 0x580   : > { %v1985_v33 = vpop.f32.mrf.mxu0  ;;  %12159 = vst [vmem:[#allocation38_spill] sm:$0xff] %v9174_v39 }
 0x581   : > { %v9168_v50 = vmul.f32 0.35355338, %v1985_v33 }
 0x582   : > { %v9145_v31 = vpop.eup %7718 }
 0x583   : > { %v1547_v23 = vsel %vm651_vm0, %v9145_v31, 0.0  ;;  %v9156_v36 = vpop.eup %7720  ;;  %v2017_v40 = vsel %vm651_vm0, %v9168_v50, -inf }
 0x584   : > { %1542 = vadd.xlane.f32.xlu1 %v1541_v3  ;;  %v1529_v30 = vsel %vm651_vm0, %v9156_v36, 0.0  ;;  %v9164_v61 = vpop.eup %7722 }
 0x585   : > { %v1532_v56 = vsel %vm651_vm0, %v9164_v61, 0.0 }
 0x588   : > { %v1988_v54 = vpop.f32.mrf.mxu0 }
 0x589   : > { %v9176_v62 = vmul.f32 0.35355338, %v1988_v54 }
 0x58b   : > { %v2020_v53 = vsel %vm651_vm0, %v9176_v62, -inf }
 0x58c   : > { %1545 = vadd.xlane.f32.xlu1 %v1544_v42 }
 0x58d   : > { %v9182_v1 = vpop.f32.mrf.mxu2 }
 0x58e   : > { %12160 = vst [vmem:[#allocation39_spill] sm:$0xff] %v9182_v1 }
 0x58f   : > { %v7516_v26 = vpop.permute.xlu1 %7515 }
 0x590   : > { %v7517_v32 = vunpack.i.l.bf16 %v7516_v26  ;;  %v7518_v44 = vunpack.i.h.bf16 %v7516_v26  ;;  %v1991_v47 = vpop.f32.mrf.mxu0 }
 0x591   : > { %v9180_v63 = vmul.f32 0.35355338, %v1991_v47 }
 0x592   : > { %1729 = vmatpush.msrb.mxu1 %v7517_v32 }
 0x593   : > { %v2023_v3 = vsel %vm651_vm0, %v9180_v63, -inf }
 0x594   : > { %1730 = vmatpush.msrb.mxu1 %v7518_v44  ;;  %1548 = vadd.xlane.f32.xlu1 %v1547_v23 }
 0x597   : > { %2009 = vmax.xlane.f32.xlu0 %v2008_v58 }
 0x598   : > { %v1994_v5 = vpop.f32.mrf.mxu0 }
 0x599   : > { %v9186_v52 = vmul.f32 0.35355338, %v1994_v5 }
 0x59b   : > { %v2026_v28 = vsel %vm651_vm0, %v9186_v52, -inf }
 0x59d   : > { %1530 = vadd.xlane.f32.xlu2 %v1529_v30 }
 0x59f   : > { %2015 = vmax.xlane.f32.xlu0 %v2014_v0 }
 0x5a5   : > { %1533 = vadd.xlane.f32.xlu2 %v1532_v56 }
 0x5a7   : > { %2018 = vmax.xlane.f32.xlu0 %v2017_v40 }
 0x5af   : > { %2021 = vmax.xlane.f32.xlu0 %v2020_v53 }
 0x5b7   : > { %2024 = vmax.xlane.f32.xlu0 %v2023_v3 }
 0x5ba   : > { %v9188_v42 = vpop.f32.mrf.mxu2 }
 0x5bb   : > { %12161 = vst [vmem:[#allocation40_spill] sm:$0xff] %v9188_v42 }
 0x5bf   : > { %2027 = vmax.xlane.f32.xlu0 %v2026_v28  ;;  %v7536_v28 = vpop.permute.xlu1 %7535 }
 0x5c2   : > { %v2440_v55 = vpop.f32.mrf.mxu2 }
 0x5c3   : > { %v9192_v26 = vmul.f32 0.35355338, %v2440_v55 }
 0x5c4   : > { %v1504_v32 = vpop.xlane.xlu0 %1503 }
 0x5c5   : > { %v1512_v44 = vsub.f32 %v9093_v25, %v1504_v32  ;;  %v2472_v37 = vsel %vm651_vm0, %v9192_v26, -inf }
 0x5c6   : > { %2473 = vmax.xlane.f32.xlu2 %v2472_v37  ;;  %v7538_v37 = vunpack.i.h.bf16 %v7536_v28 }
 0x5c7   : > { %v1527_v23 = vmul.f32 1.442695, %v1512_v44  ;;  %v7537_v44 = vunpack.i.l.bf16 %v7536_v28 }
 0x5c9   : > { %7724 = vpow2.f32 %v1527_v23 }
 0x5ca   : > { %v2443_v23 = vpop.f32.mrf.mxu2 }
 0x5cf   : > { %v9197_v58 = vpop.eup %7724  ;;  %v2007_v38 = vpop.xlane.xlu2 %2006 }
 0x5d0   : > { %v2029_v33 = vsub.f32 %v9099_v34, %v2007_v38  ;;  %v1550_v30 = vsel %vm651_vm0, %v9197_v58, 0.0 }
 0x5d1   : > { %1551 = vadd.xlane.f32.xlu1 %v1550_v30 }
 0x5d2   : > { %v2037_v0 = vmul.f32 1.442695, %v2029_v33  ;;  %v2446_v33 = vpop.f32.mrf.mxu2 }
 0x5d4   : > { %7726 = vpow2.f32 %v2037_v0 }
 0x5d7   : > { %v7521_v54 = vpop.permute.xlu0 %7520  ;;  %v7526_v25 = vpop.permute.xlu2 %7525 }
 0x5d8   : > { %v7522_v56 = vunpack.i.l.bf16 %v7521_v54  ;;  %v7523_v47 = vunpack.i.h.bf16 %v7521_v54  ;;  %v7527_v3 = vunpack.i.l.bf16 %v7526_v25  ;;  %v7528_v34 = vunpack.i.h.bf16 %v7526_v25 }
 0x5da   : > { %v9202_v40 = vpop.eup %7726  ;;  %1731 = vmatpush.msrb.mxu1 %v7522_v56  ;;  %v2449_v25 = vpop.f32.mrf.mxu2 }
 0x5db   : > { %v2053_v53 = vsel %vm651_vm0, %v9202_v40, 0.0 }
 0x5dc   : > { %2054 = vadd.xlane.f32.xlu1 %v2053_v53  ;;  %1732 = vmatpush.msrb.mxu1 %v7523_v47  ;;  %v9219_v53 = vmul.f32 0.35355338, %v2446_v33  ;;  %v9232_v33 = vmul.f32 0.35355338, %v2443_v23 }
 0x5de   : > { %1733 = vmatpush.msrb.mxu1 %v7527_v3  ;;  %7545 = vrot.lane.b32.xlu2 %v8766_v9, %s8332_s24  ;;  %v2478_v28 = vsel %vm651_vm0, %v9219_v53, -inf  ;;  %v2475_v1 = vsel %vm651_vm0, %v9232_v33, -inf }
 0x5df   : > { %v7531_v5 = vpop.permute.xlu0 %7530  ;;  %v9214_v38 = vpop.xlane.xlu1 %2012 }
 0x5e0   : > { %1734 = vmatpush.msrb.mxu1 %v7528_v34  ;;  %v7532_v55 = vunpack.i.l.bf16 %v7531_v5  ;;  %v7533_v32 = vunpack.i.h.bf16 %v7531_v5 }
 0x5e2   : > { %1735 = vmatpush.msrb.mxu1 %v7532_v55 }
 0x5e4   : > { %1736 = vmatpush.msrb.mxu1 %v7533_v32 }
 0x5e6   : > { %2253 = vmatpush.msra.mxu1 %v7537_v44  ;;  %7555 = vrot.lane.b32.xlu2 %v8857_v60, %s8332_s24 }
 0x5e7   : > { %v9216_v30 = vpop.xlane.xlu1 %1536 }
 0x5e8   : > { %2254 = vmatpush.msra.mxu1 %v7538_v37  ;;  %v2452_v37 = vpop.f32.mrf.mxu2  ;;  %vm1588_vm10 = vweird.f32 %v9216_v30 }
 0x5ee   : > { %7560 = vrot.lane.b32.xlu2 %v8776_v57, %s8333_s28 }
 0x5ef   : > { %v9222_v3 = vpop.xlane.xlu1 %1539 }
 0x5f0   : > { %v2455_v19 = vpop.f32.mrf.mxu2  ;;  %vm1603_vm15 = vweird.f32 %v9222_v3 }
 0x5f5   : > { %7550 = vrot.lane.b32.xlu1 %v8788_v12, %s8333_s28 }
 0x5f7   : > { %v9239_v20 = vpop.xlane.xlu1 %1542 }
 0x60a   : > { %v2010_v0 = vpop.xlane.xlu0 %2009 }
 0x60b   : > { %v2030_v54 = vsub.f32 %v9147_v35, %v2010_v0  ;;  %v9234_v0 = vmul.f32 0.35355338, %v2449_v25 }
 0x60d   : > { %v2039_v56 = vmul.f32 1.442695, %v2030_v54  ;;  %v2481_v23 = vsel %vm651_vm0, %v9234_v0, -inf }
 0x60f   : > { %7728 = vpow2.f32 %v2039_v56 }
 0x610   : > { %v1531_v47 = vpop.xlane.xlu2 %1530 }
 0x611   : > { %7730 = vrcp.f32 %v1531_v47  ;;  %v1564_v42 = vand.u32 2147483648, %v1531_v47  ;;  %vm1558_vm2 = vweird.f32 %v1531_v47 }
 0x612   : > { %7732 = vrcp.f32 %v9216_v30 }
 0x613   : > { %v1565_v48 = vor.u32 1.1754944e-38, %v1564_v42 }
 0x615   : > { %v9224_v34 = vpop.eup %7728 }
 0x616   : > { %v2056_v5 = vsel %vm651_vm0, %v9224_v34, 0.0 }
 0x617   : > { %v7731_v35 = vpop.eup %7730  ;;  %2057 = vadd.xlane.f32.xlu0 %v2056_v5  ;;  %2479 = vmax.xlane.f32.xlu2 %v2478_v28  ;;  %v1562_v28 = vand.u32 2147483647, %v1531_v47 }
 0x618   : > { %v9230_v55 = vpop.eup %7732  ;;  %v1554_v32 = vmul.f32 %v7731_v35, %v1531_v47  ;;  %v1534_v44 = vpop.xlane.xlu2 %1533  ;;  %vm1559_vm1 = vweird.f32 %v7731_v35  ;;  %v9247_v47 = vmul.f32 0.35355338, %v2452_v37 }
 0x619   : > { %7734 = vrcp.f32 %v1534_v44  ;;  %v1584_v56 = vmul.f32 %v9230_v55, %v9216_v30  ;;  %vm1560_vm3 = vmor %vm1558_vm2, %vm1559_vm1  ;;  %vm1563_vm4 = vcmp.eq.f32.partialorder %v1562_v28, 8.507059e+37  ;;  %vm1573_vm6 = vweird.f32 %v1534_v44 }
 0x61a   : > { %v1555_v54 = vsub.f32 1.0, %v1554_v32  ;;  %7736 = vrcp.f32 %v9222_v3  ;;  %vm1589_vm8 = vweird.f32 %v9230_v55  ;;  %v1594_v28 = vand.u32 2147483648, %v9216_v30 }
 0x61b   : > { %v1585_v39 = vsub.f32 1.0, %v1584_v56  ;;  %7738 = vrcp.f32 %v9239_v20  ;;  %vm1590_vm12 = vmor %vm1588_vm10, %vm1589_vm8 }
 0x61c   : > { %v1556_v5 = vmul.f32 %v7731_v35, %v1555_v54 }
 0x61d   : > { %v1586_v56 = vmul.f32 %v9230_v55, %v1585_v39 }
 0x61e   : > { %v1557_v25 = vadd.f32 %v7731_v35, %v1556_v5  ;;  %v1579_v5 = vand.u32 2147483648, %v1534_v44 }
 0x61f   : > { %v7735_v32 = vpop.eup %7734  ;;  %2476 = vmax.xlane.f32.xlu0 %v2475_v1  ;;  %2482 = vmax.xlane.f32.xlu2 %v2481_v23  ;;  %v9264_v23 = vmul.f32 0.35355338, %v2455_v19  ;;  %v2458_v19 = vpop.f32.mrf.mxu2 }
 0x620   : > { %v1569_v45 = vmul.f32 %v7735_v32, %v1534_v44  ;;  %v1561_v29 = vsel %vm1560_vm3, %v7731_v35, %v1557_v25  ;;  %v9245_v54 = vpop.eup %7736  ;;  %vm1574_vm5 = vweird.f32 %v7735_v32  ;;  %v1577_v35 = vand.u32 2147483647, %v1534_v44 }
 0x621   : > { %v1566_v4 = vsel %vm1563_vm4, %v1565_v48, %v1561_v29  ;;  %v1599_v1 = vmul.f32 %v9245_v54, %v9222_v3  ;;  %v9255_v29 = vpop.xlane.xlu1 %1545  ;;  %vm1575_vm7 = vmor %vm1573_vm6, %vm1574_vm5  ;;  %v1592_v44 = vand.u32 2147483647, %v9216_v30  ;;  %vm1604_vm14 = vweird.f32 %v9245_v54 }
 0x622   : > { %v1570_v22 = vsub.f32 1.0, %v1569_v45  ;;  %v1567_v12 = vmul.f32 %v9156_v36, %v1566_v4  ;;  %v2484_v45 = vsel %vm651_vm0, %v9247_v47, -inf  ;;  %v1580_v36 = vor.u32 1.1754944e-38, %v1579_v5  ;;  %vm1605_vm1 = vmor %vm1603_vm15, %vm1604_vm14 }
 0x623   : > { %v1600_v48 = vsub.f32 1.0, %v1599_v1  ;;  %vm1578_vm9 = vcmp.eq.f32.partialorder %v1577_v35, 8.507059e+37  ;;  %7740 = vrcp.f32 %v9255_v29  ;;  %v1595_v1 = vor.u32 1.1754944e-38, %v1594_v28 }
 0x624   : > { %6962 = vmatmul.msk.f32.vlgmr.msrb.gmra.mxu1 %vm651_vm0, %v1567_v12  ;;  %v1571_v42 = vmul.f32 %v7735_v32, %v1570_v22  ;;  %v1587_v12 = vadd.f32 %v9230_v55, %v1586_v56  ;;  %v9261_v22 = vpop.eup %7738  ;;  %vm1593_vm13 = vcmp.eq.f32.partialorder %v1592_v44, 8.507059e+37  ;;  %vm1618_vm4 = vweird.f32 %v9239_v20 }
 0x625   : > { %v1601_v56 = vmul.f32 %v9245_v54, %v1600_v48  ;;  %vm1619_vm3 = vweird.f32 %v9261_v22  ;;  %vm1633_vm8 = vweird.f32 %v9255_v29 }
 0x626   : > { %v1572_v4 = vadd.f32 %v7735_v32, %v1571_v42  ;;  %v1591_v5 = vsel %vm1590_vm12, %v9230_v55, %v1587_v12  ;;  %v1609_v55 = vand.u32 2147483648, %v9222_v3  ;;  %vm1620_vm5 = vmor %vm1618_vm4, %vm1619_vm3 }
 0x627   : > { %2485 = vmax.xlane.f32.xlu2 %v2484_v45  ;;  %v1596_v30 = vsel %vm1593_vm13, %v1595_v1, %v1591_v5  ;;  %v1602_v45 = vadd.f32 %v9245_v54, %v1601_v56 }
 0x628   : > { %v1576_v39 = vsel %vm1575_vm7, %v7735_v32, %v1572_v4  ;;  %v1614_v32 = vmul.f32 %v9261_v22, %v9239_v20  ;;  %v1597_v48 = vmul.f32 %v9116_v43, %v1596_v30  ;;  %v1610_v43 = vor.u32 1.1754944e-38, %v1609_v55 }
 0x629   : > { %v1581_v37 = vsel %vm1578_vm9, %v1580_v36, %v1576_v39  ;;  %v9277_v35 = vpop.xlane.xlu1 %1548  ;;  %v9281_v4 = vpop.eup %7740  ;;  %v9284_v36 = vmul.f32 0.35355338, %v2458_v19  ;;  %v1607_v39 = vand.u32 2147483647, %v9222_v3 }
 0x62a   : > { %v1582_v25 = vmul.f32 %v9164_v61, %v1581_v37  ;;  %v2487_v61 = vsel %vm651_vm0, %v9264_v23, -inf  ;;  %v1615_v42 = vsub.f32 1.0, %v1614_v32  ;;  %7742 = vrcp.f32 %v9277_v35  ;;  %v2461_v3 = vpop.f32.mrf.mxu2 }
 0x62b   : > { %v1629_v12 = vmul.f32 %v9281_v4, %v9255_v29  ;;  %v1606_v37 = vsel %vm1605_vm1, %v9245_v54, %v1602_v45  ;;  %vm1608_vm2 = vcmp.eq.f32.partialorder %v1607_v39, 8.507059e+37  ;;  %v1624_v54 = vand.u32 2147483648, %v9239_v20 }
 0x62c   : > { %6963 = vmatmul.msk.f32.gmra.mxu1 %vm651_vm0, %v1582_v25  ;;  %v1616_v28 = vmul.f32 %v9261_v22, %v1615_v42  ;;  %v2490_v25 = vsel %vm651_vm0, %v9284_v36, -inf  ;;  %v1611_v44 = vsel %vm1608_vm2, %v1610_v43, %v1606_v37  ;;  %v9303_v1 = vmul.f32 0.35355338, %v2461_v3 }
 0x62d   : > { %v1630_v32 = vsub.f32 1.0, %v1629_v12  ;;  %v1612_v30 = vmul.f32 %v9124_v59, %v1611_v44  ;;  %v1622_v42 = vand.u32 2147483647, %v9239_v20  ;;  %v1625_v12 = vor.u32 1.1754944e-38, %v1624_v54  ;;  %v9326_v54 = vpop.xlane.xlu0 %2015 }
 0x62e   : > { %v1617_v5 = vadd.f32 %v9261_v22, %v1616_v28  ;;  %v2493_v37 = vsel %vm651_vm0, %v9303_v1, -inf  ;;  %vm1634_vm7 = vweird.f32 %v9281_v4  ;;  %v1639_v28 = vand.u32 2147483648, %v9255_v29 }
 0x62f   : > { %2488 = vmax.xlane.f32.xlu2 %v2487_v61  ;;  %v1631_v39 = vmul.f32 %v9281_v4, %v1630_v32  ;;  %vm1623_vm6 = vcmp.eq.f32.partialorder %v1622_v42, 8.507059e+37  ;;  %vm1635_vm9 = vmor %vm1633_vm8, %vm1634_vm7  ;;  %vm1648_vm13 = vweird.f32 %v9277_v35 }
 0x630   : > { %v7743_v56 = vpop.eup %7742 }
 0x631   : > { %v1644_v45 = vmul.f32 %v7743_v56, %v9277_v35  ;;  %v1632_v20 = vadd.f32 %v9281_v4, %v1631_v39  ;;  %vm1649_vm12 = vweird.f32 %v7743_v56 }
 0x632   : > { %vm1650_vm14 = vmor %vm1648_vm13, %vm1649_vm12 }
 0x633   : > { %7540 = vrot.lane.b32.xlu0 %v8776_v57, %s8332_s24  ;;  %v1636_v44 = vsel %vm1635_vm9, %v9281_v4, %v1632_v20  ;;  %v1652_v4 = vand.u32 2147483647, %v9277_v35  ;;  %s6903_s24 = sshll.u32 %s635_s27, 6 }
 0x634   : > { %6964 = vmatmul.msk.f32.gmra.mxu1 %vm651_vm0, %v1597_v48  ;;  %v1621_v48 = vsel %vm1620_vm5, %v9261_v22, %v1617_v5  ;;  %v1637_v22 = vand.u32 2147483647, %v9255_v29 }
 0x635   : > { %v1626_v59 = vsel %vm1623_vm6, %v1625_v12, %v1621_v48  ;;  %vm1653_vm15 = vcmp.eq.f32.partialorder %v1652_v4, 8.507059e+37 }
 0x636   : > { %v1627_v43 = vmul.f32 %v9131_v27, %v1626_v59  ;;  %vm1638_vm10 = vcmp.eq.f32.partialorder %v1637_v22, 8.507059e+37 }
 0x637   : > { %2491 = vmax.xlane.f32.xlu2 %v2490_v25 }
 0x639   : > { %v2474_v19 = vpop.xlane.xlu2 %2473 }
 0x63a   : > { %v2496_v61 = vsub.f32 %v9192_v26, %v2474_v19  ;;  %v1645_v26 = vsub.f32 1.0, %v1644_v45  ;;  %v1640_v19 = vor.u32 1.1754944e-38, %v1639_v28  ;;  %v2031_v45 = vsub.f32 %v9108_v46, %v9214_v38 }
 0x63c   : > { %v2504_v55 = vmul.f32 1.442695, %v2496_v61  ;;  %6965 = vmatmul.msk.f32.gmra.mxu1 %vm651_vm0, %v1612_v30  ;;  %v1646_v32 = vmul.f32 %v7743_v56, %v1645_v26  ;;  %v1641_v27 = vsel %vm1638_vm10, %v1640_v19, %v1636_v44  ;;  %v1654_v61 = vand.u32 2147483648, %v9277_v35  ;;  %v2019_v26 = vpop.xlane.xlu0 %2018 }
 0x63d   : > { %v1642_v30 = vmul.f32 %v9138_v21, %v1641_v27  ;;  %v2033_v46 = vsub.f32 %v9168_v50, %v2019_v26 }
 0x63e   : > { %7744 = vpow2.f32 %v2504_v55  ;;  %v1647_v29 = vadd.f32 %v7743_v56, %v1646_v32  ;;  %v1655_v39 = vor.u32 1.1754944e-38, %v1654_v61 }
 0x63f   : > { %2494 = vmax.xlane.f32.xlu2 %v2493_v37  ;;  %v2041_v37 = vmul.f32 1.442695, %v2031_v45  ;;  %v2045_v44 = vmul.f32 1.442695, %v2033_v46 }
 0x640   : > { %v1651_v48 = vsel %vm1650_vm14, %v7743_v56, %v1647_v29 }
 0x641   : > { %v1656_v59 = vsel %vm1653_vm15, %v1655_v39, %v1651_v48  ;;  %v9338_v56 = vpop.permute.xlu2 %7545  ;;  %v2032_v48 = vsub.f32 %v9158_v49, %v9326_v54 }
 0x642   : > { %v1657_v35 = vmul.f32 %v9145_v31, %v1656_v59 }
 0x644   : > { %v9320_v25 = vpop.eup %7744  ;;  %v1552_v3 = vpop.xlane.xlu1 %1551  ;;  %6966 = vmatmul.msk.f32.gmra.mxu1 %vm651_vm0, %v1627_v43 }
 0x645   : > { %7746 = vrcp.f32 %v1552_v3  ;;  %v2520_v5 = vsel %vm651_vm0, %v9320_v25, 0.0  ;;  %v1669_v20 = vand.u32 2147483648, %v1552_v3  ;;  %v1667_v28 = vand.u32 2147483647, %v1552_v3  ;;  %v2022_v45 = vpop.xlane.xlu0 %2021 }
 0x646   : > { %7748 = vpow2.f32 %v2041_v37  ;;  %vm1663_vm2 = vweird.f32 %v1552_v3  ;;  %v876_v37 = vld [vmem:[#allocation7 + $0x8] sm:$0xff] }
 0x647   : > { %2521 = vadd.xlane.f32.xlu2 %v2520_v5  ;;  %v1670_v22 = vor.u32 1.1754944e-38, %v1669_v20  ;;  %vm1668_vm4 = vcmp.eq.f32.partialorder %v1667_v28, 8.507059e+37  ;;  %7750 = vpow2.f32 %v2045_v44  ;;  %1801 = vmatpush.msrb.mxu3 %v876_v37  ;;  %v2034_v44 = vsub.f32 %v9176_v62, %v2022_v45 }
 0x64b   : > { %v7747_v42 = vpop.eup %7746 }
 0x64c   : > { %v1659_v55 = vmul.f32 %v7747_v42, %v1552_v3  ;;  %6967 = vmatmul.msk.f32.gmra.mxu1 %vm651_vm0, %v1642_v30  ;;  %vm1664_vm1 = vweird.f32 %v7747_v42  ;;  %v9340_v5 = vpop.eup %7748  ;;  %v9346_v3 = vpop.permute.xlu2 %7555 }
 0x64d   : > { %vm1665_vm3 = vmor %vm1663_vm2, %vm1664_vm1  ;;  %v2059_v50 = vsel %vm651_vm0, %v9340_v5, 0.0  ;;  %v9352_v27 = vpop.eup %7750  ;;  %v2025_v39 = vpop.xlane.xlu0 %2024 }
 0x64e   : > { %v1660_v12 = vsub.f32 1.0, %v1659_v55  ;;  %v2065_v29 = vsel %vm651_vm0, %v9352_v27, 0.0 }
 0x64f   : > { %v9348_v19 = vpop.xlane.xlu1 %2054 }
 0x650   : > { %v1661_v21 = vmul.f32 %v7747_v42, %v1660_v12  ;;  %v2043_v12 = vmul.f32 1.442695, %v2032_v48  ;;  %vm2082_vm6 = vweird.f32 %v9348_v19 }
 0x652   : > { %v1662_v38 = vadd.f32 %v7747_v42, %v1661_v21  ;;  %7752 = vpow2.f32 %v2043_v12 }
 0x654   : > { %6968 = vmatmul.msk.f32.gmra.mxu1 %vm651_vm0, %v1657_v35  ;;  %v1666_v43 = vsel %vm1665_vm3, %v7747_v42, %v1662_v38  ;;  %v7561_v30 = vpop.permute.xlu2 %7560 }
 0x655   : > { %v1671_v32 = vsel %vm1668_vm4, %v1670_v22, %v1666_v43  ;;  %v7562_v42 = vunpack.i.l.bf16 %v7561_v30  ;;  %v7563_v55 = vunpack.i.h.bf16 %v7561_v30  ;;  %v9358_v59 = vpop.xlane.xlu0 %2027 }
 0x656   : > { %v1672_v31 = vmul.f32 %v9197_v58, %v1671_v32 }
 0x658   : > { %v9360_v26 = vpop.eup %7752 }
 0x659   : > { %v2062_v21 = vsel %vm651_vm0, %v9360_v26, 0.0 }
 0x65c   : > { %6969 = vmatmul.msk.f32.gmra.mxu1 %vm651_vm0, %v1672_v31 }
 0x65d   : > { %2060 = vadd.xlane.f32.xlu0 %v2059_v50 }
 0x65f   : > { %7565 = vrot.lane.b32.xlu2 %v8766_v9, %s8333_s28 }
 0x665   : > { %2066 = vadd.xlane.f32.xlu0 %v2065_v29  ;;  %v2047_v29 = vmul.f32 1.442695, %v2034_v44  ;;  %v2088_v44 = vand.u32 2147483648, %v9348_v19 }
 0x667   : > { %v7551_v58 = vpop.permute.xlu1 %7550 }
 0x668   : > { %v7552_v61 = vunpack.i.l.bf16 %v7551_v58  ;;  %v7553_v4 = vunpack.i.h.bf16 %v7551_v58 }
 0x66a   : > { %2720 = vmatpush.msrb.mxu0 %v7552_v61  ;;  %v2035_v61 = vsub.f32 %v9180_v63, %v2025_v39 }
 0x66c   : > { %2721 = vmatpush.msrb.mxu0 %v7553_v4  ;;  %v2049_v48 = vmul.f32 1.442695, %v2035_v61 }
 0x66e   : > { %2722 = vmatpush.msrb.mxu0 %v7562_v42 }
 0x670   : > { %2723 = vmatpush.msrb.mxu0 %v7563_v55 }
 0x688   : > { %2063 = vadd.xlane.f32.xlu2 %v2062_v21 }
 0x68a   : > { %v9364_v20 = vpop.xlane.xlu0 %2057  ;;  %v2480_v35 = vpop.xlane.xlu2 %2479 }
 0x68b   : > { %v2498_v28 = vsub.f32 %v9219_v53, %v2480_v35  ;;  %vm2097_vm10 = vweird.f32 %v9364_v20 }
 0x68d   : > { %v2508_v46 = vmul.f32 1.442695, %v2498_v28 }
 0x68f   : > { %7754 = vpow2.f32 %v2508_v46  ;;  %v2036_v46 = vsub.f32 %v9186_v52, %v9358_v59 }
 0x690   : > { %7756 = vrcp.f32 %v9348_v19 }
 0x691   : > { %v2051_v59 = vmul.f32 1.442695, %v2036_v46  ;;  %v2101_v46 = vand.u32 2147483647, %v9364_v20 }
 0x692   : > { %v2477_v49 = vpop.xlane.xlu0 %2476  ;;  %v2483_v54 = vpop.xlane.xlu2 %2482 }
 0x693   : > { %v2497_v38 = vsub.f32 %v9232_v33, %v2477_v49  ;;  %v2499_v43 = vsub.f32 %v9234_v0, %v2483_v54  ;;  %vm2102_vm13 = vcmp.eq.f32.partialorder %v2101_v46, 8.507059e+37 }
 0x695   : > { %v9370_v22 = vpop.eup %7754  ;;  %v2506_v32 = vmul.f32 1.442695, %v2497_v38  ;;  %v2510_v31 = vmul.f32 1.442695, %v2499_v43 }
 0x696   : > { %v2526_v50 = vsel %vm651_vm0, %v9370_v22, 0.0  ;;  %v9375_v53 = vpop.eup %7756 }
 0x697   : > { %7758 = vpow2.f32 %v2506_v32  ;;  %2527 = vadd.xlane.f32.xlu0 %v2526_v50  ;;  %v2078_v0 = vmul.f32 %v9375_v53, %v9348_v19  ;;  %vm2083_vm5 = vweird.f32 %v9375_v53 }
 0x698   : > { %7760 = vpow2.f32 %v2510_v31  ;;  %v7547_v31 = vunpack.i.l.bf16 %v9338_v56  ;;  %vm9410_vm7 = vmor %vm2082_vm6, %vm2083_vm5 }
 0x699   : > { %7762 = vrcp.f32 %v9364_v20  ;;  %v2079_v4 = vsub.f32 1.0, %v2078_v0 }
 0x69a   : > { %v9378_v33 = vpop.xlane.xlu2 %2485  ;;  %7764 = vpow2.f32 %v2047_v29 }
 0x69b   : > { %v2080_v63 = vmul.f32 %v9375_v53, %v2079_v4  ;;  %7766 = vpow2.f32 %v2049_v48  ;;  %v7548_v4 = vunpack.i.h.bf16 %v9338_v56 }
 0x69d   : > { %v9382_v58 = vpop.eup %7758  ;;  %v2081_v38 = vadd.f32 %v9375_v53, %v2080_v63 }
 0x69e   : > { %v9384_v62 = vpop.eup %7760  ;;  %v2523_v30 = vsel %vm651_vm0, %v9382_v58, 0.0 }
 0x69f   : > { %2524 = vadd.xlane.f32.xlu1 %v2523_v30  ;;  %v2529_v42 = vsel %vm651_vm0, %v9384_v62, 0.0  ;;  %v9391_v45 = vpop.eup %7762  ;;  %v2085_v0 = vsel %vm9410_vm7, %v9375_v53, %v2081_v38 }
 0x6a0   : > { %2530 = vadd.xlane.f32.xlu0 %v2529_v42  ;;  %v9394_v37 = vpop.eup %7764  ;;  %v2093_v39 = vmul.f32 %v9391_v45, %v9364_v20  ;;  %v2089_v42 = vor.u32 1.1754944e-38, %v2088_v44  ;;  %vm2098_vm9 = vweird.f32 %v9391_v45 }
 0x6a1   : > { %v1738_v55 = vpop.f32.mrf.mxu1  ;;  %v2068_v54 = vsel %vm651_vm0, %v9394_v37, 0.0  ;;  %v9420_v30 = vpop.eup %7766  ;;  %vm2099_vm12 = vmor %vm2097_vm10, %vm2098_vm9 }
 0x6a2   : > { %6970 = vmatmul.msk.f32.vlgmr.msrb.gmra.mxu3 %vm989_vm11, %v1738_v55  ;;  %v2489_v12 = vpop.xlane.xlu2 %2488  ;;  %v2094_v43 = vsub.f32 1.0, %v2093_v39  ;;  %v2071_v63 = vsel %vm651_vm0, %v9420_v30, 0.0  ;;  %v7558_v39 = vunpack.i.h.bf16 %v9346_v3 }
 0x6a3   : > { %v2501_v21 = vsub.f32 %v9264_v23, %v2489_v12  ;;  %v2086_v23 = vand.u32 2147483647, %v9348_v19  ;;  %v7557_v12 = vunpack.i.l.bf16 %v9346_v3 }
 0x6a4   : > { %v2095_v19 = vmul.f32 %v9391_v45, %v2094_v43 }
 0x6a5   : > { %v2514_v35 = vmul.f32 1.442695, %v2501_v21  ;;  %v7541_v28 = vpop.permute.xlu0 %7540  ;;  %vm2087_vm8 = vcmp.eq.f32.partialorder %v2086_v23, 8.507059e+37  ;;  %v2103_v21 = vand.u32 2147483648, %v9364_v20 }
 0x6a6   : > { %v7542_v49 = vunpack.i.l.bf16 %v7541_v28  ;;  %v7543_v32 = vunpack.i.h.bf16 %v7541_v28  ;;  %v2096_v56 = vadd.f32 %v9391_v45, %v2095_v19  ;;  %v2500_v19 = vsub.f32 %v9247_v47, %v9378_v33 }
 0x6a7   : > { %7768 = vpow2.f32 %v2514_v35  ;;  %v2104_v43 = vor.u32 1.1754944e-38, %v2103_v21 }
 0x6a8   : > { %2069 = vadd.xlane.f32.xlu0 %v2068_v54  ;;  %2255 = vmatpush.msra.mxu1 %v7542_v49  ;;  %7770 = vpow2.f32 %v2051_v59  ;;  %v2100_v3 = vsel %vm2099_vm12, %v9391_v45, %v2096_v56 }
 0x6a9   : > { %v1741_v52 = vpop.f32.mrf.mxu1 }
 0x6aa   : > { %6971 = vmatmul.msk.f32.gmra.mxu3 %vm989_vm11, %v1741_v52  ;;  %2256 = vmatpush.msra.mxu1 %v7543_v32  ;;  %v2492_v29 = vpop.xlane.xlu2 %2491  ;;  %v2105_v32 = vsel %vm2102_vm13, %v2104_v43, %v2100_v3 }
 0x6ab   : > { %v2502_v61 = vsub.f32 %v9284_v36, %v2492_v29  ;;  %v2090_v36 = vsel %vm2087_vm8, %v2089_v42, %v2085_v0  ;;  %v2106_v45 = vmul.f32 %v9224_v34, %v2105_v32 }
 0x6ac   : > { %2257 = vmatpush.msra.mxu1 %v7547_v31  ;;  %v2091_v28 = vmul.f32 %v9202_v40, %v2090_v36 }
 0x6ad   : > { %v9423_v55 = vpop.eup %7768  ;;  %v2516_v48 = vmul.f32 1.442695, %v2502_v61 }
 0x6ae   : > { %2258 = vmatpush.msra.mxu1 %v7548_v4  ;;  %v2535_v53 = vsel %vm651_vm0, %v9423_v55, 0.0  ;;  %v9441_v38 = vpop.eup %7770 }
 0x6af   : > { %7772 = vpow2.f32 %v2516_v48  ;;  %2536 = vadd.xlane.f32.xlu2 %v2535_v53  ;;  %v2074_v23 = vsel %vm651_vm0, %v9441_v38, 0.0  ;;  %v2512_v48 = vmul.f32 1.442695, %v2500_v19 }
 0x6b0   : > { %2072 = vadd.xlane.f32.xlu0 %v2071_v63  ;;  %2259 = vmatpush.msra.mxu1 %v7557_v12 }
 0x6b1   : > { %v1744_v35 = vpop.f32.mrf.mxu1 }
 0x6b2   : > { %6972 = vmatmul.msk.f32.gmra.mxu3 %vm989_vm11, %v1744_v35  ;;  %2260 = vmatpush.msra.mxu1 %v7558_v39  ;;  %v2495_v49 = vpop.xlane.xlu2 %2494 }
 0x6b3   : > { %v2503_v54 = vsub.f32 %v9303_v1, %v2495_v49  ;;  %7002 = vmatmul.msk.f32.vlgmr.msra.gmra.mxu1 %vm651_vm0, %v2091_v28 }
 0x6b5   : > { %v9443_v44 = vpop.eup %7772  ;;  %v2518_v40 = vmul.f32 1.442695, %v2503_v54 }
 0x6b6   : > { %v2538_v20 = vsel %vm651_vm0, %v9443_v44, 0.0 }
 0x6b7   : > { %7774 = vpow2.f32 %v2518_v40  ;;  %2539 = vadd.xlane.f32.xlu2 %v2538_v20 }
 0x6b8   : > { %2075 = vadd.xlane.f32.xlu0 %v2074_v23  ;;  %7570 = vrot.lane.b32.xlu1 %v8857_v60, %s8333_s28  ;;  %s12029_s28 = scalar_lea.vmem [#allocation16], %s6903_s24 }
 0x6b9   : > { %v1747_v1 = vpop.f32.mrf.mxu1 }
 0x6ba   : > { %6973 = vmatmul.msk.f32.gmra.mxu3 %vm989_vm11, %v1747_v1  ;;  %v9453_v52 = vpop.xlane.xlu2 %2521 }
 0x6bb   : > { %7003 = vmatmul.msk.f32.gmra.mxu1 %vm651_vm0, %v2106_v45  ;;  %vm2549_vm13 = vweird.f32 %v9453_v52 }
 0x6bd   : > { %v9456_v59 = vpop.eup %7774 }
 0x6be   : > { %v2541_v31 = vsel %vm651_vm0, %v9456_v59, 0.0 }
 0x6c0   : > { %2542 = vadd.xlane.f32.xlu0 %v2541_v31 }
 0x6c1   : > { %v1750_v50 = vpop.f32.mrf.mxu1 }
 0x6c2   : > { %6974 = vmatmul.msk.f32.gmra.mxu3 %vm989_vm11, %v1750_v50  ;;  %v7566_v29 = vpop.permute.xlu2 %7565 }
 0x6c3   : > { %v7567_v0 = vunpack.i.l.bf16 %v7566_v29  ;;  %v7568_v61 = vunpack.i.h.bf16 %v7566_v29 }
 0x6c5   : > { %2724 = vmatpush.msrb.mxu0 %v7567_v0 }
 0x6c7   : > { %2725 = vmatpush.msrb.mxu0 %v7568_v61 }
 0x6c9   : > { %v1753_v34 = vpop.f32.mrf.mxu1 }
 0x6ca   : > { %6975 = vmatmul.msk.f32.gmra.mxu3 %vm989_vm11, %v1753_v34 }
 0x6cf   : > { %2856 = vrot.lane.b32.xlu2 %v8782_v11, %s8334_s26 }
 0x6d0   : > { %v2061_v4 = vpop.xlane.xlu0 %2060 }
 0x6d1   : > { %7776 = vrcp.f32 %v2061_v4  ;;  %v1756_v42 = vpop.f32.mrf.mxu1  ;;  %v2118_v47 = vand.u32 2147483648, %v2061_v4  ;;  %v2116_v56 = vand.u32 2147483647, %v2061_v4  ;;  %vm2112_vm15 = vweird.f32 %v2061_v4 }
 0x6d2   : > { %6976 = vmatmul.msk.f32.gmra.mxu3 %vm989_vm11, %v1756_v42  ;;  %7778 = vpow2.f32 %v2512_v48 }
 0x6d3   : > { %v2119_v35 = vor.u32 1.1754944e-38, %v2118_v47  ;;  %vm2117_vm2 = vcmp.eq.f32.partialorder %v2116_v56, 8.507059e+37 }
 0x6d4   : > { %2854 = vrot.lane.b32.xlu0 %v8780_v10, %s8334_s26 }
 0x6d7   : > { %v7777_v12 = vpop.eup %7776  ;;  %2850 = vrot.lane.b32.xlu2 %v8770_v24, %s8334_s26 }
 0x6d8   : > { %v2108_v53 = vmul.f32 %v7777_v12, %v2061_v4  ;;  %vm2113_vm14 = vweird.f32 %v7777_v12  ;;  %v9474_v39 = vpop.eup %7778  ;;  %v2067_v3 = vpop.xlane.xlu0 %2066 }
 0x6d9   : > { %v1759_v36 = vpop.f32.mrf.mxu1  ;;  %vm2114_vm1 = vmor %vm2112_vm15, %vm2113_vm14  ;;  %v2532_v46 = vsel %vm651_vm0, %v9474_v39, 0.0  ;;  %7780 = vrcp.f32 %v2067_v3  ;;  %v2148_v48 = vand.u32 2147483648, %v2067_v3  ;;  %vm2142_vm8 = vweird.f32 %v2067_v3 }
 0x6da   : > { %v2109_v63 = vsub.f32 1.0, %v2108_v53  ;;  %6977 = vmatmul.msk.f32.gmra.mxu3 %vm989_vm11, %v1759_v36  ;;  %v2146_v53 = vand.u32 2147483647, %v2067_v3 }
 0x6dc   : > { %3323 = vrot.lane.b32.xlu0 %v8782_v11, %s8335_s29  ;;  %v2110_v33 = vmul.f32 %v7777_v12, %v2109_v63  ;;  %v2149_v63 = vor.u32 1.1754944e-38, %v2148_v48  ;;  %vm2147_vm10 = vcmp.eq.f32.partialorder %v2146_v53, 8.507059e+37 }
 0x6de   : > { %v2111_v21 = vadd.f32 %v7777_v12, %v2110_v33  ;;  %v877_v33 = vld [vmem:[#allocation7 + $0x10] sm:$0xff] }
 0x6df   : > { %2848 = vrot.lane.b32.xlu2 %v8762_v8, %s8334_s26  ;;  %v7781_v43 = vpop.eup %7780  ;;  %2325 = vmatpush.msra.mxu3 %v877_v33  ;;  %v878_v33 = vld [vmem:[#allocation7 + $0x18] sm:$0xff] }
 0x6e0   : > { %v2115_v28 = vsel %vm2114_vm1, %v7777_v12, %v2111_v21  ;;  %v2138_v40 = vmul.f32 %v7781_v43, %v2067_v3  ;;  %vm2143_vm7 = vweird.f32 %v7781_v43  ;;  %2792 = vmatpush.msrb.mxu1 %v878_v33 }
 0x6e1   : > { %v2120_v49 = vsel %vm2117_vm2, %v2119_v35, %v2115_v28  ;;  %vm2144_vm9 = vmor %vm2142_vm8, %vm2143_vm7 }
 0x6e2   : > { %2533 = vadd.xlane.f32.xlu1 %v2532_v46  ;;  %v2121_v54 = vmul.f32 %v9340_v5, %v2120_v49  ;;  %v2139_v32 = vsub.f32 1.0, %v2138_v40 }
 0x6e4   : > { %3321 = vrot.lane.b32.xlu0 %v8780_v10, %s8335_s29  ;;  %7004 = vmatmul.msk.f32.gmra.mxu1 %vm651_vm0, %v2121_v54  ;;  %v2140_v29 = vmul.f32 %v7781_v43, %v2139_v32 }
 0x6e6   : > { %v2141_v4 = vadd.f32 %v7781_v43, %v2140_v29 }
 0x6e7   : > { %2846 = vrot.lane.b32.xlu2 %v8760_v7, %s8334_s26 }
 0x6e8   : > { %v2145_v36 = vsel %vm2144_vm9, %v7781_v43, %v2141_v4 }
 0x6e9   : > { %v2150_v47 = vsel %vm2147_vm10, %v2149_v63, %v2145_v36 }
 0x6ea   : > { %v2151_v35 = vmul.f32 %v9352_v27, %v2150_v47 }
 0x6ec   : > { %3319 = vrot.lane.b32.xlu0 %v8772_v51, %s8335_s29 }
 0x6ef   : > { %3315 = vrot.lane.b32.xlu2 %v8762_v8, %s8335_s29 }
 0x6f4   : > { %2844 = vrot.lane.b32.xlu0 %v8758_v6, %s8334_s26 }
 0x6f7   : > { %2826 = vrot.lane.b32.xlu2 %v8800_v13, %s8334_s26 }
 0x6fb   : > { %2852 = vrot.lane.b32.xlu1 %v8772_v51, %s8334_s26  ;;  %v2064_v5 = vpop.xlane.xlu2 %2063 }
 0x6fc   : > { %3313 = vrot.lane.b32.xlu0 %v8760_v7, %s8335_s29  ;;  %7782 = vrcp.f32 %v2064_v5  ;;  %v2133_v45 = vand.u32 2147483648, %v2064_v5  ;;  %v2131_v50 = vand.u32 2147483647, %v2064_v5  ;;  %vm2127_vm4 = vweird.f32 %v2064_v5 }
 0x6fd   : > { %7784 = vrcp.f32 %v9453_v52 }
 0x6fe   : > { %v2134_v34 = vor.u32 1.1754944e-38, %v2133_v45  ;;  %vm2132_vm6 = vcmp.eq.f32.partialorder %v2131_v50, 8.507059e+37 }
 0x6ff   : > { %2828 = vrot.lane.b32.xlu2 %v8806_v14, %s8334_s26 }
 0x702   : > { %v7783_v20 = vpop.eup %7782 }
 0x703   : > { %v2123_v23 = vmul.f32 %v7783_v20, %v2064_v5  ;;  %3317 = vrot.lane.b32.xlu1 %v8770_v24, %s8335_s29  ;;  %vm2128_vm3 = vweird.f32 %v7783_v20 }
 0x704   : > { %3309 = vrot.lane.b32.xlu0 %v8751_v2, %s8335_s29  ;;  %vm2129_vm5 = vmor %vm2127_vm4, %vm2128_vm3 }
 0x705   : > { %v2124_v1 = vsub.f32 1.0, %v2123_v23 }
 0x707   : > { %3295 = vrot.lane.b32.xlu2 %v8806_v14, %s8335_s29  ;;  %v2125_v31 = vmul.f32 %v7783_v20, %v2124_v1  ;;  %v2555_v1 = vand.u32 2147483648, %v9453_v52 }
 0x709   : > { %v2126_v0 = vadd.f32 %v7783_v20, %v2125_v31  ;;  %v2553_v31 = vand.u32 2147483647, %v9453_v52 }
 0x70a   : > { %v9506_v61 = vpop.xlane.xlu0 %2527 }
 0x70b   : > { %2842 = vrot.lane.b32.xlu1 %v8751_v2, %s8334_s26  ;;  %v2130_v19 = vsel %vm2129_vm5, %v7783_v20, %v2126_v0  ;;  %vm2554_vm15 = vcmp.eq.f32.partialorder %v2553_v31, 8.507059e+37 }
 0x70c   : > { %2830 = vrot.lane.b32.xlu0 %v8812_v15, %s8334_s26  ;;  %v2135_v42 = vsel %vm2132_vm6, %v2134_v34, %v2130_v19  ;;  %v2556_v19 = vor.u32 1.1754944e-38, %v2555_v1 }
 0x70d   : > { %v2136_v12 = vmul.f32 %v9360_v26, %v2135_v42  ;;  %v7785_v26 = vpop.eup %7784 }
 0x70e   : > { %v2545_v28 = vmul.f32 %v7785_v26, %v9453_v52  ;;  %vm2550_vm12 = vweird.f32 %v7785_v26 }
 0x70f   : > { %2834 = vrot.lane.b32.xlu2 %v8822_v17, %s8334_s26  ;;  %7005 = vmatmul.msk.f32.gmra.mxu1 %vm651_vm0, %v2136_v12  ;;  %vm2551_vm14 = vmor %vm2549_vm13, %vm2550_vm12 }
 0x710   : > { %v2546_v46 = vsub.f32 1.0, %v2545_v28 }
 0x712   : > { %v9521_v21 = vpop.xlane.xlu1 %2524  ;;  %v2547_v27 = vmul.f32 %v7785_v26, %v2546_v46 }
 0x713   : > { %v9517_v56 = vpop.xlane.xlu0 %2530  ;;  %3311 = vrot.lane.b32.xlu1 %v8758_v6, %s8335_s29  ;;  %7786 = vrcp.f32 %v9521_v21  ;;  %v2570_v36 = vand.u32 2147483648, %v9521_v21  ;;  %vm2564_vm6 = vweird.f32 %v9521_v21 }
 0x714   : > { %3297 = vrot.lane.b32.xlu0 %v8812_v15, %s8335_s29  ;;  %v2548_v40 = vadd.f32 %v7785_v26, %v2547_v27 }
 0x716   : > { %v2552_v29 = vsel %vm2551_vm14, %v7785_v26, %v2548_v40 }
 0x717   : > { %3301 = vrot.lane.b32.xlu2 %v8822_v17, %s8335_s29  ;;  %7006 = vmatmul.msk.f32.gmra.mxu1 %vm651_vm0, %v2151_v35  ;;  %v2557_v52 = vsel %vm2554_vm15, %v2556_v19, %v2552_v29  ;;  %vm2579_vm15 = vweird.f32 %v9506_v61 }
 0x719   : > { %v9535_v54 = vpop.eup %7786 }
 0x71a   : > { %v2560_v3 = vmul.f32 %v9535_v54, %v9521_v21  ;;  %vm2565_vm3 = vweird.f32 %v9535_v54 }
 0x71b   : > { %v2070_v49 = vpop.xlane.xlu0 %2069  ;;  %3293 = vrot.lane.b32.xlu1 %v8800_v13, %s8335_s29  ;;  %vm9584_vm7 = vmor %vm2564_vm6, %vm2565_vm3 }
 0x71c   : > { %7788 = vrcp.f32 %v2070_v49  ;;  %2836 = vrot.lane.b32.xlu0 %v8826_v18, %s8334_s26  ;;  %v2561_v45 = vsub.f32 1.0, %v2560_v3  ;;  %v2163_v42 = vand.u32 2147483648, %v2070_v49  ;;  %v2161_v12 = vand.u32 2147483647, %v2070_v49 }
 0x71d   : > { %7790 = vrcp.f32 %v9506_v61  ;;  %vm2157_vm2 = vweird.f32 %v2070_v49 }
 0x71e   : > { %v2562_v4 = vmul.f32 %v9535_v54, %v2561_v45  ;;  %v2164_v27 = vor.u32 1.1754944e-38, %v2163_v42  ;;  %vm2162_vm5 = vcmp.eq.f32.partialorder %v2161_v12, 8.507059e+37  ;;  %v2571_v42 = vor.u32 1.1754944e-38, %v2570_v36  ;;  %v12168_v36 = vld [vmem:[#allocation32_spill] sm:$0xff] }
 0x71f   : > { %2840 = vrot.lane.b32.xlu2 %v8834_v41, %s8334_s26 }
 0x720   : > { %v2563_v3 = vadd.f32 %v9535_v54, %v2562_v4 }
 0x722   : > { %v7789_v5 = vpop.eup %7788  ;;  %v9542_v43 = vpop.xlane.xlu2 %2536 }
 0x723   : > { %v2153_v20 = vmul.f32 %v7789_v5, %v2070_v49  ;;  %v9544_v32 = vpop.xlane.xlu0 %2072  ;;  %2832 = vrot.lane.b32.xlu1 %v8818_v16, %s8334_s26  ;;  %v9548_v23 = vpop.eup %7790  ;;  %vm2158_vm1 = vweird.f32 %v7789_v5  ;;  %v2558_v49 = vmul.f32 %v9320_v25, %v2557_v52 }
 0x724   : > { %7792 = vrcp.f32 %v9544_v32  ;;  %3303 = vrot.lane.b32.xlu0 %v8826_v18, %s8335_s29  ;;  %v2575_v0 = vmul.f32 %v9548_v23, %v9506_v61  ;;  %vm2159_vm4 = vmor %vm2157_vm2, %vm2158_vm1  ;;  %v2178_v25 = vand.u32 2147483648, %v9544_v32  ;;  %v2176_v4 = vand.u32 2147483647, %v9544_v32 }
 0x725   : > { %v2154_v50 = vsub.f32 1.0, %v2153_v20  ;;  %7794 = vrcp.f32 %v9517_v56  ;;  %vm2172_vm9 = vweird.f32 %v9544_v32  ;;  %vm2580_vm13 = vweird.f32 %v9548_v23 }
 0x726   : > { %v2576_v26 = vsub.f32 1.0, %v2575_v0  ;;  %v2179_v33 = vor.u32 1.1754944e-38, %v2178_v25  ;;  %vm2177_vm14 = vcmp.eq.f32.partialorder %v2176_v4, 8.507059e+37  ;;  %vm9625_vm1 = vmor %vm2579_vm15, %vm2580_vm13  ;;  %v2600_v4 = vand.u32 2147483648, %v9517_v56 }
 0x727   : > { %v2155_v34 = vmul.f32 %v7789_v5, %v2154_v50  ;;  %v2568_v50 = vand.u32 2147483647, %v9521_v21 }
 0x729   : > { %v2156_v48 = vadd.f32 %v7789_v5, %v2155_v34  ;;  %vm2569_vm12 = vcmp.eq.f32.partialorder %v2568_v50, 8.507059e+37 }
 0x72a   : > { %v9560_v53 = vpop.eup %7792  ;;  %v7571_v63 = vpop.permute.xlu1 %7570 }
 0x72b   : > { %v9563_v47 = vpop.xlane.xlu2 %2539  ;;  %v2168_v35 = vmul.f32 %v9560_v53, %v9544_v32  ;;  %v7572_v28 = vunpack.i.l.bf16 %v7571_v63  ;;  %v9567_v46 = vpop.xlane.xlu0 %2075  ;;  %3299 = vrot.lane.b32.xlu1 %v8818_v16, %s8335_s29  ;;  %v7573_v1 = vunpack.i.h.bf16 %v7571_v63  ;;  %v2160_v45 = vsel %vm2159_vm4, %v7789_v5, %v2156_v48 }
 0x72c   : > { %7796 = vrcp.f32 %v9567_v46  ;;  %3307 = vrot.lane.b32.xlu0 %v8834_v41, %s8335_s29  ;;  %v9577_v40 = vpop.eup %7794  ;;  %v2165_v31 = vsel %vm2162_vm5, %v2164_v27, %v2160_v45  ;;  %vm2173_vm8 = vweird.f32 %v9560_v53  ;;  %v2577_v5 = vmul.f32 %v9548_v23, %v2576_v26 }
 0x72d   : > { %v2169_v20 = vsub.f32 1.0, %v2168_v35  ;;  %2726 = vmatpush.msrb.mxu0 %v7572_v28  ;;  %v2166_v0 = vmul.f32 %v9394_v37, %v2165_v31  ;;  %v2590_v21 = vmul.f32 %v9577_v40, %v9517_v56  ;;  %v2567_v37 = vsel %vm9584_vm7, %v9535_v54, %v2563_v3  ;;  %vm9606_vm10 = vmor %vm2172_vm9, %vm2173_vm8 }
 0x72e   : > { %v2572_v26 = vsel %vm2569_vm12, %v2571_v42, %v2567_v37  ;;  %v2578_v28 = vadd.f32 %v9548_v23, %v2577_v5  ;;  %v2585_v27 = vand.u32 2147483648, %v9506_v61  ;;  %v2191_v29 = vand.u32 2147483647, %v9567_v46 }
 0x72f   : > { %2727 = vmatpush.msrb.mxu0 %v7573_v1  ;;  %v2170_v34 = vmul.f32 %v9560_v53, %v2169_v20  ;;  %7007 = vmatmul.msk.f32.gmra.mxu1 %vm651_vm0, %v2166_v0  ;;  %v2591_v35 = vsub.f32 1.0, %v2590_v21  ;;  %v2573_v45 = vmul.f32 %v9382_v58, %v2572_v26  ;;  %vm2187_vm3 = vweird.f32 %v9567_v46 }
 0x730   : > { %v2262_v19 = vpop.f32.mrf.mxu1  ;;  %7034 = vmatmul.msk.f32.vlgmr.msrb.gmra.mxu0 %vm651_vm0, %v2558_v49  ;;  %v2583_v49 = vand.u32 2147483647, %v9506_v61  ;;  %v2582_v58 = vsel %vm9625_vm1, %v9548_v23, %v2578_v28  ;;  %vm2192_vm6 = vcmp.eq.f32.partialorder %v2191_v29, 8.507059e+37  ;;  %vm2595_vm7 = vweird.f32 %v9577_v40 }
 0x731   : > { %7010 = vmatmul.msk.f32.vlgmr.msra.gmra.mxu3 %vm989_vm11, %v2262_v19  ;;  %v2171_v48 = vadd.f32 %v9560_v53, %v2170_v34  ;;  %v2592_v0 = vmul.f32 %v9577_v40, %v2591_v35  ;;  %vm2594_vm8 = vweird.f32 %v9517_v56  ;;  %7798 = vrcp.f32 %v9542_v43 }
 0x732   : > { %v7797_v12 = vpop.eup %7796  ;;  %vm2584_vm5 = vcmp.eq.f32.partialorder %v2583_v49, 8.507059e+37  ;;  %vm2596_vm9 = vmor %vm2594_vm8, %vm2595_vm7 }
 0x733   : > { %v2857_v52 = vpop.permute.xlu2 %2856  ;;  %v2183_v54 = vmul.f32 %v7797_v12, %v9567_v46  ;;  %2838 = vrot.lane.b32.xlu1 %v12168_v36, %s8334_s26  ;;  %v2175_v32 = vsel %vm9606_vm10, %v9560_v53, %v2171_v48  ;;  %v2193_v53 = vand.u32 2147483648, %v9567_v46  ;;  %vm2188_vm2 = vweird.f32 %v7797_v12  ;;  %v9645_v46 = vpop.xlane.xlu0 %2542  ;;  %s7344_s26 = sshll.u32 %s8449_s25, 6  ;;  %s6727_s25 = scalar_lea.sflag [#allocation4], %s635_s27 }
 0x734   : > { %7050 = vmatpush.xpose.msk.msrb.mxu3 %vm989_vm11, %v2857_v52  ;;  %v2180_v20 = vsel %vm2177_vm14, %v2179_v33, %v2175_v32  ;;  %vm2189_vm4 = vmor %vm2187_vm3, %vm2188_vm2  ;;  %v2593_v19 = vadd.f32 %v9577_v40, %v2592_v0  ;;  %v2598_v48 = vand.u32 2147483647, %v9517_v56  ;;  %v2601_v52 = vor.u32 1.1754944e-38, %v2600_v4 }
 0x735   : > { %v2184_v3 = vsub.f32 1.0, %v2183_v54  ;;  %v2181_v1 = vmul.f32 %v9420_v30, %v2180_v20  ;;  %v2586_v30 = vor.u32 1.1754944e-38, %v2585_v27  ;;  %v2194_v25 = vor.u32 1.1754944e-38, %v2193_v53 }
 0x736   : > { %vm2599_vm10 = vcmp.eq.f32.partialorder %v2598_v48, 8.507059e+37  ;;  %vm2624_vm2 = vweird.f32 %v9542_v43 }
 0x737   : > { %v2185_v50 = vmul.f32 %v7797_v12, %v2184_v3  ;;  %7008 = vmatmul.msk.f32.gmra.mxu1 %vm651_vm0, %v2181_v1  ;;  %v2587_v21 = vsel %vm2584_vm5, %v2586_v30, %v2582_v58  ;;  %v7799_v56 = vpop.eup %7798 }
 0x738   : > { %v2265_v34 = vpop.f32.mrf.mxu1  ;;  %7035 = vmatmul.msk.f32.gmra.mxu0 %vm651_vm0, %v2573_v45  ;;  %v2588_v42 = vmul.f32 %v9370_v22, %v2587_v21  ;;  %v2620_v33 = vmul.f32 %v7799_v56, %v9542_v43  ;;  %vm2625_vm14 = vweird.f32 %v7799_v56 }
 0x739   : > { %7011 = vmatmul.msk.f32.gmra.mxu3 %vm989_vm11, %v2265_v34  ;;  %v2186_v61 = vadd.f32 %v7797_v12, %v2185_v50  ;;  %vm2626_vm3 = vmor %vm2624_vm2, %vm2625_vm14 }
 0x73a   : > { %v2621_v35 = vsub.f32 1.0, %v2620_v33 }
 0x73b   : > { %3305 = vrot.lane.b32.xlu1 %v12168_v36, %s8335_s29  ;;  %v2190_v5 = vsel %vm2189_vm4, %v7797_v12, %v2186_v61  ;;  %v2597_v12 = vsel %vm2596_vm9, %v9577_v40, %v2593_v19  ;;  %v2628_v19 = vand.u32 2147483647, %v9542_v43 }
 0x73c   : > { %v2195_v23 = vsel %vm2192_vm6, %v2194_v25, %v2190_v5  ;;  %v2602_v63 = vsel %vm2599_vm10, %v2601_v52, %v2597_v12  ;;  %v2622_v1 = vmul.f32 %v7799_v56, %v2621_v35  ;;  %v2630_v5 = vand.u32 2147483648, %v9542_v43 }
 0x73d   : > { %v2196_v37 = vmul.f32 %v9441_v38, %v2195_v23  ;;  %v2603_v38 = vmul.f32 %v9384_v62, %v2602_v63  ;;  %v2851_v62 = vpop.permute.xlu2 %2850  ;;  %vm2629_vm4 = vcmp.eq.f32.partialorder %v2628_v19, 8.507059e+37  ;;  %vm2639_vm6 = vweird.f32 %v9563_v47 }
 0x73e   : > { %v2623_v61 = vadd.f32 %v7799_v56, %v2622_v1  ;;  %v2631_v48 = vor.u32 1.1754944e-38, %v2630_v5  ;;  %vm2654_vm10 = vweird.f32 %v9645_v46 }
 0x73f   : > { %7009 = vmatmul.msk.f32.gmra.mxu1 %vm651_vm0, %v2196_v37 }
 0x740   : > { %7036 = vmatmul.msk.f32.gmra.mxu0 %vm651_vm0, %v2588_v42  ;;  %v2627_v42 = vsel %vm2626_vm3, %v7799_v56, %v2623_v61 }
 0x741   : > { %v2632_v12 = vsel %vm2629_vm4, %v2631_v48, %v2627_v42 }
 0x742   : > { %v2633_v43 = vmul.f32 %v9423_v55, %v2632_v12 }
 0x745   : > { %v2849_v58 = vpop.permute.xlu2 %2848 }
 0x746   : > { %v2855_v54 = vpop.permute.xlu0 %2854 }
 0x747   : > { %7051 = vmatpush.xpose.msk.msrb.mxu3 %vm989_vm11, %v2855_v54 }
 0x748   : > { %7037 = vmatmul.msk.f32.gmra.mxu0 %vm651_vm0, %v2603_v38  ;;  %v2645_v38 = vand.u32 2147483648, %v9563_v47 }
 0x74e   : > { %v3324_v22 = vpop.permute.xlu0 %3323 }
 0x74f   : > { %7082 = vmatpush.xpose.msk.msra.mxu1 %vm989_vm11, %v3324_v22  ;;  %v2643_v22 = vand.u32 2147483647, %v9563_v47 }
 0x751   : > { %vm2644_vm8 = vcmp.eq.f32.partialorder %v2643_v22, 8.507059e+37 }
 0x755   : > { %v2534_v32 = vpop.xlane.xlu1 %2533 }
 0x756   : > { %7800 = vrcp.f32 %v2534_v32  ;;  %v3322_v40 = vpop.permute.xlu0 %3321  ;;  %v2615_v45 = vand.u32 2147483648, %v2534_v32  ;;  %v2613_v50 = vand.u32 2147483647, %v2534_v32  ;;  %vm2609_vm13 = vweird.f32 %v2534_v32 }
 0x757   : > { %7083 = vmatpush.xpose.msk.msra.mxu1 %vm989_vm11, %v3322_v40  ;;  %7802 = vrcp.f32 %v9563_v47  ;;  %v2646_v40 = vor.u32 1.1754944e-38, %v2645_v38 }
 0x758   : > { %7804 = vrcp.f32 %v9645_v46  ;;  %v2616_v0 = vor.u32 1.1754944e-38, %v2615_v45  ;;  %vm2614_vm1 = vcmp.eq.f32.partialorder %v2613_v50, 8.507059e+37 }
 0x75c   : > { %v7801_v26 = vpop.eup %7800 }
 0x75d   : > { %v2605_v28 = vmul.f32 %v7801_v26, %v2534_v32  ;;  %v7803_v27 = vpop.eup %7802  ;;  %vm2610_vm12 = vweird.f32 %v7801_v26 }
 0x75e   : > { %v3320_v3 = vpop.permute.xlu0 %3319  ;;  %v2635_v53 = vmul.f32 %v7803_v27, %v9563_v47  ;;  %vm2611_vm15 = vmor %vm2609_vm13, %vm2610_vm12  ;;  %v7805_v25 = vpop.eup %7804  ;;  %vm2640_vm5 = vweird.f32 %v7803_v27  ;;  %v2658_v47 = vand.u32 2147483647, %v9645_v46 }
 0x75f   : > { %v2606_v20 = vsub.f32 1.0, %v2605_v28  ;;  %7084 = vmatpush.xpose.msk.msra.mxu1 %vm989_vm11, %v3320_v3  ;;  %v2650_v37 = vmul.f32 %v7805_v25, %v9645_v46  ;;  %vm2641_vm7 = vmor %vm2639_vm6, %vm2640_vm5  ;;  %vm2655_vm9 = vweird.f32 %v7805_v25  ;;  %v2660_v3 = vand.u32 2147483648, %v9645_v46 }
 0x760   : > { %v2636_v34 = vsub.f32 1.0, %v2635_v53  ;;  %vm2656_vm12 = vmor %vm2654_vm10, %vm2655_vm9  ;;  %vm2659_vm13 = vcmp.eq.f32.partialorder %v2658_v47, 8.507059e+37 }
 0x761   : > { %v2607_v49 = vmul.f32 %v7801_v26, %v2606_v20  ;;  %v2268_v31 = vpop.f32.mrf.mxu1  ;;  %v2651_v52 = vsub.f32 1.0, %v2650_v37  ;;  %v2661_v20 = vor.u32 1.1754944e-38, %v2660_v3 }
 0x762   : > { %7012 = vmatmul.msk.f32.gmra.mxu3 %vm989_vm11, %v2268_v31  ;;  %v2637_v4 = vmul.f32 %v7803_v27, %v2636_v34 }
 0x763   : > { %v2608_v29 = vadd.f32 %v7801_v26, %v2607_v49  ;;  %v2652_v56 = vmul.f32 %v7805_v25, %v2651_v52 }
 0x764   : > { %v2638_v54 = vadd.f32 %v7803_v27, %v2637_v4 }
 0x765   : > { %v2612_v30 = vsel %vm2611_vm15, %v7801_v26, %v2608_v29  ;;  %v2653_v28 = vadd.f32 %v7805_v25, %v2652_v56 }
 0x766   : > { %v2617_v21 = vsel %vm2614_vm1, %v2616_v0, %v2612_v30  ;;  %v2642_v32 = vsel %vm2641_vm7, %v7803_v27, %v2638_v54  ;;  %v2845_v33 = vpop.permute.xlu0 %2844 }
 0x767   : > { %v2618_v23 = vmul.f32 %v9474_v39, %v2617_v21  ;;  %v2847_v39 = vpop.permute.xlu2 %2846  ;;  %v2647_v26 = vsel %vm2644_vm8, %v2646_v40, %v2642_v32  ;;  %v2657_v27 = vsel %vm2656_vm12, %v7805_v25, %v2653_v28 }
 0x768   : > { %v2648_v55 = vmul.f32 %v9443_v44, %v2647_v26  ;;  %v2662_v1 = vsel %vm2659_vm13, %v2661_v20, %v2657_v27 }
 0x769   : > { %7038 = vmatmul.msk.f32.gmra.mxu0 %vm651_vm0, %v2618_v23  ;;  %v2663_v44 = vmul.f32 %v9456_v59, %v2662_v1 }
 0x76d   : > { %v2853_v63 = vpop.permute.xlu1 %2852 }
 0x76e   : > { %7052 = vmatpush.xpose.msk.msrb.mxu3 %vm989_vm11, %v2853_v63  ;;  %v3314_v45 = vpop.permute.xlu0 %3313 }
 0x771   : > { %7039 = vmatmul.msk.f32.gmra.mxu0 %vm651_vm0, %v2633_v43 }
 0x772   : > { %7053 = vmatpush.xpose.msk.msrb.mxu3 %vm989_vm11, %v2851_v62  ;;  %v3316_v62 = vpop.permute.xlu2 %3315 }
 0x775   : > { %v3318_v35 = vpop.permute.xlu1 %3317 }
 0x776   : > { %7054 = vmatpush.xpose.msk.msrb.mxu3 %vm989_vm11, %v2849_v58  ;;  %7085 = vmatpush.xpose.msk.msra.mxu1 %vm989_vm11, %v3318_v35  ;;  %v3310_v49 = vpop.permute.xlu0 %3309  ;;  %v9698_v58 = vpop.f32.mrf.mxu3 }
 0x779   : > { %7040 = vmatmul.msk.f32.gmra.mxu0 %vm651_vm0, %v2648_v55 }
 0x77a   : > { %7055 = vmatpush.xpose.msk.msrb.mxu3 %vm989_vm11, %v2847_v39  ;;  %7086 = vmatpush.xpose.msk.msra.mxu1 %vm989_vm11, %v3316_v62  ;;  %v2827_v5 = vpop.permute.xlu2 %2826 }
 0x77d   : > { %v2843_v53 = vpop.permute.xlu1 %2842 }
 0x77e   : > { %7056 = vmatpush.xpose.msk.msrb.mxu3 %vm989_vm11, %v2845_v33  ;;  %7087 = vmatpush.xpose.msk.msra.mxu1 %vm989_vm11, %v3314_v45  ;;  %v9703_v25 = vpop.f32.mrf.mxu3  ;;  %v2831_v42 = vpop.permute.xlu0 %2830 }
 0x781   : > { %7041 = vmatmul.msk.f32.gmra.mxu0 %vm651_vm0, %v2663_v44 }
 0x782   : > { %7057 = vmatpush.xpose.msk.msrb.mxu3 %vm989_vm11, %v2843_v53  ;;  %v2829_v19 = vpop.permute.xlu2 %2828 }
 0x785   : > { %v3312_v46 = vpop.permute.xlu1 %3311 }
 0x786   : > { %7088 = vmatpush.xpose.msk.msra.mxu1 %vm989_vm11, %v3312_v46  ;;  %v9707_v23 = vpop.f32.mrf.mxu3  ;;  %v3298_v63 = vpop.permute.xlu0 %3297 }
 0x787   : > { %12171 = vst [vmem:[#allocation32_spill] sm:$0xff] %v9707_v23 }
 0x78a   : > { %7089 = vmatpush.xpose.msk.msra.mxu1 %vm989_vm11, %v3310_v49  ;;  %v3296_v48 = vpop.permute.xlu2 %3295 }
 0x78c   : > { %v2271_v31 = vpop.f32.mrf.mxu1 }
 0x78d   : > { %7013 = vmatmul.msk.f32.gmra.mxu3 %vm989_vm11, %v2271_v31  ;;  %v3294_v4 = vpop.permute.xlu1 %3293 }
 0x78e   : > { %v9710_v37 = vpop.f32.mrf.mxu3  ;;  %v2837_v22 = vpop.permute.xlu0 %2836 }
 0x78f   : > { %12172 = vst [vmem:[#allocation41_spill] sm:$0xff] %v9710_v37 }
 0x792   : > { %v2835_v54 = vpop.permute.xlu2 %2834 }
 0x794   : > { %v2274_v50 = vpop.f32.mrf.mxu1 }
 0x795   : > { %7014 = vmatmul.msk.f32.gmra.mxu3 %vm989_vm11, %v2274_v50  ;;  %v2833_v12 = vpop.permute.xlu1 %2832 }
 0x796   : > { %v9713_v52 = vpop.f32.mrf.mxu3  ;;  %v3304_v1 = vpop.permute.xlu0 %3303 }
 0x797   : > { %12173 = vst [vmem:[#allocation42_spill] sm:$0xff] %v9713_v52 }
 0x79a   : > { %v3302_v40 = vpop.permute.xlu2 %3301 }
 0x79d   : > { %v3300_v43 = vpop.permute.xlu1 %3299 }
 0x79e   : > { %v9718_v39 = vpop.f32.mrf.mxu3  ;;  %v3308_v46 = vpop.permute.xlu0 %3307 }
 0x79f   : > { %12174 = vst [vmem:[#allocation43_spill] sm:$0xff] %v9718_v39 }
 0x7a2   : > { %v2841_v28 = vpop.permute.xlu2 %2840 }
 0x7a5   : > { %v2839_v33 = vpop.permute.xlu1 %2838 }
 0x7a6   : > { %v9722_v32 = vpop.f32.mrf.mxu3 }
 0x7a7   : > { %12175 = vst [vmem:[#allocation44_spill] sm:$0xff] %v9722_v32 }
 0x7ac   : > { %v2277_v0 = vpop.f32.mrf.mxu1 }
 0x7ad   : > { %v2729_v29 = vpop.f32.mrf.mxu0  ;;  %7015 = vmatmul.msk.f32.gmra.mxu3 %vm989_vm11, %v2277_v0  ;;  %v3306_v53 = vpop.permute.xlu1 %3305 }
 0x7ae   : > { %7042 = vmatmul.msk.f32.vlgmr.msrb.gmra.mxu1 %vm989_vm11, %v2729_v29  ;;  %v9726_v35 = vpop.f32.mrf.mxu3 }
 0x7af   : > { %12176 = vst [vmem:[#allocation45_spill] sm:$0xff] %v9726_v35 }
 0x7b4   : > { %v2280_v34 = vpop.f32.mrf.mxu1 }
 0x7b5   : > { %v2732_v59 = vpop.f32.mrf.mxu0  ;;  %7016 = vmatmul.msk.f32.gmra.mxu3 %vm989_vm11, %v2280_v34 }
 0x7b6   : > { %7043 = vmatmul.msk.f32.gmra.mxu1 %vm989_vm11, %v2732_v59  ;;  %v9730_v55 = vpop.f32.mrf.mxu3 }
 0x7bc   : > { %v2283_v61 = vpop.f32.mrf.mxu1 }
 0x7bd   : > { %v2735_v30 = vpop.f32.mrf.mxu0  ;;  %7017 = vmatmul.msk.f32.gmra.mxu3 %vm989_vm11, %v2283_v61 }
 0x7be   : > { %7044 = vmatmul.msk.f32.gmra.mxu1 %vm989_vm11, %v2735_v30  ;;  %v9734_v47 = vpop.f32.mrf.mxu3 }
 0x7bf   : > { %12177 = vst [vmem:[#allocation46_spill] sm:$0xff] %v9734_v47 }
 0x7c5   : > { %v2738_v21 = vpop.f32.mrf.mxu0  ;;  %7058 = vmatmul.msk.f32.vlgmr.msrb.gmra.mxu3 %vm989_vm11, %v2827_v5 }
 0x7c6   : > { %7045 = vmatmul.msk.f32.gmra.mxu1 %vm989_vm11, %v2738_v21 }
 0x7cd   : > { %7059 = vmatmul.msk.f32.gmra.mxu3 %vm989_vm11, %v2829_v19 }
 0x7d5   : > { %7060 = vmatmul.msk.f32.gmra.mxu3 %vm989_vm11, %v2831_v42 }
 0x7dd   : > { %7061 = vmatmul.msk.f32.gmra.mxu3 %vm989_vm11, %v2833_v12 }
 0x7e5   : > { %7062 = vmatmul.msk.f32.gmra.mxu3 %vm989_vm11, %v2835_v54  ;;  %v9737_v62 = vpop.f32.mrf.mxu3 }
 0x7e6   : > { %v2741_v38 = vpop.f32.mrf.mxu0  ;;  %12178 = vst [vmem:[#allocation47_spill] sm:$0xff] %v9737_v62 }
 0x7e7   : > { %7046 = vmatmul.msk.f32.gmra.mxu1 %vm989_vm11, %v2741_v38 }
 0x7ed   : > { %7063 = vmatmul.msk.f32.gmra.mxu3 %vm989_vm11, %v2837_v22 }
 0x7ee   : > { %v2744_v56 = vpop.f32.mrf.mxu0 }
 0x7ef   : > { %7047 = vmatmul.msk.f32.gmra.mxu1 %vm989_vm11, %v2744_v56 }
 0x7f5   : > { %7064 = vmatmul.msk.f32.gmra.mxu3 %vm989_vm11, %v2839_v33 }
 0x7f6   : > { %v2747_v26 = vpop.f32.mrf.mxu0 }
 0x7f7   : > { %7048 = vmatmul.msk.f32.gmra.mxu1 %vm989_vm11, %v2747_v26 }
 0x7fd   : > { %7065 = vmatmul.msk.f32.gmra.mxu3 %vm989_vm11, %v2841_v28 }
 0x7fe   : > { %v2750_v3 = vpop.f32.mrf.mxu0 }
 0x7ff   : > { %7049 = vmatmul.msk.f32.gmra.mxu1 %vm989_vm11, %v2750_v3 }
 0x807   : > { %7090 = vmatmul.msk.f32.vlgmr.msra.gmra.mxu1 %vm989_vm11, %v3294_v4 }
 0x80f   : > { %7091 = vmatmul.msk.f32.gmra.mxu1 %vm989_vm11, %v3296_v48 }
 0x810   : > { %v9740_v27 = vpop.f32.mrf.mxu3 }
 0x811   : > { %12179 = vst [vmem:[#allocation48_spill] sm:$0xff] %v9740_v27 }
 0x817   : > { %7092 = vmatmul.msk.f32.gmra.mxu1 %vm989_vm11, %v3298_v63  ;;  %v12188_v63 = vld [vmem:[#allocation31_spill] sm:$0xff] }
 0x818   : > { %v9743_v20 = vpop.f32.mrf.mxu3 }
 0x819   : > { %12180 = vst [vmem:[#allocation49_spill] sm:$0xff] %v9743_v20 }
 0x81f   : > { %7093 = vmatmul.msk.f32.gmra.mxu1 %vm989_vm11, %v3300_v43 }
 0x827   : > { %7094 = vmatmul.msk.f32.gmra.mxu1 %vm989_vm11, %v3302_v40 }
 0x82b   : > { %v9751_v49 = vpop.f32.mrf.mxu1 }
 0x82f   : > { %7095 = vmatmul.msk.f32.gmra.mxu1 %vm989_vm11, %v3304_v1 }
 0x830   : > { %v9746_v45 = vpop.f32.mrf.mxu3 }
 0x831   : > { %12181 = vst [vmem:[#allocation50_spill] sm:$0xff] %v9746_v45 }
 0x833   : > { %v9756_v50 = vpop.f32.mrf.mxu1 }
 0x834   : > { %12184 = vst [vmem:[#allocation53_spill] sm:$0xff] %v9756_v50 }
 0x837   : > { %7096 = vmatmul.msk.f32.gmra.mxu1 %vm989_vm11, %v3306_v53 }
 0x838   : > { %v9749_v44 = vpop.f32.mrf.mxu3 }
 0x839   : > { %12182 = vst [vmem:[#allocation51_spill] sm:$0xff] %v9749_v44 }
 0x83b   : > { %v9762_v34 = vpop.f32.mrf.mxu1 }
 0x83c   : > { %12185 = vst [vmem:[#allocation54_spill] sm:$0xff] %v9762_v34 }
 0x83f   : > { %7097 = vmatmul.msk.f32.gmra.mxu1 %vm989_vm11, %v3308_v46 }
 0x840   : > { %v9754_v31 = vpop.f32.mrf.mxu3 }
 0x841   : > { %12183 = vst [vmem:[#allocation52_spill] sm:$0xff] %v9754_v31 }
 0x843   : > { %v9770_v4 = vpop.f32.mrf.mxu1 }
 0x844   : > { %12186 = vst [vmem:[#allocation55_spill] sm:$0xff] %v9770_v4 }
 0x848   : > { %v2907_v29 = vpop.f32.mrf.mxu3 }
 0x849   : > { %v9758_v0 = vmul.f32 0.35355338, %v2907_v29 }
 0x84b   : > { %v2939_v59 = vsel %vm651_vm0, %v9758_v0, -inf }
 0x84c   : > { %2940 = vmax.xlane.f32.xlu1 %v2939_v59 }
 0x850   : > { %v2910_v30 = vpop.f32.mrf.mxu3 }
 0x851   : > { %v9764_v61 = vmul.f32 0.35355338, %v2910_v30 }
 0x853   : > { %v2942_v5 = vsel %vm651_vm0, %v9764_v61, -inf }
 0x854   : > { %2943 = vmax.xlane.f32.xlu0 %v2942_v5 }
 0x858   : > { %v2913_v21 = vpop.f32.mrf.mxu3 }
 0x859   : > { %v9768_v19 = vmul.f32 0.35355338, %v2913_v21 }
 0x85b   : > { %v2945_v42 = vsel %vm651_vm0, %v9768_v19, -inf }
 0x85c   : > { %2946 = vmax.xlane.f32.xlu1 %v2945_v42 }
 0x860   : > { %v2916_v48 = vpop.f32.mrf.mxu3 }
 0x861   : > { %v9798_v59 = vmul.f32 0.35355338, %v2916_v48 }
 0x863   : > { %v2948_v21 = vsel %vm651_vm0, %v9798_v59, -inf }
 0x864   : > { %v9774_v12 = vpop.f32.mrf.mxu1 }
 0x865   : > { %12187 = vst [vmem:[#allocation56_spill] sm:$0xff] %v9774_v12 }
 0x868   : > { %7575 = vrot.lane.b32.xlu0 %v12188_v63, %s8336_s8  ;;  %v2919_v54 = vpop.f32.mrf.mxu3 }
 0x869   : > { %v9778_v38 = vmul.f32 0.35355338, %v2919_v54 }
 0x86b   : > { %v2951_v22 = vsel %vm651_vm0, %v9778_v38, -inf }
 0x86c   : > { %v9780_v43 = vpop.f32.mrf.mxu1  ;;  %2952 = vmax.xlane.f32.xlu2 %v2951_v22 }
 0x86d   : > { %12189 = vst [vmem:[#allocation31_spill] sm:$0xff] %v9780_v43 }
 0x870   : > { %v2922_v56 = vpop.f32.mrf.mxu3 }
 0x871   : > { %v9784_v40 = vmul.f32 0.35355338, %v2922_v56 }
 0x873   : > { %v2954_v26 = vsel %vm651_vm0, %v9784_v40, -inf }
 0x874   : > { %v9786_v33 = vpop.f32.mrf.mxu1  ;;  %2955 = vmax.xlane.f32.xlu1 %v2954_v26 }
 0x875   : > { %12190 = vst [vmem:[#allocation57_spill] sm:$0xff] %v9786_v33 }
 0x878   : > { %v2925_v5 = vpop.f32.mrf.mxu3 }
 0x879   : > { %v9806_v22 = vmul.f32 0.35355338, %v2925_v5 }
 0x87b   : > { %v2957_v48 = vsel %vm651_vm0, %v9806_v22, -inf }
 0x87c   : > { %v9790_v28 = vpop.f32.mrf.mxu1 }
 0x87d   : > { %12191 = vst [vmem:[#allocation58_spill] sm:$0xff] %v9790_v28 }
 0x880   : > { %v2928_v26 = vpop.f32.mrf.mxu3 }
 0x884   : > { %v3374_v3 = vpop.f32.mrf.mxu1 }
 0x885   : > { %v9792_v1 = vmul.f32 0.35355338, %v3374_v3 }
 0x887   : > { %v3406_v53 = vsel %vm651_vm0, %v9792_v1, -inf }
 0x888   : > { %3407 = vmax.xlane.f32.xlu2 %v3406_v53  ;;  %v9812_v53 = vmul.f32 0.35355338, %v2928_v26 }
 0x88c   : > { %v3377_v46 = vpop.f32.mrf.mxu1 }
 0x88d   : > { %v9796_v29 = vmul.f32 0.35355338, %v3377_v46  ;;  %v2960_v46 = vsel %vm651_vm0, %v9812_v53, -inf }
 0x88f   : > { %v3409_v30 = vsel %vm651_vm0, %v9796_v29, -inf }
 0x890   : > { %3410 = vmax.xlane.f32.xlu2 %v3409_v30 }
 0x892   : > { %2949 = vmax.xlane.f32.xlu0 %v2948_v21 }
 0x894   : > { %v3380_v42 = vpop.f32.mrf.mxu1 }
 0x895   : > { %v9804_v54 = vmul.f32 0.35355338, %v3380_v42 }
 0x897   : > { %v3412_v56 = vsel %vm651_vm0, %v9804_v54, -inf }
 0x898   : > { %3413 = vmax.xlane.f32.xlu2 %v3412_v56 }
 0x89a   : > { %2958 = vmax.xlane.f32.xlu0 %v2957_v48 }
 0x89c   : > { %v3383_v3 = vpop.f32.mrf.mxu1 }
 0x8a2   : > { %2961 = vmax.xlane.f32.xlu0 %v2960_v46 }
 0x8a4   : > { %v3386_v30 = vpop.f32.mrf.mxu1 }
 0x8a5   : > { %v9816_v21 = vmul.f32 0.35355338, %v3386_v30 }
 0x8a7   : > { %v3418_v5 = vsel %vm651_vm0, %v9816_v21, -inf }
 0x8aa   : > { %3419 = vmax.xlane.f32.xlu0 %v3418_v5 }
 0x8ac   : > { %v3389_v42 = vpop.f32.mrf.mxu1 }
 0x8ad   : > { %v9820_v56 = vmul.f32 0.35355338, %v3389_v42 }
 0x8af   : > { %v3421_v48 = vsel %vm651_vm0, %v9820_v56, -inf }
 0x8b0   : > { %3422 = vmax.xlane.f32.xlu2 %v3421_v48 }
 0x8be   : > { %7590 = vrot.lane.b32.xlu0 %v8776_v57, %s8337_s19 }
 0x8bf   : > { %v2941_v26 = vpop.xlane.xlu1 %2940 }
 0x8c0   : > { %v2963_v46 = vsub.f32 %v9758_v0, %v2941_v26 }
 0x8c2   : > { %v2971_v30 = vmul.f32 1.442695, %v2963_v46  ;;  %v9840_v46 = vmul.f32 0.35355338, %v3383_v3 }
 0x8c4   : > { %7806 = vpow2.f32 %v2971_v30 }
 0x8c6   : > { %7595 = vrot.lane.b32.xlu0 %v8766_v9, %s8336_s8 }
 0x8c7   : > { %v2944_v5 = vpop.xlane.xlu0 %2943 }
 0x8c8   : > { %7585 = vrot.lane.b32.xlu2 %v8776_v57, %s8336_s8  ;;  %v2964_v42 = vsub.f32 %v9764_v61, %v2944_v5  ;;  %v3415_v61 = vsel %vm651_vm0, %v9840_v46, -inf  ;;  %v3392_v5 = vpop.f32.mrf.mxu1 }
 0x8ca   : > { %v9832_v28 = vpop.eup %7806  ;;  %v2973_v48 = vmul.f32 1.442695, %v2964_v42 }
 0x8cb   : > { %v2987_v31 = vsel %vm651_vm0, %v9832_v28, 0.0 }
 0x8cc   : > { %7808 = vpow2.f32 %v2973_v48  ;;  %2988 = vadd.xlane.f32.xlu1 %v2987_v31  ;;  %v9845_v48 = vmul.f32 0.35355338, %v3392_v5 }
 0x8ce   : > { %v3424_v3 = vsel %vm651_vm0, %v9845_v48, -inf }
 0x8cf   : > { %v2947_v35 = vpop.xlane.xlu1 %2946 }
 0x8d0   : > { %v2965_v31 = vsub.f32 %v9768_v19, %v2947_v35 }
 0x8d2   : > { %v9836_v0 = vpop.eup %7808  ;;  %v2975_v44 = vmul.f32 1.442695, %v2965_v31 }
 0x8d3   : > { %v2990_v26 = vsel %vm651_vm0, %v9836_v0, 0.0 }
 0x8d4   : > { %2991 = vadd.xlane.f32.xlu1 %v2990_v26  ;;  %7810 = vpow2.f32 %v2975_v44  ;;  %v3395_v26 = vpop.f32.mrf.mxu1 }
 0x8d5   : > { %v9849_v32 = vmul.f32 0.35355338, %v3395_v26 }
 0x8da   : > { %v7576_v30 = vpop.permute.xlu0 %7575  ;;  %v9851_v43 = vpop.eup %7810 }
 0x8db   : > { %v7577_v33 = vunpack.i.l.bf16 %v7576_v30  ;;  %v7578_v42 = vunpack.i.h.bf16 %v7576_v30  ;;  %v3427_v30 = vsel %vm651_vm0, %v9849_v32, -inf  ;;  %v2993_v35 = vsel %vm651_vm0, %v9851_v43, 0.0 }
 0x8dc   : > { %3416 = vmax.xlane.f32.xlu1 %v3415_v61 }
 0x8dd   : > { %3654 = vmatpush.msra.mxu3 %v7577_v33 }
 0x8df   : > { %3655 = vmatpush.msra.mxu3 %v7578_v42  ;;  %v2953_v19 = vpop.xlane.xlu2 %2952 }
 0x8e4   : > { %3425 = vmax.xlane.f32.xlu1 %v3424_v3 }
 0x8f0   : > { %2994 = vadd.xlane.f32.xlu0 %v2993_v35 }
 0x8f1   : > { %3428 = vmax.xlane.f32.xlu2 %v3427_v30 }
 0x8fb   : > { %v3408_v33 = vpop.xlane.xlu2 %3407 }
 0x8fc   : > { %v3430_v61 = vsub.f32 %v9792_v1, %v3408_v33 }
 0x8fd   : > { %7580 = vrot.lane.b32.xlu1 %v12188_v63, %s8337_s19 }
 0x8fe   : > { %v3438_v5 = vmul.f32 1.442695, %v3430_v61 }
 0x900   : > { %7812 = vpow2.f32 %v3438_v5 }
 0x903   : > { %v3411_v44 = vpop.xlane.xlu2 %3410 }
 0x904   : > { %v3431_v42 = vsub.f32 %v9796_v29, %v3411_v44  ;;  %v2967_v44 = vsub.f32 %v9778_v38, %v2953_v19 }
 0x905   : > { %v2950_v30 = vpop.xlane.xlu0 %2949 }
 0x906   : > { %v9861_v31 = vpop.eup %7812  ;;  %v3440_v3 = vmul.f32 1.442695, %v3431_v42  ;;  %v2979_v45 = vmul.f32 1.442695, %v2967_v44 }
 0x907   : > { %v3454_v26 = vsel %vm651_vm0, %v9861_v31, 0.0 }
 0x908   : > { %7814 = vpow2.f32 %v3440_v3  ;;  %3455 = vadd.xlane.f32.xlu2 %v3454_v26  ;;  %v2956_v3 = vpop.xlane.xlu1 %2955 }
 0x909   : > { %v2968_v12 = vsub.f32 %v9784_v40, %v2956_v3 }
 0x90b   : > { %v3414_v33 = vpop.xlane.xlu2 %3413 }
 0x90c   : > { %v3432_v5 = vsub.f32 %v9804_v54, %v3414_v33  ;;  %v2981_v33 = vmul.f32 1.442695, %v2968_v12 }
 0x90d   : > { %v2959_v61 = vpop.xlane.xlu0 %2958 }
 0x90e   : > { %v9865_v35 = vpop.eup %7814  ;;  %v3442_v29 = vmul.f32 1.442695, %v3432_v5 }
 0x90f   : > { %v3457_v1 = vsel %vm651_vm0, %v9865_v35, 0.0 }
 0x910   : > { %3458 = vadd.xlane.f32.xlu2 %v3457_v1  ;;  %7816 = vpow2.f32 %v3442_v29 }
 0x911   : > { %7818 = vpow2.f32 %v2979_v45  ;;  %v2969_v45 = vsub.f32 %v9806_v22, %v2959_v61 }
 0x912   : > { %7820 = vpow2.f32 %v2981_v33 }
 0x913   : > { %v2983_v12 = vmul.f32 1.442695, %v2969_v45 }
 0x915   : > { %v2962_v42 = vpop.xlane.xlu0 %2961  ;;  %7822 = vpow2.f32 %v2983_v12 }
 0x916   : > { %v9871_v26 = vpop.eup %7816 }
 0x917   : > { %v3460_v1 = vsel %vm651_vm0, %v9871_v26, 0.0  ;;  %v9878_v5 = vpop.eup %7818 }
 0x918   : > { %v2999_v40 = vsel %vm651_vm0, %v9878_v5, 0.0  ;;  %v9887_v3 = vpop.eup %7820 }
 0x919   : > { %v3002_v33 = vsel %vm651_vm0, %v9887_v3, 0.0 }
 0x91d   : > { %v3420_v54 = vpop.xlane.xlu0 %3419 }
 0x923   : > { %v3423_v39 = vpop.xlane.xlu2 %3422 }
 0x924   : > { %v3435_v52 = vsub.f32 %v9820_v56, %v3423_v39 }
 0x927   : > { %3461 = vadd.xlane.f32.xlu1 %v3460_v1  ;;  %v2970_v1 = vsub.f32 %v9812_v53, %v2962_v42 }
 0x928   : > { %7600 = vrot.lane.b32.xlu2 %v8766_v9, %s8337_s19 }
 0x929   : > { %v2985_v61 = vmul.f32 1.442695, %v2970_v1  ;;  %v2966_v1 = vsub.f32 %v9798_v59, %v2950_v30  ;;  %v3448_v30 = vmul.f32 1.442695, %v3435_v52 }
 0x92b   : > { %v7586_v38 = vpop.permute.xlu2 %7585  ;;  %7824 = vpow2.f32 %v2985_v61  ;;  %v2977_v61 = vmul.f32 1.442695, %v2966_v1 }
 0x92c   : > { %v7587_v19 = vunpack.i.l.bf16 %v7586_v38  ;;  %v7588_v29 = vunpack.i.h.bf16 %v7586_v38 }
 0x92e   : > { %3656 = vmatpush.msra.mxu3 %v7587_v19  ;;  %v9894_v19 = vpop.eup %7822 }
 0x92f   : > { %3000 = vadd.xlane.f32.xlu1 %v2999_v40  ;;  %v3005_v45 = vsel %vm651_vm0, %v9894_v19, 0.0 }
 0x930   : > { %7605 = vrot.lane.b32.xlu2 %v8857_v60, %s8336_s8  ;;  %3657 = vmatpush.msra.mxu3 %v7588_v29  ;;  %v9885_v44 = vpop.permute.xlu0 %7590 }
 0x931   : > { %v9900_v42 = vpop.eup %7824 }
 0x932   : > { %v3008_v40 = vsel %vm651_vm0, %v9900_v42, 0.0 }
 0x937   : > { %3003 = vadd.xlane.f32.xlu1 %v3002_v33 }
 0x938   : > { %7610 = vrot.lane.b32.xlu2 %v8857_v60, %s8337_s19  ;;  %v7596_v22 = vpop.permute.xlu0 %7595  ;;  %s6738_s19 = scalar_lea.hbm %s12105_s16, %s7344_s26 }
 0x939   : > { %v7597_v38 = vunpack.i.l.bf16 %v7596_v22  ;;  %v7598_v29 = vunpack.i.h.bf16 %v7596_v22 }
 0x93b   : > { %3658 = vmatpush.msra.mxu3 %v7597_v38  ;;  %v3434_v38 = vsub.f32 %v9816_v21, %v3420_v54 }
 0x93d   : > { %3659 = vmatpush.msra.mxu3 %v7598_v29 }
 0x93f   : > { %v9898_v53 = vpop.xlane.xlu1 %2988  ;;  %3006 = vadd.xlane.f32.xlu1 %v3005_v45  ;;  %v3446_v45 = vmul.f32 1.442695, %v3434_v38 }
 0x940   : > { %vm3016_vm3 = vweird.f32 %v9898_v53 }
 0x947   : > { %v9904_v12 = vpop.xlane.xlu1 %2991  ;;  %3009 = vadd.xlane.f32.xlu1 %v3008_v40 }
 0x948   : > { %vm3031_vm8 = vweird.f32 %v9904_v12 }
 0x94f   : > { %v3417_v33 = vpop.xlane.xlu1 %3416 }
 0x950   : > { %v3433_v22 = vsub.f32 %v9840_v46, %v3417_v33 }
 0x952   : > { %v3444_v29 = vmul.f32 1.442695, %v3433_v22 }
 0x954   : > { %7826 = vpow2.f32 %v3444_v29 }
 0x955   : > { %7828 = vpow2.f32 %v2977_v61 }
 0x956   : > { %7830 = vpow2.f32 %v3446_v45 }
 0x957   : > { %v3426_v54 = vpop.xlane.xlu1 %3425  ;;  %7832 = vpow2.f32 %v3448_v30  ;;  %v7592_v30 = vunpack.i.l.bf16 %v9885_v44 }
 0x958   : > { %v3436_v56 = vsub.f32 %v9845_v48, %v3426_v54  ;;  %v7593_v54 = vunpack.i.h.bf16 %v9885_v44 }
 0x95a   : > { %v9909_v20 = vpop.eup %7826  ;;  %v3450_v33 = vmul.f32 1.442695, %v3436_v56 }
 0x95b   : > { %v9912_v4 = vpop.eup %7828  ;;  %v3463_v59 = vsel %vm651_vm0, %v9909_v20, 0.0 }
 0x95c   : > { %3464 = vadd.xlane.f32.xlu0 %v3463_v59  ;;  %v2996_v46 = vsel %vm651_vm0, %v9912_v4, 0.0  ;;  %v9918_v21 = vpop.eup %7830 }
 0x95d   : > { %v3466_v40 = vsel %vm651_vm0, %v9918_v21, 0.0  ;;  %v9926_v22 = vpop.eup %7832 }
 0x95e   : > { %v3469_v61 = vsel %vm651_vm0, %v9926_v22, 0.0 }
 0x960   : > { %4257 = vrot.lane.b32.xlu1 %v8782_v11, %s8338_s1 }
 0x961   : > { %2997 = vadd.xlane.f32.xlu2 %v2996_v46 }
 0x964   : > { %v3429_v39 = vpop.xlane.xlu2 %3428  ;;  %3467 = vadd.xlane.f32.xlu0 %v3466_v40 }
 0x965   : > { %v3437_v52 = vsub.f32 %v9849_v32, %v3429_v39 }
 0x967   : > { %v3452_v1 = vmul.f32 1.442695, %v3437_v52 }
 0x968   : > { %3786 = vrot.lane.b32.xlu1 %v8772_v51, %s8339_s17 }
 0x969   : > { %7834 = vpow2.f32 %v3452_v1 }
 0x96a   : > { %7836 = vpow2.f32 %v3450_v33  ;;  %v9955_v33 = vpop.xlane.xlu0 %2994 }
 0x96c   : > { %3470 = vadd.xlane.f32.xlu0 %v3469_v61 }
 0x96f   : > { %v9932_v48 = vpop.eup %7834  ;;  %v7581_v38 = vpop.permute.xlu1 %7580 }
 0x970   : > { %v3475_v32 = vsel %vm651_vm0, %v9932_v48, 0.0  ;;  %v7582_v29 = vunpack.i.l.bf16 %v7581_v38  ;;  %4251 = vrot.lane.b32.xlu1 %v8770_v24, %s8338_s1  ;;  %v9938_v45 = vpop.eup %7836  ;;  %v7583_v59 = vunpack.i.h.bf16 %v7581_v38 }
 0x971   : > { %3476 = vadd.xlane.f32.xlu2 %v3475_v32  ;;  %v3472_v46 = vsel %vm651_vm0, %v9938_v45, 0.0 }
 0x972   : > { %3187 = vmatpush.msra.mxu0 %v7582_v29  ;;  %7345 = vmatpush.msrb.mxu2 %v7582_v29 }
 0x974   : > { %3188 = vmatpush.msra.mxu0 %v7583_v59  ;;  %7346 = vmatpush.msrb.mxu2 %v7583_v59 }
 0x975   : > { %3473 = vadd.xlane.f32.xlu0 %v3472_v46 }
 0x976   : > { %3189 = vmatpush.msra.mxu0 %v7592_v30  ;;  %7347 = vmatpush.msrb.mxu2 %v7592_v30 }
 0x978   : > { %3780 = vrot.lane.b32.xlu1 %v8760_v7, %s8339_s17  ;;  %3190 = vmatpush.msra.mxu0 %v7593_v54 }
 0x979   : > { %7348 = vmatpush.msrb.mxu2 %v7593_v54 }
 0x97b   : > { %v3456_v39 = vpop.xlane.xlu2 %3455 }
 0x97c   : > { %7838 = vrcp.f32 %v3456_v39  ;;  %v3489_v37 = vand.u32 2147483648, %v3456_v39  ;;  %vm3483_vm15 = vweird.f32 %v3456_v39  ;;  %v3487_v23 = vand.u32 2147483647, %v3456_v39 }
 0x97d   : > { %7840 = vrcp.f32 %v9898_v53 }
 0x97e   : > { %7842 = vrcp.f32 %v9904_v12  ;;  %vm3488_vm2 = vcmp.eq.f32.partialorder %v3487_v23, 8.507059e+37 }
 0x980   : > { %4245 = vrot.lane.b32.xlu1 %v8758_v6, %s8338_s1 }
 0x982   : > { %v7839_v56 = vpop.eup %7838 }
 0x983   : > { %v3479_v40 = vmul.f32 %v7839_v56, %v3456_v39  ;;  %v9950_v52 = vpop.xlane.xlu2 %3458  ;;  %v9953_v1 = vpop.eup %7840  ;;  %vm3484_vm14 = vweird.f32 %v7839_v56 }
 0x984   : > { %7844 = vrcp.f32 %v9950_v52  ;;  %v9957_v61 = vpop.eup %7842  ;;  %v3012_v32 = vmul.f32 %v9953_v1, %v9898_v53  ;;  %vm9976_vm1 = vmor %vm3483_vm15, %vm3484_vm14  ;;  %vm3017_vm4 = vweird.f32 %v9953_v1  ;;  %vm3498_vm10 = vweird.f32 %v9950_v52 }
 0x985   : > { %v3480_v44 = vsub.f32 1.0, %v3479_v40  ;;  %7846 = vrcp.f32 %v9955_v33  ;;  %v3027_v59 = vmul.f32 %v9957_v61, %v9904_v12  ;;  %vm3032_vm5 = vweird.f32 %v9957_v61  ;;  %vm10006_vm7 = vmor %vm3016_vm3, %vm3017_vm4 }
 0x986   : > { %v3013_v40 = vsub.f32 1.0, %v3012_v32  ;;  %vm10016_vm9 = vmor %vm3031_vm8, %vm3032_vm5 }
 0x987   : > { %v3481_v38 = vmul.f32 %v7839_v56, %v3480_v44  ;;  %v3028_v27 = vsub.f32 1.0, %v3027_v59  ;;  %v3490_v59 = vor.u32 1.1754944e-38, %v3489_v37  ;;  %v3020_v37 = vand.u32 2147483647, %v9898_v53 }
 0x988   : > { %3760 = vrot.lane.b32.xlu1 %v8800_v13, %s8339_s17 }
 0x989   : > { %3788 = vrot.lane.b32.xlu2 %v8780_v10, %s8339_s17  ;;  %3790 = vrot.lane.b32.xlu0 %v8782_v11, %s8339_s17  ;;  %v3482_v44 = vadd.f32 %v7839_v56, %v3481_v38  ;;  %v3014_v11 = vmul.f32 %v9953_v1, %v3013_v40  ;;  %v3029_v38 = vmul.f32 %v9957_v61, %v3028_v27  ;;  %vm3021_vm13 = vcmp.eq.f32.partialorder %v3020_v37, 8.507059e+37 }
 0x98a   : > { %v9964_v29 = vpop.eup %7844 }
 0x98b   : > { %v3494_v30 = vmul.f32 %v9964_v29, %v9950_v52  ;;  %v7601_v46 = vpop.permute.xlu2 %7600  ;;  %v9974_v62 = vpop.eup %7846  ;;  %v3486_v32 = vsel %vm9976_vm1, %v7839_v56, %v3482_v44  ;;  %v3015_v27 = vadd.f32 %v9953_v1, %v3014_v11  ;;  %v3030_v23 = vadd.f32 %v9957_v61, %v3029_v38 }
 0x98c   : > { %v7602_v54 = vunpack.i.l.bf16 %v7601_v46  ;;  %v7603_v34 = vunpack.i.h.bf16 %v7601_v46  ;;  %v3042_v39 = vmul.f32 %v9974_v62, %v9955_v33  ;;  %v3491_v56 = vsel %vm3488_vm2, %v3490_v59, %v3486_v32 }
 0x98d   : > { %v3495_v50 = vsub.f32 1.0, %v3494_v30  ;;  %v3022_v30 = vand.u32 2147483648, %v9898_v53  ;;  %vm3499_vm6 = vweird.f32 %v9964_v29  ;;  %v3035_v11 = vand.u32 2147483647, %v9904_v12 }
 0x98e   : > { %3191 = vmatpush.msra.mxu0 %v7602_v54  ;;  %7349 = vmatpush.msrb.mxu2 %v7602_v54  ;;  %v3492_v54 = vmul.f32 %v9861_v31, %v3491_v56  ;;  %v3504_v32 = vand.u32 2147483648, %v9950_v52  ;;  %v3019_v31 = vsel %vm10006_vm7, %v9953_v1, %v3015_v27  ;;  %v3502_v53 = vand.u32 2147483647, %v9950_v52  ;;  %vm10031_vm12 = vmor %vm3498_vm10, %vm3499_vm6 }
 0x98f   : > { %vm3036_vm14 = vcmp.eq.f32.partialorder %v3035_v11, 8.507059e+37  ;;  %vm3047_vm1 = vweird.f32 %v9974_v62  ;;  %vm3046_vm2 = vweird.f32 %v9955_v33 }
 0x990   : > { %3192 = vmatpush.msra.mxu0 %v7603_v34  ;;  %7350 = vmatpush.msrb.mxu2 %v7603_v34  ;;  %v3496_v34 = vmul.f32 %v9964_v29, %v3495_v50  ;;  %v3043_v50 = vsub.f32 1.0, %v3042_v39  ;;  %v3034_v39 = vsel %vm10016_vm9, %v9957_v61, %v3030_v23  ;;  %v3505_v56 = vor.u32 1.1754944e-38, %v3504_v32  ;;  %vm3048_vm3 = vmor %vm3046_vm2, %vm3047_vm1 }
 0x991   : > { %4253 = vrot.lane.b32.xlu2 %v8772_v51, %s8338_s1  ;;  %4229 = vrot.lane.b32.xlu1 %v8806_v14, %s8338_s1  ;;  %vm3503_vm15 = vcmp.eq.f32.partialorder %v3502_v53, 8.507059e+37 }
 0x992   : > { %4255 = vrot.lane.b32.xlu0 %v8780_v10, %s8338_s1  ;;  %v3037_v10 = vand.u32 2147483648, %v9904_v12  ;;  %v3497_v40 = vadd.f32 %v9964_v29, %v3496_v34  ;;  %v3023_v12 = vor.u32 1.1754944e-38, %v3022_v30  ;;  %v3044_v1 = vmul.f32 %v9974_v62, %v3043_v50 }
 0x993   : > { %v7606_v47 = vpop.permute.xlu2 %7605 }
 0x994   : > { %v7607_v51 = vunpack.i.l.bf16 %v7606_v47  ;;  %v7608_v46 = vunpack.i.h.bf16 %v7606_v47  ;;  %v3038_v52 = vor.u32 1.1754944e-38, %v3037_v10  ;;  %v3501_v61 = vsel %vm10031_vm12, %v9964_v29, %v3497_v40 }
 0x995   : > { %v3024_v47 = vsel %vm3021_vm13, %v3023_v12, %v3019_v31  ;;  %v3045_v23 = vadd.f32 %v9974_v62, %v3044_v1  ;;  %v3052_v29 = vand.u32 2147483648, %v9955_v33  ;;  %v3050_v10 = vand.u32 2147483647, %v9955_v33 }
 0x996   : > { %3660 = vmatpush.msra.mxu3 %v7607_v51  ;;  %v3039_v30 = vsel %vm3036_vm14, %v3038_v52, %v3034_v39  ;;  %v3025_v50 = vmul.f32 %v9832_v28, %v3024_v47 }
 0x997   : > { %v3049_v28 = vsel %vm3048_vm3, %v9974_v62, %v3045_v23  ;;  %v3053_v40 = vor.u32 1.1754944e-38, %v3052_v29  ;;  %vm3051_vm4 = vcmp.eq.f32.partialorder %v3050_v10, 8.507059e+37 }
 0x998   : > { %3661 = vmatpush.msra.mxu3 %v7608_v46  ;;  %v3040_v46 = vmul.f32 %v9836_v0, %v3039_v30  ;;  %v879_v30 = vld [vmem:[#allocation7 + $0x20] sm:$0xff] }
 0x999   : > { %3782 = vrot.lane.b32.xlu2 %v8762_v8, %s8339_s17  ;;  %7098 = vmatmul.msk.f32.vlgmr.msra.gmra.mxu3 %vm651_vm0, %v3492_v54  ;;  %v3054_v33 = vsel %vm3051_vm4, %v3053_v40, %v3049_v28 }
 0x99a   : > { %3766 = vrot.lane.b32.xlu1 %v8818_v16, %s8339_s17  ;;  %3784 = vrot.lane.b32.xlu0 %v8770_v24, %s8339_s17  ;;  %v3462_v51 = vpop.xlane.xlu1 %3461  ;;  %v3506_v24 = vsel %vm3503_vm15, %v3505_v56, %v3501_v61  ;;  %v3055_v32 = vmul.f32 %v9851_v43, %v3054_v33 }
 0x99b   : > { %v7611_v34 = vpop.permute.xlu2 %7610  ;;  %7848 = vrcp.f32 %v3462_v51  ;;  %v3507_v54 = vmul.f32 %v9865_v35, %v3506_v24  ;;  %v3519_v35 = vand.u32 2147483648, %v3462_v51  ;;  %v3517_v31 = vand.u32 2147483647, %v3462_v51 }
 0x99c   : > { %v7612_v27 = vunpack.i.l.bf16 %v7611_v34  ;;  %v7613_v37 = vunpack.i.h.bf16 %v7611_v34  ;;  %vm3513_vm6 = vweird.f32 %v3462_v51 }
 0x99d   : > { %vm3518_vm8 = vcmp.eq.f32.partialorder %v3517_v31, 8.507059e+37 }
 0x99e   : > { %3193 = vmatpush.msra.mxu0 %v7612_v27  ;;  %7351 = vmatpush.msrb.mxu2 %v7612_v27 }
 0x9a0   : > { %3194 = vmatpush.msra.mxu0 %v7613_v37  ;;  %7352 = vmatpush.msrb.mxu2 %v7613_v37 }
 0x9a1   : > { %4247 = vrot.lane.b32.xlu2 %v8760_v7, %s8338_s1  ;;  %7066 = vmatmul.msk.f32.vlgmr.msra.gmra.mxu0 %vm651_vm0, %v3025_v50  ;;  %v7849_v0 = vpop.eup %7848 }
 0x9a2   : > { %4235 = vrot.lane.b32.xlu1 %v8822_v17, %s8338_s1  ;;  %7067 = vmatmul.msk.f32.vlgmr.msrb.gmra.mxu2 %vm651_vm0, %v3040_v46  ;;  %v3509_v7 = vmul.f32 %v7849_v0, %v3462_v51  ;;  %vm3514_vm5 = vweird.f32 %v7849_v0  ;;  %v10068_v53 = vpop.xlane.xlu1 %3000 }
 0x9a3   : > { %4249 = vrot.lane.b32.xlu0 %v8762_v8, %s8338_s1  ;;  %7099 = vmatmul.msk.f32.gmra.mxu3 %vm651_vm0, %v3507_v54  ;;  %vm3515_vm7 = vmor %vm3513_vm6, %vm3514_vm5  ;;  %v3520_v8 = vor.u32 1.1754944e-38, %v3519_v35  ;;  %7850 = vrcp.f32 %v10068_v53  ;;  %vm3076_vm5 = vweird.f32 %v10068_v53 }
 0x9a4   : > { %v3510_v44 = vsub.f32 1.0, %v3509_v7  ;;  %3259 = vmatpush.msrb.mxu0 %v879_v30 }
 0x9a6   : > { %v3511_v11 = vmul.f32 %v7849_v0, %v3510_v44 }
 0x9a8   : > { %v3512_v62 = vadd.f32 %v7849_v0, %v3511_v11 }
 0x9a9   : > { %3776 = vrot.lane.b32.xlu2 %v8751_v2, %s8339_s17 }
 0x9aa   : > { %3772 = vrot.lane.b32.xlu1 %v12168_v36, %s8339_s17  ;;  %7068 = vmatmul.msk.f32.gmra.mxu2 %vm651_vm0, %v3055_v32  ;;  %v3516_v38 = vsel %vm3515_vm7, %v7849_v0, %v3512_v62  ;;  %v10078_v39 = vpop.xlane.xlu1 %3003 }
 0x9ab   : > { %3778 = vrot.lane.b32.xlu0 %v8758_v6, %s8339_s17  ;;  %v3521_v43 = vsel %vm3518_vm8, %v3520_v8, %v3516_v38  ;;  %v880_v6 = vld [vmem:[#allocation7 + $0x28] sm:$0xff] }
 0x9ac   : > { %v3522_v12 = vmul.f32 %v9871_v26, %v3521_v43  ;;  %3726 = vmatpush.msra.mxu2 %v880_v6 }
 0x9ae   : > { %7100 = vmatmul.msk.f32.gmra.mxu3 %vm651_vm0, %v3522_v12 }
 0x9b1   : > { %4227 = vrot.lane.b32.xlu2 %v8800_v13, %s8338_s1 }
 0x9b2   : > { %4241 = vrot.lane.b32.xlu1 %v8834_v41, %s8338_s1  ;;  %v10086_v13 = vpop.xlane.xlu1 %3006 }
 0x9b3   : > { %4243 = vrot.lane.b32.xlu0 %v8751_v2, %s8338_s1 }
 0x9b9   : > { %3764 = vrot.lane.b32.xlu2 %v8812_v15, %s8339_s17 }
 0x9ba   : > { %v10095_v2 = vpop.xlane.xlu1 %3009 }
 0x9bb   : > { %3762 = vrot.lane.b32.xlu0 %v8806_v14, %s8339_s17  ;;  %v10099_v14 = vpop.eup %7850 }
 0x9bc   : > { %v3072_v1 = vmul.f32 %v10099_v14, %v10068_v53  ;;  %vm3077_vm10 = vweird.f32 %v10099_v14 }
 0x9bd   : > { %vm10155_vm6 = vmor %vm3076_vm5, %vm3077_vm10 }
 0x9be   : > { %v3073_v59 = vsub.f32 1.0, %v3072_v1  ;;  %v3082_v1 = vand.u32 2147483648, %v10068_v53 }
 0x9c0   : > { %v3074_v56 = vmul.f32 %v10099_v14, %v3073_v59  ;;  %v3080_v59 = vand.u32 2147483647, %v10068_v53 }
 0x9c1   : > { %4233 = vrot.lane.b32.xlu2 %v8818_v16, %s8338_s1 }
 0x9c2   : > { %v3075_v28 = vadd.f32 %v10099_v14, %v3074_v56  ;;  %vm3081_vm10 = vcmp.eq.f32.partialorder %v3080_v59, 8.507059e+37 }
 0x9c3   : > { %4231 = vrot.lane.b32.xlu0 %v8812_v15, %s8338_s1 }
 0x9c9   : > { %3770 = vrot.lane.b32.xlu2 %v8826_v18, %s8339_s17 }
 0x9cb   : > { %3768 = vrot.lane.b32.xlu0 %v8822_v17, %s8339_s17 }
 0x9cf   : > { %v3465_v26 = vpop.xlane.xlu0 %3464 }
 0x9d0   : > { %7852 = vrcp.f32 %v3465_v26  ;;  %v3534_v27 = vand.u32 2147483648, %v3465_v26  ;;  %v3532_v23 = vand.u32 2147483647, %v3465_v26  ;;  %vm3528_vm12 = vweird.f32 %v3465_v26 }
 0x9d1   : > { %4239 = vrot.lane.b32.xlu2 %v12168_v36, %s8338_s1 }
 0x9d2   : > { %v4258_v15 = vpop.permute.xlu1 %4257  ;;  %v3535_v0 = vor.u32 1.1754944e-38, %v3534_v27  ;;  %vm3533_vm15 = vcmp.eq.f32.partialorder %v3532_v23, 8.507059e+37  ;;  %v3083_v27 = vor.u32 1.1754944e-38, %v3082_v1 }
 0x9d3   : > { %4237 = vrot.lane.b32.xlu0 %v8826_v18, %s8338_s1  ;;  %7146 = vmatpush.xpose.msk.msrb.mxu2 %vm989_vm11, %v4258_v15 }
 0x9d4   : > { %v2998_v16 = vpop.xlane.xlu2 %2997 }
 0x9d5   : > { %7854 = vrcp.f32 %v2998_v16  ;;  %v3067_v54 = vand.u32 2147483648, %v2998_v16  ;;  %vm3061_vm1 = vweird.f32 %v2998_v16 }
 0x9d6   : > { %7856 = vrcp.f32 %v10078_v39  ;;  %v7853_v17 = vpop.eup %7852 }
 0x9d7   : > { %v3524_v52 = vmul.f32 %v7853_v17, %v3465_v26  ;;  %v10107_v36 = vpop.xlane.xlu0 %3467  ;;  %vm3529_vm9 = vweird.f32 %v7853_v17  ;;  %v3068_v8 = vor.u32 1.1754944e-38, %v3067_v54 }
 0x9d8   : > { %7858 = vrcp.f32 %v10107_v36  ;;  %vm10119_vm13 = vmor %vm3528_vm12, %vm3529_vm9  ;;  %v3549_v38 = vand.u32 2147483648, %v10107_v36  ;;  %v3547_v15 = vand.u32 2147483647, %v10107_v36  ;;  %vm3543_vm7 = vweird.f32 %v10107_v36 }
 0x9d9   : > { %v3525_v61 = vsub.f32 1.0, %v3524_v52  ;;  %7860 = vrcp.f32 %v10086_v13 }
 0x9da   : > { %v3550_v56 = vor.u32 1.1754944e-38, %v3549_v38  ;;  %vm3548_vm9 = vcmp.eq.f32.partialorder %v3547_v15, 8.507059e+37 }
 0x9db   : > { %v7855_v34 = vpop.eup %7854  ;;  %3774 = vrot.lane.b32.xlu0 %v8834_v41, %s8339_s17  ;;  %v3526_v51 = vmul.f32 %v7853_v17, %v3525_v61  ;;  %v3065_v41 = vand.u32 2147483647, %v2998_v16  ;;  %s6739_s17 = sshll.u32 %s12029_s28, 4  ;;  %s6740_s17 = int_to_ptr.vmem [resolvable:$true] %s6739_s17 }
 0x9dc   : > { %v10112_v18 = vpop.eup %7856  ;;  %v3057_v47 = vmul.f32 %v7855_v34, %v2998_v16  ;;  %vm3062_vm14 = vweird.f32 %v7855_v34 }
 0x9dd   : > { %v3087_v24 = vmul.f32 %v10112_v18, %v10078_v39  ;;  %v3527_v50 = vadd.f32 %v7853_v17, %v3526_v51  ;;  %vm10130_vm2 = vmor %vm3061_vm1, %vm3062_vm14  ;;  %vm10134_vm3 = vcmp.eq.f32.partialorder %v3065_v41, 8.507059e+37  ;;  %v3079_v51 = vsel %vm10155_vm6, %v10099_v14, %v3075_v28 }
 0x9de   : > { %v3058_v37 = vsub.f32 1.0, %v3057_v47  ;;  %v7859_v29 = vpop.eup %7858  ;;  %vm3092_vm12 = vweird.f32 %v10112_v18  ;;  %v3084_v46 = vsel %vm3081_vm10, %v3083_v27, %v3079_v51  ;;  %vm3091_vm14 = vweird.f32 %v10078_v39 }
 0x9df   : > { %v3539_v40 = vmul.f32 %v7859_v29, %v10107_v36  ;;  %v10125_v7 = vpop.xlane.xlu0 %3470  ;;  %v3531_v33 = vsel %vm10119_vm13, %v7853_v17, %v3527_v50  ;;  %v3088_v11 = vsub.f32 1.0, %v3087_v24  ;;  %vm3544_vm4 = vweird.f32 %v7859_v29  ;;  %v10146_v16 = vpop.eup %7860 }
 0x9e0   : > { %v3059_v10 = vmul.f32 %v7855_v34, %v3058_v37  ;;  %7862 = vrcp.f32 %v10125_v7  ;;  %v3536_v62 = vsel %vm3533_vm15, %v3535_v0, %v3531_v33  ;;  %vm3545_vm8 = vmor %vm3543_vm7, %vm3544_vm4  ;;  %v3102_v53 = vmul.f32 %v10146_v16, %v10086_v13 }
 0x9e1   : > { %v3540_v31 = vsub.f32 1.0, %v3539_v40  ;;  %v3537_v43 = vmul.f32 %v9909_v20, %v3536_v62  ;;  %v3089_v47 = vmul.f32 %v10112_v18, %v3088_v11  ;;  %v3564_v50 = vand.u32 2147483648, %v10125_v7  ;;  %vm10191_vm15 = vmor %vm3091_vm14, %vm3092_vm12 }
 0x9e2   : > { %v3060_v44 = vadd.f32 %v7855_v34, %v3059_v10  ;;  %v3562_v54 = vand.u32 2147483647, %v10125_v7  ;;  %v3097_v0 = vand.u32 2147483648, %v10078_v39  ;;  %v3095_v33 = vand.u32 2147483647, %v10078_v39 }
 0x9e3   : > { %v3541_v26 = vmul.f32 %v7859_v29, %v3540_v31  ;;  %7101 = vmatmul.msk.f32.gmra.mxu3 %vm651_vm0, %v3537_v43  ;;  %v3090_v14 = vadd.f32 %v10112_v18, %v3089_v47  ;;  %vm3558_vm1 = vweird.f32 %v10125_v7  ;;  %v3085_v11 = vmul.f32 %v9878_v5, %v3084_v46 }
 0x9e4   : > { %v10140_v12 = vpop.xlane.xlu2 %3476  ;;  %v3064_v6 = vsel %vm10130_vm2, %v7855_v34, %v3060_v44  ;;  %v3565_v35 = vor.u32 1.1754944e-38, %v3564_v50  ;;  %v3098_v38 = vor.u32 1.1754944e-38, %v3097_v0  ;;  %vm3096_vm4 = vcmp.eq.f32.partialorder %v3095_v33, 8.507059e+37 }
 0x9e5   : > { %7864 = vrcp.f32 %v10140_v12  ;;  %v3069_v20 = vsel %vm10134_vm3, %v3068_v8, %v3064_v6  ;;  %v3542_v52 = vadd.f32 %v7859_v29, %v3541_v26  ;;  %v3094_v32 = vsel %vm10191_vm15, %v10112_v18, %v3090_v14 }
 0x9e6   : > { %v3070_v34 = vmul.f32 %v9912_v4, %v3069_v20  ;;  %v7863_v61 = vpop.eup %7862  ;;  %7866 = vrcp.f32 %v10095_v2  ;;  %vm3563_vm3 = vcmp.eq.f32.partialorder %v3562_v54, 8.507059e+37  ;;  %v3112_v18 = vand.u32 2147483648, %v10086_v13 }
 0x9e7   : > { %v3554_v36 = vmul.f32 %v7863_v61, %v10125_v7  ;;  %v3546_v4 = vsel %vm3545_vm8, %v7859_v29, %v3542_v52  ;;  %v3103_v29 = vsub.f32 1.0, %v3102_v53  ;;  %vm3559_vm13 = vweird.f32 %v7863_v61 }
 0x9e8   : > { %7069 = vmatmul.msk.f32.gmra.mxu2 %vm651_vm0, %v3070_v34  ;;  %v10172_v30 = vpop.xlane.xlu0 %3473  ;;  %v3551_v23 = vsel %vm3548_vm9, %v3550_v56, %v3546_v4  ;;  %vm3560_vm2 = vmor %vm3558_vm1, %vm3559_vm13  ;;  %v3099_v15 = vsel %vm3096_vm4, %v3098_v38, %v3094_v32  ;;  %vm3107_vm5 = vweird.f32 %v10146_v16  ;;  %vm3106_vm7 = vweird.f32 %v10086_v13 }
 0x9e9   : > { %v3555_v24 = vsub.f32 1.0, %v3554_v36  ;;  %7868 = vrcp.f32 %v10172_v30  ;;  %v3552_v41 = vmul.f32 %v9918_v21, %v3551_v23  ;;  %v3104_v62 = vmul.f32 %v10146_v16, %v3103_v29  ;;  %vm10217_vm8 = vmor %vm3106_vm7, %vm3107_vm5  ;;  %v3787_v29 = vpop.permute.xlu1 %3786 }
 0x9ea   : > { %v3579_v17 = vand.u32 2147483648, %v10172_v30  ;;  %v3577_v34 = vand.u32 2147483647, %v10172_v30  ;;  %vm3573_vm9 = vweird.f32 %v10172_v30  ;;  %v3113_v51 = vor.u32 1.1754944e-38, %v3112_v18 }
 0x9eb   : > { %v10174_v37 = vpop.eup %7864  ;;  %v3556_v10 = vmul.f32 %v7863_v61, %v3555_v24  ;;  %7102 = vmatmul.msk.f32.gmra.mxu3 %vm651_vm0, %v3552_v41  ;;  %v3105_v1 = vadd.f32 %v10146_v16, %v3104_v62  ;;  %vm3588_vm15 = vweird.f32 %v10140_v12  ;;  %v3592_v24 = vand.u32 2147483647, %v10140_v12 }
 0x9ec   : > { %v10182_v28 = vpop.eup %7866  ;;  %v3584_v40 = vmul.f32 %v10174_v37, %v10140_v12  ;;  %v3580_v36 = vor.u32 1.1754944e-38, %v3579_v17  ;;  %v3789_v4 = vpop.permute.xlu2 %3788  ;;  %vm3589_vm12 = vweird.f32 %v10174_v37  ;;  %vm3578_vm13 = vcmp.eq.f32.partialorder %v3577_v34, 8.507059e+37 }
 0x9ed   : > { %v3557_v44 = vadd.f32 %v7863_v61, %v3556_v10  ;;  %v3117_v8 = vmul.f32 %v10182_v28, %v10095_v2  ;;  %vm3122_vm1 = vweird.f32 %v10182_v28  ;;  %v3127_v46 = vand.u32 2147483648, %v10095_v2 }
 0x9ee   : > { %v3585_v7 = vsub.f32 1.0, %v3584_v40  ;;  %vm3593_vm5 = vcmp.eq.f32.partialorder %v3592_v24, 8.507059e+37 }
 0x9ef   : > { %v7869_v31 = vpop.eup %7868  ;;  %v3561_v39 = vsel %vm3560_vm2, %v7863_v61, %v3557_v44  ;;  %v3118_v20 = vsub.f32 1.0, %v3117_v8  ;;  %v3100_v61 = vmul.f32 %v9887_v3, %v3099_v15  ;;  %vm3590_vm2 = vmor %vm3588_vm15, %vm3589_vm12  ;;  %v3128_v21 = vor.u32 1.1754944e-38, %v3127_v46 }
 0x9f0   : > { %7070 = vmatmul.msk.f32.gmra.mxu2 %vm651_vm0, %v3085_v11  ;;  %v3569_v5 = vmul.f32 %v7869_v31, %v10172_v30  ;;  %v3566_v43 = vsel %vm3563_vm3, %v3565_v35, %v3561_v39  ;;  %v3586_v59 = vmul.f32 %v10174_v37, %v3585_v7  ;;  %vm3574_vm6 = vweird.f32 %v7869_v31 }
 0x9f1   : > { %v3567_v6 = vmul.f32 %v9926_v22, %v3566_v43  ;;  %v3110_v22 = vand.u32 2147483647, %v10086_v13  ;;  %v3119_v53 = vmul.f32 %v10182_v28, %v3118_v20  ;;  %vm3575_vm10 = vmor %vm3573_vm9, %vm3574_vm6  ;;  %v3109_v13 = vsel %vm10217_vm8, %v10146_v16, %v3105_v1 }
 0x9f2   : > { %v3570_v26 = vsub.f32 1.0, %v3569_v5  ;;  %v3587_v3 = vadd.f32 %v10174_v37, %v3586_v59  ;;  %v3594_v30 = vand.u32 2147483648, %v10140_v12  ;;  %vm3121_vm3 = vweird.f32 %v10095_v2 }
 0x9f3   : > { %7103 = vmatmul.msk.f32.gmra.mxu3 %vm651_vm0, %v3567_v6  ;;  %vm3111_vm14 = vcmp.eq.f32.partialorder %v3110_v22, 8.507059e+37  ;;  %v3120_v41 = vadd.f32 %v10182_v28, %v3119_v53  ;;  %vm3123_vm4 = vmor %vm3121_vm3, %vm3122_vm1 }
 0x9f4   : > { %v3571_v52 = vmul.f32 %v7869_v31, %v3570_v26  ;;  %v3114_v50 = vsel %vm3111_vm14, %v3113_v51, %v3109_v13  ;;  %v3591_v10 = vsel %vm3590_vm2, %v10174_v37, %v3587_v3  ;;  %v3595_v12 = vor.u32 1.1754944e-38, %v3594_v30  ;;  %v4254_v33 = vpop.permute.xlu2 %4253 }
 0x9f5   : > { %v3115_v54 = vmul.f32 %v9894_v19, %v3114_v50  ;;  %v3124_v40 = vsel %vm3123_vm4, %v10182_v28, %v3120_v41 }
 0x9f6   : > { %v3572_v56 = vadd.f32 %v7869_v31, %v3571_v52  ;;  %v3596_v0 = vsel %vm3593_vm5, %v3595_v12, %v3591_v10 }
 0x9f7   : > { %v3597_v37 = vmul.f32 %v9932_v48, %v3596_v0 }
 0x9f8   : > { %7071 = vmatmul.msk.f32.gmra.mxu2 %vm651_vm0, %v3100_v61  ;;  %v3576_v27 = vsel %vm3575_vm10, %v7869_v31, %v3572_v56 }
 0x9f9   : > { %v3581_v23 = vsel %vm3578_vm13, %v3580_v36, %v3576_v27 }
 0x9fa   : > { %v3582_v14 = vmul.f32 %v9938_v45, %v3581_v23  ;;  %v3125_v45 = vand.u32 2147483647, %v10095_v2  ;;  %v4252_v2 = vpop.permute.xlu1 %4251 }
 0x9fb   : > { %v3791_v16 = vpop.permute.xlu0 %3790 }
 0x9fc   : > { %7104 = vmatmul.msk.f32.gmra.mxu3 %vm651_vm0, %v3582_v14  ;;  %7114 = vmatpush.xpose.msk.msra.mxu0 %vm989_vm11, %v3791_v16  ;;  %vm3126_vm6 = vcmp.eq.f32.partialorder %v3125_v45, 8.507059e+37  ;;  %v3783_v28 = vpop.permute.xlu2 %3782 }
 0x9fd   : > { %v3129_v44 = vsel %vm3126_vm6, %v3128_v21, %v3124_v40 }
 0x9fe   : > { %v3130_v19 = vmul.f32 %v9900_v42, %v3129_v44 }
 0xa00   : > { %7072 = vmatmul.msk.f32.gmra.mxu2 %vm651_vm0, %v3115_v54  ;;  %7115 = vmatpush.xpose.msk.msra.mxu0 %vm989_vm11, %v3789_v4 }
 0xa02   : > { %v3781_v48 = vpop.permute.xlu1 %3780 }
 0xa04   : > { %v4256_v11 = vpop.permute.xlu0 %4255  ;;  %7105 = vmatmul.msk.f32.gmra.mxu3 %vm651_vm0, %v3597_v37  ;;  %7116 = vmatpush.xpose.msk.msra.mxu0 %vm989_vm11, %v3787_v29  ;;  %v4248_v42 = vpop.permute.xlu2 %4247 }
 0xa05   : > { %7147 = vmatpush.xpose.msk.msrb.mxu2 %vm989_vm11, %v4256_v11 }
 0xa08   : > { %7073 = vmatmul.msk.f32.gmra.mxu2 %vm651_vm0, %v3130_v19 }
 0xa09   : > { %7148 = vmatpush.xpose.msk.msrb.mxu2 %vm989_vm11, %v4254_v33 }
 0xa0a   : > { %v4246_v31 = vpop.permute.xlu1 %4245 }
 0xa0c   : > { %v3785_v35 = vpop.permute.xlu0 %3784  ;;  %v3777_v38 = vpop.permute.xlu2 %3776 }
 0xa0d   : > { %7117 = vmatpush.xpose.msk.msra.mxu0 %vm989_vm11, %v3785_v35  ;;  %7149 = vmatpush.xpose.msk.msrb.mxu2 %vm989_vm11, %v4252_v2 }
 0xa11   : > { %7118 = vmatpush.xpose.msk.msra.mxu0 %vm989_vm11, %v3783_v28 }
 0xa12   : > { %v3761_v47 = vpop.permute.xlu1 %3760 }
 0xa14   : > { %v4228_v56 = vpop.permute.xlu2 %4227 }
 0xa15   : > { %v4250_v32 = vpop.permute.xlu0 %4249  ;;  %7119 = vmatpush.xpose.msk.msra.mxu0 %vm989_vm11, %v3781_v48 }
 0xa16   : > { %7150 = vmatpush.xpose.msk.msrb.mxu2 %vm989_vm11, %v4250_v32 }
 0xa1a   : > { %7151 = vmatpush.xpose.msk.msrb.mxu2 %vm989_vm11, %v4248_v42  ;;  %v4230_v53 = vpop.permute.xlu1 %4229 }
 0xa1c   : > { %v3663_v8 = vpop.f32.mrf.mxu3  ;;  %v3765_v36 = vpop.permute.xlu2 %3764 }
 0xa1d   : > { %v3779_v62 = vpop.permute.xlu0 %3778  ;;  %7106 = vmatmul.msk.f32.vlgmr.msra.gmra.mxu2 %vm989_vm11, %v3663_v8 }
 0xa1e   : > { %7120 = vmatpush.xpose.msk.msra.mxu0 %vm989_vm11, %v3779_v62  ;;  %7152 = vmatpush.xpose.msk.msrb.mxu2 %vm989_vm11, %v4246_v31  ;;  %v3196_v39 = vpop.f32.mrf.mxu0 }
 0xa1f   : > { %7074 = vmatmul.msk.f32.vlgmr.msrb.gmra.mxu0 %vm989_vm11, %v3196_v39 }
 0xa22   : > { %7121 = vmatpush.xpose.msk.msra.mxu0 %vm989_vm11, %v3777_v38  ;;  %v3767_v13 = vpop.permute.xlu1 %3766 }
 0xa24   : > { %v4234_v3 = vpop.permute.xlu2 %4233 }
 0xa25   : > { %v4244_v7 = vpop.permute.xlu0 %4243  ;;  %v3199_v5 = vpop.f32.mrf.mxu2 }
 0xa26   : > { %7153 = vmatpush.xpose.msk.msrb.mxu2 %vm989_vm11, %v4244_v7  ;;  %v3666_v43 = vpop.f32.mrf.mxu3 }
 0xa27   : > { %7107 = vmatmul.msk.f32.gmra.mxu2 %vm989_vm11, %v3666_v43  ;;  %7075 = vmatmul.msk.f32.gmra.mxu0 %vm989_vm11, %v3199_v5 }
 0xa2a   : > { %v4236_v30 = vpop.permute.xlu1 %4235 }
 0xa2c   : > { %v3771_v23 = vpop.permute.xlu2 %3770 }
 0xa2d   : > { %v3202_v6 = vpop.f32.mrf.mxu2  ;;  %v3763_v51 = vpop.permute.xlu0 %3762 }
 0xa2f   : > { %7076 = vmatmul.msk.f32.gmra.mxu0 %vm989_vm11, %v3202_v6 }
 0xa31   : > { %v3669_v18 = vpop.f32.mrf.mxu3 }
 0xa32   : > { %7108 = vmatmul.msk.f32.gmra.mxu2 %vm989_vm11, %v3669_v18  ;;  %v3773_v14 = vpop.permute.xlu1 %3772 }
 0xa34   : > { %v4240_v50 = vpop.permute.xlu2 %4239 }
 0xa35   : > { %v4232_v4 = vpop.permute.xlu0 %4231 }
 0xa3a   : > { %v4242_v41 = vpop.permute.xlu1 %4241 }
 0xa3d   : > { %v3769_v27 = vpop.permute.xlu0 %3768 }
 0xa45   : > { %v4238_v24 = vpop.permute.xlu0 %4237 }
 0xa4d   : > { %v3775_v16 = vpop.permute.xlu0 %3774 }
 0xa66   : > { %v3672_v26 = vpop.f32.mrf.mxu3 }
 0xa67   : > { %7109 = vmatmul.msk.f32.gmra.mxu2 %vm989_vm11, %v3672_v26 }
 0xa6b   : > { %v3205_v15 = vpop.f32.mrf.mxu2 }
 0xa6c   : > { %7077 = vmatmul.msk.f32.gmra.mxu0 %vm989_vm11, %v3205_v15 }
 0xa6e   : > { %v3675_v1 = vpop.f32.mrf.mxu3 }
 0xa6f   : > { %7110 = vmatmul.msk.f32.gmra.mxu2 %vm989_vm11, %v3675_v1 }
 0xa73   : > { %v3208_v20 = vpop.f32.mrf.mxu2 }
 0xa74   : > { %7078 = vmatmul.msk.f32.gmra.mxu0 %vm989_vm11, %v3208_v20 }
 0xa76   : > { %v3678_v17 = vpop.f32.mrf.mxu3 }
 0xa77   : > { %7111 = vmatmul.msk.f32.gmra.mxu2 %vm989_vm11, %v3678_v17 }
 0xa7b   : > { %v3211_v59 = vpop.f32.mrf.mxu2 }
 0xa7c   : > { %7079 = vmatmul.msk.f32.gmra.mxu0 %vm989_vm11, %v3211_v59 }
 0xa7f   : > { %v3681_v52 = vpop.f32.mrf.mxu3 }
 0xa80   : > { %7112 = vmatmul.msk.f32.gmra.mxu2 %vm989_vm11, %v3681_v52 }
 0xa83   : > { %v3214_v34 = vpop.f32.mrf.mxu2 }
 0xa84   : > { %7080 = vmatmul.msk.f32.gmra.mxu0 %vm989_vm11, %v3214_v34 }
 0xa87   : > { %v3684_v22 = vpop.f32.mrf.mxu3 }
 0xa88   : > { %7113 = vmatmul.msk.f32.gmra.mxu2 %vm989_vm11, %v3684_v22 }
 0xa8b   : > { %v3217_v61 = vpop.f32.mrf.mxu2 }
 0xa8c   : > { %7081 = vmatmul.msk.f32.gmra.mxu0 %vm989_vm11, %v3217_v61 }
 0xa90   : > { %7154 = vmatmul.msk.f32.vlgmr.msrb.gmra.mxu2 %vm989_vm11, %v4228_v56 }
 0xa94   : > { %7122 = vmatmul.msk.f32.vlgmr.msra.gmra.mxu0 %vm989_vm11, %v3761_v47 }
 0xa98   : > { %7155 = vmatmul.msk.f32.gmra.mxu2 %vm989_vm11, %v4230_v53 }
 0xa9c   : > { %7123 = vmatmul.msk.f32.gmra.mxu0 %vm989_vm11, %v3763_v51  ;;  %v10294_v46 = vpop.f32.mrf.mxu0 }
 0xaa0   : > { %7156 = vmatmul.msk.f32.gmra.mxu2 %vm989_vm11, %v4232_v4  ;;  %v10300_v45 = vpop.f32.mrf.mxu2 }
 0xaa4   : > { %7124 = vmatmul.msk.f32.gmra.mxu0 %vm989_vm11, %v3765_v36  ;;  %v10296_v29 = vpop.f32.mrf.mxu0 }
 0xaa8   : > { %7157 = vmatmul.msk.f32.gmra.mxu2 %vm989_vm11, %v4234_v3 }
 0xaaa   : > { %v10304_v54 = vpop.f32.mrf.mxu2 }
 0xaac   : > { %7125 = vmatmul.msk.f32.gmra.mxu0 %vm989_vm11, %v3767_v13  ;;  %v10298_v10 = vpop.f32.mrf.mxu0 }
 0xab0   : > { %7158 = vmatmul.msk.f32.gmra.mxu2 %vm989_vm11, %v4236_v30 }
 0xab4   : > { %7126 = vmatmul.msk.f32.gmra.mxu0 %vm989_vm11, %v3769_v27 }
 0xab5   : > { %v10308_v40 = vpop.f32.mrf.mxu2 }
 0xab8   : > { %7159 = vmatmul.msk.f32.gmra.mxu2 %vm989_vm11, %v4238_v24 }
 0xabc   : > { %7127 = vmatmul.msk.f32.gmra.mxu0 %vm989_vm11, %v3771_v23 }
 0xac0   : > { %7160 = vmatmul.msk.f32.gmra.mxu2 %vm989_vm11, %v4240_v50 }
 0xac4   : > { %7128 = vmatmul.msk.f32.gmra.mxu0 %vm989_vm11, %v3773_v14 }
 0xac8   : > { %7161 = vmatmul.msk.f32.gmra.mxu2 %vm989_vm11, %v4242_v41 }
 0xacc   : > { %7129 = vmatmul.msk.f32.gmra.mxu0 %vm989_vm11, %v3775_v16 }
 0xae9   : > { %v10302_v12 = vpop.f32.mrf.mxu0 }
 0xaea   : > { %v10312_v33 = vpop.f32.mrf.mxu2 }
 0xaf1   : > { %v10306_v0 = vpop.f32.mrf.mxu0 }
 0xaf2   : > { %v10316_v44 = vpop.f32.mrf.mxu2 }
 0xaf9   : > { %v10310_v21 = vpop.f32.mrf.mxu0 }
 0xafa   : > { %v10320_v28 = vpop.f32.mrf.mxu2 }
 0xb01   : > { %v10314_v37 = vpop.f32.mrf.mxu0 }
 0xb03   : > { %v10324_v31 = vpop.f32.mrf.mxu2 }
 0xb09   : > { %v10318_v11 = vpop.f32.mrf.mxu0 }
 0xb0b   : > { %v10330_v38 = vpop.f32.mrf.mxu2 }
 0xb11   : > { %v3841_v19 = vpop.f32.mrf.mxu0 }
 0xb12   : > { %v3865_v2 = vmul.f32 0.35355338, %v3841_v19 }
 0xb13   : > { %v4308_v6 = vpop.f32.mrf.mxu2 }
 0xb14   : > { %v3873_v35 = vsel %vm651_vm0, %v3865_v2, -inf  ;;  %v10342_v17 = vmul.f32 0.35355338, %v4308_v6 }
 0xb15   : > { %3874 = vmax.xlane.f32.xlu2 %v3873_v35 }
 0xb16   : > { %v4340_v34 = vsel %vm651_vm0, %v10342_v17, -inf }
 0xb19   : > { %v3844_v48 = vpop.f32.mrf.mxu0 }
 0xb1a   : > { %v3866_v32 = vmul.f32 0.35355338, %v3844_v48 }
 0xb1b   : > { %v4311_v1 = vpop.f32.mrf.mxu2 }
 0xb1c   : > { %v3876_v42 = vsel %vm651_vm0, %v3866_v32, -inf  ;;  %v10372_v35 = vmul.f32 0.35355338, %v4311_v1 }
 0xb1d   : > { %3877 = vmax.xlane.f32.xlu0 %v3876_v42 }
 0xb21   : > { %v3847_v62 = vpop.f32.mrf.mxu0 }
 0xb22   : > { %v10326_v8 = vmul.f32 0.35355338, %v3847_v62 }
 0xb23   : > { %v4314_v61 = vpop.f32.mrf.mxu2 }
 0xb24   : > { %v3879_v39 = vsel %vm651_vm0, %v10326_v8, -inf  ;;  %v10350_v47 = vmul.f32 0.35355338, %v4314_v61 }
 0xb25   : > { %3880 = vmax.xlane.f32.xlu2 %v3879_v39 }
 0xb26   : > { %v4346_v53 = vsel %vm651_vm0, %v10350_v47, -inf }
 0xb29   : > { %v3850_v7 = vpop.f32.mrf.mxu0 }
 0xb2a   : > { %v10332_v5 = vmul.f32 0.35355338, %v3850_v7 }
 0xb2b   : > { %v4317_v3 = vpop.f32.mrf.mxu2 }
 0xb2c   : > { %v3882_v43 = vsel %vm651_vm0, %v10332_v5, -inf  ;;  %v10384_v7 = vmul.f32 0.35355338, %v4317_v3 }
 0xb2d   : > { %3883 = vmax.xlane.f32.xlu2 %v3882_v43 }
 0xb31   : > { %7615 = vrot.lane.b32.xlu0 %v12188_v63, %s8340_s18  ;;  %v3853_v18 = vpop.f32.mrf.mxu0 }
 0xb32   : > { %v10358_v4 = vmul.f32 0.35355338, %v3853_v18 }
 0xb33   : > { %v4320_v23 = vpop.f32.mrf.mxu2 }
 0xb34   : > { %v3885_v13 = vsel %vm651_vm0, %v10358_v4, -inf }
 0xb39   : > { %v3856_v26 = vpop.f32.mrf.mxu0 }
 0xb3a   : > { %v10338_v15 = vmul.f32 0.35355338, %v3856_v26  ;;  %v4349_v26 = vsel %vm651_vm0, %v10384_v7, -inf }
 0xb3b   : > { %v4323_v19 = vpop.f32.mrf.mxu2 }
 0xb3c   : > { %v3888_v20 = vsel %vm651_vm0, %v10338_v15, -inf  ;;  %v10376_v42 = vmul.f32 0.35355338, %v4323_v19 }
 0xb3d   : > { %3889 = vmax.xlane.f32.xlu1 %v3888_v20 }
 0xb3e   : > { %v4355_v39 = vsel %vm651_vm0, %v10376_v42, -inf }
 0xb41   : > { %v3859_v59 = vpop.f32.mrf.mxu0 }
 0xb42   : > { %v10344_v52 = vmul.f32 0.35355338, %v3859_v59 }
 0xb43   : > { %v4326_v62 = vpop.f32.mrf.mxu2 }
 0xb44   : > { %v3891_v22 = vsel %vm651_vm0, %v10344_v52, -inf  ;;  %v10386_v43 = vmul.f32 0.35355338, %v4326_v62  ;;  %v10413_v62 = vmul.f32 0.35355338, %v4320_v23 }
 0xb45   : > { %4341 = vmax.xlane.f32.xlu1 %v4340_v34  ;;  %3892 = vmax.xlane.f32.xlu2 %v3891_v22 }
 0xb46   : > { %v4358_v20 = vsel %vm651_vm0, %v10386_v43, -inf }
 0xb49   : > { %v3862_v56 = vpop.f32.mrf.mxu0 }
 0xb4a   : > { %v10352_v51 = vmul.f32 0.35355338, %v3862_v56 }
 0xb4b   : > { %v4329_v59 = vpop.f32.mrf.mxu2 }
 0xb4c   : > { %v3894_v36 = vsel %vm651_vm0, %v10352_v51, -inf  ;;  %v10392_v34 = vmul.f32 0.35355338, %v4329_v59 }
 0xb4d   : > { %4347 = vmax.xlane.f32.xlu1 %v4346_v53  ;;  %3895 = vmax.xlane.f32.xlu2 %v3894_v36 }
 0xb4e   : > { %v4361_v22 = vsel %vm651_vm0, %v10392_v34, -inf }
 0xb5b   : > { %3886 = vmax.xlane.f32.xlu0 %v3885_v13 }
 0xb66   : > { %7630 = vrot.lane.b32.xlu1 %v12188_v63, %s8341_s23 }
 0xb6e   : > { %7635 = vrot.lane.b32.xlu1 %v8857_v60, %s8340_s18 }
 0xb76   : > { %7640 = vrot.lane.b32.xlu1 %v8776_v57, %s8341_s23 }
 0xb88   : > { %v3875_v27 = vpop.xlane.xlu2 %3874 }
 0xb89   : > { %v3897_v30 = vsub.f32 %v3865_v2, %v3875_v27  ;;  %v4343_v2 = vsel %vm651_vm0, %v10372_v35, -inf }
 0xb8b   : > { %v3905_v24 = vmul.f32 1.442695, %v3897_v30 }
 0xb8d   : > { %7870 = vpow2.f32 %v3905_v24 }
 0xb90   : > { %v3878_v14 = vpop.xlane.xlu0 %3877 }
 0xb91   : > { %v3898_v50 = vsub.f32 %v3866_v32, %v3878_v14 }
 0xb93   : > { %v10368_v41 = vpop.eup %7870  ;;  %v3907_v16 = vmul.f32 1.442695, %v3898_v50 }
 0xb94   : > { %v3921_v63 = vsel %vm651_vm0, %v10368_v41, 0.0 }
 0xb95   : > { %7872 = vpow2.f32 %v3907_v16  ;;  %3922 = vadd.xlane.f32.xlu0 %v3921_v63 }
 0xb98   : > { %v3881_v27 = vpop.xlane.xlu2 %3880 }
 0xb99   : > { %v3899_v30 = vsub.f32 %v10326_v8, %v3881_v27 }
 0xb9b   : > { %v10374_v48 = vpop.eup %7872  ;;  %v3909_v24 = vmul.f32 1.442695, %v3899_v30 }
 0xb9c   : > { %v3924_v32 = vsel %vm651_vm0, %v10374_v48, 0.0 }
 0xb9d   : > { %4344 = vmax.xlane.f32.xlu0 %v4343_v2  ;;  %3925 = vadd.xlane.f32.xlu2 %v3924_v32 }
 0xba0   : > { %4356 = vmax.xlane.f32.xlu1 %v4355_v39  ;;  %v3884_v50 = vpop.xlane.xlu2 %3883 }
 0xba1   : > { %v3900_v19 = vsub.f32 %v10332_v5, %v3884_v50  ;;  %v4352_v5 = vsel %vm651_vm0, %v10413_v62, -inf }
 0xba3   : > { %v7616_v6 = vpop.permute.xlu0 %7615  ;;  %v3911_v32 = vmul.f32 1.442695, %v3900_v19 }
 0xba4   : > { %v7617_v18 = vunpack.i.l.bf16 %v7616_v6  ;;  %v7618_v1 = vunpack.i.h.bf16 %v7616_v6 }
 0xba5   : > { %4350 = vmax.xlane.f32.xlu2 %v4349_v26 }
 0xba6   : > { %4121 = vmatpush.msrb.mxu1 %v7617_v18 }
 0xba8   : > { %4122 = vmatpush.msrb.mxu1 %v7618_v1  ;;  %4359 = vmax.xlane.f32.xlu1 %v4358_v20 }
 0xbb0   : > { %4362 = vmax.xlane.f32.xlu1 %v4361_v22  ;;  %v10396_v61 = vpop.xlane.xlu1 %3889 }
 0xbb1   : > { %7625 = vrot.lane.b32.xlu0 %v8766_v9, %s8340_s18 }
 0xbb8   : > { %v4342_v56 = vpop.xlane.xlu1 %4341  ;;  %v10425_v23 = vpop.xlane.xlu2 %3892 }
 0xbb9   : > { %v4364_v53 = vsub.f32 %v10342_v17, %v4342_v56 }
 0xbbb   : > { %v4372_v36 = vmul.f32 1.442695, %v4364_v53 }
 0xbbd   : > { %7874 = vpow2.f32 %v4372_v36  ;;  %7620 = vrot.lane.b32.xlu2 %v8776_v57, %s8340_s18  ;;  %s6741_s18 = sshll.u32 %s6738_s19, 4  ;;  %s6742_s18 = int_to_ptr.hbm [resolvable:$true] %s6741_s18 }
 0xbbe   : > { %7876 = vpow2.f32 %v3909_v24 }
 0xbbf   : > { %7878 = vpow2.f32 %v3911_v32 }
 0xbc0   : > { %v4348_v14 = vpop.xlane.xlu1 %4347  ;;  %v3896_v59 = vpop.xlane.xlu2 %3895 }
 0xbc1   : > { %v3904_v22 = vsub.f32 %v10352_v51, %v3896_v59 }
 0xbc3   : > { %v10403_v13 = vpop.eup %7874  ;;  %v3919_v53 = vmul.f32 1.442695, %v3904_v22 }
 0xbc4   : > { %v4388_v3 = vsel %vm651_vm0, %v10403_v13, 0.0  ;;  %v10408_v16 = vpop.eup %7876 }
 0xbc5   : > { %4389 = vadd.xlane.f32.xlu1 %v4388_v3  ;;  %v3927_v57 = vsel %vm651_vm0, %v10408_v16, 0.0  ;;  %v10421_v39 = vpop.eup %7878 }
 0xbc6   : > { %v3930_v26 = vsel %vm651_vm0, %v10421_v39, 0.0 }
 0xbce   : > { %v3887_v56 = vpop.xlane.xlu0 %3886 }
 0xbd8   : > { %v7631_v17 = vpop.permute.xlu1 %7630 }
 0xbd9   : > { %v7632_v63 = vunpack.i.l.bf16 %v7631_v17  ;;  %v7633_v2 = vunpack.i.h.bf16 %v7631_v17 }
 0xbdb   : > { %3928 = vadd.xlane.f32.xlu0 %v3927_v57  ;;  %4588 = vmatpush.msrb.mxu0 %v7632_v63 }
 0xbdd   : > { %4589 = vmatpush.msrb.mxu0 %v7633_v2 }
 0xbde   : > { %7645 = vrot.lane.b32.xlu1 %v8766_v9, %s8341_s23  ;;  %v4366_v9 = vsub.f32 %v10350_v47, %v4348_v14  ;;  %v3901_v14 = vsub.f32 %v10358_v4, %v3887_v56 }
 0xbe0   : > { %v10417_v8 = vpop.permute.xlu1 %7635  ;;  %v4376_v20 = vmul.f32 1.442695, %v4366_v9  ;;  %v3913_v63 = vmul.f32 1.442695, %v3901_v14 }
 0xbe2   : > { %7880 = vpow2.f32 %v4376_v20 }
 0xbe3   : > { %4353 = vmax.xlane.f32.xlu0 %v4352_v5  ;;  %7882 = vpow2.f32 %v3919_v53  ;;  %v3902_v5 = vsub.f32 %v10338_v15, %v10396_v61 }
 0xbe8   : > { %v7641_v6 = vpop.permute.xlu1 %7640  ;;  %v10431_v36 = vpop.eup %7880 }
 0xbe9   : > { %v7642_v18 = vunpack.i.l.bf16 %v7641_v6  ;;  %v7643_v1 = vunpack.i.h.bf16 %v7641_v6  ;;  %v4394_v3 = vsel %vm651_vm0, %v10431_v36, 0.0  ;;  %v10435_v30 = vpop.eup %7882 }
 0xbea   : > { %v3942_v47 = vsel %vm651_vm0, %v10435_v30, 0.0 }
 0xbeb   : > { %3931 = vadd.xlane.f32.xlu0 %v3930_v26  ;;  %4590 = vmatpush.msrb.mxu0 %v7642_v18  ;;  %v3915_v26 = vmul.f32 1.442695, %v3902_v5 }
 0xbed   : > { %4591 = vmatpush.msrb.mxu0 %v7643_v1 }
 0xbff   : > { %7650 = vrot.lane.b32.xlu0 %v8857_v60, %s8341_s23 }
 0xc08   : > { %v3923_v27 = vpop.xlane.xlu0 %3922  ;;  %4395 = vadd.xlane.f32.xlu1 %v4394_v3 }
 0xc09   : > { %7884 = vrcp.f32 %v3923_v27  ;;  %v3956_v56 = vand.u32 2147483648, %v3923_v27  ;;  %vm3950_vm8 = vweird.f32 %v3923_v27  ;;  %v3954_v14 = vand.u32 2147483647, %v3923_v27 }
 0xc0b   : > { %vm3955_vm10 = vcmp.eq.f32.partialorder %v3954_v14, 8.507059e+37 }
 0xc0f   : > { %v7885_v50 = vpop.eup %7884 }
 0xc10   : > { %v4345_v51 = vpop.xlane.xlu0 %4344  ;;  %3943 = vadd.xlane.f32.xlu1 %v3942_v47  ;;  %v10439_v24 = vpop.xlane.xlu2 %3925  ;;  %v3946_v57 = vmul.f32 %v7885_v50, %v3923_v27  ;;  %vm3951_vm7 = vweird.f32 %v7885_v50  ;;  %v7637_v27 = vunpack.i.l.bf16 %v10417_v8 }
 0xc11   : > { %v4365_v60 = vsub.f32 %v10372_v35, %v4345_v51  ;;  %7886 = vrcp.f32 %v10439_v24  ;;  %vm3952_vm9 = vmor %vm3950_vm8, %vm3951_vm7  ;;  %vm3965_vm13 = vweird.f32 %v10439_v24 }
 0xc12   : > { %v3947_v6 = vsub.f32 1.0, %v3946_v57 }
 0xc13   : > { %v4374_v17 = vmul.f32 1.442695, %v4365_v60  ;;  %v10443_v19 = vpop.xlane.xlu1 %4356 }
 0xc14   : > { %v3948_v1 = vmul.f32 %v7885_v50, %v3947_v6 }
 0xc15   : > { %7888 = vpow2.f32 %v4374_v17 }
 0xc16   : > { %7890 = vpow2.f32 %v3913_v63  ;;  %v3949_v15 = vadd.f32 %v7885_v50, %v3948_v1 }
 0xc17   : > { %v10446_v32 = vpop.eup %7886  ;;  %7892 = vpow2.f32 %v3915_v26 }
 0xc18   : > { %v4351_v2 = vpop.xlane.xlu2 %4350  ;;  %v3961_v9 = vmul.f32 %v10446_v32, %v10439_v24  ;;  %v3953_v57 = vsel %vm3952_vm9, %v7885_v50, %v3949_v15  ;;  %vm3966_vm12 = vweird.f32 %v10446_v32  ;;  %v3903_v50 = vsub.f32 %v10344_v52, %v10425_v23 }
 0xc19   : > { %v4367_v53 = vsub.f32 %v10384_v7, %v4351_v2  ;;  %v3957_v7 = vor.u32 1.1754944e-38, %v3956_v56  ;;  %v3969_v15 = vand.u32 2147483647, %v10439_v24  ;;  %vm3967_vm14 = vmor %vm3965_vm13, %vm3966_vm12 }
 0xc1a   : > { %v3962_v61 = vsub.f32 1.0, %v3961_v9  ;;  %v7638_v9 = vunpack.i.h.bf16 %v10417_v8  ;;  %v3917_v8 = vmul.f32 1.442695, %v3903_v50 }
 0xc1b   : > { %v10450_v35 = vpop.eup %7888  ;;  %v10452_v4 = vpop.xlane.xlu1 %4359  ;;  %v4378_v2 = vmul.f32 1.442695, %v4367_v53  ;;  %v3958_v1 = vsel %vm3955_vm10, %v3957_v7, %v3953_v57  ;;  %vm3970_vm15 = vcmp.eq.f32.partialorder %v3969_v15, 8.507059e+37 }
 0xc1c   : > { %v4391_v18 = vsel %vm651_vm0, %v10450_v35, 0.0  ;;  %v10458_v20 = vpop.eup %7890  ;;  %v3963_v5 = vmul.f32 %v10446_v32, %v3962_v61  ;;  %v4370_v14 = vsub.f32 %v10386_v43, %v10452_v4 }
 0xc1d   : > { %4392 = vadd.xlane.f32.xlu2 %v4391_v18  ;;  %v3933_v60 = vsel %vm651_vm0, %v10458_v20, 0.0  ;;  %v10465_v26 = vpop.eup %7892 }
 0xc1e   : > { %v3936_v61 = vsel %vm651_vm0, %v10465_v26, 0.0 }
 0xc20   : > { %v7621_v59 = vpop.permute.xlu2 %7620 }
 0xc21   : > { %v7622_v22 = vunpack.i.l.bf16 %v7621_v59  ;;  %v7623_v3 = vunpack.i.h.bf16 %v7621_v59  ;;  %v3971_v59 = vand.u32 2147483648, %v10439_v24 }
 0xc23   : > { %v7626_v47 = vpop.permute.xlu0 %7625  ;;  %v4363_v51 = vpop.xlane.xlu1 %4362  ;;  %4123 = vmatpush.msrb.mxu1 %v7622_v22  ;;  %v3959_v22 = vmul.f32 %v10368_v41, %v3958_v1  ;;  %v3972_v23 = vor.u32 1.1754944e-38, %v3971_v59 }
 0xc24   : > { %v7627_v17 = vunpack.i.l.bf16 %v7626_v47  ;;  %v4371_v63 = vsub.f32 %v10392_v34, %v4363_v51  ;;  %v7628_v18 = vunpack.i.h.bf16 %v7626_v47  ;;  %v3964_v34 = vadd.f32 %v10446_v32, %v3963_v5 }
 0xc25   : > { %3934 = vadd.xlane.f32.xlu2 %v3933_v60  ;;  %4124 = vmatpush.msrb.mxu1 %v7623_v3  ;;  %v4369_v3 = vsub.f32 %v10376_v42, %v10443_v19  ;;  %v4384_v42 = vmul.f32 1.442695, %v4370_v14 }
 0xc26   : > { %v4386_v6 = vmul.f32 1.442695, %v4371_v63  ;;  %v3968_v52 = vsel %vm3967_vm14, %v10446_v32, %v3964_v34 }
 0xc27   : > { %4125 = vmatpush.msrb.mxu1 %v7627_v17  ;;  %v3973_v53 = vsel %vm3970_vm15, %v3972_v23, %v3968_v52  ;;  %v4382_v32 = vmul.f32 1.442695, %v4369_v3 }
 0xc28   : > { %7894 = vpow2.f32 %v4386_v6  ;;  %v3974_v51 = vmul.f32 %v10374_v48, %v3973_v53 }
 0xc29   : > { %4126 = vmatpush.msrb.mxu1 %v7628_v18  ;;  %7896 = vpow2.f32 %v4378_v2 }
 0xc2a   : > { %7898 = vpow2.f32 %v3917_v8 }
 0xc2b   : > { %4127 = vmatpush.msrb.mxu1 %v7637_v27  ;;  %7900 = vpow2.f32 %v4382_v32 }
 0xc2c   : > { %7902 = vpow2.f32 %v4384_v42 }
 0xc2d   : > { %3937 = vadd.xlane.f32.xlu2 %v3936_v61  ;;  %4128 = vmatpush.msrb.mxu1 %v7638_v9 }
 0xc2e   : > { %v10479_v56 = vpop.eup %7894  ;;  %7130 = vmatmul.msk.f32.vlgmr.msrb.gmra.mxu1 %vm651_vm0, %v3959_v22 }
 0xc2f   : > { %v4409_v41 = vsel %vm651_vm0, %v10479_v56, 0.0  ;;  %v10485_v24 = vpop.eup %7896 }
 0xc30   : > { %4410 = vadd.xlane.f32.xlu1 %v4409_v41  ;;  %v4397_v47 = vsel %vm651_vm0, %v10485_v24, 0.0  ;;  %v10493_v60 = vpop.eup %7898 }
 0xc31   : > { %v3939_v17 = vsel %vm651_vm0, %v10493_v60, 0.0  ;;  %v10499_v19 = vpop.eup %7900 }
 0xc32   : > { %v4403_v48 = vsel %vm651_vm0, %v10499_v19, 0.0  ;;  %v10505_v57 = vpop.eup %7902 }
 0xc33   : > { %v4406_v5 = vsel %vm651_vm0, %v10505_v57, 0.0 }
 0xc35   : > { %4398 = vadd.xlane.f32.xlu2 %v4397_v47 }
 0xc36   : > { %7131 = vmatmul.msk.f32.gmra.mxu1 %vm651_vm0, %v3974_v51 }
 0xc38   : > { %v10503_v63 = vpop.xlane.xlu1 %4389 }
 0xc39   : > { %vm4417_vm8 = vweird.f32 %v10503_v63 }
 0xc3d   : > { %3940 = vadd.xlane.f32.xlu2 %v3939_v17 }
 0xc45   : > { %4404 = vadd.xlane.f32.xlu2 %v4403_v48 }
 0xc4d   : > { %4407 = vadd.xlane.f32.xlu2 %v4406_v5 }
 0xc4e   : > { %v3929_v43 = vpop.xlane.xlu0 %3928 }
 0xc4f   : > { %7904 = vrcp.f32 %v3929_v43  ;;  %v3986_v59 = vand.u32 2147483648, %v3929_v43  ;;  %v3984_v22 = vand.u32 2147483647, %v3929_v43  ;;  %vm3980_vm2 = vweird.f32 %v3929_v43 }
 0xc50   : > { %v7646_v4 = vpop.permute.xlu1 %7645  ;;  %7906 = vrcp.f32 %v10503_v63 }
 0xc51   : > { %v7647_v6 = vunpack.i.l.bf16 %v7646_v4  ;;  %v7648_v7 = vunpack.i.h.bf16 %v7646_v4  ;;  %v3987_v52 = vor.u32 1.1754944e-38, %v3986_v59  ;;  %vm3985_vm4 = vcmp.eq.f32.partialorder %v3984_v22, 8.507059e+37 }
 0xc53   : > { %4592 = vmatpush.msrb.mxu0 %v7647_v6  ;;  %v4423_v6 = vand.u32 2147483648, %v10503_v63 }
 0xc55   : > { %v7905_v2 = vpop.eup %7904  ;;  %4593 = vmatpush.msrb.mxu0 %v7648_v7  ;;  %v4421_v7 = vand.u32 2147483647, %v10503_v63 }
 0xc56   : > { %v3976_v18 = vmul.f32 %v7905_v2, %v3929_v43  ;;  %v4354_v27 = vpop.xlane.xlu0 %4353  ;;  %vm3981_vm1 = vweird.f32 %v7905_v2  ;;  %v7907_v15 = vpop.eup %7906 }
 0xc57   : > { %v4368_v1 = vsub.f32 %v10413_v62, %v4354_v27  ;;  %vm3982_vm3 = vmor %vm3980_vm2, %vm3981_vm1  ;;  %v4413_v41 = vmul.f32 %v7907_v15, %v10503_v63  ;;  %vm4418_vm6 = vweird.f32 %v7907_v15  ;;  %vm4422_vm13 = vcmp.eq.f32.partialorder %v4421_v7, 8.507059e+37 }
 0xc58   : > { %v3977_v34 = vsub.f32 1.0, %v3976_v18  ;;  %vm4419_vm10 = vmor %vm4417_vm8, %vm4418_vm6 }
 0xc59   : > { %v4380_v50 = vmul.f32 1.442695, %v4368_v1  ;;  %v4414_v51 = vsub.f32 1.0, %v4413_v41 }
 0xc5a   : > { %v3978_v9 = vmul.f32 %v7905_v2, %v3977_v34  ;;  %v4424_v34 = vor.u32 1.1754944e-38, %v4423_v6 }
 0xc5b   : > { %7908 = vpow2.f32 %v4380_v50  ;;  %v4415_v17 = vmul.f32 %v7907_v15, %v4414_v51 }
 0xc5c   : > { %v3979_v61 = vadd.f32 %v7905_v2, %v3978_v9 }
 0xc5d   : > { %v4416_v4 = vadd.f32 %v7907_v15, %v4415_v17 }
 0xc5e   : > { %v3932_v8 = vpop.xlane.xlu0 %3931  ;;  %v3983_v23 = vsel %vm3982_vm3, %v7905_v2, %v3979_v61 }
 0xc5f   : > { %7910 = vrcp.f32 %v3932_v8  ;;  %v3988_v53 = vsel %vm3985_vm4, %v3987_v52, %v3983_v23  ;;  %v4001_v48 = vand.u32 2147483648, %v3932_v8  ;;  %v3999_v43 = vand.u32 2147483647, %v3932_v8 }
 0xc60   : > { %v3989_v3 = vmul.f32 %v10408_v16, %v3988_v53  ;;  %vm3995_vm7 = vweird.f32 %v3932_v8  ;;  %v4420_v27 = vsel %vm4419_vm10, %v7907_v15, %v4416_v4  ;;  %v881_v15 = vld [vmem:[#allocation7 + $0x30] sm:$0xff] }
 0xc61   : > { %v10512_v62 = vpop.eup %7908  ;;  %v4002_v2 = vor.u32 1.1754944e-38, %v4001_v48  ;;  %vm4000_vm12 = vcmp.eq.f32.partialorder %v3999_v43, 8.507059e+37  ;;  %v4425_v59 = vsel %vm4422_vm13, %v4424_v34, %v4420_v27  ;;  %4193 = vmatpush.msrb.mxu3 %v881_v15 }
 0xc62   : > { %v4400_v47 = vsel %vm651_vm0, %v10512_v62, 0.0  ;;  %7132 = vmatmul.msk.f32.gmra.mxu1 %vm651_vm0, %v3989_v3  ;;  %v4426_v63 = vmul.f32 %v10403_v13, %v4425_v59 }
 0xc63   : > { %4401 = vadd.xlane.f32.xlu0 %v4400_v47 }
 0xc65   : > { %v7911_v32 = vpop.eup %7910 }
 0xc66   : > { %v3991_v14 = vmul.f32 %v7911_v32, %v3932_v8  ;;  %vm3996_vm5 = vweird.f32 %v7911_v32 }
 0xc67   : > { %vm3997_vm9 = vmor %vm3995_vm7, %vm3996_vm5 }
 0xc68   : > { %v3992_v42 = vsub.f32 1.0, %v3991_v14 }
 0xc6a   : > { %v3993_v5 = vmul.f32 %v7911_v32, %v3992_v42 }
 0xc6c   : > { %v3994_v16 = vadd.f32 %v7911_v32, %v3993_v5 }
 0xc6e   : > { %v3998_v18 = vsel %vm3997_vm9, %v7911_v32, %v3994_v16 }
 0xc6f   : > { %v4003_v1 = vsel %vm4000_vm12, %v4002_v2, %v3998_v18 }
 0xc70   : > { %v4004_v50 = vmul.f32 %v10421_v39, %v4003_v1 }
 0xc71   : > { %v7651_v9 = vpop.permute.xlu0 %7650 }
 0xc72   : > { %v7652_v22 = vunpack.i.l.bf16 %v7651_v9  ;;  %7133 = vmatmul.msk.f32.gmra.mxu1 %vm651_vm0, %v4004_v50  ;;  %v7653_v61 = vunpack.i.h.bf16 %v7651_v9 }
 0xc74   : > { %4594 = vmatpush.msrb.mxu0 %v7652_v22 }
 0xc76   : > { %4595 = vmatpush.msrb.mxu0 %v7653_v61 }
 0xc77   : > { %7162 = vmatmul.msk.f32.vlgmr.msrb.gmra.mxu0 %vm651_vm0, %v4426_v63 }
 0xc7b   : > { %v4396_v52 = vpop.xlane.xlu1 %4395 }
 0xc7c   : > { %7912 = vrcp.f32 %v4396_v52  ;;  %v4453_v7 = vand.u32 2147483648, %v4396_v52  ;;  %vm4447_vm4 = vweird.f32 %v4396_v52  ;;  %v4451_v27 = vand.u32 2147483647, %v4396_v52 }
 0xc7e   : > { %v4454_v61 = vor.u32 1.1754944e-38, %v4453_v7  ;;  %vm4452_vm8 = vcmp.eq.f32.partialorder %v4451_v27, 8.507059e+37 }
 0xc82   : > { %v7913_v39 = vpop.eup %7912 }
 0xc83   : > { %v4443_v23 = vmul.f32 %v7913_v39, %v4396_v52  ;;  %vm4448_vm2 = vweird.f32 %v7913_v39 }
 0xc84   : > { %vm10526_vm5 = vmor %vm4447_vm4, %vm4448_vm2 }
 0xc85   : > { %v4444_v47 = vsub.f32 1.0, %v4443_v23 }
 0xc87   : > { %v4445_v14 = vmul.f32 %v7913_v39, %v4444_v47 }
 0xc89   : > { %v4446_v16 = vadd.f32 %v7913_v39, %v4445_v14 }
 0xc8b   : > { %v4450_v22 = vsel %vm10526_vm5, %v7913_v39, %v4446_v16 }
 0xc90   : > { %v4393_v8 = vpop.xlane.xlu2 %4392 }
 0xc91   : > { %7914 = vrcp.f32 %v4393_v8  ;;  %v4438_v13 = vand.u32 2147483648, %v4393_v8  ;;  %v4436_v17 = vand.u32 2147483647, %v4393_v8  ;;  %vm4432_vm15 = vweird.f32 %v4393_v8 }
 0xc93   : > { %v4439_v5 = vor.u32 1.1754944e-38, %v4438_v13  ;;  %vm4437_vm3 = vcmp.eq.f32.partialorder %v4436_v17, 8.507059e+37 }
 0xc97   : > { %v7915_v41 = vpop.eup %7914 }
 0xc98   : > { %v4428_v53 = vmul.f32 %v7915_v41, %v4393_v8  ;;  %v3935_v3 = vpop.xlane.xlu2 %3934  ;;  %vm4433_vm14 = vweird.f32 %v7915_v41 }
 0xc99   : > { %7916 = vrcp.f32 %v3935_v3  ;;  %vm4434_vm1 = vmor %vm4432_vm15, %vm4433_vm14  ;;  %v4016_v9 = vand.u32 2147483648, %v3935_v3  ;;  %v4014_v59 = vand.u32 2147483647, %v3935_v3  ;;  %vm4010_vm7 = vweird.f32 %v3935_v3 }
 0xc9a   : > { %v4429_v51 = vsub.f32 1.0, %v4428_v53  ;;  %v4455_v53 = vsel %vm4452_vm8, %v4454_v61, %v4450_v22 }
 0xc9b   : > { %v4017_v52 = vor.u32 1.1754944e-38, %v4016_v9  ;;  %vm4015_vm10 = vcmp.eq.f32.partialorder %v4014_v59, 8.507059e+37 }
 0xc9c   : > { %v4430_v32 = vmul.f32 %v7915_v41, %v4429_v51 }
 0xc9e   : > { %v4431_v42 = vadd.f32 %v7915_v41, %v4430_v32  ;;  %v4456_v32 = vmul.f32 %v10431_v36, %v4455_v53 }
 0xc9f   : > { %v7917_v48 = vpop.eup %7916 }
 0xca0   : > { %v4006_v43 = vmul.f32 %v7917_v48, %v3935_v3  ;;  %v3938_v4 = vpop.xlane.xlu2 %3937  ;;  %v4435_v6 = vsel %vm4434_vm1, %v7915_v41, %v4431_v42  ;;  %vm4011_vm6 = vweird.f32 %v7917_v48 }
 0xca1   : > { %7918 = vrcp.f32 %v3938_v4  ;;  %v4440_v18 = vsel %vm4437_vm3, %v4439_v5, %v4435_v6  ;;  %vm4012_vm9 = vmor %vm4010_vm7, %vm4011_vm6  ;;  %v4031_v13 = vand.u32 2147483648, %v3938_v4  ;;  %v4029_v17 = vand.u32 2147483647, %v3938_v4 }
 0xca2   : > { %v4007_v2 = vsub.f32 1.0, %v4006_v43  ;;  %v4441_v1 = vmul.f32 %v10450_v35, %v4440_v18  ;;  %v10533_v35 = vpop.xlane.xlu1 %3943  ;;  %vm4025_vm13 = vweird.f32 %v3938_v4 }
 0xca3   : > { %v4032_v5 = vor.u32 1.1754944e-38, %v4031_v13  ;;  %vm4030_vm15 = vcmp.eq.f32.partialorder %v4029_v17, 8.507059e+37 }
 0xca4   : > { %v4008_v50 = vmul.f32 %v7917_v48, %v4007_v2  ;;  %7163 = vmatmul.msk.f32.gmra.mxu0 %vm651_vm0, %v4441_v1 }
 0xca6   : > { %v4009_v63 = vadd.f32 %v7917_v48, %v4008_v50 }
 0xca7   : > { %v7919_v15 = vpop.eup %7918 }
 0xca8   : > { %v4021_v8 = vmul.f32 %v7919_v15, %v3938_v4  ;;  %v4399_v23 = vpop.xlane.xlu2 %4398  ;;  %v4013_v41 = vsel %vm4012_vm9, %v7917_v48, %v4009_v63  ;;  %vm4026_vm12 = vweird.f32 %v7919_v15 }
 0xca9   : > { %7920 = vrcp.f32 %v4399_v23  ;;  %v4018_v51 = vsel %vm4015_vm10, %v4017_v52, %v4013_v41  ;;  %vm4027_vm14 = vmor %vm4025_vm13, %vm4026_vm12  ;;  %v4468_v1 = vand.u32 2147483648, %v4399_v23  ;;  %v4466_v34 = vand.u32 2147483647, %v4399_v23 }
 0xcaa   : > { %v4022_v47 = vsub.f32 1.0, %v4021_v8  ;;  %7922 = vrcp.f32 %v10533_v35  ;;  %v4019_v14 = vmul.f32 %v10458_v20, %v4018_v51  ;;  %vm4462_vm2 = vweird.f32 %v4399_v23 }
 0xcab   : > { %v4130_v39 = vpop.f32.mrf.mxu1  ;;  %v4469_v59 = vor.u32 1.1754944e-38, %v4468_v1  ;;  %vm4467_vm4 = vcmp.eq.f32.partialorder %v4466_v34, 8.507059e+37  ;;  %vm4055_vm10 = vweird.f32 %v10533_v35 }
 0xcac   : > { %v4023_v3 = vmul.f32 %v7919_v15, %v4022_v47  ;;  %7138 = vmatmul.msk.f32.vlgmr.msrb.gmra.mxu3 %vm989_vm11, %v4130_v39  ;;  %7164 = vmatmul.msk.f32.gmra.mxu0 %vm651_vm0, %v4456_v32 }
 0xcad   : > { %7134 = vmatmul.msk.f32.gmra.mxu1 %vm651_vm0, %v4019_v14 }
 0xcae   : > { %v4024_v42 = vadd.f32 %v7919_v15, %v4023_v3  ;;  %v4061_v3 = vand.u32 2147483648, %v10533_v35 }
 0xcaf   : > { %v7921_v48 = vpop.eup %7920 }
 0xcb0   : > { %v4458_v43 = vmul.f32 %v7921_v48, %v4399_v23  ;;  %v3941_v6 = vpop.xlane.xlu2 %3940  ;;  %v4028_v36 = vsel %vm4027_vm14, %v7919_v15, %v4024_v42  ;;  %v7923_v16 = vpop.eup %7922  ;;  %vm4463_vm1 = vweird.f32 %v7921_v48  ;;  %v4062_v42 = vor.u32 1.1754944e-38, %v4061_v3 }
 0xcb1   : > { %7924 = vrcp.f32 %v3941_v6  ;;  %v4033_v20 = vsel %vm4030_vm15, %v4032_v5, %v4028_v36  ;;  %v4051_v4 = vmul.f32 %v7923_v16, %v10533_v35  ;;  %vm4464_vm3 = vmor %vm4462_vm2, %vm4463_vm1  ;;  %v4046_v41 = vand.u32 2147483648, %v3941_v6  ;;  %v882_v5 = vld [vmem:[#allocation7 + $0x38] sm:$0xff] }
 0xcb2   : > { %v4459_v7 = vsub.f32 1.0, %v4458_v43  ;;  %v4034_v18 = vmul.f32 %v10465_v26, %v4033_v20  ;;  %v4044_v47 = vand.u32 2147483647, %v3941_v6  ;;  %vm4040_vm6 = vweird.f32 %v3941_v6  ;;  %4660 = vmatpush.msra.mxu1 %v882_v5 }
 0xcb3   : > { %v4133_v2 = vpop.f32.mrf.mxu1  ;;  %v4052_v63 = vsub.f32 1.0, %v4051_v4  ;;  %v4047_v51 = vor.u32 1.1754944e-38, %v4046_v41  ;;  %vm4056_vm8 = vweird.f32 %v7923_v16 }
 0xcb4   : > { %v4460_v27 = vmul.f32 %v7921_v48, %v4459_v7  ;;  %7139 = vmatmul.msk.f32.gmra.mxu3 %vm989_vm11, %v4133_v2  ;;  %vm4045_vm9 = vcmp.eq.f32.partialorder %v4044_v47, 8.507059e+37  ;;  %vm4057_vm12 = vmor %vm4055_vm10, %vm4056_vm8 }
 0xcb5   : > { %7135 = vmatmul.msk.f32.gmra.mxu1 %vm651_vm0, %v4034_v18  ;;  %v4053_v53 = vmul.f32 %v7923_v16, %v4052_v63 }
 0xcb6   : > { %v4461_v50 = vadd.f32 %v7921_v48, %v4460_v27 }
 0xcb7   : > { %v7925_v9 = vpop.eup %7924  ;;  %v4054_v32 = vadd.f32 %v7923_v16, %v4053_v53 }
 0xcb8   : > { %v4036_v22 = vmul.f32 %v7925_v9, %v3941_v6  ;;  %v4465_v61 = vsel %vm4464_vm3, %v7921_v48, %v4461_v50  ;;  %vm4041_vm5 = vweird.f32 %v7925_v9  ;;  %v4405_v6 = vpop.xlane.xlu2 %4404 }
 0xcb9   : > { %v4470_v15 = vsel %vm4467_vm4, %v4469_v59, %v4465_v61  ;;  %vm4042_vm7 = vmor %vm4040_vm6, %vm4041_vm5  ;;  %v4058_v17 = vsel %vm4057_vm12, %v7923_v16, %v4054_v32  ;;  %7926 = vrcp.f32 %v4405_v6  ;;  %v10554_v16 = vpop.xlane.xlu1 %4410  ;;  %vm4492_vm4 = vweird.f32 %v4405_v6 }
 0xcba   : > { %v4037_v26 = vsub.f32 1.0, %v4036_v22  ;;  %v4471_v52 = vmul.f32 %v10485_v24, %v4470_v15  ;;  %v4059_v24 = vand.u32 2147483647, %v10533_v35  ;;  %v4496_v53 = vand.u32 2147483647, %v4405_v6 }
 0xcbc   : > { %v4038_v8 = vmul.f32 %v7925_v9, %v4037_v26  ;;  %7165 = vmatmul.msk.f32.gmra.mxu0 %vm651_vm0, %v4471_v52  ;;  %vm4060_vm13 = vcmp.eq.f32.partialorder %v4059_v24, 8.507059e+37  ;;  %vm4497_vm6 = vcmp.eq.f32.partialorder %v4496_v53, 8.507059e+37 }
 0xcbd   : > { %v4063_v48 = vsel %vm4060_vm13, %v4062_v42, %v4058_v17  ;;  %vm4522_vm13 = vweird.f32 %v10554_v16 }
 0xcbe   : > { %v4039_v23 = vadd.f32 %v7925_v9, %v4038_v8  ;;  %v4064_v43 = vmul.f32 %v10435_v30, %v4063_v48  ;;  %v4498_v8 = vand.u32 2147483648, %v4405_v6 }
 0xcbf   : > { %v7927_v36 = vpop.eup %7926 }
 0xcc0   : > { %v4043_v39 = vsel %vm4042_vm7, %v7925_v9, %v4039_v23  ;;  %v4408_v7 = vpop.xlane.xlu2 %4407  ;;  %vm4493_vm1 = vweird.f32 %v7927_v36  ;;  %v4499_v32 = vor.u32 1.1754944e-38, %v4498_v8 }
 0xcc1   : > { %v4048_v13 = vsel %vm4045_vm9, %v4047_v51, %v4043_v39  ;;  %vm4494_vm5 = vmor %vm4492_vm4, %vm4493_vm1  ;;  %vm4507_vm8 = vweird.f32 %v4408_v7  ;;  %v4511_v42 = vand.u32 2147483647, %v4408_v7 }
 0xcc2   : > { %v4049_v14 = vmul.f32 %v10493_v60, %v4048_v13  ;;  %v4488_v60 = vmul.f32 %v7927_v36, %v4405_v6 }
 0xcc3   : > { %vm4512_vm10 = vcmp.eq.f32.partialorder %v4511_v42, 8.507059e+37  ;;  %v12219_v42 = vld [vmem:[#allocation32_spill] sm:$0xff] }
 0xcc4   : > { %7136 = vmatmul.msk.f32.gmra.mxu1 %vm651_vm0, %v4049_v14  ;;  %v4489_v2 = vsub.f32 1.0, %v4488_v60  ;;  %v4513_v14 = vand.u32 2147483648, %v4408_v7  ;;  %v4528_v60 = vand.u32 2147483648, %v10554_v16 }
 0xcc6   : > { %v4490_v30 = vmul.f32 %v7927_v36, %v4489_v2  ;;  %v4529_v2 = vor.u32 1.1754944e-38, %v4528_v60  ;;  %v12222_v60 = vld [vmem:[#allocation54_spill] sm:$0xff] }
 0xcc8   : > { %v4491_v63 = vadd.f32 %v7927_v36, %v4490_v30 }
 0xcca   : > { %v4495_v39 = vsel %vm4494_vm5, %v7927_v36, %v4491_v63 }
 0xccb   : > { %v4500_v3 = vsel %vm4497_vm6, %v4499_v32, %v4495_v39  ;;  %v12217_v32 = vld [vmem:[#allocation46_spill] sm:$0xff] }
 0xccc   : > { %7137 = vmatmul.msk.f32.gmra.mxu1 %vm651_vm0, %v4064_v43  ;;  %v4514_v43 = vor.u32 1.1754944e-38, %v4513_v14 }
 0xcd6   : > { %v4402_v35 = vpop.xlane.xlu0 %4401 }
 0xcd7   : > { %7928 = vrcp.f32 %v4402_v35  ;;  %v4483_v34 = vand.u32 2147483648, %v4402_v35  ;;  %v4481_v59 = vand.u32 2147483647, %v4402_v35  ;;  %vm4477_vm15 = vweird.f32 %v4402_v35 }
 0xcd8   : > { %7930 = vrcp.f32 %v4408_v7 }
 0xcd9   : > { %7932 = vrcp.f32 %v10554_v16  ;;  %v4484_v61 = vor.u32 1.1754944e-38, %v4483_v34  ;;  %vm4482_vm3 = vcmp.eq.f32.partialorder %v4481_v59, 8.507059e+37 }
 0xcdd   : > { %v7929_v20 = vpop.eup %7928 }
 0xcde   : > { %v4473_v18 = vmul.f32 %v7929_v20, %v4402_v35  ;;  %v7931_v27 = vpop.eup %7930  ;;  %vm4478_vm14 = vweird.f32 %v7929_v20 }
 0xcdf   : > { %v4136_v4 = vpop.f32.mrf.mxu1  ;;  %v4503_v50 = vmul.f32 %v7931_v27, %v4408_v7  ;;  %vm4479_vm2 = vmor %vm4477_vm15, %vm4478_vm14  ;;  %v7933_v52 = vpop.eup %7932  ;;  %vm4508_vm7 = vweird.f32 %v7931_v27  ;;  %v4526_v7 = vand.u32 2147483647, %v10554_v16 }
 0xce0   : > { %v4474_v1 = vsub.f32 1.0, %v4473_v18  ;;  %7140 = vmatmul.msk.f32.gmra.mxu3 %vm989_vm11, %v4136_v4  ;;  %v4518_v23 = vmul.f32 %v7933_v52, %v10554_v16  ;;  %vm4509_vm9 = vmor %vm4507_vm8, %vm4508_vm7  ;;  %vm4523_vm12 = vweird.f32 %v7933_v52 }
 0xce1   : > { %v4504_v26 = vsub.f32 1.0, %v4503_v50  ;;  %vm4524_vm14 = vmor %vm4522_vm13, %vm4523_vm12  ;;  %vm4527_vm15 = vcmp.eq.f32.partialorder %v4526_v7, 8.507059e+37  ;;  %v12214_v50 = vld [vmem:[#allocation33_spill] sm:$0xff] }
 0xce2   : > { %v4475_v9 = vmul.f32 %v7929_v20, %v4474_v1  ;;  %v4519_v13 = vsub.f32 1.0, %v4518_v23 }
 0xce3   : > { %v4505_v51 = vmul.f32 %v7931_v27, %v4504_v26 }
 0xce4   : > { %v4476_v22 = vadd.f32 %v7929_v20, %v4475_v9  ;;  %v4520_v48 = vmul.f32 %v7933_v52, %v4519_v13  ;;  %v1869_v9 = vadd.f32 %v12214_v50, %v9698_v58  ;;  %v7982_v58 = vld [vmem:[%s8556_s0] sm:$0xff]  ;;  %v12218_v13 = vld [vmem:[#allocation53_spill] sm:$0xff]  ;;  %v12226_v50 = vld [vmem:[#allocation48_spill] sm:$0xff] }
 0xce5   : > { %v4506_v24 = vadd.f32 %v7931_v27, %v4505_v51 }
 0xce6   : > { %v4480_v15 = vsel %vm4479_vm2, %v7929_v20, %v4476_v22  ;;  %v4521_v35 = vadd.f32 %v7933_v52, %v4520_v48  ;;  %v2351_v22 = vadd.f32 %v9730_v55, %v1869_v9 }
 0xce7   : > { %v4485_v41 = vsel %vm4482_vm3, %v4484_v61, %v4480_v15  ;;  %v4510_v5 = vsel %vm4509_vm9, %v7931_v27, %v4506_v24 }
 0xce8   : > { %v4486_v47 = vmul.f32 %v10512_v62, %v4485_v41  ;;  %v4501_v62 = vmul.f32 %v10499_v19, %v4500_v3  ;;  %v4515_v36 = vsel %vm4512_vm10, %v4514_v43, %v4510_v5  ;;  %v4525_v20 = vsel %vm4524_vm14, %v7933_v52, %v4521_v35  ;;  %v12221_v43 = vld [vmem:[#allocation47_spill] sm:$0xff] }
 0xce9   : > { %v4516_v19 = vmul.f32 %v10505_v57, %v4515_v36  ;;  %v4530_v18 = vsel %vm4527_vm15, %v4529_v2, %v4525_v20  ;;  %v2818_v61 = vadd.f32 %v9751_v49, %v2351_v22  ;;  %v7983_v20 = vld [vmem:[%s8556_s0 + $0x8] sm:$0xff] }
 0xcea   : > { %7166 = vmatmul.msk.f32.gmra.mxu0 %vm651_vm0, %v4486_v47  ;;  %v4531_v27 = vmul.f32 %v10479_v56, %v4530_v18  ;;  %v10587_v47 = vld [vmem:[#allocation8] ss:$0 sm:$0xff] }
 0xceb   : > { %v3285_v63 = vadd.f32 %v10294_v46, %v2818_v61 }
 0xced   : > { %v3752_v15 = vadd.f32 %v10300_v45, %v3285_v63  ;;  %v12216_v45 = vld [vmem:[#allocation34_spill] sm:$0xff] }
 0xcee   : > { %v1872_v39 = vadd.f32 %v12216_v45, %v9703_v25 }
 0xcef   : > { %v4139_v17 = vpop.f32.mrf.mxu1 }
 0xcf0   : > { %7141 = vmatmul.msk.f32.gmra.mxu3 %vm989_vm11, %v4139_v17  ;;  %v2352_v3 = vadd.f32 %v12217_v32, %v1872_v39  ;;  %v12233_v32 = vld [vmem:[#allocation56_spill] sm:$0xff] }
 0xcf2   : > { %7167 = vmatmul.msk.f32.gmra.mxu0 %vm651_vm0, %v4501_v62  ;;  %v2819_v24 = vadd.f32 %v12218_v13, %v2352_v3  ;;  %v12220_v62 = vld [vmem:[#allocation35_spill] sm:$0xff] }
 0xcf3   : > { %v1875_v48 = vadd.f32 %v12220_v62, %v12219_v42  ;;  %v12236_v42 = vld [vmem:[#allocation50_spill] sm:$0xff] }
 0xcf4   : > { %v4597_v6 = vpop.f32.mrf.mxu0  ;;  %v3286_v14 = vadd.f32 %v10296_v29, %v2819_v24  ;;  %v12234_v24 = vld [vmem:[#allocation43_spill] sm:$0xff] }
 0xcf5   : > { %7170 = vmatmul.msk.f32.vlgmr.msra.gmra.mxu1 %vm989_vm11, %v4597_v6  ;;  %v2353_v6 = vadd.f32 %v12221_v43, %v1875_v48 }
 0xcf6   : > { %v3753_v5 = vadd.f32 %v10304_v54, %v3286_v14  ;;  %v12235_v14 = vld [vmem:[#allocation38_spill] sm:$0xff] }
 0xcf7   : > { %v2820_v7 = vadd.f32 %v12222_v60, %v2353_v6 }
 0xcfa   : > { %7168 = vmatmul.msk.f32.gmra.mxu0 %vm651_vm0, %v4516_v19  ;;  %v3287_v19 = vadd.f32 %v10298_v10, %v2820_v7  ;;  %v7984_v10 = vld [vmem:[%s8556_s0 + $0x10] sm:$0xff] }
 0xcfc   : > { %v3754_v29 = vadd.f32 %v10308_v40, %v3287_v19  ;;  %v12239_v19 = vld [vmem:[#allocation39_spill] sm:$0xff] }
 0xd02   : > { %7169 = vmatmul.msk.f32.gmra.mxu0 %vm651_vm0, %v4531_v27 }
 0xd21   : > { %v4600_v1 = vpop.f32.mrf.mxu0 }
 0xd22   : > { %7171 = vmatmul.msk.f32.gmra.mxu1 %vm989_vm11, %v4600_v1 }
 0xd29   : > { %v4603_v4 = vpop.f32.mrf.mxu0 }
 0xd2a   : > { %v4142_v30 = vpop.f32.mrf.mxu1  ;;  %7172 = vmatmul.msk.f32.gmra.mxu1 %vm989_vm11, %v4603_v4 }
 0xd2b   : > { %7142 = vmatmul.msk.f32.gmra.mxu3 %vm989_vm11, %v4142_v30 }
 0xd2f   : > { %v4195_v26 = vpop.f32.mrf.mxu3 }
 0xd30   : > { %v4219_v8 = vadd.f32 %v4195_v26, %v3752_v15 }
 0xd32   : > { %v4145_v57 = vpop.f32.mrf.mxu1 }
 0xd33   : > { %7143 = vmatmul.msk.f32.gmra.mxu3 %vm989_vm11, %v4145_v57  ;;  %v12224_v57 = vld [vmem:[#allocation41_spill] sm:$0xff] }
 0xd37   : > { %v4198_v17 = vpop.f32.mrf.mxu3 }
 0xd38   : > { %v4220_v36 = vadd.f32 %v4198_v17, %v3753_v5  ;;  %v1884_v17 = vadd.f32 %v12235_v14, %v12234_v24  ;;  %v12237_v5 = vld [vmem:[#allocation31_spill] sm:$0xff] }
 0xd39   : > { %v4606_v16 = vpop.f32.mrf.mxu0 }
 0xd3a   : > { %7173 = vmatmul.msk.f32.gmra.mxu1 %vm989_vm11, %v4606_v16  ;;  %v12225_v16 = vld [vmem:[#allocation36_spill] sm:$0xff]  ;;  %v2356_v62 = vadd.f32 %v12236_v42, %v1884_v17 }
 0xd3c   : > { %v2823_v43 = vadd.f32 %v12237_v5, %v2356_v62  ;;  %v7989_v62 = vld [vmem:[%s8556_s0 + $0x38] sm:$0xff] }
 0xd41   : > { %v4148_v34 = vpop.f32.mrf.mxu1 }
 0xd42   : > { %7144 = vmatmul.msk.f32.gmra.mxu3 %vm989_vm11, %v4148_v34  ;;  %v1878_v34 = vadd.f32 %v12225_v16, %v12224_v57 }
 0xd44   : > { %v2354_v9 = vadd.f32 %v12226_v50, %v1878_v34 }
 0xd49   : > { %v4151_v56 = vpop.f32.mrf.mxu1 }
 0xd4a   : > { %7145 = vmatmul.msk.f32.gmra.mxu3 %vm989_vm11, %v4151_v56 }
 0xd63   : > { %v4201_v18 = vpop.f32.mrf.mxu3 }
 0xd64   : > { %v4221_v1 = vadd.f32 %v4201_v18, %v3754_v29  ;;  %v12240_v18 = vld [vmem:[#allocation51_spill] sm:$0xff] }
 0xd67   : > { %v4609_v59 = vpop.f32.mrf.mxu0 }
 0xd68   : > { %7174 = vmatmul.msk.f32.gmra.mxu1 %vm989_vm11, %v4609_v59  ;;  %v12228_v59 = vld [vmem:[#allocation55_spill] sm:$0xff] }
 0xd69   : > { %v2821_v22 = vadd.f32 %v12228_v59, %v2354_v9  ;;  %v12244_v59 = vld [vmem:[#allocation45_spill] sm:$0xff] }
 0xd6b   : > { %v3288_v63 = vadd.f32 %v10302_v12, %v2821_v22  ;;  %v12232_v12 = vld [vmem:[#allocation49_spill] sm:$0xff] }
 0xd6d   : > { %v3755_v15 = vadd.f32 %v10312_v33, %v3288_v63  ;;  %v7987_v63 = vld [vmem:[%s8556_s0 + $0x28] sm:$0xff] }
 0xd6f   : > { %v4612_v52 = vpop.f32.mrf.mxu0 }
 0xd70   : > { %7175 = vmatmul.msk.f32.gmra.mxu1 %vm989_vm11, %v4612_v52 }
 0xd72   : > { %v4662_v41 = vpop.f32.mrf.mxu1 }
 0xd73   : > { %v4686_v53 = vadd.f32 %v4662_v41, %v4219_v8  ;;  %v4204_v26 = vpop.f32.mrf.mxu3 }
 0xd74   : > { %v4222_v52 = vadd.f32 %v4204_v26, %v3755_v15  ;;  %v12246_v15 = vld [vmem:[#allocation52_spill] sm:$0xff] }
 0xd75   : > { %v4694_v23 = vadd.f32 %v7982_v58, %v4686_v53  ;;  %v7985_v53 = vld [vmem:[%s8556_s0 + $0x18] sm:$0xff] }
 0xd77   : > { %v10591_v51 = vadd.f32 %v10587_v47, %v4694_v23  ;;  %v4615_v55 = vpop.f32.mrf.mxu0 }
 0xd78   : > { %7176 = vmatmul.msk.f32.gmra.mxu1 %vm989_vm11, %v4615_v55 }
 0xd79   : > { %12215 = vst [vmem:[#allocation33_spill] sm:$0xff] %v10591_v51  ;;  %v4714_v49 = vsel %vm651_vm0, %v10591_v51, 0.0 }
 0xd7a   : > { %4715 = vadd.xlane.f32.xlu2 %v4714_v49  ;;  %v12230_v49 = vld [vmem:[#allocation42_spill] sm:$0xff] }
 0xd7f   : > { %v4618_v46 = vpop.f32.mrf.mxu0 }
 0xd80   : > { %7177 = vmatmul.msk.f32.gmra.mxu1 %vm989_vm11, %v4618_v46  ;;  %v12231_v46 = vld [vmem:[#allocation37_spill] sm:$0xff] }
 0xd81   : > { %v1881_v45 = vadd.f32 %v12231_v46, %v12230_v49 }
 0xd83   : > { %v2355_v39 = vadd.f32 %v12232_v12, %v1881_v45 }
 0xd85   : > { %v2822_v33 = vadd.f32 %v12233_v32, %v2355_v39  ;;  %v7988_v39 = vld [vmem:[%s8556_s0 + $0x30] sm:$0xff] }
 0xd87   : > { %v3289_v13 = vadd.f32 %v10306_v0, %v2822_v33 }
 0xd89   : > { %v3756_v48 = vadd.f32 %v10316_v44, %v3289_v13 }
 0xd9f   : > { %v4665_v35 = vpop.f32.mrf.mxu1 }
 0xda0   : > { %v4687_v25 = vadd.f32 %v4665_v35, %v4220_v36  ;;  %v3290_v35 = vadd.f32 %v10310_v21, %v2823_v43 }
 0xda2   : > { %v4695_v2 = vadd.f32 %v7983_v20, %v4687_v25  ;;  %v12238_v25 = vld [vmem:[#allocation44_spill] sm:$0xff] }
 0xda3   : > { %v1887_v20 = vadd.f32 %v12239_v19, %v12238_v25 }
 0xda4   : > { %v10611_v27 = vadd.f32 %v10587_v47, %v4695_v2  ;;  %v7986_v2 = vld [vmem:[%s8556_s0 + $0x20] sm:$0xff]  ;;  %s8244_s0 = sshra.s32 %s6742_s18, 4  ;;  %s8245_s0 = int_to_ptr.hbm [resolvable:$true] %s8244_s0 }
 0xda5   : > { %v2357_v29 = vadd.f32 %v12240_v18, %v1887_v20  ;;  %s8246_s2 = scalar_lea.hbm %s8245_s0, 64  ;;  %p8251_p3 = scmp.lt.s32.totalorder %s8245_s0, %s12105_s16 }
 0xda6   : > { %12223 = vst [vmem:[#allocation34_spill] sm:$0xff] %v10611_v27  ;;  %v4717_v54 = vsel %vm651_vm0, %v10611_v27, 0.0  ;;  %p8247_p0 = scmp.ne.s32.totalorder %s8245_s0, %s8246_s2  ;;  %p8252_p4 = scmp.lt.s32.totalorder %s8250_s6, %s8246_s2 }
 0xda7   : > { %4718 = vadd.xlane.f32.xlu1 %v4717_v54  ;;  %v4668_v4 = vpop.f32.mrf.mxu1  ;;  %v12242_v54 = vld [vmem:[#allocation57_spill] sm:$0xff] }
 0xda8   : > { %v4688_v30 = vadd.f32 %v4668_v4, %v4221_v1  ;;  %v3757_v1 = vadd.f32 %v10320_v28, %v3290_v35  ;;  %v2824_v4 = vadd.f32 %v12242_v54, %v2357_v29  ;;  %v12245_v28 = vld [vmem:[#allocation40_spill] sm:$0xff]  ;;  %v4929_v54 = vld [vmem:[%s12098_s9 + $0x78] sm:$0xff]  ;;  %p8248_p1 = pnand %p8247_p0, %p8466_p5  ;;  %p8253_p7 = por %p8252_p4, %p8251_p3 }
 0xda9   : > { %v1890_v22 = vadd.f32 %v12245_v28, %v12244_v59  ;;  %5009 = vmatpush.msra.mxu2 %v4929_v54  ;;  %v4921_v59 = vld [vmem:[%s12098_s9 + $0x38] sm:$0xff] }
 0xdaa   : > { %v4696_v56 = vadd.f32 %v7984_v10, %v4688_v30  ;;  %v3291_v34 = vadd.f32 %v10314_v37, %v2824_v4  ;;  %v12243_v10 = vld [vmem:[#allocation30_spill] sm:$0xff]  ;;  %p8249_p2 = pneg %p8248_p1 }
 0xdab   : > { %v4926_v4 = vld [vmem:[%s12098_s9 + $0x60] sm:$0xff] }
 0xdac   : > { %v10620_v40 = vadd.f32 %v10587_v47, %v4696_v56  ;;  %p8254_p8 = pnand %p8253_p7, %p8249_p2 }
 0xdae   : > { %12227 = vst [vmem:[#allocation46_spill] sm:$0xff] %v10620_v40  ;;  %v4720_v61 = vsel %vm651_vm0, %v10620_v40, 0.0  ;;  %v4207_v3 = vpop.f32.mrf.mxu3 }
 0xdaf   : > { %4721 = vadd.xlane.f32.xlu2 %v4720_v61  ;;  %v4223_v6 = vadd.f32 %v4207_v3, %v3756_v48 }
 0xdb6   : > { %v4210_v7 = vpop.f32.mrf.mxu3 }
 0xdb7   : > { %v4671_v8 = vpop.f32.mrf.mxu1  ;;  %v4224_v30 = vadd.f32 %v4210_v7, %v3757_v1  ;;  %v4928_v1 = vld [vmem:[%s12098_s9 + $0x70] sm:$0xff] }
 0xdb8   : > { %v4689_v41 = vadd.f32 %v4671_v8, %v4222_v52  ;;  %v2358_v52 = vadd.f32 %v12246_v15, %v1890_v22  ;;  %v3758_v8 = vadd.f32 %v10324_v31, %v3291_v34  ;;  %4968 = vmatpush.msra.mxu3 %v4928_v1  ;;  %v4923_v34 = vld [vmem:[%s12098_s9 + $0x48] sm:$0xff]  ;;  %v4918_v22 = vld [vmem:[%s12098_s9 + $0x20] sm:$0xff]  ;;  %v4917_v15 = vld [vmem:[%s12098_s9 + $0x18] sm:$0xff] }
 0xdba   : > { %v4697_v58 = vadd.f32 %v7985_v53, %v4689_v41  ;;  %v12248_v53 = vld [vmem:[#allocation58_spill] sm:$0xff]  ;;  %4969 = vmatpush.msra.mxu3 %v4926_v4 }
 0xdbc   : > { %v10629_v23 = vadd.f32 %v10587_v47, %v4697_v58  ;;  %v2825_v58 = vadd.f32 %v12248_v53, %v2358_v52 }
 0xdbe   : > { %12229 = vst [vmem:[#allocation53_spill] sm:$0xff] %v10629_v23  ;;  %v4723_v55 = vsel %vm651_vm0, %v10629_v23, 0.0  ;;  %v3292_v31 = vadd.f32 %v10318_v11, %v2825_v58 }
 0xdbf   : > { %4724 = vadd.xlane.f32.xlu1 %v4723_v55 }
 0xdc0   : > { %v3759_v3 = vadd.f32 %v10330_v38, %v3292_v31 }
 0xdc5   : > { %v4213_v9 = vpop.f32.mrf.mxu3 }
 0xdc6   : > { %v4225_v55 = vadd.f32 %v4213_v9, %v3758_v8  ;;  %v4920_v9 = vld [vmem:[%s12098_s9 + $0x30] sm:$0xff]  ;;  %v4914_v8 = vld [vmem:[%s12098_s9] sm:$0xff] }
 0xdcd   : > { %v4216_v33 = vpop.f32.mrf.mxu3 }
 0xdce   : > { %v4226_v24 = vadd.f32 %v4216_v33, %v3759_v3 }
 0xde5   : > { %v4674_v36 = vpop.f32.mrf.mxu1 }
 0xde6   : > { %v4690_v60 = vadd.f32 %v4674_v36, %v4223_v6 }
 0xde8   : > { %v4698_v0 = vadd.f32 %v7986_v2, %v4690_v60 }
 0xdea   : > { %v10650_v44 = vadd.f32 %v10587_v47, %v4698_v0 }
 0xdec   : > { %12241 = vst [vmem:[#allocation32_spill] sm:$0xff] %v10650_v44  ;;  %v4726_v21 = vsel %vm651_vm0, %v10650_v44, 0.0 }
 0xded   : > { %v4716_v57 = vpop.xlane.xlu2 %4715  ;;  %4727 = vadd.xlane.f32.xlu0 %v4726_v21  ;;  %v4677_v16 = vpop.f32.mrf.mxu1  ;;  %v4924_v21 = vld [vmem:[%s12098_s9 + $0x50] sm:$0xff] }
 0xdee   : > { %v4738_v56 = vmul.f32 %v4716_v57, %v12243_v10  ;;  %v4691_v50 = vadd.f32 %v4677_v16, %v4224_v30  ;;  %v4927_v30 = vld [vmem:[%s12098_s9 + $0x68] sm:$0xff]  ;;  %v4925_v57 = vld [vmem:[%s12098_s9 + $0x58] sm:$0xff]  ;;  %4970 = vmatpush.msra.mxu3 %v4924_v21  ;;  %v4922_v16 = vld [vmem:[%s12098_s9 + $0x40] sm:$0xff] }
 0xdef   : > { %5010 = vmatpush.msra.mxu2 %v4927_v30 }
 0xdf0   : > { %v10660_v61 = vsub.f32 %v10591_v51, %v4738_v56  ;;  %v4699_v26 = vadd.f32 %v7987_v63, %v4691_v50  ;;  %4971 = vmatpush.msra.mxu3 %v4922_v16  ;;  %v4919_v63 = vld [vmem:[%s12098_s9 + $0x28] sm:$0xff] }
 0xdf1   : > { %5011 = vmatpush.msra.mxu2 %v4925_v57 }
 0xdf2   : > { %v10666_v41 = vadd.f32 %v10587_v47, %v4699_v26  ;;  %v4754_v37 = vmul.f32 %v10660_v61, %v10660_v61  ;;  %4972 = vmatpush.msra.mxu3 %v4920_v9  ;;  %v4916_v26 = vld [vmem:[%s12098_s9 + $0x10] sm:$0xff] }
 0xdf3   : > { %5012 = vmatpush.msra.mxu2 %v4923_v34 }
 0xdf4   : > { %12247 = vst [vmem:[#allocation35_spill] sm:$0xff] %v10666_v41  ;;  %v4762_v49 = vsel %vm651_vm0, %v4754_v37, 0.0  ;;  %v4729_v46 = vsel %vm651_vm0, %v10666_v41, 0.0  ;;  %4973 = vmatpush.msra.mxu3 %v4918_v22  ;;  %v4915_v37 = vld [vmem:[%s12098_s9 + $0x8] sm:$0xff] }
 0xdf5   : > { %4763 = vadd.xlane.f32.xlu1 %v4762_v49  ;;  %4730 = vadd.xlane.f32.xlu2 %v4729_v46  ;;  %v4680_v45 = vpop.f32.mrf.mxu1 }
 0xdf6   : > { %v4692_v12 = vadd.f32 %v4680_v45, %v4225_v55  ;;  %5013 = vmatpush.msra.mxu2 %v4921_v59  ;;  %4974 = vmatpush.msra.mxu3 %v4916_v26 }
 0xdf8   : > { %v4700_v32 = vadd.f32 %v7988_v39, %v4692_v12  ;;  %5014 = vmatpush.msra.mxu2 %v4919_v63  ;;  %4975 = vmatpush.msra.mxu3 %v4914_v8 }
 0xdfa   : > { %v10678_v13 = vadd.f32 %v10587_v47, %v4700_v32  ;;  %5015 = vmatpush.msra.mxu2 %v4917_v15 }
 0xdfc   : > { %12249 = vst [vmem:[#allocation47_spill] sm:$0xff] %v10678_v13  ;;  %v4732_v14 = vsel %vm651_vm0, %v10678_v13, 0.0  ;;  %5016 = vmatpush.msra.mxu2 %v4915_v37 }
 0xdfd   : > { %4733 = vadd.xlane.f32.xlu0 %v4732_v14  ;;  %v4683_v17 = vpop.f32.mrf.mxu1 }
 0xdfe   : > { %v4693_v42 = vadd.f32 %v4683_v17, %v4226_v24 }
 0xe00   : > { %v4701_v48 = vadd.f32 %v7989_v62, %v4693_v42 }
 0xe02   : > { %v10684_v11 = vadd.f32 %v10587_v47, %v4701_v48 }
 0xe04   : > { %12250 = vst [vmem:[#allocation54_spill] sm:$0xff] %v10684_v11  ;;  %v4735_v5 = vsel %vm651_vm0, %v10684_v11, 0.0 }
 0xe05   : > { %4736 = vadd.xlane.f32.xlu1 %v4735_v5 }
 0xe1a   : > { %v4719_v38 = vpop.xlane.xlu1 %4718 }
 0xe1b   : > { %v4739_v43 = vmul.f32 %v4719_v38, %v12243_v10 }
 0xe1d   : > { %v10690_v6 = vsub.f32 %v10611_v27, %v4739_v43  ;;  %v6126_v27 = vld [vmem:[#allocation13 + $0x1f8] sm:$0xff] }
 0xe1f   : > { %v4755_v36 = vmul.f32 %v10690_v6, %v10690_v6 }
 0xe21   : > { %v4765_v35 = vsel %vm651_vm0, %v4755_v36, 0.0 }
 0xe22   : > { %v4722_v60 = vpop.xlane.xlu2 %4721  ;;  %4766 = vadd.xlane.f32.xlu2 %v4765_v35 }
 0xe23   : > { %v4740_v47 = vmul.f32 %v4722_v60, %v12243_v10  ;;  %v10783_v60 = vld [vmem:[#allocation10] ss:$0 sm:$0xff] }
 0xe25   : > { %v10697_v7 = vsub.f32 %v10620_v40, %v4740_v47 }
 0xe27   : > { %v4756_v25 = vmul.f32 %v10697_v7, %v10697_v7 }
 0xe29   : > { %v4768_v19 = vsel %vm651_vm0, %v4756_v25, 0.0 }
 0xe2a   : > { %4769 = vadd.xlane.f32.xlu0 %v4768_v19  ;;  %v10787_v19 = vld [vmem:[#allocation11] ss:$0 sm:$0xff] }
 0xe32   : > { %v4725_v20 = vpop.xlane.xlu1 %4724 }
 0xe33   : > { %v4741_v2 = vmul.f32 %v4725_v20, %v12243_v10 }
 0xe35   : > { %v10704_v0 = vsub.f32 %v10629_v23, %v4741_v2  ;;  %v5972_v23 = vld [vmem:[#allocation13 + $0x1b8] sm:$0xff] }
 0xe37   : > { %v4757_v18 = vmul.f32 %v10704_v0, %v10704_v0 }
 0xe39   : > { %v4771_v29 = vsel %vm651_vm0, %v4757_v18, 0.0 }
 0xe3a   : > { %4772 = vadd.xlane.f32.xlu2 %v4771_v29 }
 0xe60   : > { %v4728_v56 = vpop.xlane.xlu0 %4727 }
 0xe61   : > { %v4742_v50 = vmul.f32 %v4728_v56, %v12243_v10 }
 0xe63   : > { %v10741_v28 = vsub.f32 %v10650_v44, %v4742_v50  ;;  %v6125_v44 = vld [vmem:[#allocation13 + $0x1f0] sm:$0xff] }
 0xe65   : > { %v4758_v52 = vmul.f32 %v10741_v28, %v10741_v28 }
 0xe67   : > { %v4774_v53 = vsel %vm651_vm0, %v4758_v52, 0.0 }
 0xe68   : > { %v4764_v58 = vpop.xlane.xlu1 %4763  ;;  %v4731_v55 = vpop.xlane.xlu2 %4730  ;;  %4775 = vadd.xlane.f32.xlu1 %v4774_v53 }
 0xe69   : > { %v4786_v49 = vmul.f32 %v4764_v58, %v12243_v10  ;;  %v4743_v46 = vmul.f32 %v4731_v55, %v12243_v10 }
 0xe6b   : > { %v4794_v45 = vadd.f32 1e-06, %v4786_v49  ;;  %v10767_v31 = vsub.f32 %v10666_v41, %v4743_v46 }
 0xe6d   : > { %7934 = vrsqrt.f32 %v4794_v45  ;;  %v4759_v12 = vmul.f32 %v10767_v31, %v10767_v31  ;;  %vm4808_vm1 = vweird.f32 %v4794_v45 }
 0xe6f   : > { %v4777_v39 = vsel %vm651_vm0, %v4759_v12, 0.0 }
 0xe70   : > { %4778 = vadd.xlane.f32.xlu0 %v4777_v39  ;;  %v4734_v32 = vpop.xlane.xlu0 %4733 }
 0xe71   : > { %v4744_v33 = vmul.f32 %v4734_v32, %v12243_v10 }
 0xe73   : > { %v7935_v3 = vpop.eup %7934  ;;  %v10774_v24 = vsub.f32 %v10678_v13, %v4744_v33  ;;  %v5971_v13 = vld [vmem:[#allocation13 + $0x1b0] sm:$0xff] }
 0xe74   : > { %v4803_v14 = vmul.f32 %v7935_v3, %v4794_v45  ;;  %vm4809_vm11 = vweird.f32 %v7935_v3 }
 0xe75   : > { %v4760_v17 = vmul.f32 %v10774_v24, %v10774_v24  ;;  %vm4810_vm2 = vmor %vm4808_vm1, %vm4809_vm11 }
 0xe76   : > { %v4804_v42 = vmul.f32 %v7935_v3, %v4803_v14 }
 0xe77   : > { %v4780_v62 = vsel %vm651_vm0, %v4760_v17, 0.0 }
 0xe78   : > { %v4805_v48 = vmul.f32 0.5, %v4804_v42  ;;  %4781 = vadd.xlane.f32.xlu2 %v4780_v62  ;;  %v4737_v5 = vpop.xlane.xlu1 %4736 }
 0xe79   : > { %v4745_v38 = vmul.f32 %v4737_v5, %v12243_v10 }
 0xe7a   : > { %v4806_v43 = vsub.f32 1.5, %v4805_v48 }
 0xe7b   : > { %v10781_v36 = vsub.f32 %v10684_v11, %v4745_v38 }
 0xe7c   : > { %v4807_v35 = vmul.f32 %v7935_v3, %v4806_v43 }
 0xe7d   : > { %v4761_v47 = vmul.f32 %v10781_v36, %v10781_v36 }
 0xe7e   : > { %v4811_v25 = vsel %vm4810_vm2, %v7935_v3, %v4807_v35 }
 0xe7f   : > { %v4882_v20 = vmul.f32 %v4811_v25, %v10660_v61  ;;  %v4783_v2 = vsel %vm651_vm0, %v4761_v47, 0.0 }
 0xe80   : > { %4784 = vadd.xlane.f32.xlu1 %v4783_v2 }
 0xe81   : > { %v4894_v18 = vmul.f32 %v10783_v60, %v4882_v20 }
 0xe83   : > { %v4906_v29 = vadd.f32 %v10787_v19, %v4894_v18 }
 0xe85   : > { %7178 = vmatmul.msk.f32.vlgmr.msra.gmra.mxu3 %vm651_vm0, %v4906_v29  ;;  %7186 = vmatmul.msk.f32.vlgmr.msra.gmra.mxu2 %vm651_vm0, %v4906_v29 }
 0xe95   : > { %v4767_v1 = vpop.xlane.xlu2 %4766 }
 0xe96   : > { %v4787_v54 = vmul.f32 %v4767_v1, %v12243_v10 }
 0xe98   : > { %v4795_v4 = vadd.f32 1e-06, %v4787_v54 }
 0xe9a   : > { %7936 = vrsqrt.f32 %v4795_v4  ;;  %vm4818_vm4 = vweird.f32 %v4795_v4 }
 0xe9d   : > { %v4770_v30 = vpop.xlane.xlu0 %4769 }
 0xe9e   : > { %v4788_v21 = vmul.f32 %v4770_v30, %v12243_v10 }
 0xea0   : > { %v7937_v61 = vpop.eup %7936  ;;  %v4796_v57 = vadd.f32 1e-06, %v4788_v21 }
 0xea1   : > { %v4813_v16 = vmul.f32 %v7937_v61, %v4795_v4  ;;  %vm4819_vm3 = vweird.f32 %v7937_v61 }
 0xea2   : > { %7938 = vrsqrt.f32 %v4796_v57  ;;  %vm4820_vm5 = vmor %vm4818_vm4, %vm4819_vm3  ;;  %vm4828_vm7 = vweird.f32 %v4796_v57 }
 0xea3   : > { %v4814_v34 = vmul.f32 %v7937_v61, %v4813_v16 }
 0xea5   : > { %v4815_v56 = vmul.f32 0.5, %v4814_v34 }
 0xea7   : > { %v4816_v50 = vsub.f32 1.5, %v4815_v56 }
 0xea8   : > { %v7939_v9 = vpop.eup %7938 }
 0xea9   : > { %v4817_v59 = vmul.f32 %v7937_v61, %v4816_v50  ;;  %v4823_v22 = vmul.f32 %v7939_v9, %v4796_v57  ;;  %vm4829_vm6 = vweird.f32 %v7939_v9 }
 0xeaa   : > { %vm4830_vm8 = vmor %vm4828_vm7, %vm4829_vm6 }
 0xeab   : > { %v4821_v63 = vsel %vm4820_vm5, %v7937_v61, %v4817_v59  ;;  %v4824_v26 = vmul.f32 %v7939_v9, %v4823_v22 }
 0xeac   : > { %v4883_v15 = vmul.f32 %v4821_v63, %v10690_v6 }
 0xead   : > { %v4825_v52 = vmul.f32 0.5, %v4824_v26  ;;  %v4773_v8 = vpop.xlane.xlu2 %4772 }
 0xeae   : > { %v4789_v37 = vmul.f32 %v4773_v8, %v12243_v10  ;;  %v4895_v53 = vmul.f32 %v10783_v60, %v4883_v15 }
 0xeaf   : > { %v4826_v58 = vsub.f32 1.5, %v4825_v52 }
 0xeb0   : > { %v4797_v55 = vadd.f32 1e-06, %v4789_v37  ;;  %v4907_v49 = vadd.f32 %v10787_v19, %v4895_v53 }
 0xeb1   : > { %v4827_v46 = vmul.f32 %v7939_v9, %v4826_v58 }
 0xeb2   : > { %7940 = vrsqrt.f32 %v4797_v55  ;;  %7179 = vmatmul.msk.f32.gmra.mxu3 %vm651_vm0, %v4907_v49  ;;  %7187 = vmatmul.msk.f32.gmra.mxu2 %vm651_vm0, %v4907_v49  ;;  %vm4838_vm10 = vweird.f32 %v4797_v55 }
 0xeb3   : > { %v4831_v6 = vsel %vm4830_vm8, %v7939_v9, %v4827_v46 }
 0xeb4   : > { %v4884_v45 = vmul.f32 %v4831_v6, %v10697_v7 }
 0xeb6   : > { %v4896_v12 = vmul.f32 %v10783_v60, %v4884_v45 }
 0xeb8   : > { %v7941_v39 = vpop.eup %7940  ;;  %v4908_v32 = vadd.f32 %v10787_v19, %v4896_v12 }
 0xeb9   : > { %v4833_v33 = vmul.f32 %v7941_v39, %v4797_v55  ;;  %vm4839_vm9 = vweird.f32 %v7941_v39 }
 0xeba   : > { %7180 = vmatmul.msk.f32.gmra.mxu3 %vm651_vm0, %v4908_v32  ;;  %7188 = vmatmul.msk.f32.gmra.mxu2 %vm651_vm0, %v4908_v32  ;;  %vm4840_vm12 = vmor %vm4838_vm10, %vm4839_vm9 }
 0xebb   : > { %v4834_v3 = vmul.f32 %v7941_v39, %v4833_v33 }
 0xebd   : > { %v4835_v14 = vmul.f32 0.5, %v4834_v3 }
 0xebf   : > { %v4836_v17 = vsub.f32 1.5, %v4835_v14 }
 0xec1   : > { %v4837_v42 = vmul.f32 %v7941_v39, %v4836_v17 }
 0xec3   : > { %v4841_v62 = vsel %vm4840_vm12, %v7941_v39, %v4837_v42 }
 0xec4   : > { %v4885_v7 = vmul.f32 %v4841_v62, %v10704_v0 }
 0xec6   : > { %v4897_v48 = vmul.f32 %v10783_v60, %v4885_v7 }
 0xec8   : > { %v4909_v5 = vadd.f32 %v10787_v19, %v4897_v48 }
 0xeca   : > { %7181 = vmatmul.msk.f32.gmra.mxu3 %vm651_vm0, %v4909_v5  ;;  %7189 = vmatmul.msk.f32.gmra.mxu2 %vm651_vm0, %v4909_v5 }
 0xedb   : > { %v4776_v38 = vpop.xlane.xlu1 %4775 }
 0xedc   : > { %v4790_v43 = vmul.f32 %v4776_v38, %v12243_v10 }
 0xede   : > { %v4798_v35 = vadd.f32 1e-06, %v4790_v43 }
 0xee0   : > { %7942 = vrsqrt.f32 %v4798_v35  ;;  %vm4848_vm14 = vweird.f32 %v4798_v35 }
 0xee3   : > { %v4779_v47 = vpop.xlane.xlu0 %4778 }
 0xee4   : > { %v4791_v25 = vmul.f32 %v4779_v47, %v12243_v10 }
 0xee6   : > { %v7943_v20 = vpop.eup %7942  ;;  %v4799_v2 = vadd.f32 1e-06, %v4791_v25 }
 0xee7   : > { %v4843_v18 = vmul.f32 %v7943_v20, %v4798_v35  ;;  %vm4849_vm13 = vweird.f32 %v7943_v20 }
 0xee8   : > { %7944 = vrsqrt.f32 %v4799_v2  ;;  %vm4850_vm15 = vmor %vm4848_vm14, %vm4849_vm13  ;;  %vm4858_vm1 = vweird.f32 %v4799_v2 }
 0xee9   : > { %v4844_v0 = vmul.f32 %v7943_v20, %v4843_v18 }
 0xeeb   : > { %v4845_v29 = vmul.f32 0.5, %v4844_v0  ;;  %v4782_v1 = vpop.xlane.xlu2 %4781 }
 0xeec   : > { %v4792_v54 = vmul.f32 %v4782_v1, %v12243_v10 }
 0xeed   : > { %v4846_v4 = vsub.f32 1.5, %v4845_v29 }
 0xeee   : > { %v7945_v30 = vpop.eup %7944  ;;  %v4800_v21 = vadd.f32 1e-06, %v4792_v54 }
 0xeef   : > { %v4847_v61 = vmul.f32 %v7943_v20, %v4846_v4  ;;  %v4853_v57 = vmul.f32 %v7945_v30, %v4799_v2  ;;  %vm4859_vm11 = vweird.f32 %v7945_v30 }
 0xef0   : > { %7946 = vrsqrt.f32 %v4800_v21  ;;  %vm4860_vm2 = vmor %vm4858_vm1, %vm4859_vm11  ;;  %vm4868_vm4 = vweird.f32 %v4800_v21 }
 0xef1   : > { %v4851_v16 = vsel %vm4850_vm15, %v7943_v20, %v4847_v61  ;;  %v4854_v34 = vmul.f32 %v7945_v30, %v4853_v57 }
 0xef2   : > { %v4886_v56 = vmul.f32 %v4851_v16, %v10741_v28 }
 0xef3   : > { %v4855_v50 = vmul.f32 0.5, %v4854_v34  ;;  %v4785_v9 = vpop.xlane.xlu1 %4784 }
 0xef4   : > { %v4793_v59 = vmul.f32 %v4785_v9, %v12243_v10  ;;  %v4898_v22 = vmul.f32 %v10783_v60, %v4886_v56 }
 0xef5   : > { %v4856_v63 = vsub.f32 1.5, %v4855_v50 }
 0xef6   : > { %v7947_v26 = vpop.eup %7946  ;;  %v4801_v15 = vadd.f32 1e-06, %v4793_v59  ;;  %v4910_v52 = vadd.f32 %v10787_v19, %v4898_v22 }
 0xef7   : > { %v4857_v8 = vmul.f32 %v7945_v30, %v4856_v63  ;;  %v4863_v37 = vmul.f32 %v7947_v26, %v4800_v21  ;;  %vm4869_vm3 = vweird.f32 %v7947_v26 }
 0xef8   : > { %7948 = vrsqrt.f32 %v4801_v15  ;;  %7182 = vmatmul.msk.f32.gmra.mxu3 %vm651_vm0, %v4910_v52  ;;  %7190 = vmatmul.msk.f32.gmra.mxu2 %vm651_vm0, %v4910_v52  ;;  %vm4870_vm5 = vmor %vm4868_vm4, %vm4869_vm3  ;;  %vm4878_vm7 = vweird.f32 %v4801_v15 }
 0xef9   : > { %v4861_v28 = vsel %vm4860_vm2, %v7945_v30, %v4857_v8  ;;  %v4864_v53 = vmul.f32 %v7947_v26, %v4863_v37 }
 0xefa   : > { %v4887_v10 = vmul.f32 %v4861_v28, %v10767_v31 }
 0xefb   : > { %v4865_v58 = vmul.f32 0.5, %v4864_v53  ;;  %v5042_v53 = vld [vmem:[#allocation13] sm:$0xff] }
 0xefc   : > { %v4899_v55 = vmul.f32 %v10783_v60, %v4887_v10  ;;  %v5195_v10 = vld [vmem:[#allocation13 + $0x40] sm:$0xff] }
 0xefd   : > { %v4866_v49 = vsub.f32 1.5, %v4865_v58  ;;  %v5043_v58 = vld [vmem:[#allocation13 + $0x8] sm:$0xff] }
 0xefe   : > { %v7949_v46 = vpop.eup %7948  ;;  %v4911_v6 = vadd.f32 %v10787_v19, %v4899_v55  ;;  %v5196_v55 = vld [vmem:[#allocation13 + $0x48] sm:$0xff] }
 0xeff   : > { %v4867_v45 = vmul.f32 %v7947_v26, %v4866_v49  ;;  %v4873_v12 = vmul.f32 %v7949_v46, %v4801_v15  ;;  %vm4879_vm6 = vweird.f32 %v7949_v46  ;;  %v5044_v49 = vld [vmem:[#allocation13 + $0x10] sm:$0xff] }
 0xf00   : > { %7183 = vmatmul.msk.f32.gmra.mxu3 %vm651_vm0, %v4911_v6  ;;  %7191 = vmatmul.msk.f32.gmra.mxu2 %vm651_vm0, %v4911_v6  ;;  %vm4880_vm8 = vmor %vm4878_vm7, %vm4879_vm6  ;;  %v5045_v6 = vld [vmem:[#allocation13 + $0x18] sm:$0xff] }
 0xf01   : > { %v4871_v39 = vsel %vm4870_vm5, %v7947_v26, %v4867_v45  ;;  %v4874_v32 = vmul.f32 %v7949_v46, %v4873_v12  ;;  %v5198_v45 = vld [vmem:[#allocation13 + $0x58] sm:$0xff]  ;;  %v5046_v12 = vld [vmem:[#allocation13 + $0x20] sm:$0xff] }
 0xf02   : > { %v4888_v31 = vmul.f32 %v4871_v39, %v10774_v24  ;;  %v5199_v39 = vld [vmem:[#allocation13 + $0x60] sm:$0xff] }
 0xf03   : > { %v4875_v33 = vmul.f32 0.5, %v4874_v32  ;;  %v5047_v32 = vld [vmem:[#allocation13 + $0x28] sm:$0xff] }
 0xf04   : > { %v4900_v3 = vmul.f32 %v10783_v60, %v4888_v31  ;;  %v5200_v31 = vld [vmem:[#allocation13 + $0x68] sm:$0xff] }
 0xf05   : > { %v4876_v14 = vsub.f32 1.5, %v4875_v33  ;;  %v5048_v33 = vld [vmem:[#allocation13 + $0x30] sm:$0xff] }
 0xf06   : > { %v4912_v17 = vadd.f32 %v10787_v19, %v4900_v3  ;;  %v5201_v3 = vld [vmem:[#allocation13 + $0x70] sm:$0xff] }
 0xf07   : > { %v4877_v42 = vmul.f32 %v7949_v46, %v4876_v14  ;;  %v5049_v14 = vld [vmem:[#allocation13 + $0x38] sm:$0xff] }
 0xf08   : > { %7184 = vmatmul.msk.f32.gmra.mxu3 %vm651_vm0, %v4912_v17  ;;  %7192 = vmatmul.msk.f32.gmra.mxu2 %vm651_vm0, %v4912_v17  ;;  %v4977_v5 = vpop.f32.mrf.mxu3  ;;  %v5018_v38 = vpop.f32.mrf.mxu2  ;;  %v5202_v17 = vld [vmem:[#allocation13 + $0x78] sm:$0xff] }
 0xf09   : > { %v4881_v62 = vsel %vm4880_vm8, %v7949_v46, %v4877_v42  ;;  %v5197_v46 = vld [vmem:[#allocation13 + $0x50] sm:$0xff]  ;;  %v5349_v42 = vld [vmem:[#allocation13 + $0x80] sm:$0xff] }
 0xf0a   : > { %v4889_v7 = vmul.f32 %v4881_v62, %v10781_v36  ;;  %v5503_v62 = vld [vmem:[#allocation13 + $0xc0] sm:$0xff] }
 0xf0c   : > { %v4901_v48 = vmul.f32 %v10783_v60, %v4889_v7  ;;  %v5350_v7 = vld [vmem:[#allocation13 + $0x88] sm:$0xff] }
 0xf0e   : > { %v4913_v24 = vadd.f32 %v10787_v19, %v4901_v48  ;;  %v4930_v19 = vld [vmem:[%s12099_s10] sm:$0x3]  ;;  %v5504_v48 = vld [vmem:[#allocation13 + $0xc8] sm:$0xff] }
 0xf0f   : > { %v4932_v54 = vperm.slane %v4930_v19, 0  ;;  %v4933_v4 = vperm.slane %v4930_v19, 1 }
 0xf10   : > { %7185 = vmatmul.msk.f32.gmra.mxu3 %vm651_vm0, %v4913_v24  ;;  %7193 = vmatmul.msk.f32.gmra.mxu2 %vm651_vm0, %v4913_v24  ;;  %v5351_v24 = vld [vmem:[#allocation13 + $0x90] sm:$0xff] }
 0xf11   : > { %v10892_v37 = vadd.f32 %v4977_v5, %v4932_v54  ;;  %v10894_v28 = vadd.f32 %v5018_v38, %v4933_v4  ;;  %v5505_v5 = vld [vmem:[#allocation13 + $0xd0] sm:$0xff]  ;;  %v5352_v38 = vld [vmem:[#allocation13 + $0x98] sm:$0xff] }
 0xf35   : > { %v4980_v43 = vpop.f32.mrf.mxu3  ;;  %v5021_v35 = vpop.f32.mrf.mxu2 }
 0xf36   : > { %v10884_v52 = vadd.f32 %v4980_v43, %v4932_v54  ;;  %v10886_v8 = vadd.f32 %v5021_v35, %v4933_v4  ;;  %v5506_v43 = vld [vmem:[#allocation13 + $0xd8] sm:$0xff]  ;;  %v5353_v35 = vld [vmem:[#allocation13 + $0xa0] sm:$0xff] }
 0xf3d   : > { %v4983_v47 = vpop.f32.mrf.mxu3  ;;  %v5024_v25 = vpop.f32.mrf.mxu2 }
 0xf3e   : > { %v10876_v26 = vadd.f32 %v4983_v47, %v4932_v54  ;;  %v10878_v15 = vadd.f32 %v5024_v25, %v4933_v4  ;;  %v5507_v47 = vld [vmem:[#allocation13 + $0xe0] sm:$0xff]  ;;  %v5354_v25 = vld [vmem:[#allocation13 + $0xa8] sm:$0xff] }
 0xf4d   : > { %v4986_v20 = vpop.f32.mrf.mxu3  ;;  %v5027_v2 = vpop.f32.mrf.mxu2 }
 0xf4e   : > { %v10868_v22 = vadd.f32 %v4986_v20, %v4932_v54  ;;  %v10870_v63 = vadd.f32 %v5027_v2, %v4933_v4  ;;  %v5508_v20 = vld [vmem:[#allocation13 + $0xe8] sm:$0xff]  ;;  %v5355_v2 = vld [vmem:[#allocation13 + $0xb0] sm:$0xff] }
 0xf7b   : > { %v4989_v18 = vpop.f32.mrf.mxu3  ;;  %v5030_v0 = vpop.f32.mrf.mxu2 }
 0xf7c   : > { %v10860_v9 = vadd.f32 %v4989_v18, %v4932_v54  ;;  %v10862_v59 = vadd.f32 %v5030_v0, %v4933_v4  ;;  %v5509_v18 = vld [vmem:[#allocation13 + $0xf0] sm:$0xff] }
 0xf83   : > { %v4992_v29 = vpop.f32.mrf.mxu3  ;;  %v5033_v36 = vpop.f32.mrf.mxu2 }
 0xf84   : > { %v10852_v56 = vadd.f32 %v4992_v29, %v4932_v54  ;;  %v10854_v50 = vadd.f32 %v5033_v36, %v4933_v4  ;;  %v5356_v36 = vld [vmem:[#allocation13 + $0xb8] sm:$0xff] }
 0xf8b   : > { %v4995_v1 = vpop.f32.mrf.mxu3  ;;  %v5036_v60 = vpop.f32.mrf.mxu2 }
 0xf8c   : > { %v10844_v16 = vadd.f32 %v4995_v1, %v4932_v54  ;;  %v10846_v34 = vadd.f32 %v5036_v60, %v4933_v4  ;;  %v5510_v1 = vld [vmem:[#allocation13 + $0xf8] sm:$0xff] }
 0xf93   : > { %v4998_v30 = vpop.f32.mrf.mxu3  ;;  %v5039_v21 = vpop.f32.mrf.mxu2 }
 0xf94   : > { %v10840_v61 = vadd.f32 %v4998_v30, %v4932_v54  ;;  %v10842_v57 = vadd.f32 %v5039_v21, %v4933_v4  ;;  %v5657_v54 = vld [vmem:[#allocation13 + $0x100] sm:$0xff] }
 0xf95   : > { %v5811_v21 = vld [vmem:[#allocation13 + $0x140] sm:$0xff] }
 0xf96   : > { %5082 = vmatpush.msra.mxu0 %v10840_v61  ;;  %5123 = vmatpush.msrb.mxu1 %v10842_v57 }
 0xf97   : > { %5235 = vmatpush.msrb.mxu3 %v10840_v61  ;;  %5276 = vmatpush.msrb.mxu2 %v10842_v57 }
 0xf98   : > { %5083 = vmatpush.msra.mxu0 %v10844_v16  ;;  %5124 = vmatpush.msrb.mxu1 %v10846_v34 }
 0xf99   : > { %5236 = vmatpush.msrb.mxu3 %v10844_v16  ;;  %5277 = vmatpush.msrb.mxu2 %v10846_v34 }
 0xf9a   : > { %5084 = vmatpush.msra.mxu0 %v10852_v56  ;;  %5125 = vmatpush.msrb.mxu1 %v10854_v50 }
 0xf9b   : > { %5237 = vmatpush.msrb.mxu3 %v10852_v56  ;;  %5278 = vmatpush.msrb.mxu2 %v10854_v50 }
 0xf9c   : > { %5085 = vmatpush.msra.mxu0 %v10860_v9  ;;  %5126 = vmatpush.msrb.mxu1 %v10862_v59 }
 0xf9d   : > { %5238 = vmatpush.msrb.mxu3 %v10860_v9  ;;  %5279 = vmatpush.msrb.mxu2 %v10862_v59 }
 0xf9e   : > { %5086 = vmatpush.msra.mxu0 %v10868_v22  ;;  %5127 = vmatpush.msrb.mxu1 %v10870_v63 }
 0xf9f   : > { %5239 = vmatpush.msrb.mxu3 %v10868_v22  ;;  %5280 = vmatpush.msrb.mxu2 %v10870_v63 }
 0xfa0   : > { %5087 = vmatpush.msra.mxu0 %v10876_v26  ;;  %5128 = vmatpush.msrb.mxu1 %v10878_v15 }
 0xfa1   : > { %5240 = vmatpush.msrb.mxu3 %v10876_v26  ;;  %5281 = vmatpush.msrb.mxu2 %v10878_v15 }
 0xfa2   : > { %5088 = vmatpush.msra.mxu0 %v10884_v52  ;;  %5129 = vmatpush.msrb.mxu1 %v10886_v8 }
 0xfa3   : > { %5241 = vmatpush.msrb.mxu3 %v10884_v52  ;;  %5282 = vmatpush.msrb.mxu2 %v10886_v8 }
 0xfa4   : > { %5089 = vmatpush.msra.mxu0 %v10892_v37  ;;  %5130 = vmatpush.msrb.mxu1 %v10894_v28 }
 0xfa5   : > { %5242 = vmatpush.msrb.mxu3 %v10892_v37  ;;  %5283 = vmatpush.msrb.mxu2 %v10894_v28 }
 0xfa6   : > { %7194 = vmatmul.msk.f32.vlgmr.msra.gmra.mxu0 %vm651_vm0, %v5042_v53  ;;  %7202 = vmatmul.msk.f32.vlgmr.msrb.gmra.mxu1 %vm651_vm0, %v5042_v53 }
 0xfa7   : > { %7210 = vmatmul.msk.f32.vlgmr.msrb.gmra.mxu3 %vm651_vm0, %v5195_v10  ;;  %7218 = vmatmul.msk.f32.vlgmr.msrb.gmra.mxu2 %vm651_vm0, %v5195_v10 }
 0xfa8   : > { %5389 = vmatpush.msrb.mxu0 %v10840_v61  ;;  %5430 = vmatpush.msra.mxu1 %v10842_v57 }
 0xfa9   : > { %5543 = vmatpush.msra.mxu3 %v10840_v61  ;;  %5584 = vmatpush.msra.mxu2 %v10842_v57 }
 0xfaa   : > { %5390 = vmatpush.msrb.mxu0 %v10844_v16  ;;  %5431 = vmatpush.msra.mxu1 %v10846_v34 }
 0xfab   : > { %5544 = vmatpush.msra.mxu3 %v10844_v16  ;;  %5585 = vmatpush.msra.mxu2 %v10846_v34 }
 0xfac   : > { %5391 = vmatpush.msrb.mxu0 %v10852_v56  ;;  %5432 = vmatpush.msra.mxu1 %v10854_v50 }
 0xfad   : > { %5545 = vmatpush.msra.mxu3 %v10852_v56  ;;  %5586 = vmatpush.msra.mxu2 %v10854_v50 }
 0xfae   : > { %5392 = vmatpush.msrb.mxu0 %v10860_v9  ;;  %5433 = vmatpush.msra.mxu1 %v10862_v59 }
 0xfaf   : > { %5546 = vmatpush.msra.mxu3 %v10860_v9  ;;  %5587 = vmatpush.msra.mxu2 %v10862_v59 }
 0xfb0   : > { %7195 = vmatmul.msk.f32.gmra.mxu0 %vm651_vm0, %v5043_v58  ;;  %7203 = vmatmul.msk.f32.gmra.mxu1 %vm651_vm0, %v5043_v58  ;;  %v5658_v58 = vld [vmem:[#allocation13 + $0x108] sm:$0xff] }
 0xfb1   : > { %7211 = vmatmul.msk.f32.gmra.mxu3 %vm651_vm0, %v5196_v55  ;;  %7219 = vmatmul.msk.f32.gmra.mxu2 %vm651_vm0, %v5196_v55  ;;  %v5812_v55 = vld [vmem:[#allocation13 + $0x148] sm:$0xff] }
 0xfb2   : > { %5393 = vmatpush.msrb.mxu0 %v10868_v22  ;;  %5434 = vmatpush.msra.mxu1 %v10870_v63 }
 0xfb3   : > { %5547 = vmatpush.msra.mxu3 %v10868_v22  ;;  %5588 = vmatpush.msra.mxu2 %v10870_v63 }
 0xfb4   : > { %5394 = vmatpush.msrb.mxu0 %v10876_v26  ;;  %5435 = vmatpush.msra.mxu1 %v10878_v15 }
 0xfb5   : > { %5548 = vmatpush.msra.mxu3 %v10876_v26  ;;  %5589 = vmatpush.msra.mxu2 %v10878_v15 }
 0xfb6   : > { %5395 = vmatpush.msrb.mxu0 %v10884_v52  ;;  %5436 = vmatpush.msra.mxu1 %v10886_v8 }
 0xfb7   : > { %5549 = vmatpush.msra.mxu3 %v10884_v52  ;;  %5590 = vmatpush.msra.mxu2 %v10886_v8 }
 0xfb8   : > { %5396 = vmatpush.msrb.mxu0 %v10892_v37  ;;  %5437 = vmatpush.msra.mxu1 %v10894_v28 }
 0xfb9   : > { %5550 = vmatpush.msra.mxu3 %v10892_v37  ;;  %5591 = vmatpush.msra.mxu2 %v10894_v28 }
 0xfba   : > { %5697 = vmatpush.msra.mxu0 %v10840_v61  ;;  %5738 = vmatpush.msrb.mxu1 %v10842_v57 }
 0xfbb   : > { %5851 = vmatpush.msrb.mxu3 %v10840_v61  ;;  %5892 = vmatpush.msrb.mxu2 %v10842_v57 }
 0xfbc   : > { %7196 = vmatmul.msk.f32.gmra.mxu0 %vm651_vm0, %v5044_v49  ;;  %7204 = vmatmul.msk.f32.gmra.mxu1 %vm651_vm0, %v5044_v49 }
 0xfbd   : > { %7212 = vmatmul.msk.f32.gmra.mxu3 %vm651_vm0, %v5197_v46  ;;  %7220 = vmatmul.msk.f32.gmra.mxu2 %vm651_vm0, %v5197_v46 }
 0xfbe   : > { %5698 = vmatpush.msra.mxu0 %v10844_v16  ;;  %5739 = vmatpush.msrb.mxu1 %v10846_v34 }
 0xfbf   : > { %5852 = vmatpush.msrb.mxu3 %v10844_v16  ;;  %5893 = vmatpush.msrb.mxu2 %v10846_v34 }
 0xfc0   : > { %5699 = vmatpush.msra.mxu0 %v10852_v56  ;;  %5740 = vmatpush.msrb.mxu1 %v10854_v50 }
 0xfc1   : > { %5853 = vmatpush.msrb.mxu3 %v10852_v56  ;;  %5894 = vmatpush.msrb.mxu2 %v10854_v50 }
 0xfc2   : > { %5700 = vmatpush.msra.mxu0 %v10860_v9  ;;  %5741 = vmatpush.msrb.mxu1 %v10862_v59 }
 0xfc3   : > { %5854 = vmatpush.msrb.mxu3 %v10860_v9  ;;  %5895 = vmatpush.msrb.mxu2 %v10862_v59 }
 0xfc4   : > { %5701 = vmatpush.msra.mxu0 %v10868_v22  ;;  %5742 = vmatpush.msrb.mxu1 %v10870_v63 }
 0xfc5   : > { %5855 = vmatpush.msrb.mxu3 %v10868_v22  ;;  %5896 = vmatpush.msrb.mxu2 %v10870_v63 }
 0xfc6   : > { %7197 = vmatmul.msk.f32.gmra.mxu0 %vm651_vm0, %v5045_v6  ;;  %7205 = vmatmul.msk.f32.gmra.mxu1 %vm651_vm0, %v5045_v6 }
 0xfc7   : > { %7213 = vmatmul.msk.f32.gmra.mxu3 %vm651_vm0, %v5198_v45  ;;  %7221 = vmatmul.msk.f32.gmra.mxu2 %vm651_vm0, %v5198_v45 }
 0xfc8   : > { %5702 = vmatpush.msra.mxu0 %v10876_v26  ;;  %5743 = vmatpush.msrb.mxu1 %v10878_v15 }
 0xfc9   : > { %5856 = vmatpush.msrb.mxu3 %v10876_v26  ;;  %5897 = vmatpush.msrb.mxu2 %v10878_v15 }
 0xfca   : > { %5703 = vmatpush.msra.mxu0 %v10884_v52  ;;  %5744 = vmatpush.msrb.mxu1 %v10886_v8 }
 0xfcb   : > { %5857 = vmatpush.msrb.mxu3 %v10884_v52  ;;  %5898 = vmatpush.msrb.mxu2 %v10886_v8 }
 0xfcc   : > { %5704 = vmatpush.msra.mxu0 %v10892_v37  ;;  %5745 = vmatpush.msrb.mxu1 %v10894_v28 }
 0xfcd   : > { %5858 = vmatpush.msrb.mxu3 %v10892_v37  ;;  %5899 = vmatpush.msrb.mxu2 %v10894_v28 }
 0xfce   : > { %7198 = vmatmul.msk.f32.gmra.mxu0 %vm651_vm0, %v5046_v12  ;;  %7206 = vmatmul.msk.f32.gmra.mxu1 %vm651_vm0, %v5046_v12  ;;  %v5662_v12 = vld [vmem:[#allocation13 + $0x128] sm:$0xff] }
 0xfcf   : > { %7214 = vmatmul.msk.f32.gmra.mxu3 %vm651_vm0, %v5199_v39  ;;  %7222 = vmatmul.msk.f32.gmra.mxu2 %vm651_vm0, %v5199_v39  ;;  %v5816_v39 = vld [vmem:[#allocation13 + $0x168] sm:$0xff] }
 0xfd6   : > { %7199 = vmatmul.msk.f32.gmra.mxu0 %vm651_vm0, %v5047_v32  ;;  %7207 = vmatmul.msk.f32.gmra.mxu1 %vm651_vm0, %v5047_v32 }
 0xfd7   : > { %7215 = vmatmul.msk.f32.gmra.mxu3 %vm651_vm0, %v5200_v31  ;;  %7223 = vmatmul.msk.f32.gmra.mxu2 %vm651_vm0, %v5200_v31 }
 0xfde   : > { %7200 = vmatmul.msk.f32.gmra.mxu0 %vm651_vm0, %v5048_v33  ;;  %7208 = vmatmul.msk.f32.gmra.mxu1 %vm651_vm0, %v5048_v33 }
 0xfdf   : > { %7216 = vmatmul.msk.f32.gmra.mxu3 %vm651_vm0, %v5201_v3  ;;  %7224 = vmatmul.msk.f32.gmra.mxu2 %vm651_vm0, %v5201_v3 }
 0xfe6   : > { %7201 = vmatmul.msk.f32.gmra.mxu0 %vm651_vm0, %v5049_v14  ;;  %7209 = vmatmul.msk.f32.gmra.mxu1 %vm651_vm0, %v5049_v14  ;;  %v5663_v14 = vld [vmem:[#allocation13 + $0x130] sm:$0xff] }
 0xfe7   : > { %7217 = vmatmul.msk.f32.gmra.mxu3 %vm651_vm0, %v5202_v17  ;;  %7225 = vmatmul.msk.f32.gmra.mxu2 %vm651_vm0, %v5202_v17  ;;  %v5817_v17 = vld [vmem:[#allocation13 + $0x170] sm:$0xff] }
 0xfee   : > { %7226 = vmatmul.msk.f32.vlgmr.msrb.gmra.mxu0 %vm651_vm0, %v5349_v42  ;;  %7234 = vmatmul.msk.f32.vlgmr.msra.gmra.mxu1 %vm651_vm0, %v5349_v42 }
 0xfef   : > { %7242 = vmatmul.msk.f32.vlgmr.msra.gmra.mxu3 %vm651_vm0, %v5503_v62  ;;  %7250 = vmatmul.msk.f32.vlgmr.msra.gmra.mxu2 %vm651_vm0, %v5503_v62 }
 0xff0   : > { %6005 = vmatpush.msrb.mxu0 %v10840_v61  ;;  %6046 = vmatpush.msra.mxu1 %v10842_v57 }
 0xff1   : > { %6159 = vmatpush.msra.mxu3 %v10840_v61  ;;  %6200 = vmatpush.msra.mxu2 %v10842_v57 }
 0xff2   : > { %6006 = vmatpush.msrb.mxu0 %v10844_v16  ;;  %6047 = vmatpush.msra.mxu1 %v10846_v34 }
 0xff3   : > { %6160 = vmatpush.msra.mxu3 %v10844_v16  ;;  %6201 = vmatpush.msra.mxu2 %v10846_v34 }
 0xff4   : > { %6007 = vmatpush.msrb.mxu0 %v10852_v56  ;;  %6048 = vmatpush.msra.mxu1 %v10854_v50 }
 0xff5   : > { %6161 = vmatpush.msra.mxu3 %v10852_v56  ;;  %6202 = vmatpush.msra.mxu2 %v10854_v50 }
 0xff6   : > { %6008 = vmatpush.msrb.mxu0 %v10860_v9  ;;  %6049 = vmatpush.msra.mxu1 %v10862_v59 }
 0xff7   : > { %6162 = vmatpush.msra.mxu3 %v10860_v9  ;;  %6203 = vmatpush.msra.mxu2 %v10862_v59 }
 0xff8   : > { %7227 = vmatmul.msk.f32.gmra.mxu0 %vm651_vm0, %v5350_v7  ;;  %7235 = vmatmul.msk.f32.gmra.mxu1 %vm651_vm0, %v5350_v7 }
 0xff9   : > { %7243 = vmatmul.msk.f32.gmra.mxu3 %vm651_vm0, %v5504_v48  ;;  %7251 = vmatmul.msk.f32.gmra.mxu2 %vm651_vm0, %v5504_v48 }
 0xffa   : > { %6009 = vmatpush.msrb.mxu0 %v10868_v22  ;;  %6050 = vmatpush.msra.mxu1 %v10870_v63 }
 0xffb   : > { %6163 = vmatpush.msra.mxu3 %v10868_v22  ;;  %6204 = vmatpush.msra.mxu2 %v10870_v63 }
 0xffc   : > { %6010 = vmatpush.msrb.mxu0 %v10876_v26  ;;  %6051 = vmatpush.msra.mxu1 %v10878_v15 }
 0xffd   : > { %6164 = vmatpush.msra.mxu3 %v10876_v26  ;;  %6205 = vmatpush.msra.mxu2 %v10878_v15 }
 0xffe   : > { %6011 = vmatpush.msrb.mxu0 %v10884_v52  ;;  %6052 = vmatpush.msra.mxu1 %v10886_v8 }
 0xfff   : > { %6165 = vmatpush.msra.mxu3 %v10884_v52  ;;  %6206 = vmatpush.msra.mxu2 %v10886_v8 }
0x1000   : > { %6012 = vmatpush.msrb.mxu0 %v10892_v37  ;;  %6053 = vmatpush.msra.mxu1 %v10894_v28 }
0x1001   : > { %6166 = vmatpush.msra.mxu3 %v10892_v37  ;;  %6207 = vmatpush.msra.mxu2 %v10894_v28 }
0x1002   : > { %7228 = vmatmul.msk.f32.gmra.mxu0 %vm651_vm0, %v5351_v24  ;;  %7236 = vmatmul.msk.f32.gmra.mxu1 %vm651_vm0, %v5351_v24  ;;  %v5664_v24 = vld [vmem:[#allocation13 + $0x138] sm:$0xff] }
0x1003   : > { %7244 = vmatmul.msk.f32.gmra.mxu3 %vm651_vm0, %v5505_v5  ;;  %7252 = vmatmul.msk.f32.gmra.mxu2 %vm651_vm0, %v5505_v5  ;;  %v5818_v5 = vld [vmem:[#allocation13 + $0x178] sm:$0xff] }
0x100a   : > { %7229 = vmatmul.msk.f32.gmra.mxu0 %vm651_vm0, %v5352_v38  ;;  %7237 = vmatmul.msk.f32.gmra.mxu1 %vm651_vm0, %v5352_v38 }
0x100b   : > { %7245 = vmatmul.msk.f32.gmra.mxu3 %vm651_vm0, %v5506_v43  ;;  %7253 = vmatmul.msk.f32.gmra.mxu2 %vm651_vm0, %v5506_v43 }
0x1012   : > { %7230 = vmatmul.msk.f32.gmra.mxu0 %vm651_vm0, %v5353_v35  ;;  %7238 = vmatmul.msk.f32.gmra.mxu1 %vm651_vm0, %v5353_v35 }
0x1013   : > { %7246 = vmatmul.msk.f32.gmra.mxu3 %vm651_vm0, %v5507_v47  ;;  %7254 = vmatmul.msk.f32.gmra.mxu2 %vm651_vm0, %v5507_v47 }
0x101a   : > { %7231 = vmatmul.msk.f32.gmra.mxu0 %vm651_vm0, %v5354_v25  ;;  %7239 = vmatmul.msk.f32.gmra.mxu1 %vm651_vm0, %v5354_v25  ;;  %v5965_v25 = vld [vmem:[#allocation13 + $0x180] sm:$0xff] }
0x101b   : > { %7247 = vmatmul.msk.f32.gmra.mxu3 %vm651_vm0, %v5508_v20  ;;  %7255 = vmatmul.msk.f32.gmra.mxu2 %vm651_vm0, %v5508_v20  ;;  %v6119_v20 = vld [vmem:[#allocation13 + $0x1c0] sm:$0xff] }
0x1022   : > { %7232 = vmatmul.msk.f32.gmra.mxu0 %vm651_vm0, %v5355_v2  ;;  %7240 = vmatmul.msk.f32.gmra.mxu1 %vm651_vm0, %v5355_v2 }
0x1023   : > { %7248 = vmatmul.msk.f32.gmra.mxu3 %vm651_vm0, %v5509_v18  ;;  %7256 = vmatmul.msk.f32.gmra.mxu2 %vm651_vm0, %v5509_v18  ;;  %v11060_v0 = vpop.f32.mrf.mxu0  ;;  %v11062_v29 = vpop.f32.mrf.mxu1 }
0x102a   : > { %7233 = vmatmul.msk.f32.gmra.mxu0 %vm651_vm0, %v5356_v36  ;;  %7241 = vmatmul.msk.f32.gmra.mxu1 %vm651_vm0, %v5356_v36  ;;  %v11068_v60 = vpop.f32.mrf.mxu3  ;;  %v11070_v19 = vpop.f32.mrf.mxu2 }
0x102b   : > { %7249 = vmatmul.msk.f32.gmra.mxu3 %vm651_vm0, %v5510_v1  ;;  %7257 = vmatmul.msk.f32.gmra.mxu2 %vm651_vm0, %v5510_v1  ;;  %v5966_v1 = vld [vmem:[#allocation13 + $0x188] sm:$0xff] }
0x102d   : > { %v11072_v4 = vpop.f32.mrf.mxu0  ;;  %v11074_v30 = vpop.f32.mrf.mxu1 }
0x1032   : > { %7258 = vmatmul.msk.f32.vlgmr.msra.gmra.mxu0 %vm651_vm0, %v5657_v54  ;;  %7266 = vmatmul.msk.f32.vlgmr.msrb.gmra.mxu1 %vm651_vm0, %v5657_v54 }
0x1033   : > { %7274 = vmatmul.msk.f32.vlgmr.msrb.gmra.mxu3 %vm651_vm0, %v5811_v21  ;;  %7282 = vmatmul.msk.f32.vlgmr.msrb.gmra.mxu2 %vm651_vm0, %v5811_v21  ;;  %v6120_v21 = vld [vmem:[#allocation13 + $0x1c8] sm:$0xff] }
0x1034   : > { %6313 = vmatpush.msra.mxu0 %v10840_v61  ;;  %6354 = vmatpush.msrb.mxu1 %v10842_v57  ;;  %v11084_v53 = vpop.f32.mrf.mxu3  ;;  %v11086_v10 = vpop.f32.mrf.mxu2 }
0x1036   : > { %6314 = vmatpush.msra.mxu0 %v10844_v16  ;;  %6355 = vmatpush.msrb.mxu1 %v10846_v34  ;;  %v5659_v16 = vld [vmem:[#allocation13 + $0x110] sm:$0xff] }
0x1037   : > { %v5813_v34 = vld [vmem:[#allocation13 + $0x150] sm:$0xff] }
0x1038   : > { %6315 = vmatpush.msra.mxu0 %v10852_v56  ;;  %6356 = vmatpush.msrb.mxu1 %v10854_v50 }
0x1039   : > { %v11090_v49 = vpop.f32.mrf.mxu0  ;;  %v11092_v46 = vpop.f32.mrf.mxu1 }
0x103a   : > { %6316 = vmatpush.msra.mxu0 %v10860_v9  ;;  %6357 = vmatpush.msrb.mxu1 %v10862_v59  ;;  %v5660_v9 = vld [vmem:[#allocation13 + $0x118] sm:$0xff] }
0x103b   : > { %7259 = vmatmul.msk.f32.gmra.mxu0 %vm651_vm0, %v5658_v58  ;;  %7267 = vmatmul.msk.f32.gmra.mxu1 %vm651_vm0, %v5658_v58  ;;  %v5814_v59 = vld [vmem:[#allocation13 + $0x158] sm:$0xff] }
0x103c   : > { %7275 = vmatmul.msk.f32.gmra.mxu3 %vm651_vm0, %v5812_v55  ;;  %7283 = vmatmul.msk.f32.gmra.mxu2 %vm651_vm0, %v5812_v55 }
0x103d   : > { %6317 = vmatpush.msra.mxu0 %v10868_v22  ;;  %6358 = vmatpush.msrb.mxu1 %v10870_v63 }
0x103f   : > { %6318 = vmatpush.msra.mxu0 %v10876_v26  ;;  %6359 = vmatpush.msrb.mxu1 %v10878_v15 }
0x1040   : > { %v11104_v61 = vpop.f32.mrf.mxu3  ;;  %v11106_v57 = vpop.f32.mrf.mxu2 }
0x1041   : > { %6319 = vmatpush.msra.mxu0 %v10884_v52  ;;  %6360 = vmatpush.msrb.mxu1 %v10886_v8  ;;  %v5661_v52 = vld [vmem:[#allocation13 + $0x120] sm:$0xff] }
0x1042   : > { %v5815_v8 = vld [vmem:[#allocation13 + $0x160] sm:$0xff] }
0x1043   : > { %6320 = vmatpush.msra.mxu0 %v10892_v37  ;;  %6361 = vmatpush.msrb.mxu1 %v10894_v28  ;;  %v11112_v56 = vpop.f32.mrf.mxu0  ;;  %v11114_v50 = vpop.f32.mrf.mxu1 }
0x1044   : > { %7260 = vmatmul.msk.f32.gmra.mxu0 %vm651_vm0, %v5659_v16  ;;  %7268 = vmatmul.msk.f32.gmra.mxu1 %vm651_vm0, %v5659_v16  ;;  %v5967_v16 = vld [vmem:[#allocation13 + $0x190] sm:$0xff] }
0x1045   : > { %7276 = vmatmul.msk.f32.gmra.mxu3 %vm651_vm0, %v5813_v34  ;;  %7284 = vmatmul.msk.f32.gmra.mxu2 %vm651_vm0, %v5813_v34 }
0x104a   : > { %v11120_v22 = vpop.f32.mrf.mxu3  ;;  %v11122_v63 = vpop.f32.mrf.mxu2 }
0x104b   : > { %v11124_v26 = vpop.f32.mrf.mxu0  ;;  %v11126_v15 = vpop.f32.mrf.mxu1 }
0x104c   : > { %7261 = vmatmul.msk.f32.gmra.mxu0 %vm651_vm0, %v5660_v9  ;;  %7269 = vmatmul.msk.f32.gmra.mxu1 %vm651_vm0, %v5660_v9  ;;  %v6121_v9 = vld [vmem:[#allocation13 + $0x1d0] sm:$0xff] }
0x104d   : > { %7277 = vmatmul.msk.f32.gmra.mxu3 %vm651_vm0, %v5814_v59  ;;  %7285 = vmatmul.msk.f32.gmra.mxu2 %vm651_vm0, %v5814_v59 }
0x1052   : > { %v11132_v37 = vpop.f32.mrf.mxu3  ;;  %v11134_v28 = vpop.f32.mrf.mxu2 }
0x1053   : > { %v11136_v6 = vpop.f32.mrf.mxu0  ;;  %v11138_v45 = vpop.f32.mrf.mxu1 }
0x1054   : > { %7262 = vmatmul.msk.f32.gmra.mxu0 %vm651_vm0, %v5661_v52  ;;  %7270 = vmatmul.msk.f32.gmra.mxu1 %vm651_vm0, %v5661_v52 }
0x1055   : > { %7278 = vmatmul.msk.f32.gmra.mxu3 %vm651_vm0, %v5815_v8  ;;  %7286 = vmatmul.msk.f32.gmra.mxu2 %vm651_vm0, %v5815_v8 }
0x105a   : > { %v11144_v32 = vpop.f32.mrf.mxu3  ;;  %v11152_v3 = vpop.f32.mrf.mxu2 }
0x105b   : > { %v11146_v31 = vpop.f32.mrf.mxu0  ;;  %v11148_v33 = vpop.f32.mrf.mxu1 }
0x105c   : > { %7263 = vmatmul.msk.f32.gmra.mxu0 %vm651_vm0, %v5662_v12  ;;  %7271 = vmatmul.msk.f32.gmra.mxu1 %vm651_vm0, %v5662_v12  ;;  %v5968_v12 = vld [vmem:[#allocation13 + $0x198] sm:$0xff] }
0x105d   : > { %7279 = vmatmul.msk.f32.gmra.mxu3 %vm651_vm0, %v5816_v39  ;;  %7287 = vmatmul.msk.f32.gmra.mxu2 %vm651_vm0, %v5816_v39  ;;  %v6122_v39 = vld [vmem:[#allocation13 + $0x1d8] sm:$0xff] }
0x1062   : > { %v11162_v7 = vpop.f32.mrf.mxu3  ;;  %v11166_v48 = vpop.f32.mrf.mxu2 }
0x1063   : > { %v11156_v42 = vpop.f32.mrf.mxu0  ;;  %v11158_v62 = vpop.f32.mrf.mxu1 }
0x1064   : > { %7264 = vmatmul.msk.f32.gmra.mxu0 %vm651_vm0, %v5663_v14  ;;  %7272 = vmatmul.msk.f32.gmra.mxu1 %vm651_vm0, %v5663_v14 }
0x1065   : > { %7280 = vmatmul.msk.f32.gmra.mxu3 %vm651_vm0, %v5817_v17  ;;  %7288 = vmatmul.msk.f32.gmra.mxu2 %vm651_vm0, %v5817_v17 }
0x106a   : > { %v11176_v35 = vpop.f32.mrf.mxu3  ;;  %v11178_v47 = vpop.f32.mrf.mxu2 }
0x106b   : > { %v11168_v38 = vpop.f32.mrf.mxu0  ;;  %v11170_v43 = vpop.f32.mrf.mxu1 }
0x106c   : > { %7265 = vmatmul.msk.f32.gmra.mxu0 %vm651_vm0, %v5664_v24  ;;  %7273 = vmatmul.msk.f32.gmra.mxu1 %vm651_vm0, %v5664_v24 }
0x106d   : > { %7281 = vmatmul.msk.f32.gmra.mxu3 %vm651_vm0, %v5818_v5  ;;  %7289 = vmatmul.msk.f32.gmra.mxu2 %vm651_vm0, %v5818_v5 }
0x1072   : > { %v11188_v36 = vpop.f32.mrf.mxu3  ;;  %v11190_v54 = vpop.f32.mrf.mxu2 }
0x1074   : > { %7290 = vmatmul.msk.f32.vlgmr.msrb.gmra.mxu0 %vm651_vm0, %v5965_v25  ;;  %7298 = vmatmul.msk.f32.vlgmr.msra.gmra.mxu1 %vm651_vm0, %v5965_v25  ;;  %v5969_v25 = vld [vmem:[#allocation13 + $0x1a0] sm:$0xff] }
0x1075   : > { %7306 = vmatmul.msk.f32.vlgmr.msra.gmra.mxu3 %vm651_vm0, %v6119_v20  ;;  %7314 = vmatmul.msk.f32.vlgmr.msra.gmra.mxu2 %vm651_vm0, %v6119_v20  ;;  %v11184_v2 = vpop.f32.mrf.mxu0  ;;  %v11186_v18 = vpop.f32.mrf.mxu1  ;;  %v6123_v20 = vld [vmem:[#allocation13 + $0x1e0] sm:$0xff] }
0x107c   : > { %7291 = vmatmul.msk.f32.gmra.mxu0 %vm651_vm0, %v5966_v1  ;;  %7299 = vmatmul.msk.f32.gmra.mxu1 %vm651_vm0, %v5966_v1  ;;  %v11200_v34 = vpop.f32.mrf.mxu3  ;;  %v11202_v59 = vpop.f32.mrf.mxu2 }
0x107d   : > { %7307 = vmatmul.msk.f32.gmra.mxu3 %vm651_vm0, %v6120_v21  ;;  %7315 = vmatmul.msk.f32.gmra.mxu2 %vm651_vm0, %v6120_v21 }
0x107f   : > { %v11196_v58 = vpop.f32.mrf.mxu0  ;;  %v11198_v55 = vpop.f32.mrf.mxu1 }
0x1084   : > { %7292 = vmatmul.msk.f32.gmra.mxu0 %vm651_vm0, %v5967_v16  ;;  %7300 = vmatmul.msk.f32.gmra.mxu1 %vm651_vm0, %v5967_v16 }
0x1085   : > { %7308 = vmatmul.msk.f32.gmra.mxu3 %vm651_vm0, %v6121_v9  ;;  %7316 = vmatmul.msk.f32.gmra.mxu2 %vm651_vm0, %v6121_v9 }
0x1086   : > { %v11212_v14 = vpop.f32.mrf.mxu3  ;;  %v11218_v17 = vpop.f32.mrf.mxu2 }
0x1087   : > { %v11208_v52 = vpop.f32.mrf.mxu0  ;;  %v11210_v8 = vpop.f32.mrf.mxu1 }
0x108c   : > { %7293 = vmatmul.msk.f32.gmra.mxu0 %vm651_vm0, %v5968_v12  ;;  %7301 = vmatmul.msk.f32.gmra.mxu1 %vm651_vm0, %v5968_v12  ;;  %v5970_v12 = vld [vmem:[#allocation13 + $0x1a8] sm:$0xff] }
0x108d   : > { %7309 = vmatmul.msk.f32.gmra.mxu3 %vm651_vm0, %v6122_v39  ;;  %7317 = vmatmul.msk.f32.gmra.mxu2 %vm651_vm0, %v6122_v39  ;;  %v6124_v39 = vld [vmem:[#allocation13 + $0x1e8] sm:$0xff] }
0x108e   : > { %v11228_v1 = vpop.f32.mrf.mxu3  ;;  %v11234_v9 = vpop.f32.mrf.mxu2 }
0x108f   : > { %v11220_v24 = vpop.f32.mrf.mxu0  ;;  %v11222_v5 = vpop.f32.mrf.mxu1 }
0x1090   : > { %12251 = vst [vmem:[#allocation41_spill] sm:$0xff] %v11222_v5 }
0x1094   : > { %7294 = vmatmul.msk.f32.gmra.mxu0 %vm651_vm0, %v5969_v25  ;;  %7302 = vmatmul.msk.f32.gmra.mxu1 %vm651_vm0, %v5969_v25 }
0x1095   : > { %7310 = vmatmul.msk.f32.gmra.mxu3 %vm651_vm0, %v6123_v20  ;;  %7318 = vmatmul.msk.f32.gmra.mxu2 %vm651_vm0, %v6123_v20 }
0x1096   : > { %v11244_v11 = vpop.f32.mrf.mxu3  ;;  %v11246_v41 = vpop.f32.mrf.mxu2 }
0x1097   : > { %v11230_v21 = vpop.f32.mrf.mxu0  ;;  %v11232_v16 = vpop.f32.mrf.mxu1  ;;  %12256 = vst [vmem:[#allocation37_spill] sm:$0xff] %v11244_v11 }
0x1098   : > { %12252 = vst [vmem:[#allocation36_spill] sm:$0xff] %v11230_v21 }
0x1099   : > { %12253 = vst [vmem:[#allocation48_spill] sm:$0xff] %v11232_v16 }
0x109a   : > { %12257 = vst [vmem:[#allocation49_spill] sm:$0xff] %v11246_v41  ;;  %v5156_v41 = vld [vmem:[#allocation14] sm:$0x3] }
0x109b   : > { %v5158_v11 = vperm.slane %v5156_v41, 0 }
0x109c   : > { %7295 = vmatmul.msk.f32.gmra.mxu0 %vm651_vm0, %v5970_v12  ;;  %7303 = vmatmul.msk.f32.gmra.mxu1 %vm651_vm0, %v5970_v12 }
0x109d   : > { %7311 = vmatmul.msk.f32.gmra.mxu3 %vm651_vm0, %v6124_v39  ;;  %7319 = vmatmul.msk.f32.gmra.mxu2 %vm651_vm0, %v6124_v39 }
0x109e   : > { %v11256_v40 = vpop.f32.mrf.mxu3  ;;  %v11258_v51 = vpop.f32.mrf.mxu2 }
0x109f   : > { %v11240_v25 = vpop.f32.mrf.mxu0  ;;  %v11242_v20 = vpop.f32.mrf.mxu1  ;;  %12260 = vst [vmem:[#allocation38_spill] sm:$0xff] %v11256_v40 }
0x10a0   : > { %12254 = vst [vmem:[#allocation55_spill] sm:$0xff] %v11240_v25 }
0x10a1   : > { %12255 = vst [vmem:[#allocation42_spill] sm:$0xff] %v11242_v20 }
0x10a2   : > { %12261 = vst [vmem:[#allocation50_spill] sm:$0xff] %v11258_v51  ;;  %v6274_v51 = vld [vmem:[#allocation13 + $0x208] sm:$0xff] }
0x10a4   : > { %7296 = vmatmul.msk.f32.gmra.mxu0 %vm651_vm0, %v5971_v13  ;;  %7304 = vmatmul.msk.f32.gmra.mxu1 %vm651_vm0, %v5971_v13 }
0x10a5   : > { %7312 = vmatmul.msk.f32.gmra.mxu3 %vm651_vm0, %v6125_v44  ;;  %7320 = vmatmul.msk.f32.gmra.mxu2 %vm651_vm0, %v6125_v44 }
0x10a6   : > { %v11272_v20 = vpop.f32.mrf.mxu2 }
0x10a7   : > { %v11252_v12 = vpop.f32.mrf.mxu0  ;;  %v11254_v39 = vpop.f32.mrf.mxu1  ;;  %12265 = vst [vmem:[#allocation51_spill] sm:$0xff] %v11272_v20 }
0x10a8   : > { %12258 = vst [vmem:[#allocation56_spill] sm:$0xff] %v11252_v12  ;;  %v6273_v12 = vld [vmem:[#allocation13 + $0x200] sm:$0xff] }
0x10a9   : > { %12259 = vst [vmem:[#allocation43_spill] sm:$0xff] %v11254_v39  ;;  %v11268_v39 = vpop.f32.mrf.mxu3 }
0x10aa   : > { %12264 = vst [vmem:[#allocation39_spill] sm:$0xff] %v11268_v39 }
0x10ac   : > { %7297 = vmatmul.msk.f32.gmra.mxu0 %vm651_vm0, %v5972_v23  ;;  %7305 = vmatmul.msk.f32.gmra.mxu1 %vm651_vm0, %v5972_v23 }
0x10ad   : > { %7313 = vmatmul.msk.f32.gmra.mxu3 %vm651_vm0, %v6126_v27  ;;  %7321 = vmatmul.msk.f32.gmra.mxu2 %vm651_vm0, %v6126_v27 }
0x10af   : > { %v11264_v13 = vpop.f32.mrf.mxu0  ;;  %v11266_v44 = vpop.f32.mrf.mxu1 }
0x10b0   : > { %12262 = vst [vmem:[#allocation31_spill] sm:$0xff] %v11264_v13 }
0x10b1   : > { %12263 = vst [vmem:[#allocation44_spill] sm:$0xff] %v11266_v44  ;;  %v11280_v27 = vpop.f32.mrf.mxu3  ;;  %v11282_v44 = vpop.f32.mrf.mxu2 }
0x10b2   : > { %12268 = vst [vmem:[#allocation45_spill] sm:$0xff] %v11280_v27 }
0x10b3   : > { %12269 = vst [vmem:[#allocation40_spill] sm:$0xff] %v11282_v44  ;;  %v6277_v44 = vld [vmem:[#allocation13 + $0x220] sm:$0xff] }
0x10b4   : > { %7322 = vmatmul.msk.f32.vlgmr.msra.gmra.mxu0 %vm651_vm0, %v6273_v12  ;;  %7330 = vmatmul.msk.f32.vlgmr.msrb.gmra.mxu1 %vm651_vm0, %v6273_v12  ;;  %v6275_v12 = vld [vmem:[#allocation13 + $0x210] sm:$0xff] }
0x10b8   : > { %v11274_v25 = vpop.f32.mrf.mxu0  ;;  %v11276_v23 = vpop.f32.mrf.mxu1 }
0x10b9   : > { %12266 = vst [vmem:[#allocation57_spill] sm:$0xff] %v11274_v25  ;;  %v11290_v25 = vpop.f32.mrf.mxu3  ;;  %v11296_v40 = vpop.f32.mrf.mxu2 }
0x10ba   : > { %12267 = vst [vmem:[#allocation30_spill] sm:$0xff] %v11276_v23 }
0x10bb   : > { %12272 = vst [vmem:[#allocation59_spill] sm:$0xff] %v11290_v25 }
0x10bc   : > { %7323 = vmatmul.msk.f32.gmra.mxu0 %vm651_vm0, %v6274_v51  ;;  %7331 = vmatmul.msk.f32.gmra.mxu1 %vm651_vm0, %v6274_v51  ;;  %v6276_v51 = vld [vmem:[#allocation13 + $0x218] sm:$0xff]  ;;  %12275 = vst [vmem:[#allocation62_spill] sm:$0xff] %v11296_v40  ;;  %v6278_v40 = vld [vmem:[#allocation13 + $0x228] sm:$0xff] }
0x10c1   : > { %v11284_v13 = vpop.f32.mrf.mxu0  ;;  %v11286_v39 = vpop.f32.mrf.mxu1 }
0x10c2   : > { %12270 = vst [vmem:[#allocation52_spill] sm:$0xff] %v11284_v13  ;;  %v11304_v27 = vpop.f32.mrf.mxu3 }
0x10c3   : > { %12271 = vst [vmem:[#allocation58_spill] sm:$0xff] %v11286_v39 }
0x10c4   : > { %7324 = vmatmul.msk.f32.gmra.mxu0 %vm651_vm0, %v6275_v12  ;;  %7332 = vmatmul.msk.f32.gmra.mxu1 %vm651_vm0, %v6275_v12  ;;  %12278 = vst [vmem:[#allocation65_spill] sm:$0xff] %v11304_v27  ;;  %v11306_v12 = vpop.f32.mrf.mxu2 }
0x10c5   : > { %12279 = vst [vmem:[#allocation66_spill] sm:$0xff] %v11306_v12  ;;  %v6279_v12 = vld [vmem:[#allocation13 + $0x230] sm:$0xff] }
0x10c9   : > { %v11292_v23 = vpop.f32.mrf.mxu0  ;;  %v11294_v20 = vpop.f32.mrf.mxu1 }
0x10ca   : > { %12273 = vst [vmem:[#allocation60_spill] sm:$0xff] %v11292_v23  ;;  %v11314_v25 = vpop.f32.mrf.mxu3 }
0x10cb   : > { %12274 = vst [vmem:[#allocation61_spill] sm:$0xff] %v11294_v20 }
0x10cc   : > { %7325 = vmatmul.msk.f32.gmra.mxu0 %vm651_vm0, %v6276_v51  ;;  %7333 = vmatmul.msk.f32.gmra.mxu1 %vm651_vm0, %v6276_v51  ;;  %12282 = vst [vmem:[#allocation69_spill] sm:$0xff] %v11314_v25  ;;  %v11318_v51 = vpop.f32.mrf.mxu2 }
0x10cd   : > { %12283 = vst [vmem:[#allocation70_spill] sm:$0xff] %v11318_v51 }
0x10d1   : > { %v11300_v13 = vpop.f32.mrf.mxu0  ;;  %v11302_v39 = vpop.f32.mrf.mxu1 }
0x10d2   : > { %12276 = vst [vmem:[#allocation63_spill] sm:$0xff] %v11300_v13 }
0x10d3   : > { %12277 = vst [vmem:[#allocation64_spill] sm:$0xff] %v11302_v39 }
0x10d4   : > { %7326 = vmatmul.msk.f32.gmra.mxu0 %vm651_vm0, %v6277_v44  ;;  %7334 = vmatmul.msk.f32.gmra.mxu1 %vm651_vm0, %v6277_v44  ;;  %v11326_v44 = vpop.f32.mrf.mxu3 }
0x10d5   : > { %12286 = vst [vmem:[#allocation73_spill] sm:$0xff] %v11326_v44 }
0x10d9   : > { %v11310_v20 = vpop.f32.mrf.mxu0  ;;  %v11312_v23 = vpop.f32.mrf.mxu1 }
0x10da   : > { %12280 = vst [vmem:[#allocation67_spill] sm:$0xff] %v11310_v20 }
0x10db   : > { %12281 = vst [vmem:[#allocation68_spill] sm:$0xff] %v11312_v23  ;;  %v11328_v23 = vpop.f32.mrf.mxu2 }
0x10dc   : > { %7327 = vmatmul.msk.f32.gmra.mxu0 %vm651_vm0, %v6278_v40  ;;  %7335 = vmatmul.msk.f32.gmra.mxu1 %vm651_vm0, %v6278_v40  ;;  %12287 = vst [vmem:[#allocation74_spill] sm:$0xff] %v11328_v23  ;;  %v6280_v40 = vld [vmem:[#allocation13 + $0x238] sm:$0xff] }
0x10e1   : > { %v11320_v39 = vpop.f32.mrf.mxu0  ;;  %v11322_v13 = vpop.f32.mrf.mxu1 }
0x10e2   : > { %12284 = vst [vmem:[#allocation71_spill] sm:$0xff] %v11320_v39  ;;  %v11336_v39 = vpop.f32.mrf.mxu3 }
0x10e3   : > { %12285 = vst [vmem:[#allocation72_spill] sm:$0xff] %v11322_v13 }
0x10e4   : > { %7328 = vmatmul.msk.f32.gmra.mxu0 %vm651_vm0, %v6279_v12  ;;  %7336 = vmatmul.msk.f32.gmra.mxu1 %vm651_vm0, %v6279_v12  ;;  %12290 = vst [vmem:[#allocation77_spill] sm:$0xff] %v11336_v39  ;;  %v11342_v12 = vpop.f32.mrf.mxu2  ;;  %v11352_v39 = vperm.slane %v5156_v41, 1 }
0x10e5   : > { %12293 = vst [vmem:[#allocation80_spill] sm:$0xff] %v11342_v12 }
0x10e6   : > { %v5163_v41 = vmul.f32 %v11352_v39, %v11062_v29  ;;  %v5167_v29 = vmul.f32 %v11352_v39, %v11092_v46 }
0x10e9   : > { %v11330_v20 = vpop.f32.mrf.mxu0  ;;  %v11332_v25 = vpop.f32.mrf.mxu1 }
0x10ea   : > { %12288 = vst [vmem:[#allocation75_spill] sm:$0xff] %v11330_v20  ;;  %v11348_v20 = vpop.f32.mrf.mxu3 }
0x10eb   : > { %12289 = vst [vmem:[#allocation76_spill] sm:$0xff] %v11332_v25  ;;  %v5310_v25 = vld [vmem:[#allocation14 + $0x2] sm:$0x3] }
0x10ec   : > { %7329 = vmatmul.msk.f32.gmra.mxu0 %vm651_vm0, %v6280_v40  ;;  %7337 = vmatmul.msk.f32.gmra.mxu1 %vm651_vm0, %v6280_v40  ;;  %12296 = vst [vmem:[#allocation83_spill] sm:$0xff] %v11348_v20  ;;  %v11350_v27 = vpop.f32.mrf.mxu2  ;;  %v5312_v16 = vperm.slane %v5310_v25, 0  ;;  %v5313_v40 = vperm.slane %v5310_v25, 1  ;;  %v5162_v25 = vmul.f32 %v5158_v11, %v11060_v0 }
0x10ed   : > { %12297 = vst [vmem:[#allocation84_spill] sm:$0xff] %v11350_v27 }
0x10ee   : > { %v5316_v12 = vmul.f32 %v5312_v16, %v11068_v60  ;;  %v5319_v20 = vmul.f32 %v5313_v40, %v11086_v10  ;;  %v5320_v27 = vmul.f32 %v5312_v16, %v11104_v61  ;;  %v5165_v60 = vmul.f32 %v11352_v39, %v11074_v30 }
0x10ef   : > { %v5323_v10 = vmul.f32 %v5313_v40, %v11122_v63 }
0x10f1   : > { %v11338_v13 = vpop.f32.mrf.mxu0  ;;  %v11340_v51 = vpop.f32.mrf.mxu1 }
0x10f2   : > { %12291 = vst [vmem:[#allocation78_spill] sm:$0xff] %v11338_v13  ;;  %v11363_v21 = vpop.f32.mrf.mxu3 }
0x10f3   : > { %12292 = vst [vmem:[#allocation79_spill] sm:$0xff] %v11340_v51 }
0x10f4   : > { %12300 = vst [vmem:[#allocation87_spill] sm:$0xff] %v11363_v21  ;;  %v11375_v61 = vpop.f32.mrf.mxu2  ;;  %v5332_v21 = vadd.f32 %v5316_v12, %v5162_v25  ;;  %v5618_v12 = vld [vmem:[#allocation14 + $0x6] sm:$0x3] }
0x10f9   : > { %v11344_v44 = vpop.f32.mrf.mxu0  ;;  %v11346_v23 = vpop.f32.mrf.mxu1 }
0x10fa   : > { %12294 = vst [vmem:[#allocation81_spill] sm:$0xff] %v11344_v44  ;;  %v5317_v44 = vmul.f32 %v5313_v40, %v11070_v19  ;;  %v5166_v19 = vmul.f32 %v5158_v11, %v11090_v49  ;;  %v5168_v49 = vmul.f32 %v5158_v11, %v11112_v56  ;;  %v5171_v56 = vmul.f32 %v11352_v39, %v11126_v15  ;;  %v6607_v15 = vld [vmem:[%s12103_s14 + $0x78] sm:$0xff] }
0x10fb   : > { %12295 = vst [vmem:[#allocation82_spill] sm:$0xff] %v11346_v23  ;;  %v5318_v23 = vmul.f32 %v5312_v16, %v11084_v53  ;;  %v5322_v53 = vmul.f32 %v5312_v16, %v11120_v22  ;;  %v5169_v22 = vmul.f32 %v11352_v39, %v11114_v50  ;;  %6628 = vmatpush.msrb.mxu3 %v6607_v15 }
0x10fc   : > { %v11377_v0 = vadd.f32 %v5317_v44, %v5163_v41  ;;  %v11385_v30 = vadd.f32 %v5320_v27, %v5166_v19  ;;  %v5170_v44 = vmul.f32 %v5158_v11, %v11124_v26  ;;  %v5172_v26 = vmul.f32 %v5158_v11, %v11136_v6  ;;  %v6623_v6 = vld [vmem:[%s12103_s14 + $0xf8] sm:$0xff] }
0x10fd   : > { %v11399_v27 = vadd.f32 %v5322_v53, %v5168_v49  ;;  %v11401_v25 = vadd.f32 %v5323_v10, %v5169_v22  ;;  %v5173_v41 = vmul.f32 %v11352_v39, %v11138_v45  ;;  %v5329_v19 = vmul.f32 %v5313_v40, %v11166_v48  ;;  %6669 = vmatpush.msrb.mxu2 %v6623_v6  ;;  %v11437_v49 = vpop.f32.mrf.mxu3 }
0x10fe   : > { %v11416_v53 = vperm.slane %v5618_v12, 0  ;;  %v5330_v45 = vmul.f32 %v5312_v16, %v11176_v35  ;;  %v11429_v10 = vperm.slane %v5618_v12, 1  ;;  %v5175_v48 = vmul.f32 %v11352_v39, %v11148_v33 }
0x10ff   : > { %v5176_v35 = vmul.f32 %v5158_v11, %v11156_v42  ;;  %v5177_v33 = vmul.f32 %v11352_v39, %v11158_v62 }
0x1100   : > { %v5629_v15 = vmul.f32 %v11429_v10, %v11218_v17  ;;  %v5630_v6 = vmul.f32 %v11416_v53, %v11228_v1 }
0x1101   : > { %v11354_v13 = vpop.f32.mrf.mxu0  ;;  %v11356_v51 = vpop.f32.mrf.mxu1  ;;  %v11462_v42 = vadd.f32 %v5330_v45, %v5176_v35 }
0x1102   : > { %12298 = vst [vmem:[#allocation85_spill] sm:$0xff] %v11354_v13  ;;  %v5164_v13 = vmul.f32 %v5158_v11, %v11072_v4  ;;  %v5464_v4 = vld [vmem:[#allocation14 + $0x4] sm:$0x3] }
0x1103   : > { %12299 = vst [vmem:[#allocation86_spill] sm:$0xff] %v11356_v51  ;;  %v5321_v51 = vmul.f32 %v5313_v40, %v11106_v57  ;;  %v11383_v57 = vadd.f32 %v5319_v20, %v5165_v60  ;;  %v11405_v50 = vperm.slane %v5464_v4, 0  ;;  %v5328_v60 = vmul.f32 %v5312_v16, %v11162_v7 }
0x1104   : > { %v11379_v5 = vadd.f32 %v5318_v23, %v5164_v13  ;;  %v5324_v13 = vmul.f32 %v5312_v16, %v11132_v37  ;;  %v5325_v23 = vmul.f32 %v5313_v40, %v11134_v28  ;;  %v5326_v37 = vmul.f32 %v5312_v16, %v11144_v32 }
0x1105   : > { %v11390_v63 = vadd.f32 %v5321_v51, %v5167_v29  ;;  %v5327_v28 = vmul.f32 %v5313_v40, %v11152_v3  ;;  %v11410_v51 = vperm.slane %v5464_v4, 1  ;;  %v5174_v7 = vmul.f32 %v5158_v11, %v11146_v31  ;;  %v6622_v11 = vld [vmem:[%s12103_s14 + $0xf0] sm:$0xff] }
0x1106   : > { %v11424_v32 = vadd.f32 %v5324_v13, %v5170_v44  ;;  %v11426_v3 = vadd.f32 %v5325_v23, %v5171_v56  ;;  %v5331_v29 = vmul.f32 %v5313_v40, %v11178_v47  ;;  %v5470_v4 = vmul.f32 %v11405_v50, %v11168_v38  ;;  %v11454_v47 = vpop.f32.mrf.mxu2  ;;  %v6606_v40 = vld [vmem:[%s12103_s14 + $0x70] sm:$0xff]  ;;  %6670 = vmatpush.msrb.mxu2 %v6622_v11 }
0x1107   : > { %v11439_v22 = vadd.f32 %v5326_v37, %v5172_v26  ;;  %v11441_v44 = vadd.f32 %v5327_v28, %v5173_v41  ;;  %v5471_v16 = vmul.f32 %v11410_v51, %v11170_v43  ;;  %v11446_v31 = vadd.f32 %v5328_v60, %v5174_v7  ;;  %6629 = vmatpush.msrb.mxu3 %v6606_v40 }
0x1108   : > { %v11448_v13 = vadd.f32 %v5329_v19, %v5175_v48  ;;  %v5624_v38 = vmul.f32 %v11416_v53, %v11188_v36  ;;  %v5472_v43 = vmul.f32 %v11405_v50, %v11184_v2  ;;  %v5473_v62 = vmul.f32 %v11410_v51, %v11186_v18  ;;  %v6605_v2 = vld [vmem:[%s12103_s14 + $0x68] sm:$0xff] }
0x1109   : > { %v11395_v46 = vpop.f32.mrf.mxu0  ;;  %v11397_v20 = vpop.f32.mrf.mxu1  ;;  %v11472_v23 = vadd.f32 %v5331_v29, %v5177_v33  ;;  %v5486_v12 = vadd.f32 %v5470_v4, %v5332_v21  ;;  %v5625_v56 = vmul.f32 %v11429_v10, %v11190_v54  ;;  %v5474_v26 = vmul.f32 %v11405_v50, %v11196_v58  ;;  %v6621_v18 = vld [vmem:[%s12103_s14 + $0xe8] sm:$0xff]  ;;  %6630 = vmatpush.msrb.mxu3 %v6605_v2  ;;  %v6602_v4 = vld [vmem:[%s12103_s14 + $0x50] sm:$0xff] }
0x110a   : > { %v5487_v37 = vadd.f32 %v5471_v16, %v11377_v0  ;;  %v5626_v28 = vmul.f32 %v11416_v53, %v11200_v34  ;;  %v5627_v21 = vmul.f32 %v11429_v10, %v11202_v59  ;;  %6671 = vmatpush.msrb.mxu2 %v6621_v18  ;;  %v5475_v58 = vmul.f32 %v11410_v51, %v11198_v55  ;;  %v6604_v34 = vld [vmem:[%s12103_s14 + $0x60] sm:$0xff]  ;;  %v11532_v29 = vpop.f32.mrf.mxu3  ;;  %v12302_v33 = vld [vmem:[#allocation36_spill] sm:$0xff] }
0x110b   : > { %v11489_v54 = vadd.f32 %v5624_v38, %v5486_v12  ;;  %v5628_v41 = vmul.f32 %v11416_v53, %v11212_v14  ;;  %v5476_v60 = vmul.f32 %v11405_v50, %v11208_v52  ;;  %v6620_v59 = vld [vmem:[%s12103_s14 + $0xe0] sm:$0xff]  ;;  %v5488_v0 = vadd.f32 %v5472_v43, %v11379_v5  ;;  %6631 = vmatpush.msrb.mxu3 %v6604_v34  ;;  %v6603_v5 = vld [vmem:[%s12103_s14 + $0x58] sm:$0xff]  ;;  %v5772_v38 = vld [vmem:[#allocation14 + $0x8] sm:$0x3] }
0x110c   : > { %v5489_v19 = vadd.f32 %v5473_v62, %v11383_v57  ;;  %v5477_v55 = vmul.f32 %v11410_v51, %v11210_v8  ;;  %6672 = vmatpush.msrb.mxu2 %v6620_v59  ;;  %v11507_v14 = vadd.f32 %v5625_v56, %v5487_v37  ;;  %v5490_v52 = vadd.f32 %v5474_v26, %v11385_v30  ;;  %v6619_v8 = vld [vmem:[%s12103_s14 + $0xd8] sm:$0xff]  ;;  %v12304_v12 = vld [vmem:[#allocation48_spill] sm:$0xff] }
0x110d   : > { %v11520_v57 = vadd.f32 %v5626_v28, %v5488_v0  ;;  %v5631_v30 = vmul.f32 %v11429_v10, %v11234_v9  ;;  %6632 = vmatpush.msrb.mxu3 %v6603_v5  ;;  %v5491_v17 = vadd.f32 %v5475_v58, %v11390_v63  ;;  %v5492_v7 = vadd.f32 %v5476_v60, %v11399_v27  ;;  %v6618_v9 = vld [vmem:[%s12103_s14 + $0xd0] sm:$0xff]  ;;  %v6601_v2 = vld [vmem:[%s12103_s14 + $0x48] sm:$0xff]  ;;  %v12306_v58 = vld [vmem:[#allocation38_spill] sm:$0xff] }
0x110e   : > { %v11522_v45 = vadd.f32 %v5627_v21, %v5489_v19  ;;  %6673 = vmatpush.msrb.mxu2 %v6619_v8  ;;  %v11527_v1 = vadd.f32 %v5628_v41, %v5490_v52  ;;  %v5478_v48 = vmul.f32 %v11405_v50, %v11220_v24  ;;  %v5493_v35 = vadd.f32 %v5477_v55, %v11401_v25  ;;  %v12301_v63 = vld [vmem:[#allocation41_spill] sm:$0xff]  ;;  %v11557_v26 = vpop.f32.mrf.mxu2  ;;  %v6617_v18 = vld [vmem:[%s12103_s14 + $0xc8] sm:$0xff]  ;;  %v12307_v59 = vld [vmem:[#allocation50_spill] sm:$0xff] }
0x110f   : > { %v5479_v16 = vmul.f32 %v11410_v51, %v12301_v63  ;;  %v5480_v27 = vmul.f32 %v11405_v50, %v12302_v33  ;;  %6633 = vmatpush.msrb.mxu3 %v6602_v4  ;;  %v11549_v11 = vadd.f32 %v5629_v15, %v5491_v17  ;;  %v11551_v43 = vadd.f32 %v5630_v6, %v5492_v7  ;;  %v12303_v62 = vld [vmem:[#allocation37_spill] sm:$0xff]  ;;  %v12308_v19 = vld [vmem:[#allocation55_spill] sm:$0xff]  ;;  %v12309_v8 = vld [vmem:[#allocation42_spill] sm:$0xff] }
0x1110   : > { %6674 = vmatpush.msrb.mxu2 %v6618_v9  ;;  %v5632_v25 = vmul.f32 %v11416_v53, %v12303_v62  ;;  %v5481_v56 = vmul.f32 %v11410_v51, %v12304_v12  ;;  %v11565_v37 = vadd.f32 %v5631_v30, %v5493_v35  ;;  %v12305_v28 = vld [vmem:[#allocation49_spill] sm:$0xff]  ;;  %v5634_v41 = vmul.f32 %v11416_v53, %v12306_v58  ;;  %v6600_v15 = vld [vmem:[%s12103_s14 + $0x40] sm:$0xff]  ;;  %v12311_v33 = vld [vmem:[#allocation56_spill] sm:$0xff] }
0x1111   : > { %v11468_v39 = vpop.f32.mrf.mxu0  ;;  %v11470_v36 = vpop.f32.mrf.mxu1  ;;  %v5633_v21 = vmul.f32 %v11429_v10, %v12305_v28  ;;  %v5926_v60 = vld [vmem:[#allocation14 + $0xa] sm:$0x3]  ;;  %6634 = vmatpush.msrb.mxu3 %v6601_v2  ;;  %v5494_v34 = vadd.f32 %v5478_v48, %v11424_v32  ;;  %v5635_v0 = vmul.f32 %v11429_v10, %v12307_v59  ;;  %v5482_v55 = vmul.f32 %v11405_v50, %v12308_v19  ;;  %v6616_v6 = vld [vmem:[%s12103_s14 + $0xc0] sm:$0xff] }
0x1112   : > { %6675 = vmatpush.msrb.mxu2 %v6617_v18  ;;  %v11576_v52 = vperm.slane %v5772_v38, 0  ;;  %v5495_v5 = vadd.f32 %v5479_v16, %v11426_v3  ;;  %v5496_v32 = vadd.f32 %v5480_v27, %v11439_v22  ;;  %v5483_v30 = vmul.f32 %v11410_v51, %v12309_v8  ;;  %v12310_v4 = vld [vmem:[#allocation39_spill] sm:$0xff]  ;;  %v6599_v3 = vld [vmem:[%s12103_s14 + $0x38] sm:$0xff]  ;;  %v6598_v63 = vld [vmem:[%s12103_s14 + $0x30] sm:$0xff] }
0x1113   : > { %v11588_v17 = vperm.slane %v5772_v38, 1  ;;  %6635 = vmatpush.msrb.mxu3 %v6600_v15  ;;  %v11590_v7 = vadd.f32 %v5632_v25, %v5494_v34  ;;  %v5497_v48 = vadd.f32 %v5481_v56, %v11441_v44  ;;  %v5636_v9 = vmul.f32 %v11416_v53, %v12310_v4  ;;  %v6615_v22 = vld [vmem:[%s12103_s14 + $0xb8] sm:$0xff]  ;;  %v6614_v62 = vld [vmem:[%s12103_s14 + $0xb0] sm:$0xff]  ;;  %v12312_v56 = vld [vmem:[#allocation51_spill] sm:$0xff]  ;;  %v11641_v15 = vpop.f32.mrf.mxu3 }
0x1114   : > { %6676 = vmatpush.msrb.mxu2 %v6616_v6  ;;  %v11595_v35 = vperm.slane %v5926_v60, 0  ;;  %v11606_v16 = vadd.f32 %v5633_v21, %v5495_v5  ;;  %v11608_v44 = vadd.f32 %v5634_v41, %v5496_v32  ;;  %v5484_v27 = vmul.f32 %v11405_v50, %v12311_v33  ;;  %v12313_v18 = vld [vmem:[#allocation43_spill] sm:$0xff]  ;;  %v12314_v21 = vld [vmem:[#allocation45_spill] sm:$0xff] }
0x1115   : > { %v11612_v38 = vperm.slane %v5926_v60, 1  ;;  %6636 = vmatpush.msrb.mxu3 %v6599_v3  ;;  %v11617_v25 = vadd.f32 %v5635_v0, %v5497_v48  ;;  %v5498_v12 = vadd.f32 %v5482_v55, %v11446_v31  ;;  %v5637_v2 = vmul.f32 %v11429_v10, %v12312_v56  ;;  %v12315_v41 = vld [vmem:[#allocation31_spill] sm:$0xff]  ;;  %v12318_v0 = vld [vmem:[#allocation40_spill] sm:$0xff]  ;;  %v12320_v55 = vld [vmem:[#allocation57_spill] sm:$0xff] }
0x1116   : > { %6677 = vmatpush.msrb.mxu2 %v6615_v22  ;;  %v5485_v28 = vmul.f32 %v11410_v51, %v12313_v18  ;;  %v5499_v50 = vadd.f32 %v5483_v30, %v11448_v13  ;;  %v5638_v58 = vmul.f32 %v11416_v53, %v12314_v21  ;;  %v5778_v60 = vmul.f32 %v11576_v52, %v12315_v41  ;;  %v12319_v51 = vld [vmem:[#allocation44_spill] sm:$0xff]  ;;  %v12321_v8 = vld [vmem:[#allocation59_spill] sm:$0xff]  ;;  %v12322_v30 = vld [vmem:[#allocation30_spill] sm:$0xff] }
0x1117   : > { %6637 = vmatpush.msrb.mxu3 %v6598_v63  ;;  %v11633_v31 = vadd.f32 %v5636_v9, %v5498_v12  ;;  %v5639_v19 = vmul.f32 %v11429_v10, %v12318_v0  ;;  %v5779_v13 = vmul.f32 %v11588_v17, %v12319_v51  ;;  %v5780_v53 = vmul.f32 %v11576_v52, %v12320_v55  ;;  %v6597_v6 = vld [vmem:[%s12103_s14 + $0x28] sm:$0xff]  ;;  %v12323_v3 = vld [vmem:[#allocation62_spill] sm:$0xff]  ;;  %v12324_v63 = vld [vmem:[#allocation65_spill] sm:$0xff] }
0x1118   : > { %6678 = vmatpush.msrb.mxu2 %v6614_v62  ;;  %v6613_v5 = vld [vmem:[%s12103_s14 + $0xa8] sm:$0xff]  ;;  %v5500_v32 = vadd.f32 %v5484_v27, %v11462_v42  ;;  %v5932_v10 = vmul.f32 %v11595_v35, %v12321_v8  ;;  %v5781_v48 = vmul.f32 %v11588_v17, %v12322_v30  ;;  %v11654_v4 = vadd.f32 %v5637_v2, %v5499_v50  ;;  %v6080_v62 = vld [vmem:[#allocation14 + $0xc] sm:$0x3]  ;;  %v11661_v42 = vpop.f32.mrf.mxu2  ;;  %v6596_v27 = vld [vmem:[%s12103_s14 + $0x20] sm:$0xff] }
0x1119   : > { %v11545_v24 = vpop.f32.mrf.mxu0  ;;  %v11547_v40 = vpop.f32.mrf.mxu1  ;;  %6638 = vmatpush.msrb.mxu3 %v6597_v6  ;;  %v5501_v9 = vadd.f32 %v5485_v28, %v11472_v23  ;;  %v5933_v22 = vmul.f32 %v11612_v38, %v12323_v3  ;;  %v5934_v33 = vmul.f32 %v11595_v35, %v12324_v63  ;;  %v6612_v12 = vld [vmem:[%s12103_s14 + $0xa0] sm:$0xff]  ;;  %v5794_v23 = vadd.f32 %v5778_v60, %v11489_v54  ;;  %v6234_v28 = vld [vmem:[#allocation14 + $0xe] sm:$0x3]  ;;  %v12326_v0 = vld [vmem:[#allocation52_spill] sm:$0xff] }
0x111a   : > { %6679 = vmatpush.msrb.mxu2 %v6613_v5  ;;  %v11669_v56 = vadd.f32 %v5638_v58, %v5500_v32  ;;  %v12325_v2 = vld [vmem:[#allocation66_spill] sm:$0xff]  ;;  %v5795_v21 = vadd.f32 %v5779_v13, %v11507_v14  ;;  %v5796_v41 = vadd.f32 %v5780_v53, %v11520_v57  ;;  %v5782_v51 = vmul.f32 %v11576_v52, %v12326_v0  ;;  %v6594_v60 = vld [vmem:[%s12103_s14 + $0x10] sm:$0xff] }
0x111b   : > { %v5935_v18 = vmul.f32 %v11612_v38, %v12325_v2  ;;  %6639 = vmatpush.msrb.mxu3 %v6596_v27  ;;  %v11674_v50 = vadd.f32 %v5639_v19, %v5501_v9  ;;  %v6595_v58 = vld [vmem:[%s12103_s14 + $0x18] sm:$0xff]  ;;  %v5948_v19 = vadd.f32 %v5932_v10, %v5794_v23  ;;  %v5797_v14 = vadd.f32 %v5781_v48, %v11522_v45  ;;  %v6610_v55 = vld [vmem:[%s12103_s14 + $0x90] sm:$0xff] }
0x111c   : > { %6680 = vmatpush.msrb.mxu2 %v6612_v12  ;;  %v6611_v54 = vld [vmem:[%s12103_s14 + $0x98] sm:$0xff]  ;;  %v11690_v13 = vperm.slane %v6080_v62, 0  ;;  %v11692_v57 = vperm.slane %v6080_v62, 1  ;;  %v5949_v53 = vadd.f32 %v5933_v22, %v5795_v21  ;;  %v11697_v6 = vadd.f32 %v5934_v33, %v5796_v41  ;;  %v12328_v8 = vld [vmem:[#allocation60_spill] sm:$0xff] }
0x111d   : > { %6640 = vmatpush.msrb.mxu3 %v6595_v58  ;;  %v12327_v5 = vld [vmem:[#allocation58_spill] sm:$0xff]  ;;  %v5784_v10 = vmul.f32 %v11576_v52, %v12328_v8  ;;  %v11703_v45 = vadd.f32 %v5935_v18, %v5797_v14  ;;  %v12329_v30 = vld [vmem:[#allocation61_spill] sm:$0xff]  ;;  %v11707_v9 = vperm.slane %v6234_v28, 0  ;;  %v11709_v3 = vperm.slane %v6234_v28, 1  ;;  %v6593_v28 = vld [vmem:[%s12103_s14 + $0x8] sm:$0xff] }
0x111e   : > { %6681 = vmatpush.msrb.mxu2 %v6611_v54  ;;  %v5783_v32 = vmul.f32 %v11588_v17, %v12327_v5  ;;  %v5785_v48 = vmul.f32 %v11588_v17, %v12329_v30  ;;  %v5798_v33 = vadd.f32 %v5782_v51, %v11527_v1  ;;  %v12332_v62 = vld [vmem:[#allocation69_spill] sm:$0xff]  ;;  %v12333_v12 = vld [vmem:[#allocation70_spill] sm:$0xff]  ;;  %v6609_v21 = vld [vmem:[%s12103_s14 + $0x88] sm:$0xff] }
0x111f   : > { %6641 = vmatpush.msrb.mxu3 %v6594_v60  ;;  %v5936_v27 = vmul.f32 %v11595_v35, %v12332_v62  ;;  %v5937_v23 = vmul.f32 %v11612_v38, %v12333_v12  ;;  %v12334_v2 = vld [vmem:[#allocation73_spill] sm:$0xff]  ;;  %v12335_v41 = vld [vmem:[#allocation74_spill] sm:$0xff]  ;;  %v12337_v58 = vld [vmem:[#allocation79_spill] sm:$0xff]  ;;  %v11740_v12 = vpop.f32.mrf.mxu3 }
0x1120   : > { %6682 = vmatpush.msrb.mxu2 %v6610_v55  ;;  %v5938_v18 = vmul.f32 %v11595_v35, %v12334_v2  ;;  %v5939_v1 = vmul.f32 %v11612_v38, %v12335_v41  ;;  %v12336_v0 = vld [vmem:[#allocation78_spill] sm:$0xff]  ;;  %v6087_v54 = vmul.f32 %v11692_v57, %v12337_v58  ;;  %v6388_v60 = vld [vmem:[#allocation14 + $0x10] sm:$0x3]  ;;  %v5799_v14 = vadd.f32 %v5783_v32, %v11549_v11  ;;  %v12338_v5 = vld [vmem:[#allocation63_spill] sm:$0xff]  ;;  %v11757_v41 = vpop.f32.mrf.mxu2 }
0x1121   : > { %v11629_v34 = vpop.f32.mrf.mxu0  ;;  %v11631_v59 = vpop.f32.mrf.mxu1  ;;  %v6086_v51 = vmul.f32 %v11690_v13, %v12336_v0  ;;  %6642 = vmatpush.msrb.mxu3 %v6593_v28  ;;  %v5800_v55 = vadd.f32 %v5784_v10, %v11551_v43  ;;  %v5786_v8 = vmul.f32 %v11576_v52, %v12338_v5  ;;  %v12339_v30 = vld [vmem:[#allocation64_spill] sm:$0xff]  ;;  %v6592_v2 = vld [vmem:[%s12103_s14] sm:$0xff]  ;;  %v5801_v11 = vadd.f32 %v5785_v48, %v11565_v37 }
0x1122   : > { %12316 = vst [vmem:[#allocation41_spill] sm:$0xff] %v11629_v34  ;;  %6683 = vmatpush.msrb.mxu2 %v6609_v21  ;;  %v5787_v62 = vmul.f32 %v11588_v17, %v12339_v30  ;;  %v6608_v28 = vld [vmem:[%s12103_s14 + $0x80] sm:$0xff]  ;;  %v6240_v43 = vmul.f32 %v11707_v9, %v11532_v29  ;;  %v6241_v32 = vmul.f32 %v11709_v3, %v11557_v26  ;;  %v11759_v0 = vperm.slane %v6388_v60, 0  ;;  %v12341_v30 = vld [vmem:[#allocation80_spill] sm:$0xff] }
0x1123   : > { %12317 = vst [vmem:[#allocation36_spill] sm:$0xff] %v11631_v59  ;;  %6643 = vmatpush.msrb.mxu3 %v6592_v2  ;;  %v11753_v10 = vadd.f32 %v5936_v27, %v5798_v33  ;;  %v11755_v21 = vadd.f32 %v5937_v23, %v5799_v14  ;;  %v11761_v58 = vperm.slane %v6388_v60, 1  ;;  %v11763_v5 = vadd.f32 %v5938_v18, %v5800_v55  ;;  %v6426_v26 = vld [vmem:[%s12102_s13] sm:$0x3]  ;;  %v12340_v23 = vld [vmem:[#allocation77_spill] sm:$0xff]  ;;  %v12342_v18 = vld [vmem:[#allocation67_spill] sm:$0xff] }
0x1124   : > { %6684 = vmatpush.msrb.mxu2 %v6608_v28  ;;  %v11765_v37 = vadd.f32 %v5939_v1, %v5801_v11  ;;  %v6102_v29 = vadd.f32 %v6086_v51, %v5948_v19  ;;  %v6103_v48 = vadd.f32 %v6087_v54, %v5949_v53  ;;  %v5802_v33 = vadd.f32 %v5786_v8, %v11590_v7  ;;  %v12343_v55 = vld [vmem:[#allocation68_spill] sm:$0xff]  ;;  %v12344_v28 = vld [vmem:[#allocation83_spill] sm:$0xff] }
0x1125   : > { %v5803_v27 = vadd.f32 %v5787_v62, %v11606_v16  ;;  %v5940_v14 = vmul.f32 %v11595_v35, %v12340_v23  ;;  %v5941_v60 = vmul.f32 %v11612_v38, %v12341_v30  ;;  %v5788_v1 = vmul.f32 %v11576_v52, %v12342_v18  ;;  %v12345_v23 = vld [vmem:[#allocation84_spill] sm:$0xff]  ;;  %v12346_v18 = vld [vmem:[#allocation81_spill] sm:$0xff] }
0x1126   : > { %v5789_v19 = vmul.f32 %v11588_v17, %v12343_v55  ;;  %v6256_v53 = vadd.f32 %v6240_v43, %v6102_v29  ;;  %v6257_v51 = vadd.f32 %v6241_v32, %v6103_v48  ;;  %v11781_v8 = vperm.slane %v6426_v26, 0  ;;  %v12347_v32 = vld [vmem:[#allocation82_spill] sm:$0xff]  ;;  %v12348_v48 = vld [vmem:[#allocation71_spill] sm:$0xff] }
0x1127   : > { %v11784_v62 = vperm.slane %v6426_v26, 1  ;;  %v5942_v11 = vmul.f32 %v11595_v35, %v12344_v28  ;;  %v5943_v30 = vmul.f32 %v11612_v38, %v12345_v23  ;;  %v6088_v43 = vmul.f32 %v11690_v13, %v12346_v18 }
0x1128   : > { %v6089_v29 = vmul.f32 %v11692_v57, %v12347_v32  ;;  %v5790_v55 = vmul.f32 %v11576_v52, %v12348_v48  ;;  %v5805_v28 = vadd.f32 %v5789_v19, %v11617_v25  ;;  %v6242_v23 = vmul.f32 %v11707_v9, %v11641_v15  ;;  %v6177_v48 = vpop.f32.mrf.mxu3  ;;  %v12350_v19 = vld [vmem:[#allocation87_spill] sm:$0xff] }
0x1129   : > { %v11711_v63 = vpop.f32.mrf.mxu0  ;;  %v11713_v22 = vpop.f32.mrf.mxu1  ;;  %v6243_v18 = vmul.f32 %v11709_v3, %v11661_v42  ;;  %v11804_v59 = vadd.f32 %v5940_v14, %v5802_v33  ;;  %v11806_v32 = vadd.f32 %v5941_v60, %v5803_v27  ;;  %v6104_v15 = vadd.f32 %v6088_v43, %v11697_v6 }
0x112a   : > { %12330 = vst [vmem:[#allocation37_spill] sm:$0xff] %v11711_v63  ;;  %v5804_v63 = vadd.f32 %v5788_v1, %v11608_v44  ;;  %v11816_v25 = vadd.f32 %v5943_v30, %v5805_v28  ;;  %v6105_v1 = vadd.f32 %v6089_v29, %v11703_v45  ;;  %v5806_v42 = vadd.f32 %v5790_v55, %v11633_v31  ;;  %v6218_v27 = vpop.f32.mrf.mxu2  ;;  %v12351_v30 = vld [vmem:[#allocation75_spill] sm:$0xff]  ;;  %v12352_v29 = vld [vmem:[#allocation76_spill] sm:$0xff] }
0x112b   : > { %12331 = vst [vmem:[#allocation48_spill] sm:$0xff] %v11713_v22  ;;  %v5792_v43 = vmul.f32 %v11576_v52, %v12351_v30  ;;  %v5793_v55 = vmul.f32 %v11588_v17, %v12352_v29  ;;  %v6244_v52 = vmul.f32 %v11707_v9, %v11740_v12 }
0x112c   : > { %v11814_v44 = vadd.f32 %v5942_v11, %v5804_v63  ;;  %v5945_v63 = vmul.f32 %v11612_v38, %v11375_v61 }
0x1131   : > { %v6322_v54 = vpop.f32.mrf.mxu0  ;;  %v6363_v2 = vpop.f32.mrf.mxu1 }
0x1132   : > { %v6394_v7 = vmul.f32 %v11759_v0, %v6322_v54  ;;  %v6395_v16 = vmul.f32 %v11761_v58, %v6363_v2  ;;  %v12349_v54 = vld [vmem:[#allocation72_spill] sm:$0xff] }
0x1133   : > { %v5791_v2 = vmul.f32 %v11588_v17, %v12349_v54  ;;  %v12353_v54 = vld [vmem:[#allocation85_spill] sm:$0xff]  ;;  %v6245_v17 = vmul.f32 %v11709_v3, %v11757_v41 }
0x1134   : > { %v6410_v26 = vadd.f32 %v6394_v7, %v6256_v53  ;;  %v6411_v22 = vadd.f32 %v6395_v16, %v6257_v51  ;;  %v6258_v51 = vadd.f32 %v6242_v23, %v6104_v15  ;;  %v6259_v7 = vadd.f32 %v6243_v18, %v6105_v1 }
0x1135   : > { %v5807_v33 = vadd.f32 %v5791_v2, %v11654_v4  ;;  %v6090_v61 = vmul.f32 %v11690_v13, %v12353_v54  ;;  %v12354_v2 = vld [vmem:[#allocation86_spill] sm:$0xff]  ;;  %v5946_v54 = vmul.f32 %v11595_v35, %v11437_v49  ;;  %v6095_v49 = vmul.f32 %v11692_v57, %v11470_v36 }
0x1136   : > { %v11809_v34 = vadd.f32 %v11781_v8, %v6410_v26  ;;  %v11812_v53 = vadd.f32 %v11784_v62, %v6411_v22  ;;  %v5944_v22 = vmul.f32 %v11595_v35, %v12350_v19  ;;  %v6091_v26 = vmul.f32 %v11692_v57, %v12354_v2 }
0x1137   : > { %v6106_v12 = vadd.f32 %v6090_v61, %v11753_v10  ;;  %v6246_v10 = vmul.f32 %v11707_v9, %v6177_v48  ;;  %v11882_v61 = vmul.f32 %v11612_v38, %v11454_v47 }
0x1138   : > { %v6464_v14 = vmul.f32 0.044715, %v11809_v34  ;;  %v6465_v60 = vmul.f32 0.044715, %v11812_v53  ;;  %v11842_v1 = vadd.f32 %v5944_v22, %v5806_v42  ;;  %v11859_v42 = vadd.f32 %v5792_v43, %v11669_v56 }
0x1139   : > { %v6325_v6 = vpop.f32.mrf.mxu0  ;;  %v6366_v16 = vpop.f32.mrf.mxu1  ;;  %v6107_v41 = vadd.f32 %v6091_v26, %v11755_v21  ;;  %v6092_v22 = vmul.f32 %v11690_v13, %v11395_v46 }
0x113a   : > { %v6480_v45 = vmul.f32 %v6464_v14, %v11809_v34  ;;  %v6481_v31 = vmul.f32 %v6465_v60, %v11812_v53  ;;  %v6396_v4 = vmul.f32 %v11759_v0, %v6325_v6  ;;  %v6397_v11 = vmul.f32 %v11761_v58, %v6366_v16  ;;  %v6221_v21 = vpop.f32.mrf.mxu2 }
0x113b   : > { %v11844_v14 = vadd.f32 %v5945_v63, %v5807_v33  ;;  %v11862_v33 = vadd.f32 %v5793_v55, %v11674_v50  ;;  %v6093_v63 = vmul.f32 %v11692_v57, %v11397_v20  ;;  %v6247_v20 = vmul.f32 %v11709_v3, %v6218_v27 }
0x113c   : > { %v6496_v28 = vmul.f32 %v6480_v45, %v11809_v34  ;;  %v6497_v23 = vmul.f32 %v6481_v31, %v11812_v53  ;;  %v6412_v18 = vadd.f32 %v6396_v4, %v6258_v51  ;;  %v6413_v15 = vadd.f32 %v6397_v11, %v6259_v7  ;;  %v6180_v7 = vpop.f32.mrf.mxu3 }
0x113d   : > { %v6260_v31 = vadd.f32 %v6244_v52, %v6106_v12  ;;  %v6261_v4 = vadd.f32 %v6245_v17, %v6107_v41  ;;  %v6108_v26 = vadd.f32 %v6092_v22, %v11763_v5  ;;  %v6248_v17 = vmul.f32 %v11707_v9, %v6180_v7 }
0x113e   : > { %v11851_v60 = vadd.f32 %v11781_v8, %v6412_v18  ;;  %v11854_v19 = vadd.f32 %v11784_v62, %v6413_v15  ;;  %v6512_v6 = vadd.f32 %v6496_v28, %v11809_v34  ;;  %v6513_v51 = vadd.f32 %v6497_v23, %v11812_v53 }
0x113f   : > { %v6109_v28 = vadd.f32 %v6093_v63, %v11765_v37  ;;  %v6094_v18 = vmul.f32 %v11690_v13, %v11468_v39  ;;  %v6262_v38 = vadd.f32 %v6246_v10, %v6108_v26  ;;  %v6448_v39 = vmul.f32 0.5, %v11809_v34 }
0x1140   : > { %v6528_v16 = vmul.f32 0.7978846, %v6512_v6  ;;  %v6529_v45 = vmul.f32 0.7978846, %v6513_v51  ;;  %v6466_v50 = vmul.f32 0.044715, %v11851_v60 }
0x1141   : > { %v6328_v56 = vpop.f32.mrf.mxu0  ;;  %v6369_v11 = vpop.f32.mrf.mxu1  ;;  %v6467_v30 = vmul.f32 0.044715, %v11854_v19  ;;  %v6263_v5 = vadd.f32 %v6247_v20, %v6109_v28  ;;  %v6449_v63 = vmul.f32 0.5, %v11812_v53  ;;  %v11911_v20 = vadd.f32 %v5946_v54, %v11859_v42 }
0x1142   : > { %v6398_v43 = vmul.f32 %v11759_v0, %v6328_v56  ;;  %v6399_v46 = vmul.f32 %v11761_v58, %v6369_v11  ;;  %7950 = vtanh.f32 %v6528_v16  ;;  %v6482_v29 = vmul.f32 %v6466_v50, %v11851_v60  ;;  %v6224_v10 = vpop.f32.mrf.mxu2 }
0x1143   : > { %7952 = vtanh.f32 %v6529_v45  ;;  %v6483_v55 = vmul.f32 %v6467_v30, %v11854_v19  ;;  %v6249_v11 = vmul.f32 %v11709_v3, %v6221_v21  ;;  %v6111_v21 = vadd.f32 %v6095_v49, %v11806_v32 }
0x1144   : > { %v6414_v48 = vadd.f32 %v6398_v43, %v6260_v31  ;;  %v6415_v2 = vadd.f32 %v6399_v46, %v6261_v4  ;;  %v6498_v27 = vmul.f32 %v6482_v29, %v11851_v60  ;;  %v6183_v31 = vpop.f32.mrf.mxu3  ;;  %v6110_v29 = vadd.f32 %v6094_v18, %v11804_v59 }
0x1145   : > { %v6499_v23 = vmul.f32 %v6483_v55, %v11854_v19  ;;  %v6097_v59 = vmul.f32 %v11692_v57, %v11547_v40  ;;  %v6250_v32 = vmul.f32 %v11707_v9, %v6183_v31 }
0x1146   : > { %v11893_v35 = vadd.f32 %v11781_v8, %v6414_v48  ;;  %v11896_v47 = vadd.f32 %v11784_v62, %v6415_v2  ;;  %v6514_v37 = vadd.f32 %v6498_v27, %v11851_v60  ;;  %v6096_v2 = vmul.f32 %v11690_v13, %v11545_v24 }
0x1147   : > { %v6515_v15 = vadd.f32 %v6499_v23, %v11854_v19  ;;  %v6264_v42 = vadd.f32 %v6248_v17, %v6110_v29  ;;  %v6265_v23 = vadd.f32 %v6249_v11, %v6111_v21  ;;  %v12355_v11 = vld [vmem:[#allocation41_spill] sm:$0xff] }
0x1148   : > { %v7951_v52 = vpop.eup %7950  ;;  %v6468_v6 = vmul.f32 0.044715, %v11893_v35  ;;  %v6469_v36 = vmul.f32 0.044715, %v11896_v47  ;;  %v6530_v16 = vmul.f32 0.7978846, %v6514_v37  ;;  %v6112_v31 = vadd.f32 %v6096_v2, %v11814_v44 }
0x1149   : > { %v7953_v51 = vpop.eup %7952  ;;  %v6331_v12 = vpop.f32.mrf.mxu0  ;;  %v6560_v22 = vadd.f32 1.0, %v7951_v52  ;;  %v6531_v45 = vmul.f32 0.7978846, %v6515_v15  ;;  %v6450_v15 = vmul.f32 0.5, %v11851_v60  ;;  %v12356_v44 = vld [vmem:[#allocation36_spill] sm:$0xff] }
0x114a   : > { %v6372_v41 = vpop.f32.mrf.mxu1  ;;  %v6400_v4 = vmul.f32 %v11759_v0, %v6331_v12  ;;  %v6561_v7 = vadd.f32 1.0, %v7953_v51  ;;  %v6484_v34 = vmul.f32 %v6468_v6, %v11893_v35  ;;  %7954 = vtanh.f32 %v6530_v16 }
0x114b   : > { %v6401_v56 = vmul.f32 %v11761_v58, %v6372_v41  ;;  %v6576_v50 = vmul.f32 %v6560_v22, %v6448_v39  ;;  %v6485_v30 = vmul.f32 %v6469_v36, %v11896_v47  ;;  %7956 = vtanh.f32 %v6531_v45 }
0x114c   : > { %v6416_v43 = vadd.f32 %v6400_v4, %v6262_v38  ;;  %v6577_v53 = vmul.f32 %v6561_v7, %v6449_v63  ;;  %v6500_v55 = vmul.f32 %v6484_v34, %v11893_v35  ;;  %v6251_v38 = vmul.f32 %v11709_v3, %v6224_v10  ;;  %v6186_v63 = vpop.f32.mrf.mxu3 }
0x114d   : > { %v6417_v46 = vadd.f32 %v6401_v56, %v6263_v5  ;;  %6644 = vmatmul.f32.vlgmr.msrb.gmra.mxu3 %v6576_v50  ;;  %v6501_v48 = vmul.f32 %v6485_v30, %v11896_v47  ;;  %v6451_v12 = vmul.f32 0.5, %v11854_v19  ;;  %v6113_v34 = vadd.f32 %v6097_v59, %v11816_v25  ;;  %v6227_v50 = vpop.f32.mrf.mxu2 }
0x114e   : > { %v11920_v26 = vadd.f32 %v11781_v8, %v6416_v43  ;;  %6685 = vmatmul.f32.vlgmr.msrb.gmra.mxu2 %v6577_v53  ;;  %v6516_v54 = vadd.f32 %v6500_v55, %v11893_v35  ;;  %v6098_v19 = vmul.f32 %v11690_v13, %v12355_v11  ;;  %v6266_v43 = vadd.f32 %v6250_v32, %v6112_v31 }
0x114f   : > { %v11923_v28 = vadd.f32 %v11784_v62, %v6417_v46  ;;  %v6517_v27 = vadd.f32 %v6501_v48, %v11896_v47  ;;  %v6099_v46 = vmul.f32 %v11692_v57, %v12356_v44  ;;  %v6267_v29 = vadd.f32 %v6251_v38, %v6113_v34 }
0x1150   : > { %v6470_v24 = vmul.f32 0.044715, %v11920_v26  ;;  %v7955_v49 = vpop.eup %7954  ;;  %v6532_v52 = vmul.f32 0.7978846, %v6516_v54  ;;  %v6252_v55 = vmul.f32 %v11707_v9, %v6186_v63 }
0x1151   : > { %v6471_v18 = vmul.f32 0.044715, %v11923_v28  ;;  %v6334_v5 = vpop.f32.mrf.mxu0  ;;  %v6533_v40 = vmul.f32 0.7978846, %v6517_v27  ;;  %v7957_v17 = vpop.eup %7956  ;;  %v6562_v36 = vadd.f32 1.0, %v7955_v49  ;;  %v6452_v27 = vmul.f32 0.5, %v11893_v35 }
0x1152   : > { %v6375_v37 = vpop.f32.mrf.mxu1  ;;  %v6402_v39 = vmul.f32 %v11759_v0, %v6334_v5  ;;  %v6486_v51 = vmul.f32 %v6470_v24, %v11920_v26  ;;  %v6563_v41 = vadd.f32 1.0, %v7957_v17  ;;  %7958 = vtanh.f32 %v6532_v52 }
0x1153   : > { %v6403_v6 = vmul.f32 %v11761_v58, %v6375_v37  ;;  %v6487_v22 = vmul.f32 %v6471_v18, %v11923_v28  ;;  %v6578_v60 = vmul.f32 %v6562_v36, %v6450_v15  ;;  %7960 = vtanh.f32 %v6533_v40 }
0x1154   : > { %v6418_v16 = vadd.f32 %v6402_v39, %v6264_v42  ;;  %v6579_v4 = vmul.f32 %v6563_v41, %v6451_v12  ;;  %v6502_v56 = vmul.f32 %v6486_v51, %v11920_v26  ;;  %v6253_v42 = vmul.f32 %v11709_v3, %v6227_v50  ;;  %v6189_v41 = vpop.f32.mrf.mxu3 }
0x1155   : > { %v6419_v45 = vadd.f32 %v6403_v6, %v6265_v23  ;;  %v6503_v7 = vmul.f32 %v6487_v22, %v11923_v28  ;;  %6647 = vmatmul.f32.gmra.mxu3 %v6578_v60  ;;  %v6453_v37 = vmul.f32 0.5, %v11896_v47  ;;  %v5963_v35 = vadd.f32 %v11882_v61, %v11862_v33  ;;  %v12358_v61 = vld [vmem:[#allocation48_spill] sm:$0xff]  ;;  %v6230_v44 = vpop.f32.mrf.mxu2 }
0x1156   : > { %v11946_v30 = vadd.f32 %v11781_v8, %v6418_v16  ;;  %6688 = vmatmul.f32.gmra.mxu2 %v6579_v4  ;;  %v6518_v53 = vadd.f32 %v6502_v56, %v11920_v26  ;;  %v6114_v12 = vadd.f32 %v6098_v19, %v11842_v1  ;;  %v6115_v47 = vadd.f32 %v6099_v46, %v11844_v14  ;;  %v12357_v16 = vld [vmem:[#allocation37_spill] sm:$0xff] }
0x1157   : > { %v11949_v10 = vadd.f32 %v11784_v62, %v6419_v45  ;;  %v6519_v25 = vadd.f32 %v6503_v7, %v11923_v28  ;;  %v6100_v33 = vmul.f32 %v11690_v13, %v12357_v16  ;;  %v6101_v45 = vmul.f32 %v11692_v57, %v12358_v61 }
0x1158   : > { %v6472_v48 = vmul.f32 0.044715, %v11946_v30  ;;  %v7959_v2 = vpop.eup %7958  ;;  %v6534_v23 = vmul.f32 0.7978846, %v6518_v53  ;;  %v6268_v14 = vadd.f32 %v6252_v55, %v6114_v12  ;;  %v6269_v31 = vadd.f32 %v6253_v42, %v6115_v47 }
0x1159   : > { %v6473_v21 = vmul.f32 0.044715, %v11949_v10  ;;  %v6337_v59 = vpop.f32.mrf.mxu0  ;;  %v6535_v32 = vmul.f32 0.7978846, %v6519_v25  ;;  %v7961_v24 = vpop.eup %7960  ;;  %v6564_v38 = vadd.f32 1.0, %v7959_v2  ;;  %v6254_v34 = vmul.f32 %v11707_v9, %v6189_v41 }
0x115a   : > { %v6378_v54 = vpop.f32.mrf.mxu1  ;;  %v6404_v18 = vmul.f32 %v11759_v0, %v6337_v59  ;;  %v6488_v5 = vmul.f32 %v6472_v48, %v11946_v30  ;;  %v6565_v15 = vadd.f32 1.0, %v7961_v24  ;;  %7962 = vtanh.f32 %v6534_v23 }
0x115b   : > { %v6405_v49 = vmul.f32 %v11761_v58, %v6378_v54  ;;  %v6489_v52 = vmul.f32 %v6473_v21, %v11949_v10  ;;  %v6580_v39 = vmul.f32 %v6564_v38, %v6452_v27  ;;  %7964 = vtanh.f32 %v6535_v32 }
0x115c   : > { %v6420_v40 = vadd.f32 %v6404_v18, %v6266_v43  ;;  %v6581_v6 = vmul.f32 %v6565_v15, %v6453_v37  ;;  %v6504_v36 = vmul.f32 %v6488_v5, %v11946_v30  ;;  %v6454_v13 = vmul.f32 0.5, %v11920_v26 }
0x115d   : > { %v6421_v17 = vadd.f32 %v6405_v49, %v6267_v29  ;;  %v6505_v51 = vmul.f32 %v6489_v52, %v11949_v10  ;;  %6650 = vmatmul.f32.gmra.mxu3 %v6580_v39  ;;  %v6455_v55 = vmul.f32 0.5, %v11923_v28  ;;  %v6255_v42 = vmul.f32 %v11709_v3, %v6230_v44 }
0x115e   : > { %v11972_v22 = vadd.f32 %v11781_v8, %v6420_v40  ;;  %6691 = vmatmul.f32.gmra.mxu2 %v6581_v6  ;;  %v6520_v60 = vadd.f32 %v6504_v36, %v11946_v30  ;;  %v6116_v23 = vadd.f32 %v6100_v33, %v11911_v20  ;;  %v6117_v24 = vadd.f32 %v6101_v45, %v5963_v35 }
0x115f   : > { %v11975_v63 = vadd.f32 %v11784_v62, %v6421_v17  ;;  %v6521_v1 = vadd.f32 %v6505_v51, %v11949_v10  ;;  %v6456_v40 = vmul.f32 0.5, %v11946_v30  ;;  %v6457_v47 = vmul.f32 0.5, %v11949_v10 }
0x1160   : > { %v6474_v4 = vmul.f32 0.044715, %v11972_v22  ;;  %v7963_v7 = vpop.eup %7962  ;;  %v6536_v50 = vmul.f32 0.7978846, %v6520_v60  ;;  %v6270_v49 = vadd.f32 %v6254_v34, %v6116_v23  ;;  %v6271_v20 = vadd.f32 %v6255_v42, %v6117_v24 }
0x1161   : > { %v6475_v56 = vmul.f32 0.044715, %v11975_v63  ;;  %v6340_v11 = vpop.f32.mrf.mxu0  ;;  %v6537_v57 = vmul.f32 0.7978846, %v6521_v1  ;;  %v7965_v43 = vpop.eup %7964  ;;  %v6566_v25 = vadd.f32 1.0, %v7963_v7 }
0x1162   : > { %v6381_v19 = vpop.f32.mrf.mxu1  ;;  %v6406_v46 = vmul.f32 %v11759_v0, %v6340_v11  ;;  %v6490_v29 = vmul.f32 %v6474_v4, %v11972_v22  ;;  %v6567_v48 = vadd.f32 1.0, %v7965_v43  ;;  %7966 = vtanh.f32 %v6536_v50 }
0x1163   : > { %v6407_v53 = vmul.f32 %v11761_v58, %v6381_v19  ;;  %v6491_v9 = vmul.f32 %v6475_v56, %v11975_v63  ;;  %v6582_v26 = vmul.f32 %v6566_v25, %v6454_v13  ;;  %7968 = vtanh.f32 %v6537_v57 }
0x1164   : > { %v6422_v21 = vadd.f32 %v6406_v46, %v6268_v14  ;;  %v6583_v59 = vmul.f32 %v6567_v48, %v6455_v55  ;;  %v6506_v54 = vmul.f32 %v6490_v29, %v11972_v22  ;;  %v6458_v19 = vmul.f32 0.5, %v11972_v22 }
0x1165   : > { %v6423_v2 = vadd.f32 %v6407_v53, %v6269_v31  ;;  %v6507_v27 = vmul.f32 %v6491_v9, %v11975_v63  ;;  %6653 = vmatmul.f32.gmra.mxu3 %v6582_v26 }
0x1166   : > { %v11997_v32 = vadd.f32 %v11781_v8, %v6422_v21  ;;  %6694 = vmatmul.f32.gmra.mxu2 %v6583_v59  ;;  %v6522_v18 = vadd.f32 %v6506_v54, %v11972_v22 }
0x1167   : > { %v12000_v28 = vadd.f32 %v11784_v62, %v6423_v2  ;;  %v6523_v3 = vadd.f32 %v6507_v27, %v11975_v63 }
0x1168   : > { %v6476_v38 = vmul.f32 0.044715, %v11997_v32  ;;  %v7967_v37 = vpop.eup %7966  ;;  %v6538_v17 = vmul.f32 0.7978846, %v6522_v18  ;;  %v6460_v21 = vmul.f32 0.5, %v11997_v32 }
0x1169   : > { %v6477_v5 = vmul.f32 0.044715, %v12000_v28  ;;  %v6343_v15 = vpop.f32.mrf.mxu0  ;;  %v6539_v39 = vmul.f32 0.7978846, %v6523_v3  ;;  %v7969_v6 = vpop.eup %7968  ;;  %v6568_v51 = vadd.f32 1.0, %v7967_v37 }
0x116a   : > { %v6384_v52 = vpop.f32.mrf.mxu1  ;;  %v6408_v35 = vmul.f32 %v11759_v0, %v6343_v15  ;;  %v6492_v12 = vmul.f32 %v6476_v38, %v11997_v32  ;;  %v6569_v41 = vadd.f32 1.0, %v7969_v6  ;;  %7970 = vtanh.f32 %v6538_v17  ;;  %v12359_v15 = vld [vmem:[#allocation33_spill] sm:$0xff] }
0x116b   : > { %v6409_v36 = vmul.f32 %v11761_v58, %v6384_v52  ;;  %v6493_v16 = vmul.f32 %v6477_v5, %v12000_v28  ;;  %v6584_v45 = vmul.f32 %v6568_v51, %v6456_v40  ;;  %7972 = vtanh.f32 %v6539_v39 }
0x116c   : > { %v6424_v33 = vadd.f32 %v6408_v35, %v6270_v49  ;;  %v6585_v30 = vmul.f32 %v6569_v41, %v6457_v47  ;;  %v6508_v60 = vmul.f32 %v6492_v12, %v11997_v32  ;;  %v12360_v35 = vld [vmem:[#allocation34_spill] sm:$0xff] }
0x116d   : > { %v6425_v61 = vadd.f32 %v6409_v36, %v6271_v20  ;;  %v6509_v0 = vmul.f32 %v6493_v16, %v12000_v28  ;;  %6656 = vmatmul.f32.gmra.mxu3 %v6584_v45  ;;  %v12361_v16 = vld [vmem:[#allocation46_spill] sm:$0xff] }
0x116e   : > { %v6446_v58 = vadd.f32 %v11781_v8, %v6424_v33  ;;  %6697 = vmatmul.f32.gmra.mxu2 %v6585_v30  ;;  %v6524_v10 = vadd.f32 %v6508_v60, %v11997_v32  ;;  %v6459_v8 = vmul.f32 0.5, %v11975_v63  ;;  %v6461_v63 = vmul.f32 0.5, %v12000_v28 }
0x116f   : > { %v6447_v1 = vadd.f32 %v11784_v62, %v6425_v61  ;;  %v6525_v14 = vadd.f32 %v6509_v0, %v12000_v28  ;;  %v7659_v28 = vld [vmem:[%s12104_s15] ss:$0 sm:$0xff]  ;;  %v12362_v0 = vld [vmem:[#allocation53_spill] sm:$0xff] }
0x1170   : > { %v6478_v31 = vmul.f32 0.044715, %v6446_v58  ;;  %v7971_v56 = vpop.eup %7970  ;;  %v6540_v7 = vmul.f32 0.7978846, %v6524_v10  ;;  %v6462_v23 = vmul.f32 0.5, %v6446_v58 }
0x1171   : > { %v6479_v4 = vmul.f32 0.044715, %v6447_v1  ;;  %v6541_v34 = vmul.f32 0.7978846, %v6525_v14  ;;  %v7973_v11 = vpop.eup %7972  ;;  %v6570_v13 = vadd.f32 1.0, %v7971_v56  ;;  %v6463_v18 = vmul.f32 0.5, %v6447_v1 }
0x1172   : > { %v6494_v50 = vmul.f32 %v6478_v31, %v6446_v58  ;;  %v6571_v62 = vadd.f32 1.0, %v7973_v11  ;;  %7974 = vtanh.f32 %v6540_v7 }
0x1173   : > { %v6495_v57 = vmul.f32 %v6479_v4, %v6447_v1  ;;  %v6586_v43 = vmul.f32 %v6570_v13, %v6458_v19  ;;  %7976 = vtanh.f32 %v6541_v34  ;;  %v12363_v4 = vld [vmem:[#allocation32_spill] sm:$0xff]  ;;  %v12364_v13 = vld [vmem:[#allocation35_spill] sm:$0xff] }
0x1174   : > { %v6510_v44 = vmul.f32 %v6494_v50, %v6446_v58  ;;  %v6587_v53 = vmul.f32 %v6571_v62, %v6459_v8 }
0x1175   : > { %v6511_v46 = vmul.f32 %v6495_v57, %v6447_v1  ;;  %6659 = vmatmul.f32.gmra.mxu3 %v6586_v43 }
0x1176   : > { %v6526_v25 = vadd.f32 %v6510_v44, %v6446_v58  ;;  %6700 = vmatmul.f32.gmra.mxu2 %v6587_v53  ;;  %v12365_v44 = vld [vmem:[#allocation47_spill] sm:$0xff] }
0x1177   : > { %v6527_v29 = vadd.f32 %v6511_v46, %v6447_v1 }
0x1178   : > { %v6542_v55 = vmul.f32 0.7978846, %v6526_v25  ;;  %v7975_v9 = vpop.eup %7974 }
0x1179   : > { %v6543_v48 = vmul.f32 0.7978846, %v6527_v29  ;;  %v7977_v22 = vpop.eup %7976  ;;  %v6572_v2 = vadd.f32 1.0, %v7975_v9 }
0x117a   : > { %7978 = vtanh.f32 %v6542_v55  ;;  %v6573_v26 = vadd.f32 1.0, %v7977_v22 }
0x117b   : > { %7980 = vtanh.f32 %v6543_v48  ;;  %v6588_v42 = vmul.f32 %v6572_v2, %v6460_v21  ;;  %v12367_v48 = vld [vmem:[#allocation54_spill] sm:$0xff] }
0x117c   : > { %v6589_v59 = vmul.f32 %v6573_v26, %v6461_v63 }
0x117d   : > { %6662 = vmatmul.f32.gmra.mxu3 %v6588_v42 }
0x117e   : > { %6703 = vmatmul.f32.gmra.mxu2 %v6589_v59 }
0x1180   : > { %v7979_v54 = vpop.eup %7978 }
0x1181   : > { %v7981_v27 = vpop.eup %7980  ;;  %v6574_v24 = vadd.f32 1.0, %v7979_v54 }
0x1182   : > { %v6575_v3 = vadd.f32 1.0, %v7981_v27 }
0x1183   : > { %v6590_v49 = vmul.f32 %v6574_v24, %v6462_v23 }
0x1184   : > { %v6591_v32 = vmul.f32 %v6575_v3, %v6463_v18 }
0x1185   : > { %6665 = vmatmul.f32.gmra.mxu3 %v6590_v49 }
0x1186   : > { %6706 = vmatmul.f32.gmra.mxu2 %v6591_v32 }
0x11d0   : > { %v6645_v38 = vpop.f32.mrf.mxu3 }
0x11d1   : > { %v6646_v5 = vadd.f32 %v7659_v28, %v6645_v38  ;;  %v6686_v37 = vpop.f32.mrf.mxu2 }
0x11d3   : > { %v6687_v20 = vadd.f32 %v6686_v37, %v6646_v5 }
0x11d5   : > { %v6710_v52 = vadd.f32 %v6687_v20, %v12359_v15 }
0x11d7   : > { %6718 = vst.msk [vmem:[%s12029_s28] sm:$0xff] %vm651_vm0, %v6710_v52 }
0x11d8   : > { %v6648_v40 = vpop.f32.mrf.mxu3 }
0x11d9   : > { %v6649_v17 = vadd.f32 %v7659_v28, %v6648_v40  ;;  %v6689_v39 = vpop.f32.mrf.mxu2 }
0x11db   : > { %v6690_v6 = vadd.f32 %v6689_v39, %v6649_v17 }
0x11dd   : > { %v6711_v36 = vadd.f32 %v6690_v6, %v12360_v35 }
0x11df   : > { %6719 = vst.msk [vmem:[%s12029_s28 + $0x8] sm:$0xff] %vm651_vm0, %v6711_v36 }
0x11e0   : > { %v6651_v51 = vpop.f32.mrf.mxu3 }
0x11e1   : > { %v6652_v12 = vadd.f32 %v7659_v28, %v6651_v51  ;;  %v6692_v47 = vpop.f32.mrf.mxu2 }
0x11e3   : > { %v6693_v41 = vadd.f32 %v6692_v47, %v6652_v12 }
0x11e5   : > { %v6712_v33 = vadd.f32 %v6693_v41, %v12361_v16 }
0x11e7   : > { %6720 = vst.msk [vmem:[%s12029_s28 + $0x10] sm:$0xff] %vm651_vm0, %v6712_v33 }
0x11e8   : > { %v6654_v61 = vpop.f32.mrf.mxu3 }
0x11e9   : > { %v6655_v45 = vadd.f32 %v7659_v28, %v6654_v61  ;;  %v6695_v30 = vpop.f32.mrf.mxu2 }
0x11eb   : > { %v6696_v60 = vadd.f32 %v6695_v30, %v6655_v45 }
0x11ed   : > { %v6713_v58 = vadd.f32 %v6696_v60, %v12362_v0 }
0x11ef   : > { %6721 = vst.msk [vmem:[%s12029_s28 + $0x18] sm:$0xff] %vm651_vm0, %v6713_v58 }
0x11f0   : > { %v6657_v1 = vpop.f32.mrf.mxu3 }
0x11f1   : > { %v6658_v10 = vadd.f32 %v7659_v28, %v6657_v1  ;;  %v6698_v14 = vpop.f32.mrf.mxu2 }
0x11f3   : > { %v6699_v31 = vadd.f32 %v6698_v14, %v6658_v10 }
0x11f5   : > { %v6714_v56 = vadd.f32 %v6699_v31, %v12363_v4 }
0x11f7   : > { %6722 = vst.msk [vmem:[%s12029_s28 + $0x20] sm:$0xff] %vm651_vm0, %v6714_v56 }
0x11f8   : > { %v6660_v7 = vpop.f32.mrf.mxu3 }
0x11f9   : > { %v6661_v34 = vadd.f32 %v7659_v28, %v6660_v7  ;;  %v6701_v11 = vpop.f32.mrf.mxu2 }
0x11fb   : > { %v6702_v19 = vadd.f32 %v6701_v11, %v6661_v34 }
0x11fd   : > { %v6715_v50 = vadd.f32 %v6702_v19, %v12364_v13 }
0x11ff   : > { %6723 = vst.msk [vmem:[%s12029_s28 + $0x28] sm:$0xff] %vm651_vm0, %v6715_v50 }
0x1200   : > { %v6663_v57 = vpop.f32.mrf.mxu3 }
0x1201   : > { %v6664_v8 = vadd.f32 %v7659_v28, %v6663_v57  ;;  %v6704_v62 = vpop.f32.mrf.mxu2 }
0x1203   : > { %v6705_v43 = vadd.f32 %v6704_v62, %v6664_v8 }
0x1205   : > { %v6716_v46 = vadd.f32 %v6705_v43, %v12365_v44 }
0x1207   : > { %6724 = vst.msk [vmem:[%s12029_s28 + $0x30] sm:$0xff] %vm651_vm0, %v6716_v46 }
0x1208   : > { %v6666_v53 = vpop.f32.mrf.mxu3 }
0x1209   : > { %v6667_v25 = vadd.f32 %v7659_v28, %v6666_v53  ;;  %v6707_v29 = vpop.f32.mrf.mxu2 }
0x120b   : > { %v6708_v55 = vadd.f32 %v6707_v29, %v6667_v25 }
0x120d   : > { %v6717_v9 = vadd.f32 %v6708_v55, %v12367_v48 }
0x120f   : > { %6725 = vst.msk [vmem:[%s12029_s28 + $0x38] sm:$0xff] %vm651_vm0, %v6717_v9 }
0x1210   : > { %8257 = shalt.err (!%p8254_p8)
}
0x1211   : > { %s8342_s27 = smov 128  }
0x1212   : > { %7385 = dma.vmem_to_hbm [thread:$0]  (%p8466_p5), %s6740_s17, 1024, %s6742_s18, %s6727_s25, %s8342_s27, %s8342_s27, %s8341_s23  }
0x1213 PF: > { %s12368_s28 = sld [smem:[#allocation25_spill]] }
0x1214   : > { %s12369_s26 = sld [smem:[#allocation23_spill]] }
0x1219   : > { %p7432_p9 = scmp.ge.s32.totalorder %s12368_s28, 2 }
0x121a   : > { %s6756_s8 = sand.u32 1, %s12369_s26  }
0x121b   : > { %p7413_p10 = pnand %p7432_p9, %p8470_p6  ;;  %s6757_s19 = scalar_lea.sflag [#allocation4], %s6756_s8 }
0x121d   : > { %p7414_p11 = pneg %p7413_p10 }
0x121f   : > { %8295 = dma.done.wait (%p7414_p11), %s6757_s19, 1024  }
0x1220   : > { %8297 = vsyncadd (%p7414_p11), %s6757_s19, 4294966272  ;;  %s12371_s24 = sld [smem:[#allocation26_spill]]  ;;  %s12374_s21 = smov %s8304_s22 }
0x1221   : > { %s12372_s0 = sld [smem:[#allocation24_spill]] }
0x1222   : > { %s12373_s23 = sld [smem:[#allocation27_spill]] }
0x1226   : > { %p31_p12 = scmp.ge.s32.totalorder %s12371_s24, 4  }
0x1227   : > { %s12375_s22 = smov %s12372_s0 }
0x1228   :  { %33 = sbr.rel (!%p31_p12) target bundleno = 14 (0xe), region = 168 }
0x122d   :  { %6763 = vsyncpa [#allocation3], 1 }
0x122e   :  { %6765 = vsyncpa [#allocation3 + $0x1], 1 }
0x122f   :  { %6766 = vsyncpa [#allocation6], 1 }
0x1230   :  { %6767 = vsyncpa [#allocation9], 1 }
0x1231   :  { %6768 = vsyncpa [#allocation12], 1 }
0x1232   :  { %6769 = vsyncpa [#allocation15], 1 }
0x1233   :  { %6770 = vsyncpa [#allocation4], 1 }
0x1234   :  { %6772 = vsyncpa [#allocation4 + $0x1], 1 }

</bundles_post_ra>
